<compile_context>
chip_gen: v7x
topology: tpu7x:2x2x1
jax: 0.10.0
libtpu: 0.0.40
codegen_flags: <defaults>
</compile_context>

<pallas_src>
import functools

import numpy as np
import jax
import jax.numpy as jnp
from jax.experimental import pallas as pl
from jax.experimental.pallas import tpu as pltpu


def _round_up(x, m):
    return ((x + m - 1) // m) * m


def _full_spec(shape):
    n = len(shape)
    return pl.BlockSpec(shape, lambda i, _n=n: (0,) * _n)


def _choose_m_tiling(M):
    """Pad M only to a multiple of 8; tile by 128 only when it divides evenly
    (or M is large), so small conv2/conv3/fc batches don't pad 2->128 rows."""
    Mp = _round_up(M, 8)
    if Mp % 128 == 0 and Mp > 128:
        return Mp, 128                      # several parallel M tiles (megacore)
    if Mp > 512:
        Mp = _round_up(M, 128)
        return Mp, 128
    return Mp, Mp                           # single full-extent tile


# ----------------------------------------------------------------------------
# Pallas kernels
# ----------------------------------------------------------------------------
def _matmul_bias_relu_kernel(x_ref, w_ref, b_ref, o_ref):
    # Whole-K single-shot matmul: bf16 operands, f32 accumulation, f32 bias+ReLU.
    y = jnp.dot(x_ref[...], w_ref[...], preferred_element_type=jnp.float32)
    y = jnp.maximum(y + b_ref[...], 0.0)
    o_ref[...] = y.astype(o_ref.dtype)


def _fc_gru_critic_kernel(feat_ref, fcw_ref, fcb_ref, h_ref, m_ref,
                          wih_ref, whh_ref, bih_ref, bhh_ref,
                          cw_ref, cb_ref, critic_ref, x_ref, *, hidden):
    """Fused Linear(5184->512)+ReLU  ->  GRUCell(512)  ->  critic Linear(512->1)."""
    H = hidden
    # fc + ReLU (bf16 MXU operands, f32 accumulate)
    x = jnp.dot(feat_ref[...], fcw_ref[...], preferred_element_type=jnp.float32)
    x = jnp.maximum(x + fcb_ref[...], 0.0)                      # (Bp, H) f32
    # GRUCell (PyTorch gate order r, z, n); all gate math in f32.
    h = h_ref[...] * m_ref[...]                                  # states * masks
    gi = jnp.dot(x.astype(jnp.bfloat16), wih_ref[...],
                 preferred_element_type=jnp.float32) + bih_ref[...]
    gh = jnp.dot(h.astype(jnp.bfloat16), whh_ref[...],
                 preferred_element_type=jnp.float32) + bhh_ref[...]
    r = jax.nn.sigmoid(gi[:, :H] + gh[:, :H])
    z = jax.nn.sigmoid(gi[:, H:2 * H] + gh[:, H:2 * H])
    n = jnp.tanh(gi[:, 2 * H:] + r * gh[:, 2 * H:])
    h_new = (1.0 - z) * n + z * h                                # (Bp, H) f32
    x_ref[...] = h_new
    # Critic head as a row reduction (avoids an N=1 padded-to-128 matmul).
    critic_ref[...] = (jnp.sum(h_new * cw_ref[...], axis=-1, keepdims=True)
                       + cb_ref[...])


def _fc_critic_kernel(feat_ref, fcw_ref, fcb_ref, cw_ref, cb_ref,
                      critic_ref, x_ref):
    """Fused Linear(5184->512)+ReLU -> critic Linear(512->1) (no-GRU path)."""
    x = jnp.dot(feat_ref[...], fcw_ref[...], preferred_element_type=jnp.float32)
    x = jnp.maximum(x + fcb_ref[...], 0.0)
    x_ref[...] = x
    critic_ref[...] = (jnp.sum(x * cw_ref[...], axis=-1, keepdims=True)
                       + cb_ref[...])


# ----------------------------------------------------------------------------
# Pallas wrappers
# ----------------------------------------------------------------------------
def _pallas_matmul_bias_relu(x, w, b, out_dtype=jnp.bfloat16):
    """relu(x @ w + b). x:(M,K) any float; w:(Kp,N) bf16 (K pre-padded); b:(1,N) f32."""
    M, K = x.shape
    Kp, N = w.shape
    Mp, tm = _choose_m_tiling(M)
    x_p = jnp.pad(x.astype(jnp.bfloat16), ((0, Mp - M), (0, Kp - K)))
    out = pl.pallas_call(
        _matmul_bias_relu_kernel,
        out_shape=jax.ShapeDtypeStruct((Mp, N), out_dtype),
        grid_spec=pltpu.PrefetchScalarGridSpec(
            num_scalar_prefetch=0,
            grid=(Mp // tm,),
            in_specs=[
                pl.BlockSpec((tm, Kp), lambda i: (i, 0)),
                pl.BlockSpec((Kp, N), lambda i: (0, 0)),
                pl.BlockSpec((1, N), lambda i: (0, 0)),
            ],
            out_specs=pl.BlockSpec((tm, N), lambda i: (i, 0)),
        ),
        compiler_params=pltpu.CompilerParams(
            dimension_semantics=("parallel",)),
    )(x_p, w, b)
    return out[:M]


def pallas_fc_gru_critic(feat, states, masks, pp):
    """Fused tail (fc + GRUCell + critic). feat:(B,5184), states:(B,512), masks:(B,1)."""
    B, K = feat.shape
    H = 512
    Bp = _round_up(B, 8)
    Kp = pp["fc_w"].shape[0]
    feat_p = jnp.pad(feat.astype(jnp.bfloat16), ((0, Bp - B), (0, Kp - K)))
    h_p = jnp.pad(states.astype(jnp.float32), ((0, Bp - B), (0, 0)))
    m_p = jnp.pad(masks.astype(jnp.float32), ((0, Bp - B), (0, 0)))

    critic, x_out = pl.pallas_call(
        functools.partial(_fc_gru_critic_kernel, hidden=H),
        out_shape=(jax.ShapeDtypeStruct((Bp, 1), jnp.float32),
                   jax.ShapeDtypeStruct((Bp, H), jnp.float32)),
        grid_spec=pltpu.PrefetchScalarGridSpec(
            num_scalar_prefetch=0,
            grid=(1,),
            in_specs=[
                _full_spec((Bp, Kp)),            # feat
                _full_spec((Kp, H)),             # fc weight (bf16)
                _full_spec((1, H)),              # fc bias
                _full_spec((Bp, H)),             # states
                _full_spec((Bp, 1)),             # masks
                _full_spec((H, 3 * H)),          # W_ih^T (bf16)
                _full_spec((H, 3 * H)),          # W_hh^T (bf16)
                _full_spec((1, 3 * H)),          # b_ih
                _full_spec((1, 3 * H)),          # b_hh
                _full_spec((1, H)),              # critic weight (row)
                _full_spec((1, 1)),              # critic bias
            ],
            out_specs=(_full_spec((Bp, 1)), _full_spec((Bp, H))),
        ),
        compiler_params=pltpu.CompilerParams(
            dimension_semantics=("arbitrary",),
            vmem_limit_bytes=28 * 1024 * 1024),   # ~18 MB working set; fits v7x 64 MiB
    )(feat_p, pp["fc_w"], pp["fc_b"], h_p, m_p,
      pp["gru_w_ih"], pp["gru_w_hh"], pp["gru_b_ih"], pp["gru_b_hh"],
      pp["critic_w"], pp["critic_b"])
    return critic[:B], x_out[:B]


def pallas_fc_critic(feat, pp):
    """Fused tail without GRU (fc + critic)."""
    B, K = feat.shape
    H = 512
    Bp = _round_up(B, 8)
    Kp = pp["fc_w"].shape[0]
    feat_p = jnp.pad(feat.astype(jnp.bfloat16), ((0, Bp - B), (0, Kp - K)))
    critic, x_out = pl.pallas_call(
        _fc_critic_kernel,
        out_shape=(jax.ShapeDtypeStruct((Bp, 1), jnp.float32),
                   jax.ShapeDtypeStruct((Bp, H), jnp.float32)),
        grid_spec=pltpu.PrefetchScalarGridSpec(
            num_scalar_prefetch=0,
            grid=(1,),
            in_specs=[_full_spec((Bp, Kp)), _full_spec((Kp, H)),
                      _full_spec((1, H)), _full_spec((1, H)),
                      _full_spec((1, 1))],
            out_specs=(_full_spec((Bp, 1)), _full_spec((Bp, H))),
        ),
        compiler_params=pltpu.CompilerParams(
            dimension_semantics=("arbitrary",),
            vmem_limit_bytes=24 * 1024 * 1024),
    )(feat_p, pp["fc_w"], pp["fc_b"], pp["critic_w"], pp["critic_b"])
    return critic[:B], x_out[:B]


# ----------------------------------------------------------------------------
# Conv via NHWC im2col (plain-JAX glue) + Pallas matmul (hot path)
# ----------------------------------------------------------------------------
def conv2d_relu_nhwc(x, w2, b, kh, kw, stride):
    """x:(B,H,W,C) NHWC bf16; w2:(Kp,O) bf16 (prepped, (di,dj,c) feature order).
    Returns NHWC (B,Ho,Wo,O) bf16 -- no NCHW round-trip between layers."""
    B, H, W, C = x.shape
    Ho = (H - kh) // stride + 1
    Wo = (W - kw) // stride + 1
    cols = []
    for di in range(kh):
        for dj in range(kw):
            cols.append(x[:, di::stride, dj::stride, :][:, :Ho, :Wo, :])
    patches = jnp.stack(cols, axis=3)                   # (B,Ho,Wo,kh*kw,C)
    patches = patches.reshape(B * Ho * Wo, kh * kw * C)
    y = _pallas_matmul_bias_relu(patches, w2, b)        # (B*Ho*Wo, O) bf16
    O = w2.shape[1]
    return y.reshape(B, Ho, Wo, O)


# ----------------------------------------------------------------------------
# Parameter init (torch layout) + one-time kernel-ready preparation
# ----------------------------------------------------------------------------
def orthogonal_init(key, shape, gain=1.0):
    rows = shape[0]
    cols = int(np.prod(shape[1:]))
    n, m = max(rows, cols), min(rows, cols)
    a = jax.random.normal(key, (n, m), dtype=jnp.float32)
    q, r = jnp.linalg.qr(a)
    q = q * jnp.sign(jnp.diagonal(r))
    if rows < cols:
        q = q.T
    return (gain * q).reshape(shape)


def init_params(key, num_inputs, use_gru):
    ks = jax.random.split(key, 7)
    g = float(np.sqrt(2.0))  # relu gain
    p = {
        "conv1_w": orthogonal_init(ks[0], (32, num_inputs, 8, 8), g),
        "conv1_b": jnp.zeros((32,), jnp.float32),
        "conv2_w": orthogonal_init(ks[1], (64, 32, 4, 4), g),
        "conv2_b": jnp.zeros((64,), jnp.float32),
        "conv3_w": orthogonal_init(ks[2], (64, 64, 3, 3), g),
        "conv3_b": jnp.zeros((64,), jnp.float32),
        "fc_w": orthogonal_init(ks[3], (512, 5184), g),      # torch Linear (out,in)
        "fc_b": jnp.zeros((512,), jnp.float32),
        "critic_w": orthogonal_init(ks[4], (1, 512), 1.0),
        "critic_b": jnp.zeros((1,), jnp.float32),
    }
    if use_gru:
        p["gru_w_ih"] = orthogonal_init(ks[5], (3 * 512, 512), 1.0)
        p["gru_w_hh"] = orthogonal_init(ks[6], (3 * 512, 512), 1.0)
        p["gru_b_ih"] = jnp.zeros((3 * 512,), jnp.float32)
        p["gru_b_hh"] = jnp.zeros((3 * 512,), jnp.float32)
    return p


def _prep_conv(w, b):
    """torch (O,C,kh,kw) -> (kh*kw*C, O) bf16 matching the NHWC im2col (di,dj,c)
    feature order; contraction dim padded to a multiple of 128 (zero rows)."""
    O, C, kh, kw = w.shape
    K = kh * kw * C
    w2 = jnp.transpose(w, (0, 2, 3, 1)).reshape(O, K).T           # (K, O)
    Kp = _round_up(K, 128)
    w2 = jnp.pad(w2, ((0, Kp - K), (0, 0))).astype(jnp.bfloat16)
    return w2, b.reshape(1, O).astype(jnp.float32)


def prepare_params(params, use_gru):
    """One-time conversion of torch-layout params to kernel-ready layout
    (all transposes / reshapes / pads / bf16 casts hoisted out of forward)."""
    pp = {}
    pp["conv1_w"], pp["conv1_b"] = _prep_conv(params["conv1_w"], params["conv1_b"])
    pp["conv2_w"], pp["conv2_b"] = _prep_conv(params["conv2_w"], params["conv2_b"])
    pp["conv3_w"], pp["conv3_b"] = _prep_conv(params["conv3_w"], params["conv3_b"])

    # fc: permute columns so an NHWC flatten of the conv3 output matches torch's
    # NCHW (channel-major) flatten.  Linear(5184,512) with 64 channels => 9x9.
    C3, Hc, Wc = 64, 9, 9
    hh, ww, cc = np.meshgrid(np.arange(Hc), np.arange(Wc), np.arange(C3),
                             indexing="ij")
    perm = (cc * (Hc * Wc) + hh * Wc + ww).reshape(-1)             # nhwc-pos -> nchw-idx
    K = C3 * Hc * Wc
    Kp = _round_up(K, 128)
    fc_w_t = params["fc_w"][:, perm].T                             # (5184, 512)
    pp["fc_w"] = jnp.pad(fc_w_t, ((0, Kp - K), (0, 0))).astype(jnp.bfloat16)
    pp["fc_b"] = params["fc_b"].reshape(1, 512).astype(jnp.float32)

    pp["critic_w"] = params["critic_w"].reshape(1, 512).astype(jnp.float32)
    pp["critic_b"] = params["critic_b"].reshape(1, 1).astype(jnp.float32)

    if use_gru:
        pp["gru_w_ih"] = params["gru_w_ih"].T.astype(jnp.bfloat16)   # (512, 1536)
        pp["gru_w_hh"] = params["gru_w_hh"].T.astype(jnp.bfloat16)   # (512, 1536)
        pp["gru_b_ih"] = params["gru_b_ih"].reshape(1, 3 * 512).astype(jnp.float32)
        pp["gru_b_hh"] = params["gru_b_hh"].reshape(1, 3 * 512).astype(jnp.float32)
    return pp


# ----------------------------------------------------------------------------
# CNNBase.forward
# ----------------------------------------------------------------------------
def cnn_base_forward(prepped, inputs, states, masks, use_gru=True):
    x = inputs.astype(jnp.float32) / 255.0
    x = jnp.transpose(x, (0, 2, 3, 1)).astype(jnp.bfloat16)     # NCHW -> NHWC, once
    x = conv2d_relu_nhwc(x, prepped["conv1_w"], prepped["conv1_b"], 8, 8, 4)
    x = conv2d_relu_nhwc(x, prepped["conv2_w"], prepped["conv2_b"], 4, 4, 2)
    x = conv2d_relu_nhwc(x, prepped["conv3_w"], prepped["conv3_b"], 3, 3, 1)
    B = x.shape[0]
    feat = x.reshape(B, -1)    # NHWC flatten; fc weight columns permuted at prep time
    if use_gru:
        if inputs.shape[0] == states.shape[0]:
            critic, x_out = pallas_fc_gru_critic(feat, states, masks, prepped)
            return critic, x_out, x_out
        # TODO(synk): multi-step rollout GRU path (inputs.size(0) != states.size(0)) not implemented.
        raise NotImplementedError("sequence-unrolled GRU path not implemented")
    critic, x_out = pallas_fc_critic(feat, prepped)
    return critic, x_out, states


if __name__ == "__main__":
    key = jax.random.PRNGKey(0)
    k_params, k_in, k_st = jax.random.split(key, 3)

    num_inputs = 4
    batch = 2
    # Spatial size 100x100 is forced by the Linear(5184, 512): 100 ->conv8/4-> 24
    # ->conv4/2-> 11 ->conv3/1-> 9, and 64*9*9 = 5184.
    params = init_params(k_params, num_inputs, use_gru=True)
    prepped = prepare_params(params, use_gru=True)

    inputs = jax.random.uniform(k_in, (batch, num_inputs, 100, 100),
                                jnp.float32, 0.0, 255.0)
    states = jax.random.normal(k_st, (batch, 512), jnp.float32)
    masks = jnp.ones((batch, 1), jnp.float32)

    forward = jax.jit(cnn_base_forward, static_argnames=("use_gru",))
    critic, x_out, new_states = forward(prepped, inputs, states, masks,
                                        use_gru=True)
    jax.block_until_ready((critic, x_out, new_states))

    assert critic.shape == (batch, 1)
    assert x_out.shape == (batch, 512)
    assert new_states.shape == (batch, 512)
    assert np.all(np.isfinite(np.asarray(critic)))
    assert np.all(np.isfinite(np.asarray(x_out)))
    print("KERNEL_OK")
</pallas_src>

<mosaic_0001>
module attributes {stable_mosaic.version = 11 : i64} {
  func.func @_matmul_bias_relu_kernel(%arg0: i32, %arg1: memref<128x256xbf16, #tpu.memory_space<vmem>>, %arg2: memref<256x32xbf16, #tpu.memory_space<vmem>>, %arg3: memref<1x32xf32, #tpu.memory_space<vmem>>, %arg4: memref<128x32xbf16, #tpu.memory_space<vmem>>) attributes {dimension_semantics = [#tpu.dimension_semantics<parallel>], iteration_bounds = array<i64: 9>, scalar_prefetch = 0 : i64, scratch_operands = 0 : i64, tpu.core_type = #tpu.core_type<tc>, window_params = [{transform_indices = @transform_0, window_bounds = array<i64: 128, 256>}, {pipeline_mode = #tpu.pipeline_mode<synchronous>, transform_indices = @transform_1, window_bounds = array<i64: 256, 32>}, {pipeline_mode = #tpu.pipeline_mode<synchronous>, transform_indices = @transform_2, window_bounds = array<i64: 1, 32>}, {transform_indices = @transform_3, window_bounds = array<i64: 128, 32>}]} {
    %c0 = arith.constant 0 : index
    %c0_0 = arith.constant 0 : index
    %0 = vector.load %arg1[%c0, %c0_0] : memref<128x256xbf16, #tpu.memory_space<vmem>>, vector<128x256xbf16>
    %c0_1 = arith.constant 0 : index
    %c0_2 = arith.constant 0 : index
    %1 = vector.load %arg2[%c0_1, %c0_2] : memref<256x32xbf16, #tpu.memory_space<vmem>>, vector<256x32xbf16>
    %cst = arith.constant dense<0.000000e+00> : vector<128x32xf32>
    %2 = tpu.matmul %0, %1, %cst {dimension_numbers = #tpu.dot_dimension_numbers<[1], [0], [0], [1], [0, 0, 1, 1], [], []>} : vector<128x256xbf16>, vector<256x32xbf16>, vector<128x32xf32> -> vector<128x32xf32>
    %c0_3 = arith.constant 0 : index
    %c0_4 = arith.constant 0 : index
    %3 = vector.load %arg3[%c0_3, %c0_4] : memref<1x32xf32, #tpu.memory_space<vmem>>, vector<1x32xf32>
    %4 = vector.broadcast %3 : vector<1x32xf32> to vector<128x32xf32>
    %5 = arith.addf %2, %4 : vector<128x32xf32>
    %cst_5 = arith.constant 0.000000e+00 : f32
    %6 = vector.broadcast %cst_5 : f32 to vector<128x32xf32>
    %7 = arith.maximumf %5, %6 : vector<128x32xf32>
    %8 = arith.truncf %7 : vector<128x32xf32> to vector<128x32xbf16>
    %c0_6 = arith.constant 0 : index
    %c0_7 = arith.constant 0 : index
    %9 = vector.load %arg4[%c0_6, %c0_7] : memref<128x32xbf16, #tpu.memory_space<vmem>>, vector<128x32xbf16>
    tpu.vector_store %arg4[%c0_6, %c0_7], %8 {strides = array<i32>} : memref<128x32xbf16, #tpu.memory_space<vmem>>, vector<128x32xbf16>,
    return
  }
  func.func @transform_0(%arg0: i32) -> (i32, i32) {
    %c0_i32 = arith.constant 0 : i32
    %c0_i32_0 = arith.constant 0 : i32
    return %arg0, %c0_i32 : i32, i32
  }
  func.func @transform_1(%arg0: i32) -> (i32, i32) {
    %c0_i32 = arith.constant 0 : i32
    %c0_i32_0 = arith.constant 0 : i32
    %c0_i32_1 = arith.constant 0 : i32
    return %c0_i32, %c0_i32_0 : i32, i32
  }
  func.func @transform_2(%arg0: i32) -> (i32, i32) {
    %c0_i32 = arith.constant 0 : i32
    %c0_i32_0 = arith.constant 0 : i32
    %c0_i32_1 = arith.constant 0 : i32
    return %c0_i32, %c0_i32_0 : i32, i32
  }
  func.func @transform_3(%arg0: i32) -> (i32, i32) {
    %c0_i32 = arith.constant 0 : i32
    %c0_i32_0 = arith.constant 0 : i32
    return %arg0, %c0_i32 : i32, i32
  }
}

module attributes {stable_mosaic.version = 11 : i64} {
  func.func @_matmul_bias_relu_kernel(%arg0: i32, %arg1: memref<248x512xbf16, #tpu.memory_space<vmem>>, %arg2: memref<512x64xbf16, #tpu.memory_space<vmem>>, %arg3: memref<1x64xf32, #tpu.memory_space<vmem>>, %arg4: memref<248x64xbf16, #tpu.memory_space<vmem>>) attributes {dimension_semantics = [#tpu.dimension_semantics<parallel>], iteration_bounds = array<i64: 1>, scalar_prefetch = 0 : i64, scratch_operands = 0 : i64, tpu.core_type = #tpu.core_type<tc>, window_params = [{transform_indices = @transform_0, window_bounds = array<i64: 248, 512>}, {pipeline_mode = #tpu.pipeline_mode<synchronous>, transform_indices = @transform_1, window_bounds = array<i64: 512, 64>}, {pipeline_mode = #tpu.pipeline_mode<synchronous>, transform_indices = @transform_2, window_bounds = array<i64: 1, 64>}, {transform_indices = @transform_3, window_bounds = array<i64: 248, 64>}]} {
    %c0 = arith.constant 0 : index
    %c0_0 = arith.constant 0 : index
    %0 = vector.load %arg1[%c0, %c0_0] : memref<248x512xbf16, #tpu.memory_space<vmem>>, vector<248x512xbf16>
    %c0_1 = arith.constant 0 : index
    %c0_2 = arith.constant 0 : index
    %1 = vector.load %arg2[%c0_1, %c0_2] : memref<512x64xbf16, #tpu.memory_space<vmem>>, vector<512x64xbf16>
    %cst = arith.constant dense<0.000000e+00> : vector<248x64xf32>
    %2 = tpu.matmul %0, %1, %cst {dimension_numbers = #tpu.dot_dimension_numbers<[1], [0], [0], [1], [0, 0, 1, 1], [], []>} : vector<248x512xbf16>, vector<512x64xbf16>, vector<248x64xf32> -> vector<248x64xf32>
    %c0_3 = arith.constant 0 : index
    %c0_4 = arith.constant 0 : index
    %3 = vector.load %arg3[%c0_3, %c0_4] : memref<1x64xf32, #tpu.memory_space<vmem>>, vector<1x64xf32>
    %4 = vector.broadcast %3 : vector<1x64xf32> to vector<248x64xf32>
    %5 = arith.addf %2, %4 : vector<248x64xf32>
    %cst_5 = arith.constant 0.000000e+00 : f32
    %6 = vector.broadcast %cst_5 : f32 to vector<248x64xf32>
    %7 = arith.maximumf %5, %6 : vector<248x64xf32>
    %8 = arith.truncf %7 : vector<248x64xf32> to vector<248x64xbf16>
    %c0_6 = arith.constant 0 : index
    %c0_7 = arith.constant 0 : index
    %9 = vector.load %arg4[%c0_6, %c0_7] : memref<248x64xbf16, #tpu.memory_space<vmem>>, vector<248x64xbf16>
    tpu.vector_store %arg4[%c0_6, %c0_7], %8 {strides = array<i32>} : memref<248x64xbf16, #tpu.memory_space<vmem>>, vector<248x64xbf16>,
    return
  }
  func.func @transform_0(%arg0: i32) -> (i32, i32) {
    %c0_i32 = arith.constant 0 : i32
    %c0_i32_0 = arith.constant 0 : i32
    return %arg0, %c0_i32 : i32, i32
  }
  func.func @transform_1(%arg0: i32) -> (i32, i32) {
    %c0_i32 = arith.constant 0 : i32
    %c0_i32_0 = arith.constant 0 : i32
    %c0_i32_1 = arith.constant 0 : i32
    return %c0_i32, %c0_i32_0 : i32, i32
  }
  func.func @transform_2(%arg0: i32) -> (i32, i32) {
    %c0_i32 = arith.constant 0 : i32
    %c0_i32_0 = arith.constant 0 : i32
    %c0_i32_1 = arith.constant 0 : i32
    return %c0_i32, %c0_i32_0 : i32, i32
  }
  func.func @transform_3(%arg0: i32) -> (i32, i32) {
    %c0_i32 = arith.constant 0 : i32
    %c0_i32_0 = arith.constant 0 : i32
    return %arg0, %c0_i32 : i32, i32
  }
}

module attributes {stable_mosaic.version = 11 : i64} {
  func.func @_matmul_bias_relu_kernel(%arg0: i32, %arg1: memref<168x640xbf16, #tpu.memory_space<vmem>>, %arg2: memref<640x64xbf16, #tpu.memory_space<vmem>>, %arg3: memref<1x64xf32, #tpu.memory_space<vmem>>, %arg4: memref<168x64xbf16, #tpu.memory_space<vmem>>) attributes {dimension_semantics = [#tpu.dimension_semantics<parallel>], iteration_bounds = array<i64: 1>, scalar_prefetch = 0 : i64, scratch_operands = 0 : i64, tpu.core_type = #tpu.core_type<tc>, window_params = [{transform_indices = @transform_0, window_bounds = array<i64: 168, 640>}, {pipeline_mode = #tpu.pipeline_mode<synchronous>, transform_indices = @transform_1, window_bounds = array<i64: 640, 64>}, {pipeline_mode = #tpu.pipeline_mode<synchronous>, transform_indices = @transform_2, window_bounds = array<i64: 1, 64>}, {transform_indices = @transform_3, window_bounds = array<i64: 168, 64>}]} {
    %c0 = arith.constant 0 : index
    %c0_0 = arith.constant 0 : index
    %0 = vector.load %arg1[%c0, %c0_0] : memref<168x640xbf16, #tpu.memory_space<vmem>>, vector<168x640xbf16>
    %c0_1 = arith.constant 0 : index
    %c0_2 = arith.constant 0 : index
    %1 = vector.load %arg2[%c0_1, %c0_2] : memref<640x64xbf16, #tpu.memory_space<vmem>>, vector<640x64xbf16>
    %cst = arith.constant dense<0.000000e+00> : vector<168x64xf32>
    %2 = tpu.matmul %0, %1, %cst {dimension_numbers = #tpu.dot_dimension_numbers<[1], [0], [0], [1], [0, 0, 1, 1], [], []>} : vector<168x640xbf16>, vector<640x64xbf16>, vector<168x64xf32> -> vector<168x64xf32>
    %c0_3 = arith.constant 0 : index
    %c0_4 = arith.constant 0 : index
    %3 = vector.load %arg3[%c0_3, %c0_4] : memref<1x64xf32, #tpu.memory_space<vmem>>, vector<1x64xf32>
    %4 = vector.broadcast %3 : vector<1x64xf32> to vector<168x64xf32>
    %5 = arith.addf %2, %4 : vector<168x64xf32>
    %cst_5 = arith.constant 0.000000e+00 : f32
    %6 = vector.broadcast %cst_5 : f32 to vector<168x64xf32>
    %7 = arith.maximumf %5, %6 : vector<168x64xf32>
    %8 = arith.truncf %7 : vector<168x64xf32> to vector<168x64xbf16>
    %c0_6 = arith.constant 0 : index
    %c0_7 = arith.constant 0 : index
    %9 = vector.load %arg4[%c0_6, %c0_7] : memref<168x64xbf16, #tpu.memory_space<vmem>>, vector<168x64xbf16>
    tpu.vector_store %arg4[%c0_6, %c0_7], %8 {strides = array<i32>} : memref<168x64xbf16, #tpu.memory_space<vmem>>, vector<168x64xbf16>,
    return
  }
  func.func @transform_0(%arg0: i32) -> (i32, i32) {
    %c0_i32 = arith.constant 0 : i32
    %c0_i32_0 = arith.constant 0 : i32
    return %arg0, %c0_i32 : i32, i32
  }
  func.func @transform_1(%arg0: i32) -> (i32, i32) {
    %c0_i32 = arith.constant 0 : i32
    %c0_i32_0 = arith.constant 0 : i32
    %c0_i32_1 = arith.constant 0 : i32
    return %c0_i32, %c0_i32_0 : i32, i32
  }
  func.func @transform_2(%arg0: i32) -> (i32, i32) {
    %c0_i32 = arith.constant 0 : i32
    %c0_i32_0 = arith.constant 0 : i32
    %c0_i32_1 = arith.constant 0 : i32
    return %c0_i32, %c0_i32_0 : i32, i32
  }
  func.func @transform_3(%arg0: i32) -> (i32, i32) {
    %c0_i32 = arith.constant 0 : i32
    %c0_i32_0 = arith.constant 0 : i32
    return %arg0, %c0_i32 : i32, i32
  }
}

module attributes {stable_mosaic.version = 11 : i64} {
  func.func @_fc_gru_critic_kernel(%arg0: i32, %arg1: memref<8x5248xbf16, #tpu.memory_space<vmem>>, %arg2: memref<5248x512xbf16, #tpu.memory_space<vmem>>, %arg3: memref<1x512xf32, #tpu.memory_space<vmem>>, %arg4: memref<8x512xf32, #tpu.memory_space<vmem>>, %arg5: memref<8x1xf32, #tpu.memory_space<vmem>>, %arg6: memref<512x1536xbf16, #tpu.memory_space<vmem>>, %arg7: memref<512x1536xbf16, #tpu.memory_space<vmem>>, %arg8: memref<1x1536xf32, #tpu.memory_space<vmem>>, %arg9: memref<1x1536xf32, #tpu.memory_space<vmem>>, %arg10: memref<1x512xf32, #tpu.memory_space<vmem>>, %arg11: memref<1x1xf32, #tpu.memory_space<vmem>>, %arg12: memref<8x1xf32, #tpu.memory_space<vmem>>, %arg13: memref<8x512xf32, #tpu.memory_space<vmem>>) attributes {dimension_semantics = [#tpu.dimension_semantics<arbitrary>], iteration_bounds = array<i64: 1>, scalar_prefetch = 0 : i64, scratch_operands = 0 : i64, tpu.core_type = #tpu.core_type<tc>, window_params = [{pipeline_mode = #tpu.pipeline_mode<synchronous>, transform_indices = @transform_0, window_bounds = array<i64: 8, 5248>}, {pipeline_mode = #tpu.pipeline_mode<synchronous>, transform_indices = @transform_1, window_bounds = array<i64: 5248, 512>}, {pipeline_mode = #tpu.pipeline_mode<synchronous>, transform_indices = @transform_2, window_bounds = array<i64: 1, 512>}, {pipeline_mode = #tpu.pipeline_mode<synchronous>, transform_indices = @transform_3, window_bounds = array<i64: 8, 512>}, {pipeline_mode = #tpu.pipeline_mode<synchronous>, transform_indices = @transform_4, window_bounds = array<i64: 8, 1>}, {pipeline_mode = #tpu.pipeline_mode<synchronous>, transform_indices = @transform_5, window_bounds = array<i64: 512, 1536>}, {pipeline_mode = #tpu.pipeline_mode<synchronous>, transform_indices = @transform_6, window_bounds = array<i64: 512, 1536>}, {pipeline_mode = #tpu.pipeline_mode<synchronous>, transform_indices = @transform_7, window_bounds = array<i64: 1, 1536>}, {pipeline_mode = #tpu.pipeline_mode<synchronous>, transform_indices = @transform_8, window_bounds = array<i64: 1, 1536>}, {pipeline_mode = #tpu.pipeline_mode<synchronous>, transform_indices = @transform_9, window_bounds = array<i64: 1, 512>}, {pipeline_mode = #tpu.pipeline_mode<synchronous>, transform_indices = @transform_10, window_bounds = array<i64: 1, 1>}, {pipeline_mode = #tpu.pipeline_mode<synchronous>, transform_indices = @transform_11, window_bounds = array<i64: 8, 1>}, {pipeline_mode = #tpu.pipeline_mode<synchronous>, transform_indices = @transform_12, window_bounds = array<i64: 8, 512>}]} {
    %c0 = arith.constant 0 : index
    %c0_0 = arith.constant 0 : index
    %0 = vector.load %arg1[%c0, %c0_0] : memref<8x5248xbf16, #tpu.memory_space<vmem>>, vector<8x5248xbf16>
    %c0_1 = arith.constant 0 : index
    %c0_2 = arith.constant 0 : index
    %1 = vector.load %arg2[%c0_1, %c0_2] : memref<5248x512xbf16, #tpu.memory_space<vmem>>, vector<5248x512xbf16>
    %cst = arith.constant dense<0.000000e+00> : vector<8x512xf32>
    %2 = tpu.matmul %0, %1, %cst {dimension_numbers = #tpu.dot_dimension_numbers<[1], [0], [0], [1], [0, 0, 1, 1], [], []>} : vector<8x5248xbf16>, vector<5248x512xbf16>, vector<8x512xf32> -> vector<8x512xf32>
    %c0_3 = arith.constant 0 : index
    %c0_4 = arith.constant 0 : index
    %3 = vector.load %arg3[%c0_3, %c0_4] : memref<1x512xf32, #tpu.memory_space<vmem>>, vector<1x512xf32>
    %4 = vector.broadcast %3 : vector<1x512xf32> to vector<8x512xf32>
    %5 = arith.addf %2, %4 : vector<8x512xf32>
    %cst_5 = arith.constant 0.000000e+00 : f32
    %6 = vector.broadcast %cst_5 : f32 to vector<8x512xf32>
    %7 = arith.maximumf %5, %6 : vector<8x512xf32>
    %c0_6 = arith.constant 0 : index
    %c0_7 = arith.constant 0 : index
    %8 = vector.load %arg4[%c0_6, %c0_7] : memref<8x512xf32, #tpu.memory_space<vmem>>, vector<8x512xf32>
    %c0_8 = arith.constant 0 : index
    %c0_9 = arith.constant 0 : index
    %9 = vector.load %arg5[%c0_8, %c0_9] : memref<8x1xf32, #tpu.memory_space<vmem>>, vector<8x1xf32>
    %10 = vector.broadcast %9 : vector<8x1xf32> to vector<8x512xf32>
    %11 = arith.mulf %8, %10 : vector<8x512xf32>
    %12 = arith.truncf %7 : vector<8x512xf32> to vector<8x512xbf16>
    %c0_10 = arith.constant 0 : index
    %c0_11 = arith.constant 0 : index
    %13 = vector.load %arg6[%c0_10, %c0_11] : memref<512x1536xbf16, #tpu.memory_space<vmem>>, vector<512x1536xbf16>
    %cst_12 = arith.constant dense<0.000000e+00> : vector<8x1536xf32>
    %14 = tpu.matmul %12, %13, %cst_12 {dimension_numbers = #tpu.dot_dimension_numbers<[1], [0], [0], [1], [0, 0, 1, 1], [], []>} : vector<8x512xbf16>, vector<512x1536xbf16>, vector<8x1536xf32> -> vector<8x1536xf32>
    %c0_13 = arith.constant 0 : index
    %c0_14 = arith.constant 0 : index
    %15 = vector.load %arg8[%c0_13, %c0_14] : memref<1x1536xf32, #tpu.memory_space<vmem>>, vector<1x1536xf32>
    %16 = vector.broadcast %15 : vector<1x1536xf32> to vector<8x1536xf32>
    %17 = arith.addf %14, %16 : vector<8x1536xf32>
    %18 = arith.truncf %11 : vector<8x512xf32> to vector<8x512xbf16>
    %c0_15 = arith.constant 0 : index
    %c0_16 = arith.constant 0 : index
    %19 = vector.load %arg7[%c0_15, %c0_16] : memref<512x1536xbf16, #tpu.memory_space<vmem>>, vector<512x1536xbf16>
    %cst_17 = arith.constant dense<0.000000e+00> : vector<8x1536xf32>
    %20 = tpu.matmul %18, %19, %cst_17 {dimension_numbers = #tpu.dot_dimension_numbers<[1], [0], [0], [1], [0, 0, 1, 1], [], []>} : vector<8x512xbf16>, vector<512x1536xbf16>, vector<8x1536xf32> -> vector<8x1536xf32>
    %c0_18 = arith.constant 0 : index
    %c0_19 = arith.constant 0 : index
    %21 = vector.load %arg9[%c0_18, %c0_19] : memref<1x1536xf32, #tpu.memory_space<vmem>>, vector<1x1536xf32>
    %22 = vector.broadcast %21 : vector<1x1536xf32> to vector<8x1536xf32>
    %23 = arith.addf %20, %22 : vector<8x1536xf32>
    %24 = vector.extract_strided_slice %17 {offsets = [0, 0], sizes = [8, 512], strides = [1, 1]} : vector<8x1536xf32> to vector<8x512xf32>
    %25 = vector.extract_strided_slice %23 {offsets = [0, 0], sizes = [8, 512], strides = [1, 1]} : vector<8x1536xf32> to vector<8x512xf32>
    %26 = arith.addf %24, %25 : vector<8x512xf32>
    %27 = arith.negf %26 : vector<8x512xf32>
    %28 = math.exp %27 : vector<8x512xf32>
    %cst_20 = arith.constant 1.000000e+00 : f32
    %29 = vector.broadcast %cst_20 : f32 to vector<8x512xf32>
    %30 = arith.addf %29, %28 : vector<8x512xf32>
    %31 = arith.divf %29, %30 : vector<8x512xf32>
    %32 = vector.extract_strided_slice %17 {offsets = [0, 512], sizes = [8, 512], strides = [1, 1]} : vector<8x1536xf32> to vector<8x512xf32>
    %33 = vector.extract_strided_slice %23 {offsets = [0, 512], sizes = [8, 512], strides = [1, 1]} : vector<8x1536xf32> to vector<8x512xf32>
    %34 = arith.addf %32, %33 : vector<8x512xf32>
    %35 = arith.negf %34 : vector<8x512xf32>
    %36 = math.exp %35 : vector<8x512xf32>
    %cst_21 = arith.constant 1.000000e+00 : f32
    %37 = vector.broadcast %cst_21 : f32 to vector<8x512xf32>
    %38 = arith.addf %37, %36 : vector<8x512xf32>
    %39 = arith.divf %37, %38 : vector<8x512xf32>
    %40 = vector.extract_strided_slice %17 {offsets = [0, 1024], sizes = [8, 512], strides = [1, 1]} : vector<8x1536xf32> to vector<8x512xf32>
    %41 = vector.extract_strided_slice %23 {offsets = [0, 1024], sizes = [8, 512], strides = [1, 1]} : vector<8x1536xf32> to vector<8x512xf32>
    %42 = arith.mulf %31, %41 : vector<8x512xf32>
    %43 = arith.addf %40, %42 : vector<8x512xf32>
    %44 = math.tanh %43 : vector<8x512xf32>
    %cst_22 = arith.constant 1.000000e+00 : f32
    %45 = vector.broadcast %cst_22 : f32 to vector<8x512xf32>
    %46 = arith.subf %45, %39 : vector<8x512xf32>
    %47 = arith.mulf %46, %44 : vector<8x512xf32>
    %48 = arith.mulf %39, %11 : vector<8x512xf32>
    %49 = arith.addf %47, %48 : vector<8x512xf32>
    %c0_23 = arith.constant 0 : index
    %c0_24 = arith.constant 0 : index
    %50 = vector.load %arg13[%c0_23, %c0_24] : memref<8x512xf32, #tpu.memory_space<vmem>>, vector<8x512xf32>
    tpu.vector_store %arg13[%c0_23, %c0_24], %49 {strides = array<i32>} : memref<8x512xf32, #tpu.memory_space<vmem>>, vector<8x512xf32>,
    %c0_25 = arith.constant 0 : index
    %c0_26 = arith.constant 0 : index
    %51 = vector.load %arg10[%c0_25, %c0_26] : memref<1x512xf32, #tpu.memory_space<vmem>>, vector<1x512xf32>
    %52 = vector.broadcast %51 : vector<1x512xf32> to vector<8x512xf32>
    %53 = arith.mulf %49, %52 : vector<8x512xf32>
    %cst_27 = arith.constant dense<0.000000e+00> : vector<8xf32>
    %54 = vector.multi_reduction <add>, %53, %cst_27 [1] : vector<8x512xf32> to vector<8xf32>
    %55 = vector.shape_cast %54 : vector<8xf32> to vector<8x1xf32>
    %c0_28 = arith.constant 0 : index
    %c0_29 = arith.constant 0 : index
    %56 = vector.load %arg11[%c0_28, %c0_29] : memref<1x1xf32, #tpu.memory_space<vmem>>, vector<1x1xf32>
    %57 = vector.broadcast %56 : vector<1x1xf32> to vector<8x1xf32>
    %58 = arith.addf %55, %57 : vector<8x1xf32>
    %c0_30 = arith.constant 0 : index
    %c0_31 = arith.constant 0 : index
    %59 = vector.load %arg12[%c0_30, %c0_31] : memref<8x1xf32, #tpu.memory_space<vmem>>, vector<8x1xf32>
    tpu.vector_store %arg12[%c0_30, %c0_31], %58 {strides = array<i32>} : memref<8x1xf32, #tpu.memory_space<vmem>>, vector<8x1xf32>,
    return
  }
  func.func @transform_0(%arg0: i32) -> (i32, i32) {
    %c0_i32 = arith.constant 0 : i32
    %c0_i32_0 = arith.constant 0 : i32
    %c0_i32_1 = arith.constant 0 : i32
    return %c0_i32, %c0_i32_0 : i32, i32
  }
  func.func @transform_1(%arg0: i32) -> (i32, i32) {
    %c0_i32 = arith.constant 0 : i32
    %c0_i32_0 = arith.constant 0 : i32
    %c0_i32_1 = arith.constant 0 : i32
    return %c0_i32, %c0_i32_0 : i32, i32
  }
  func.func @transform_2(%arg0: i32) -> (i32, i32) {
    %c0_i32 = arith.constant 0 : i32
    %c0_i32_0 = arith.constant 0 : i32
    %c0_i32_1 = arith.constant 0 : i32
    return %c0_i32, %c0_i32_0 : i32, i32
  }
  func.func @transform_3(%arg0: i32) -> (i32, i32) {
    %c0_i32 = arith.constant 0 : i32
    %c0_i32_0 = arith.constant 0 : i32
    %c0_i32_1 = arith.constant 0 : i32
    return %c0_i32, %c0_i32_0 : i32, i32
  }
  func.func @transform_4(%arg0: i32) -> (i32, i32) {
    %c0_i32 = arith.constant 0 : i32
    %c0_i32_0 = arith.constant 0 : i32
    %c0_i32_1 = arith.constant 0 : i32
    return %c0_i32, %c0_i32_0 : i32, i32
  }
  func.func @transform_5(%arg0: i32) -> (i32, i32) {
    %c0_i32 = arith.constant 0 : i32
    %c0_i32_0 = arith.constant 0 : i32
    %c0_i32_1 = arith.constant 0 : i32
    return %c0_i32, %c0_i32_0 : i32, i32
  }
  func.func @transform_6(%arg0: i32) -> (i32, i32) {
    %c0_i32 = arith.constant 0 : i32
    %c0_i32_0 = arith.constant 0 : i32
    %c0_i32_1 = arith.constant 0 : i32
    return %c0_i32, %c0_i32_0 : i32, i32
  }
  func.func @transform_7(%arg0: i32) -> (i32, i32) {
    %c0_i32 = arith.constant 0 : i32
    %c0_i32_0 = arith.constant 0 : i32
    %c0_i32_1 = arith.constant 0 : i32
    return %c0_i32, %c0_i32_0 : i32, i32
  }
  func.func @transform_8(%arg0: i32) -> (i32, i32) {
    %c0_i32 = arith.constant 0 : i32
    %c0_i32_0 = arith.constant 0 : i32
    %c0_i32_1 = arith.constant 0 : i32
    return %c0_i32, %c0_i32_0 : i32, i32
  }
  func.func @transform_9(%arg0: i32) -> (i32, i32) {
    %c0_i32 = arith.constant 0 : i32
    %c0_i32_0 = arith.constant 0 : i32
    %c0_i32_1 = arith.constant 0 : i32
    return %c0_i32, %c0_i32_0 : i32, i32
  }
  func.func @transform_10(%arg0: i32) -> (i32, i32) {
    %c0_i32 = arith.constant 0 : i32
    %c0_i32_0 = arith.constant 0 : i32
    %c0_i32_1 = arith.constant 0 : i32
    return %c0_i32, %c0_i32_0 : i32, i32
  }
  func.func @transform_11(%arg0: i32) -> (i32, i32) {
    %c0_i32 = arith.constant 0 : i32
    %c0_i32_0 = arith.constant 0 : i32
    %c0_i32_1 = arith.constant 0 : i32
    return %c0_i32, %c0_i32_0 : i32, i32
  }
  func.func @transform_12(%arg0: i32) -> (i32, i32) {
    %c0_i32 = arith.constant 0 : i32
    %c0_i32_0 = arith.constant 0 : i32
    %c0_i32_1 = arith.constant 0 : i32
    return %c0_i32, %c0_i32_0 : i32, i32
  }
}

</mosaic_0001>

<bundles_post_ra>
// kernel: cnn_base_forward.4
= control target key start
LH: loop header
LB: loop body
LE: loop exit
PB: predicated region body
PF: predicated region fallthrough
CT: control target
= control target key end

     0   :  { %s893_s12 = smov 0   ;;  %s1035_s0 = inlined_call_operand.vmem [shape: bf16[1152,256], index: 0, kind: input, shape index: {}]   ;;  %s1036_s1 = inlined_call_operand.vmem [shape: bf16[256,32], index: 1, kind: input, shape index: {}]   ;;  %s1037_s2 = inlined_call_operand.vmem [shape: f32[1,32], index: 2, kind: input, shape index: {}]   ;;  %s1038_s3 = inlined_call_operand.vmem [shape: bf16[1152,32], index: 3, kind: output, shape index: {}]  }
   0x1 LB: > { %s659_s13 = sadd.s32 4294967295, %s871_s12   ;;  %p663_p0 = scmp.ge.s32.totalorder %s871_s12, 1  ;;  %s871_s12 = sphi %s893_s12, %s13_s12  }
   0x2   : > { %p139_p1 = scmp.lt.s32.totalorder %s871_s12, 10 }
   0x4   : > { %p140_p2 = pnand %p663_p0, %p139_p1 }
   0x5   : > { %v825_v0 = vld [vmem:[%s1036_s1 + $0x40] sm:$0xff] (!%p140_p2)   ;;  %s664_s16 = sshll.u32 (!%p140_p2), %s659_s13, 4  ;;  %v827_v2 = vld [vmem:[%s1036_s1 + $0x48] sm:$0xff] (!%p140_p2)   ;;  %v829_v4 = vld [vmem:[%s1036_s1 + $0x50] sm:$0xff] (!%p140_p2)   ;;  %vm586_vm0 = vcmask (!%p140_p2), 257024  }
   0x6   : > { %143 = sbr.rel (%p140_p2) target bundleno = 286 (0x11e), region = 32  ;;  %v826_v1 = vld [vmem:[%s1036_s1] sm:$0xff] (!%p140_p2)   ;;  %737 = vmatprep.subr.bf16.mxu0 (!%p140_p2), %v825_v0  ;;  %801 = vmatprep.subr.bf16.mxu1 (!%p140_p2), %v825_v0  ;;  %v828_v3 = vld [vmem:[%s1036_s1 + $0x8] sm:$0xff] (!%p140_p2)   ;;  %p165_p3 = scmp.lt.s32.totalorder (!%p140_p2), %s664_s16, 143  ;;  %v830_v5 = vld [vmem:[%s1036_s1 + $0x10] sm:$0xff] (!%p140_p2)  }
   0x7   : > { %738 = vmatpush3.bf16.msra.mxu0 (!%p140_p2), %v826_v1  ;;  %809 = vmatpush3.bf16.msra.mxu1 (!%p140_p2), %v826_v1  ;;  %v831_v6 = vld [vmem:[%s1036_s1 + $0x58] sm:$0xff] (!%p140_p2)   ;;  %v833_v8 = vld [vmem:[%s1036_s1 + $0x60] sm:$0xff] (!%p140_p2)   ;;  %v835_v10 = vld [vmem:[%s1036_s1 + $0x68] sm:$0xff] (!%p140_p2)  }
   0x8   : > { %739 = vmatprep.subr.bf16.mxu0 (!%p140_p2), %v827_v2  ;;  %802 = vmatprep.subr.bf16.mxu1 (!%p140_p2), %v827_v2  ;;  %v832_v7 = vld [vmem:[%s1036_s1 + $0x18] sm:$0xff] (!%p140_p2)   ;;  %v834_v9 = vld [vmem:[%s1036_s1 + $0x20] sm:$0xff] (!%p140_p2)   ;;  %v836_v13 = vld [vmem:[%s1036_s1 + $0x28] sm:$0xff] (!%p140_p2)  }
   0x9   : > { %v837_v14 = vld [vmem:[%s1036_s1 + $0x70] sm:$0xff] (!%p140_p2)   ;;  %v839_v16 = vld [vmem:[%s1036_s1 + $0x78] sm:$0xff] (!%p140_p2)   ;;  %v976_v34 = vld [vmem:[%s1037_s2] ss:$0 sm:$0xff] (!%p140_p2) }
   0xa   : > { %v838_v15 = vld [vmem:[%s1036_s1 + $0x30] sm:$0xff] (!%p140_p2)   ;;  %v840_v17 = vld [vmem:[%s1036_s1 + $0x38] sm:$0xff] (!%p140_p2)  }
   0xb   : > { %740 = vmatpush3.bf16.msra.mxu0 (!%p140_p2), %v828_v3  ;;  %810 = vmatpush3.bf16.msra.mxu1 (!%p140_p2), %v828_v3 }
   0xc   : > { %741 = vmatprep.subr.bf16.mxu0 (!%p140_p2), %v829_v4  ;;  %803 = vmatprep.subr.bf16.mxu1 (!%p140_p2), %v829_v4 }
   0xd   : > { %s1040_s16 = smov (!%p165_p3, %s664_s16), 143 }
   0xe   : > { %s720_s4 = sshll.u32 %s1040_s16, 3  ;;  %s668_s28 = sshll.u32 %s1040_s16, 2 }
   0xf   : > { %742 = vmatpush3.bf16.msra.mxu0 %v830_v5  ;;  %811 = vmatpush3.bf16.msra.mxu1 %v830_v5  ;;  %s934_s9 = scalar_lea.vmem %s1035_s0, %s720_s4  ;;  %s986_s4 = scalar_lea.vmem %s1038_s3, %s668_s28 }
  0x10   : > { %743 = vmatprep.subr.bf16.mxu0 %v831_v6  ;;  %804 = vmatprep.subr.bf16.mxu1 %v831_v6  ;;  %v843_v11 = vld [vmem:[%s934_s9 + $0x4] ss:$8 sps:$4 sm:$0xff]   ;;  %v841_v18 = vld [vmem:[%s934_s9] ss:$8 sps:$4 sm:$0xff]   ;;  %v847_v20 = vld [vmem:[%s934_s9 + $0x14] ss:$8 sps:$4 sm:$0xff]  }
  0x11   : > { %v846_v12 = vld [vmem:[%s934_s9 + $0x44] ss:$8 sps:$4 sm:$0xff]   ;;  %441 = vmatprep.mubr.bf16.mxu0 %v843_v11  ;;  %v844_v19 = vld [vmem:[%s934_s9 + $0x40] ss:$8 sps:$4 sm:$0xff]   ;;  %v849_v21 = vld [vmem:[%s934_s9 + $0x54] ss:$8 sps:$4 sm:$0xff]  }
  0x12   : > { %473 = vmatprep.mubr.bf16.mxu1 %v846_v12  ;;  %v851_v22 = vld [vmem:[%s934_s9 + $0x10] ss:$8 sps:$4 sm:$0xff]   ;;  %v853_v24 = vld [vmem:[%s934_s9 + $0x24] ss:$8 sps:$4 sm:$0xff]   ;;  %v857_v26 = vld [vmem:[%s934_s9 + $0x20] ss:$8 sps:$4 sm:$0xff]  }
  0x13   : > { %744 = vmatpush3.bf16.msra.mxu0 %v832_v7  ;;  %812 = vmatpush3.bf16.msra.mxu1 %v832_v7  ;;  %v852_v23 = vld [vmem:[%s934_s9 + $0x50] ss:$8 sps:$4 sm:$0xff]   ;;  %v855_v25 = vld [vmem:[%s934_s9 + $0x64] ss:$8 sps:$4 sm:$0xff]   ;;  %v858_v27 = vld [vmem:[%s934_s9 + $0x60] ss:$8 sps:$4 sm:$0xff]  }
  0x14   : > { %745 = vmatprep.subr.bf16.mxu0 %v833_v8  ;;  %805 = vmatprep.subr.bf16.mxu1 %v833_v8  ;;  %v859_v28 = vld [vmem:[%s934_s9 + $0x34] ss:$8 sps:$4 sm:$0xff]   ;;  %v863_v30 = vld [vmem:[%s934_s9 + $0x30] ss:$8 sps:$4 sm:$0xff]  }
  0x15   : > { %v861_v29 = vld [vmem:[%s934_s9 + $0x74] ss:$8 sps:$4 sm:$0xff]   ;;  %v864_v31 = vld [vmem:[%s934_s9 + $0x70] ss:$8 sps:$4 sm:$0xff]  }
  0x17   : > { %746 = vmatpush3.bf16.msra.mxu0 %v834_v9  ;;  %813 = vmatpush3.bf16.msra.mxu1 %v834_v9 }
  0x18   : > { %747 = vmatprep.subr.bf16.mxu0 %v835_v10  ;;  %806 = vmatprep.subr.bf16.mxu1 %v835_v10 }
  0x1b   : > { %748 = vmatpush3.bf16.msra.mxu0 %v836_v13  ;;  %814 = vmatpush3.bf16.msra.mxu1 %v836_v13 }
  0x1c   : > { %749 = vmatprep.subr.bf16.mxu0 %v837_v14  ;;  %807 = vmatprep.subr.bf16.mxu1 %v837_v14 }
  0x1f   : > { %750 = vmatpush3.bf16.msra.mxu0 %v838_v15  ;;  %815 = vmatpush3.bf16.msra.mxu1 %v838_v15 }
  0x20   : > { %751 = vmatprep.subr.bf16.mxu0 %v839_v16  ;;  %808 = vmatprep.subr.bf16.mxu1 %v839_v16 }
  0x23   : > { %752 = vmatpush3.bf16.msra.mxu0 %v840_v17  ;;  %816 = vmatpush3.bf16.msra.mxu1 %v840_v17 }
  0x26   : > { %442 = vmatmul.mubr.bf16.vlgmr.msra.gmra.mrb[0].mxu0 %v841_v18  ;;  %474 = vmatmul.mubr.bf16.vlgmr.msra.gmra.mrb[0].mxu1 %v844_v19 }
  0x27   : > { %449 = vmatprep.mubr.bf16.mxu0 %v847_v20  ;;  %481 = vmatprep.mubr.bf16.mxu1 %v849_v21 }
  0x2e   : > { %450 = vmatmul.mubr.bf16.gmra.mrb[4].mxu0 %v851_v22  ;;  %482 = vmatmul.mubr.bf16.gmra.mrb[4].mxu1 %v852_v23 }
  0x2f   : > { %457 = vmatprep.mubr.bf16.mxu0 %v853_v24  ;;  %489 = vmatprep.mubr.bf16.mxu1 %v855_v25 }
  0x36   : > { %458 = vmatmul.mubr.bf16.gmra.mrb[8].mxu0 %v857_v26  ;;  %490 = vmatmul.mubr.bf16.gmra.mrb[8].mxu1 %v858_v27 }
  0x37   : > { %465 = vmatprep.mubr.bf16.mxu0 %v859_v28  ;;  %497 = vmatprep.mubr.bf16.mxu1 %v861_v29 }
  0x3e   : > { %466 = vmatmul.mubr.bf16.gmra.mrb[12].mxu0 %v863_v30  ;;  %498 = vmatmul.mubr.bf16.gmra.mrb[12].mxu1 %v864_v31 }
  0xf9   : > { %v753_v32 = vpop.f32.mrb[0].mxu0  ;;  %v777_v33 = vpop.f32.mrb[0].mxu1 }
  0xfa   : > { %v754_v35 = vpop.f32.mrb[1].mxu0  ;;  %v778_v36 = vpop.f32.mrb[1].mxu1 }
  0xfb   : > { %v755_v37 = vadd.f32 %v754_v35, %v753_v32  ;;  %v779_v38 = vadd.f32 %v778_v36, %v777_v33  ;;  %v756_v39 = vpop.f32.mrb[2].mxu0  ;;  %v780_v40 = vpop.f32.mrb[2].mxu1 }
  0xfc   : > { %v757_v41 = vpop.f32.mrb[3].mxu0  ;;  %v781_v42 = vpop.f32.mrb[3].mxu1 }
  0xfd   : > { %v444_v43 = vadd.f32 %v755_v37, %v976_v34  ;;  %v476_v44 = vadd.f32 %v779_v38, %v976_v34  ;;  %v758_v45 = vadd.f32 %v757_v41, %v756_v39  ;;  %v782_v46 = vadd.f32 %v781_v42, %v780_v40 }
  0xff   : > { %v506_v47 = vmax.f32 %v444_v43, 0.0  ;;  %v514_v48 = vmax.f32 %v476_v44, 0.0  ;;  %v447_v49 = vadd.f32 %v758_v45, %v976_v34  ;;  %v479_v50 = vadd.f32 %v782_v46, %v976_v34 }
 0x101   : > { %v721_v51 = vpack.c.bf16 %v506_v47, %v506_v47  ;;  %v729_v52 = vpack.c.bf16 %v514_v48, %v514_v48  ;;  %v507_v53 = vmax.f32 %v447_v49, 0.0  ;;  %v515_v54 = vmax.f32 %v479_v50, 0.0  ;;  %v759_v55 = vpop.f32.mrb[4].mxu0  ;;  %v783_v56 = vpop.f32.mrb[4].mxu1 }
 0x102   : > { %v760_v57 = vpop.f32.mrb[5].mxu0  ;;  %v784_v58 = vpop.f32.mrb[5].mxu1 }
 0x103   : > { %587 = vst.msk [vmem:[%s986_s4] sm:$0xf] %vm586_vm0, %v721_v51  ;;  %595 = vst.msk [vmem:[%s986_s4 + $0x20] sm:$0xf] %vm586_vm0, %v729_v52  ;;  %v722_v59 = vpack.c.bf16 %v507_v53, %v507_v53  ;;  %v730_v60 = vpack.c.bf16 %v515_v54, %v515_v54  ;;  %v761_v61 = vadd.f32 %v760_v57, %v759_v55  ;;  %v762_v63 = vpop.f32.mrb[6].mxu0  ;;  %v786_v0 = vpop.f32.mrb[6].mxu1 }
 0x104   : > { %v785_v62 = vadd.f32 %v784_v58, %v783_v56  ;;  %v763_v1 = vpop.f32.mrb[7].mxu0  ;;  %v787_v2 = vpop.f32.mrb[7].mxu1 }
 0x105   : > { %588 = vst.msk [vmem:[%s986_s4 + $0x4] sm:$0xf] %vm586_vm0, %v722_v59  ;;  %596 = vst.msk [vmem:[%s986_s4 + $0x24] sm:$0xf] %vm586_vm0, %v730_v60  ;;  %v452_v3 = vadd.f32 %v761_v61, %v976_v34  ;;  %v764_v5 = vadd.f32 %v763_v1, %v762_v63  ;;  %v788_v6 = vadd.f32 %v787_v2, %v786_v0 }
 0x106   : > { %v484_v4 = vadd.f32 %v785_v62, %v976_v34 }
 0x107   : > { %v508_v7 = vmax.f32 %v452_v3, 0.0  ;;  %v455_v9 = vadd.f32 %v764_v5, %v976_v34  ;;  %v487_v10 = vadd.f32 %v788_v6, %v976_v34 }
 0x108   : > { %v516_v8 = vmax.f32 %v484_v4, 0.0 }
 0x109   : > { %v723_v11 = vpack.c.bf16 %v508_v7, %v508_v7  ;;  %v509_v13 = vmax.f32 %v455_v9, 0.0  ;;  %v517_v14 = vmax.f32 %v487_v10, 0.0  ;;  %v765_v15 = vpop.f32.mrb[8].mxu0  ;;  %v789_v16 = vpop.f32.mrb[8].mxu1 }
 0x10a   : > { %v731_v12 = vpack.c.bf16 %v516_v8, %v516_v8  ;;  %v766_v17 = vpop.f32.mrb[9].mxu0  ;;  %v790_v18 = vpop.f32.mrb[9].mxu1 }
 0x10b   : > { %589 = vst.msk [vmem:[%s986_s4 + $0x8] sm:$0xf] %vm586_vm0, %v723_v11  ;;  %v724_v19 = vpack.c.bf16 %v509_v13, %v509_v13  ;;  %v732_v20 = vpack.c.bf16 %v517_v14, %v517_v14  ;;  %v767_v21 = vadd.f32 %v766_v17, %v765_v15  ;;  %v791_v22 = vadd.f32 %v790_v18, %v789_v16  ;;  %v768_v23 = vpop.f32.mrb[10].mxu0  ;;  %v792_v24 = vpop.f32.mrb[10].mxu1 }
 0x10c   : > { %597 = vst.msk [vmem:[%s986_s4 + $0x28] sm:$0xf] %vm586_vm0, %v731_v12  ;;  %v769_v25 = vpop.f32.mrb[11].mxu0  ;;  %v793_v26 = vpop.f32.mrb[11].mxu1 }
 0x10d   : > { %590 = vst.msk [vmem:[%s986_s4 + $0xc] sm:$0xf] %vm586_vm0, %v724_v19  ;;  %598 = vst.msk [vmem:[%s986_s4 + $0x2c] sm:$0xf] %vm586_vm0, %v732_v20  ;;  %v460_v27 = vadd.f32 %v767_v21, %v976_v34  ;;  %v492_v28 = vadd.f32 %v791_v22, %v976_v34  ;;  %v770_v29 = vadd.f32 %v769_v25, %v768_v23 }
 0x10e   : > { %v794_v30 = vadd.f32 %v793_v26, %v792_v24 }
 0x10f   : > { %v510_v31 = vmax.f32 %v460_v27, 0.0  ;;  %v518_v32 = vmax.f32 %v492_v28, 0.0  ;;  %v463_v33 = vadd.f32 %v770_v29, %v976_v34 }
 0x110   : > { %v495_v35 = vadd.f32 %v794_v30, %v976_v34 }
 0x111   : > { %v725_v36 = vpack.c.bf16 %v510_v31, %v510_v31  ;;  %v733_v37 = vpack.c.bf16 %v518_v32, %v518_v32  ;;  %v511_v38 = vmax.f32 %v463_v33, 0.0  ;;  %v771_v40 = vpop.f32.mrb[12].mxu0  ;;  %v795_v41 = vpop.f32.mrb[12].mxu1 }
 0x112   : > { %v519_v39 = vmax.f32 %v495_v35, 0.0  ;;  %v772_v42 = vpop.f32.mrb[13].mxu0  ;;  %v796_v43 = vpop.f32.mrb[13].mxu1 }
 0x113   : > { %591 = vst.msk [vmem:[%s986_s4 + $0x10] sm:$0xf] %vm586_vm0, %v725_v36  ;;  %599 = vst.msk [vmem:[%s986_s4 + $0x30] sm:$0xf] %vm586_vm0, %v733_v37  ;;  %v726_v44 = vpack.c.bf16 %v511_v38, %v511_v38  ;;  %v773_v46 = vadd.f32 %v772_v42, %v771_v40  ;;  %v797_v47 = vadd.f32 %v796_v43, %v795_v41  ;;  %v774_v48 = vpop.f32.mrb[14].mxu0  ;;  %v798_v49 = vpop.f32.mrb[14].mxu1 }
 0x114   : > { %v734_v45 = vpack.c.bf16 %v519_v39, %v519_v39  ;;  %v775_v50 = vpop.f32.mrb[15].mxu0  ;;  %v799_v51 = vpop.f32.mrb[15].mxu1 }
 0x115   : > { %592 = vst.msk [vmem:[%s986_s4 + $0x14] sm:$0xf] %vm586_vm0, %v726_v44  ;;  %v468_v52 = vadd.f32 %v773_v46, %v976_v34  ;;  %v500_v53 = vadd.f32 %v797_v47, %v976_v34  ;;  %v776_v54 = vadd.f32 %v775_v50, %v774_v48  ;;  %v800_v55 = vadd.f32 %v799_v51, %v798_v49 }
 0x116   : > { %600 = vst.msk [vmem:[%s986_s4 + $0x34] sm:$0xf] %vm586_vm0, %v734_v45 }
 0x117   : > { %v512_v56 = vmax.f32 %v468_v52, 0.0  ;;  %v520_v57 = vmax.f32 %v500_v53, 0.0  ;;  %v471_v58 = vadd.f32 %v776_v54, %v976_v34  ;;  %v503_v59 = vadd.f32 %v800_v55, %v976_v34 }
 0x119   : > { %v727_v60 = vpack.c.bf16 %v512_v56, %v512_v56  ;;  %v735_v61 = vpack.c.bf16 %v520_v57, %v520_v57  ;;  %v513_v62 = vmax.f32 %v471_v58, 0.0  ;;  %v521_v63 = vmax.f32 %v503_v59, 0.0 }
 0x11b   : > { %593 = vst.msk [vmem:[%s986_s4 + $0x18] sm:$0xf] %vm586_vm0, %v727_v60  ;;  %601 = vst.msk [vmem:[%s986_s4 + $0x38] sm:$0xf] %vm586_vm0, %v735_v61  ;;  %v728_v0 = vpack.c.bf16 %v513_v62, %v513_v62  ;;  %v736_v1 = vpack.c.bf16 %v521_v63, %v521_v63 }
 0x11d   : > { %594 = vst.msk [vmem:[%s986_s4 + $0x1c] sm:$0xf] %vm586_vm0, %v728_v0  ;;  %602 = vst.msk [vmem:[%s986_s4 + $0x3c] sm:$0xf] %vm586_vm0, %v736_v1 }
 0x11e PF: > { %s13_s12 = sadd.s32 1, %s871_s12  }
 0x11f   : > { %p10_p4 = scmp.ge.s32.totalorder %s13_s12, 11  }
 0x121   :  { %12 = sbr.rel (!%p10_p4) target bundleno = 1 (0x1), region = 62 }

// kernel: cnn_base_forward.5
= control target key start
LH: loop header
LB: loop body
LE: loop exit
PB: predicated region body
PF: predicated region fallthrough
CT: control target
= control target key end

     0   :  { %vm1130_vm0 = vcmask 519168   ;;  %s2137_s1 = inlined_call_operand.vmem [shape: bf16[512,64], index: 1, kind: input, shape index: {}]   ;;  %s2138_s0 = inlined_call_operand.vmem [shape: bf16[248,512], index: 0, kind: input, shape index: {}]   ;;  %s2139_s2 = inlined_call_operand.vmem [shape: f32[1,64], index: 2, kind: input, shape index: {}]   ;;  %s2140_s3 = inlined_call_operand.vmem [shape: bf16[248,64], index: 3, kind: output, shape index: {}]  }
   0x1   :  { %v1549_v0 = vld [vmem:[%s2137_s1 + $0x40] sm:$0xff]   ;;  %v1553_v4 = vld [vmem:[%s2137_s1 + $0x48] sm:$0xff]   ;;  %v1557_v8 = vld [vmem:[%s2137_s1 + $0x50] sm:$0xff]  }
   0x2   :  { %v1550_v1 = vld [vmem:[%s2137_s1 + $0xc0] sm:$0xff]   ;;  %1325 = vmatprep.subr.bf16.mxu0 %v1549_v0  ;;  %v1554_v5 = vld [vmem:[%s2137_s1 + $0xc8] sm:$0xff]   ;;  %v1558_v9 = vld [vmem:[%s2137_s1 + $0xd0] sm:$0xff]  }
   0x3   :  { %v1551_v2 = vld [vmem:[%s2137_s1] sm:$0xff]   ;;  %1437 = vmatprep.subr.bf16.mxu1 %v1550_v1  ;;  %v1555_v6 = vld [vmem:[%s2137_s1 + $0x8] sm:$0xff]   ;;  %v1559_v10 = vld [vmem:[%s2137_s1 + $0x10] sm:$0xff]  }
   0x4   :  { %v1552_v3 = vld [vmem:[%s2137_s1 + $0x80] sm:$0xff]   ;;  %1326 = vmatpush3.bf16.msra.mxu0 %v1551_v2  ;;  %v1556_v7 = vld [vmem:[%s2137_s1 + $0x88] sm:$0xff]   ;;  %v1560_v11 = vld [vmem:[%s2137_s1 + $0x90] sm:$0xff]  }
   0x5   :  { %1438 = vmatpush3.bf16.msra.mxu1 %v1552_v3  ;;  %1327 = vmatprep.subr.bf16.mxu0 %v1553_v4  ;;  %v1561_v12 = vld [vmem:[%s2137_s1 + $0x58] sm:$0xff]   ;;  %v1565_v16 = vld [vmem:[%s2137_s1 + $0x60] sm:$0xff]   ;;  %v1569_v20 = vld [vmem:[%s2137_s1 + $0x68] sm:$0xff]  }
   0x6   :  { %1439 = vmatprep.subr.bf16.mxu1 %v1554_v5  ;;  %v1562_v13 = vld [vmem:[%s2137_s1 + $0xd8] sm:$0xff]   ;;  %v1566_v17 = vld [vmem:[%s2137_s1 + $0xe0] sm:$0xff]   ;;  %v1570_v21 = vld [vmem:[%s2137_s1 + $0xe8] sm:$0xff]  }
   0x7   :  { %v1563_v14 = vld [vmem:[%s2137_s1 + $0x18] sm:$0xff]   ;;  %v1567_v18 = vld [vmem:[%s2137_s1 + $0x20] sm:$0xff]   ;;  %v1571_v22 = vld [vmem:[%s2137_s1 + $0x28] sm:$0xff]  }
   0x8   :  { %1328 = vmatpush3.bf16.msra.mxu0 %v1555_v6  ;;  %v1564_v15 = vld [vmem:[%s2137_s1 + $0x98] sm:$0xff]   ;;  %v1568_v19 = vld [vmem:[%s2137_s1 + $0xa0] sm:$0xff]   ;;  %v1572_v23 = vld [vmem:[%s2137_s1 + $0xa8] sm:$0xff]  }
   0x9   :  { %1440 = vmatpush3.bf16.msra.mxu1 %v1556_v7  ;;  %1329 = vmatprep.subr.bf16.mxu0 %v1557_v8  ;;  %v1573_v24 = vld [vmem:[%s2137_s1 + $0x70] sm:$0xff]   ;;  %v1577_v28 = vld [vmem:[%s2137_s1 + $0x78] sm:$0xff]  }
   0xa   :  { %1441 = vmatprep.subr.bf16.mxu1 %v1558_v9  ;;  %v1574_v25 = vld [vmem:[%s2137_s1 + $0xf0] sm:$0xff]   ;;  %v1578_v29 = vld [vmem:[%s2137_s1 + $0xf8] sm:$0xff]  }
   0xb   :  { %v1575_v26 = vld [vmem:[%s2137_s1 + $0x30] sm:$0xff]   ;;  %v1579_v30 = vld [vmem:[%s2137_s1 + $0x38] sm:$0xff]  }
   0xc   :  { %1330 = vmatpush3.bf16.msra.mxu0 %v1559_v10  ;;  %v1576_v27 = vld [vmem:[%s2137_s1 + $0xb0] sm:$0xff]   ;;  %v1580_v31 = vld [vmem:[%s2137_s1 + $0xb8] sm:$0xff]  }
   0xd   :  { %1442 = vmatpush3.bf16.msra.mxu1 %v1560_v11  ;;  %1331 = vmatprep.subr.bf16.mxu0 %v1561_v12  ;;  %v1581_v32 = vld [vmem:[%s2138_s0] ss:$16 sps:$4 sm:$0xff]   ;;  %v1583_v33 = vld [vmem:[%s2138_s0 + $0x4] ss:$16 sps:$4 sm:$0xff]   ;;  %v1584_v34 = vld [vmem:[%s2138_s0 + $0x8] ss:$16 sps:$4 sm:$0xff]  }
   0xe   :  { %1443 = vmatprep.subr.bf16.mxu1 %v1562_v13  ;;  %v1586_v35 = vld [vmem:[%s2138_s0 + $0xc] ss:$16 sps:$4 sm:$0xff]   ;;  %686 = vmatprep.mubr.bf16.mxu0 %v1583_v33  ;;  %v1587_v36 = vld [vmem:[%s2138_s0 + $0x24] ss:$16 sps:$4 sm:$0xff]   ;;  %v1591_v38 = vld [vmem:[%s2138_s0 + $0x20] ss:$16 sps:$4 sm:$0xff]  }
   0xf   :  { %846 = vmatprep.mubr.bf16.mxu1 %v1586_v35  ;;  %v1589_v37 = vld [vmem:[%s2138_s0 + $0x2c] ss:$16 sps:$4 sm:$0xff]   ;;  %v1592_v39 = vld [vmem:[%s2138_s0 + $0x28] ss:$16 sps:$4 sm:$0xff]   ;;  %v1593_v40 = vld [vmem:[%s2138_s0 + $0x44] ss:$16 sps:$4 sm:$0xff]  }
  0x10   :  { %1332 = vmatpush3.bf16.msra.mxu0 %v1563_v14  ;;  %v1595_v41 = vld [vmem:[%s2138_s0 + $0x4c] ss:$16 sps:$4 sm:$0xff]   ;;  %v1597_v42 = vld [vmem:[%s2138_s0 + $0x40] ss:$16 sps:$4 sm:$0xff]   ;;  %v1598_v43 = vld [vmem:[%s2138_s0 + $0x48] ss:$16 sps:$4 sm:$0xff]  }
  0x11   :  { %1444 = vmatpush3.bf16.msra.mxu1 %v1564_v15  ;;  %1333 = vmatprep.subr.bf16.mxu0 %v1565_v16  ;;  %v1599_v44 = vld [vmem:[%s2138_s0 + $0x64] ss:$16 sps:$4 sm:$0xff]   ;;  %v1601_v45 = vld [vmem:[%s2138_s0 + $0x6c] ss:$16 sps:$4 sm:$0xff]   ;;  %v1603_v46 = vld [vmem:[%s2138_s0 + $0x60] ss:$16 sps:$4 sm:$0xff]  }
  0x12   :  { %1445 = vmatprep.subr.bf16.mxu1 %v1566_v17  ;;  %v1604_v47 = vld [vmem:[%s2138_s0 + $0x68] ss:$16 sps:$4 sm:$0xff]   ;;  %v1605_v48 = vld [vmem:[%s2138_s0 + $0x84] ss:$16 sps:$4 sm:$0xff]   ;;  %v1607_v49 = vld [vmem:[%s2138_s0 + $0x8c] ss:$16 sps:$4 sm:$0xff]  }
  0x13   :  { %v1609_v50 = vld [vmem:[%s2138_s0 + $0x80] ss:$16 sps:$4 sm:$0xff]   ;;  %v1610_v51 = vld [vmem:[%s2138_s0 + $0x88] ss:$16 sps:$4 sm:$0xff]   ;;  %v1611_v52 = vld [vmem:[%s2138_s0 + $0xa4] ss:$16 sps:$4 sm:$0xff]  }
  0x14   :  { %1334 = vmatpush3.bf16.msra.mxu0 %v1567_v18  ;;  %v1613_v53 = vld [vmem:[%s2138_s0 + $0xac] ss:$16 sps:$4 sm:$0xff]   ;;  %v1615_v54 = vld [vmem:[%s2138_s0 + $0xa0] ss:$16 sps:$4 sm:$0xff]   ;;  %v1616_v55 = vld [vmem:[%s2138_s0 + $0xa8] ss:$16 sps:$4 sm:$0xff]  }
  0x15   :  { %1446 = vmatpush3.bf16.msra.mxu1 %v1568_v19  ;;  %1335 = vmatprep.subr.bf16.mxu0 %v1569_v20  ;;  %v1617_v56 = vld [vmem:[%s2138_s0 + $0xc4] ss:$16 sps:$4 sm:$0xff]   ;;  %v1619_v57 = vld [vmem:[%s2138_s0 + $0xcc] ss:$16 sps:$4 sm:$0xff]   ;;  %v1621_v58 = vld [vmem:[%s2138_s0 + $0xc0] ss:$16 sps:$4 sm:$0xff]  }
  0x16   :  { %1447 = vmatprep.subr.bf16.mxu1 %v1570_v21  ;;  %v1622_v59 = vld [vmem:[%s2138_s0 + $0xc8] ss:$16 sps:$4 sm:$0xff]   ;;  %v1623_v60 = vld [vmem:[%s2138_s0 + $0xe4] ss:$16 sps:$4 sm:$0xff]   ;;  %v1625_v61 = vld [vmem:[%s2138_s0 + $0xec] ss:$16 sps:$4 sm:$0xff]  }
  0x17   :  { %v1627_v62 = vld [vmem:[%s2138_s0 + $0xe0] ss:$16 sps:$4 sm:$0xff]   ;;  %v1628_v63 = vld [vmem:[%s2138_s0 + $0xe8] ss:$16 sps:$4 sm:$0xff]   ;;  %v1629_v0 = vld [vmem:[%s2138_s0 + $0x104] ss:$16 sps:$4 sm:$0xff]  }
  0x18   :  { %1336 = vmatpush3.bf16.msra.mxu0 %v1571_v22  ;;  %v1631_v1 = vld [vmem:[%s2138_s0 + $0x10c] ss:$16 sps:$4 sm:$0xff]   ;;  %v1633_v2 = vld [vmem:[%s2138_s0 + $0x100] ss:$16 sps:$4 sm:$0xff]   ;;  %v1634_v3 = vld [vmem:[%s2138_s0 + $0x108] ss:$16 sps:$4 sm:$0xff]  }
  0x19   :  { %1448 = vmatpush3.bf16.msra.mxu1 %v1572_v23  ;;  %1337 = vmatprep.subr.bf16.mxu0 %v1573_v24  ;;  %v1635_v4 = vld [vmem:[%s2138_s0 + $0x124] ss:$16 sps:$4 sm:$0xff]   ;;  %v1637_v5 = vld [vmem:[%s2138_s0 + $0x12c] ss:$16 sps:$4 sm:$0xff]   ;;  %v1639_v6 = vld [vmem:[%s2138_s0 + $0x120] ss:$16 sps:$4 sm:$0xff]  }
  0x1a   :  { %1449 = vmatprep.subr.bf16.mxu1 %v1574_v25  ;;  %v1640_v7 = vld [vmem:[%s2138_s0 + $0x128] ss:$16 sps:$4 sm:$0xff]   ;;  %v1641_v8 = vld [vmem:[%s2138_s0 + $0x144] ss:$16 sps:$4 sm:$0xff]   ;;  %v1643_v9 = vld [vmem:[%s2138_s0 + $0x14c] ss:$16 sps:$4 sm:$0xff]  }
  0x1b   :  { %v1645_v10 = vld [vmem:[%s2138_s0 + $0x140] ss:$16 sps:$4 sm:$0xff]   ;;  %v1646_v11 = vld [vmem:[%s2138_s0 + $0x148] ss:$16 sps:$4 sm:$0xff]   ;;  %v1647_v12 = vld [vmem:[%s2138_s0 + $0x164] ss:$16 sps:$4 sm:$0xff]  }
  0x1c   :  { %1338 = vmatpush3.bf16.msra.mxu0 %v1575_v26  ;;  %v1649_v13 = vld [vmem:[%s2138_s0 + $0x16c] ss:$16 sps:$4 sm:$0xff]   ;;  %v1651_v14 = vld [vmem:[%s2138_s0 + $0x160] ss:$16 sps:$4 sm:$0xff]   ;;  %v1652_v15 = vld [vmem:[%s2138_s0 + $0x168] ss:$16 sps:$4 sm:$0xff]  }
  0x1d   :  { %1450 = vmatpush3.bf16.msra.mxu1 %v1576_v27  ;;  %1339 = vmatprep.subr.bf16.mxu0 %v1577_v28  ;;  %v1653_v16 = vld [vmem:[%s2138_s0 + $0x184] ss:$16 sps:$4 sm:$0xff]   ;;  %v1655_v17 = vld [vmem:[%s2138_s0 + $0x18c] ss:$16 sps:$4 sm:$0xff]   ;;  %v1657_v18 = vld [vmem:[%s2138_s0 + $0x180] ss:$16 sps:$4 sm:$0xff]  }
  0x1e   :  { %1451 = vmatprep.subr.bf16.mxu1 %v1578_v29  ;;  %v1658_v19 = vld [vmem:[%s2138_s0 + $0x188] ss:$16 sps:$4 sm:$0xff]   ;;  %v1659_v20 = vld [vmem:[%s2138_s0 + $0x1a4] ss:$16 sps:$4 sm:$0xff]   ;;  %v1661_v21 = vld [vmem:[%s2138_s0 + $0x1ac] ss:$16 sps:$4 sm:$0xff]  }
  0x1f   :  { %v1663_v22 = vld [vmem:[%s2138_s0 + $0x1a0] ss:$16 sps:$4 sm:$0xff]   ;;  %v1664_v23 = vld [vmem:[%s2138_s0 + $0x1a8] ss:$16 sps:$4 sm:$0xff]   ;;  %v1665_v24 = vld [vmem:[%s2138_s0 + $0x1c4] ss:$16 sps:$4 sm:$0xff]  }
  0x20   :  { %1340 = vmatpush3.bf16.msra.mxu0 %v1579_v30  ;;  %v1667_v25 = vld [vmem:[%s2138_s0 + $0x1cc] ss:$16 sps:$4 sm:$0xff]   ;;  %v75_v26 = vld [vmem:[%s2138_s0 + $0x1e0] sm:$0xff]  ;;  %v1670_v29 = vld [vmem:[%s2138_s0 + $0x1c8] ss:$16 sps:$4 sm:$0xff]  }
  0x21   :  { %1452 = vmatpush3.bf16.msra.mxu1 %v1580_v31  ;;  %v76_v27 = vld [vmem:[%s2138_s0 + $0x1e8] sm:$0xff]  ;;  %v1669_v28 = vld [vmem:[%s2138_s0 + $0x1c0] ss:$16 sps:$4 sm:$0xff]   ;;  %v1228_v30 = vcombine.high %v75_v26, %v75_v26 }
  0x22   :  { %v1230_v31 = vcombine.high %v76_v27, %v76_v27  ;;  %v1229_v33 = vcombine.low %v76_v27, %v76_v27 }
  0x23   :  { %687 = vmatmul.mubr.bf16.vlgmr.msra.gmra.mrb[0].mxu0 %v1581_v32  ;;  %v1227_v32 = vcombine.low %v75_v26, %v75_v26 }
  0x24   :  { %847 = vmatmul.mubr.bf16.vlgmr.msra.gmra.mrb[0].mxu1 %v1584_v34  ;;  %694 = vmatprep.mubr.bf16.mxu0 %v1587_v36  ;;  %v1980_v36 = vld [vmem:[%s2139_s2] ss:$0 sm:$0xff] }
  0x25   :  { %854 = vmatprep.mubr.bf16.mxu1 %v1589_v37 }
  0x2b   :  { %695 = vmatmul.mubr.bf16.gmra.mrb[4].mxu0 %v1591_v38 }
  0x2c   :  { %855 = vmatmul.mubr.bf16.gmra.mrb[4].mxu1 %v1592_v39  ;;  %702 = vmatprep.mubr.bf16.mxu0 %v1593_v40 }
  0x2d   :  { %862 = vmatprep.mubr.bf16.mxu1 %v1595_v41 }
  0x33   :  { %703 = vmatmul.mubr.bf16.gmra.mrb[8].mxu0 %v1597_v42 }
  0x34   :  { %863 = vmatmul.mubr.bf16.gmra.mrb[8].mxu1 %v1598_v43  ;;  %710 = vmatprep.mubr.bf16.mxu0 %v1599_v44 }
  0x35   :  { %870 = vmatprep.mubr.bf16.mxu1 %v1601_v45 }
  0x3b   :  { %711 = vmatmul.mubr.bf16.gmra.mrb[12].mxu0 %v1603_v46 }
  0x3c   :  { %871 = vmatmul.mubr.bf16.gmra.mrb[12].mxu1 %v1604_v47  ;;  %718 = vmatprep.mubr.bf16.mxu0 %v1605_v48 }
  0x3d   :  { %878 = vmatprep.mubr.bf16.mxu1 %v1607_v49 }
  0x43   :  { %719 = vmatmul.mubr.bf16.gmra.mrb[16].mxu0 %v1609_v50 }
  0x44   :  { %879 = vmatmul.mubr.bf16.gmra.mrb[16].mxu1 %v1610_v51  ;;  %726 = vmatprep.mubr.bf16.mxu0 %v1611_v52 }
  0x45   :  { %886 = vmatprep.mubr.bf16.mxu1 %v1613_v53 }
  0x4b   :  { %727 = vmatmul.mubr.bf16.gmra.mrb[20].mxu0 %v1615_v54 }
  0x4c   :  { %887 = vmatmul.mubr.bf16.gmra.mrb[20].mxu1 %v1616_v55  ;;  %734 = vmatprep.mubr.bf16.mxu0 %v1617_v56 }
  0x4d   :  { %894 = vmatprep.mubr.bf16.mxu1 %v1619_v57 }
  0x53   :  { %735 = vmatmul.mubr.bf16.gmra.mrb[24].mxu0 %v1621_v58 }
  0x54   :  { %895 = vmatmul.mubr.bf16.gmra.mrb[24].mxu1 %v1622_v59  ;;  %742 = vmatprep.mubr.bf16.mxu0 %v1623_v60 }
  0x55   :  { %902 = vmatprep.mubr.bf16.mxu1 %v1625_v61 }
  0x5b   :  { %743 = vmatmul.mubr.bf16.gmra.mrb[28].mxu0 %v1627_v62 }
  0x5c   :  { %903 = vmatmul.mubr.bf16.gmra.mrb[28].mxu1 %v1628_v63  ;;  %750 = vmatprep.mubr.bf16.mxu0 %v1629_v0 }
  0x5d   :  { %910 = vmatprep.mubr.bf16.mxu1 %v1631_v1 }
  0x63   :  { %751 = vmatmul.mubr.bf16.gmra.mrb[32].mxu0 %v1633_v2 }
  0x64   :  { %911 = vmatmul.mubr.bf16.gmra.mrb[32].mxu1 %v1634_v3  ;;  %758 = vmatprep.mubr.bf16.mxu0 %v1635_v4 }
  0x65   :  { %918 = vmatprep.mubr.bf16.mxu1 %v1637_v5 }
  0x6b   :  { %759 = vmatmul.mubr.bf16.gmra.mrb[36].mxu0 %v1639_v6 }
  0x6c   :  { %919 = vmatmul.mubr.bf16.gmra.mrb[36].mxu1 %v1640_v7  ;;  %766 = vmatprep.mubr.bf16.mxu0 %v1641_v8 }
  0x6d   :  { %926 = vmatprep.mubr.bf16.mxu1 %v1643_v9 }
  0x73   :  { %767 = vmatmul.mubr.bf16.gmra.mrb[40].mxu0 %v1645_v10 }
  0x74   :  { %927 = vmatmul.mubr.bf16.gmra.mrb[40].mxu1 %v1646_v11  ;;  %774 = vmatprep.mubr.bf16.mxu0 %v1647_v12 }
  0x75   :  { %934 = vmatprep.mubr.bf16.mxu1 %v1649_v13 }
  0x7b   :  { %775 = vmatmul.mubr.bf16.gmra.mrb[44].mxu0 %v1651_v14 }
  0x7c   :  { %935 = vmatmul.mubr.bf16.gmra.mrb[44].mxu1 %v1652_v15  ;;  %782 = vmatprep.mubr.bf16.mxu0 %v1653_v16 }
  0x7d   :  { %942 = vmatprep.mubr.bf16.mxu1 %v1655_v17 }
  0x83   :  { %783 = vmatmul.mubr.bf16.gmra.mrb[48].mxu0 %v1657_v18 }
  0x84   :  { %943 = vmatmul.mubr.bf16.gmra.mrb[48].mxu1 %v1658_v19  ;;  %790 = vmatprep.mubr.bf16.mxu0 %v1659_v20 }
  0x85   :  { %950 = vmatprep.mubr.bf16.mxu1 %v1661_v21 }
  0x8b   :  { %791 = vmatmul.mubr.bf16.gmra.mrb[52].mxu0 %v1663_v22 }
  0x8c   :  { %951 = vmatmul.mubr.bf16.gmra.mrb[52].mxu1 %v1664_v23  ;;  %798 = vmatprep.mubr.bf16.mxu0 %v1665_v24 }
  0x8d   :  { %958 = vmatprep.mubr.bf16.mxu1 %v1667_v25 }
  0x93   :  { %799 = vmatmul.mubr.bf16.gmra.mrb[56].mxu0 %v1669_v28 }
  0x94   :  { %959 = vmatmul.mubr.bf16.gmra.mrb[56].mxu1 %v1670_v29  ;;  %806 = vmatprep.mubr.bf16.mxu0 %v1228_v30 }
  0x95   :  { %966 = vmatprep.mubr.bf16.mxu1 %v1230_v31 }
  0x9b   :  { %807 = vmatmul.mubr.bf16.gmra.mrb[60].mxu0 %v1227_v32 }
  0x9c   :  { %967 = vmatmul.mubr.bf16.gmra.mrb[60].mxu1 %v1229_v33 }
  0xf6   :  { %v1341_v34 = vpop.f32.mrb[0].mxu0 }
  0xf7   :  { %v1453_v35 = vpop.f32.mrb[0].mxu1  ;;  %v1342_v37 = vpop.f32.mrb[1].mxu0 }
  0xf8   :  { %v1343_v38 = vadd.f32 %v1342_v37, %v1341_v34  ;;  %v1454_v39 = vpop.f32.mrb[1].mxu1  ;;  %v1344_v40 = vpop.f32.mrb[2].mxu0 }
  0xf9   :  { %v1455_v41 = vadd.f32 %v1454_v39, %v1453_v35  ;;  %v1456_v42 = vpop.f32.mrb[2].mxu1  ;;  %v1345_v43 = vpop.f32.mrb[3].mxu0 }
  0xfa   :  { %v689_v44 = vadd.f32 %v1343_v38, %v1980_v36  ;;  %v1346_v45 = vadd.f32 %v1345_v43, %v1344_v40  ;;  %v1457_v46 = vpop.f32.mrb[3].mxu1 }
  0xfb   :  { %v1458_v47 = vadd.f32 %v1457_v46, %v1456_v42 }
  0xfc   :  { %v849_v48 = vadd.f32 %v1455_v41, %v689_v44  ;;  %v692_v49 = vadd.f32 %v1346_v45, %v1980_v36 }
  0xfe   :  { %v974_v50 = vmax.f32 %v849_v48, 0.0  ;;  %v852_v51 = vadd.f32 %v1458_v47, %v692_v49  ;;  %v1347_v52 = vpop.f32.mrb[4].mxu0 }
  0xff   :  { %v1459_v53 = vpop.f32.mrb[4].mxu1  ;;  %v1348_v54 = vpop.f32.mrb[5].mxu0 }
 0x100   :  { %v1294_v55 = vpack.c.bf16 %v974_v50, %v974_v50  ;;  %v975_v56 = vmax.f32 %v852_v51, 0.0  ;;  %v1349_v57 = vadd.f32 %v1348_v54, %v1347_v52  ;;  %v1460_v58 = vpop.f32.mrb[5].mxu1  ;;  %v1350_v59 = vpop.f32.mrb[6].mxu0 }
 0x101   :  { %v1461_v60 = vadd.f32 %v1460_v58, %v1459_v53  ;;  %v1462_v61 = vpop.f32.mrb[6].mxu1  ;;  %v1351_v62 = vpop.f32.mrb[7].mxu0 }
 0x102   :  { %1131 = vst.msk [vmem:[%s2140_s3] sm:$0xf] %vm1130_vm0, %v1294_v55  ;;  %v1295_v63 = vpack.c.bf16 %v975_v56, %v975_v56  ;;  %v697_v0 = vadd.f32 %v1349_v57, %v1980_v36  ;;  %v1352_v1 = vadd.f32 %v1351_v62, %v1350_v59  ;;  %v1463_v2 = vpop.f32.mrb[7].mxu1 }
 0x103   :  { %v1464_v3 = vadd.f32 %v1463_v2, %v1462_v61 }
 0x104   :  { %1132 = vst.msk [vmem:[%s2140_s3 + $0x4] sm:$0xf] %vm1130_vm0, %v1295_v63  ;;  %v857_v4 = vadd.f32 %v1461_v60, %v697_v0  ;;  %v700_v5 = vadd.f32 %v1352_v1, %v1980_v36 }
 0x106   :  { %v976_v6 = vmax.f32 %v857_v4, 0.0  ;;  %v860_v7 = vadd.f32 %v1464_v3, %v700_v5  ;;  %v1353_v8 = vpop.f32.mrb[8].mxu0 }
 0x107   :  { %v1465_v9 = vpop.f32.mrb[8].mxu1  ;;  %v1354_v10 = vpop.f32.mrb[9].mxu0 }
 0x108   :  { %v1296_v11 = vpack.c.bf16 %v976_v6, %v976_v6  ;;  %v977_v12 = vmax.f32 %v860_v7, 0.0  ;;  %v1355_v13 = vadd.f32 %v1354_v10, %v1353_v8  ;;  %v1466_v14 = vpop.f32.mrb[9].mxu1  ;;  %v1356_v15 = vpop.f32.mrb[10].mxu0 }
 0x109   :  { %v1467_v16 = vadd.f32 %v1466_v14, %v1465_v9  ;;  %v1468_v17 = vpop.f32.mrb[10].mxu1  ;;  %v1357_v18 = vpop.f32.mrb[11].mxu0 }
 0x10a   :  { %1133 = vst.msk [vmem:[%s2140_s3 + $0x8] sm:$0xf] %vm1130_vm0, %v1296_v11  ;;  %v1297_v19 = vpack.c.bf16 %v977_v12, %v977_v12  ;;  %v705_v20 = vadd.f32 %v1355_v13, %v1980_v36  ;;  %v1358_v21 = vadd.f32 %v1357_v18, %v1356_v15  ;;  %v1469_v22 = vpop.f32.mrb[11].mxu1 }
 0x10b   :  { %v1470_v23 = vadd.f32 %v1469_v22, %v1468_v17 }
 0x10c   :  { %1134 = vst.msk [vmem:[%s2140_s3 + $0xc] sm:$0xf] %vm1130_vm0, %v1297_v19  ;;  %v865_v24 = vadd.f32 %v1467_v16, %v705_v20  ;;  %v708_v25 = vadd.f32 %v1358_v21, %v1980_v36 }
 0x10e   :  { %v978_v26 = vmax.f32 %v865_v24, 0.0  ;;  %v868_v27 = vadd.f32 %v1470_v23, %v708_v25  ;;  %v1359_v28 = vpop.f32.mrb[12].mxu0 }
 0x10f   :  { %v1471_v29 = vpop.f32.mrb[12].mxu1  ;;  %v1360_v30 = vpop.f32.mrb[13].mxu0 }
 0x110   :  { %v1298_v31 = vpack.c.bf16 %v978_v26, %v978_v26  ;;  %v979_v32 = vmax.f32 %v868_v27, 0.0  ;;  %v1361_v33 = vadd.f32 %v1360_v30, %v1359_v28  ;;  %v1472_v34 = vpop.f32.mrb[13].mxu1  ;;  %v1362_v35 = vpop.f32.mrb[14].mxu0 }
 0x111   :  { %v1473_v37 = vadd.f32 %v1472_v34, %v1471_v29  ;;  %v1474_v38 = vpop.f32.mrb[14].mxu1  ;;  %v1363_v39 = vpop.f32.mrb[15].mxu0 }
 0x112   :  { %1135 = vst.msk [vmem:[%s2140_s3 + $0x10] sm:$0xf] %vm1130_vm0, %v1298_v31  ;;  %v1299_v40 = vpack.c.bf16 %v979_v32, %v979_v32  ;;  %v713_v41 = vadd.f32 %v1361_v33, %v1980_v36  ;;  %v1364_v42 = vadd.f32 %v1363_v39, %v1362_v35  ;;  %v1475_v43 = vpop.f32.mrb[15].mxu1 }
 0x113   :  { %v1476_v44 = vadd.f32 %v1475_v43, %v1474_v38 }
 0x114   :  { %1136 = vst.msk [vmem:[%s2140_s3 + $0x14] sm:$0xf] %vm1130_vm0, %v1299_v40  ;;  %v873_v45 = vadd.f32 %v1473_v37, %v713_v41  ;;  %v716_v46 = vadd.f32 %v1364_v42, %v1980_v36 }
 0x116   :  { %v980_v47 = vmax.f32 %v873_v45, 0.0  ;;  %v876_v48 = vadd.f32 %v1476_v44, %v716_v46  ;;  %v1365_v49 = vpop.f32.mrb[16].mxu0 }
 0x117   :  { %v1477_v50 = vpop.f32.mrb[16].mxu1  ;;  %v1366_v51 = vpop.f32.mrb[17].mxu0 }
 0x118   :  { %v1300_v52 = vpack.c.bf16 %v980_v47, %v980_v47  ;;  %v981_v53 = vmax.f32 %v876_v48, 0.0  ;;  %v1367_v54 = vadd.f32 %v1366_v51, %v1365_v49  ;;  %v1478_v55 = vpop.f32.mrb[17].mxu1  ;;  %v1368_v56 = vpop.f32.mrb[18].mxu0 }
 0x119   :  { %v1479_v57 = vadd.f32 %v1478_v55, %v1477_v50  ;;  %v1480_v58 = vpop.f32.mrb[18].mxu1  ;;  %v1369_v59 = vpop.f32.mrb[19].mxu0 }
 0x11a   :  { %1137 = vst.msk [vmem:[%s2140_s3 + $0x18] sm:$0xf] %vm1130_vm0, %v1300_v52  ;;  %v1301_v60 = vpack.c.bf16 %v981_v53, %v981_v53  ;;  %v721_v61 = vadd.f32 %v1367_v54, %v1980_v36  ;;  %v1370_v62 = vadd.f32 %v1369_v59, %v1368_v56  ;;  %v1481_v63 = vpop.f32.mrb[19].mxu1 }
 0x11b   :  { %v1482_v0 = vadd.f32 %v1481_v63, %v1480_v58 }
 0x11c   :  { %1138 = vst.msk [vmem:[%s2140_s3 + $0x1c] sm:$0xf] %vm1130_vm0, %v1301_v60  ;;  %v881_v1 = vadd.f32 %v1479_v57, %v721_v61  ;;  %v724_v2 = vadd.f32 %v1370_v62, %v1980_v36 }
 0x11e   :  { %v982_v3 = vmax.f32 %v881_v1, 0.0  ;;  %v884_v4 = vadd.f32 %v1482_v0, %v724_v2  ;;  %v1371_v5 = vpop.f32.mrb[20].mxu0 }
 0x11f   :  { %v1483_v6 = vpop.f32.mrb[20].mxu1  ;;  %v1372_v7 = vpop.f32.mrb[21].mxu0 }
 0x120   :  { %v1302_v8 = vpack.c.bf16 %v982_v3, %v982_v3  ;;  %v983_v9 = vmax.f32 %v884_v4, 0.0  ;;  %v1373_v10 = vadd.f32 %v1372_v7, %v1371_v5  ;;  %v1484_v11 = vpop.f32.mrb[21].mxu1  ;;  %v1374_v12 = vpop.f32.mrb[22].mxu0 }
 0x121   :  { %v1485_v13 = vadd.f32 %v1484_v11, %v1483_v6  ;;  %v1486_v14 = vpop.f32.mrb[22].mxu1  ;;  %v1375_v15 = vpop.f32.mrb[23].mxu0 }
 0x122   :  { %1139 = vst.msk [vmem:[%s2140_s3 + $0x20] sm:$0xf] %vm1130_vm0, %v1302_v8  ;;  %v1303_v16 = vpack.c.bf16 %v983_v9, %v983_v9  ;;  %v729_v17 = vadd.f32 %v1373_v10, %v1980_v36  ;;  %v1376_v18 = vadd.f32 %v1375_v15, %v1374_v12  ;;  %v1487_v19 = vpop.f32.mrb[23].mxu1 }
 0x123   :  { %v1488_v20 = vadd.f32 %v1487_v19, %v1486_v14 }
 0x124   :  { %1140 = vst.msk [vmem:[%s2140_s3 + $0x24] sm:$0xf] %vm1130_vm0, %v1303_v16  ;;  %v889_v21 = vadd.f32 %v1485_v13, %v729_v17  ;;  %v732_v22 = vadd.f32 %v1376_v18, %v1980_v36 }
 0x126   :  { %v984_v23 = vmax.f32 %v889_v21, 0.0  ;;  %v892_v24 = vadd.f32 %v1488_v20, %v732_v22  ;;  %v1377_v25 = vpop.f32.mrb[24].mxu0 }
 0x127   :  { %v1489_v26 = vpop.f32.mrb[24].mxu1  ;;  %v1378_v27 = vpop.f32.mrb[25].mxu0 }
 0x128   :  { %v1304_v28 = vpack.c.bf16 %v984_v23, %v984_v23  ;;  %v985_v29 = vmax.f32 %v892_v24, 0.0  ;;  %v1379_v30 = vadd.f32 %v1378_v27, %v1377_v25  ;;  %v1490_v31 = vpop.f32.mrb[25].mxu1  ;;  %v1380_v32 = vpop.f32.mrb[26].mxu0 }
 0x129   :  { %v1491_v33 = vadd.f32 %v1490_v31, %v1489_v26  ;;  %v1492_v34 = vpop.f32.mrb[26].mxu1  ;;  %v1381_v35 = vpop.f32.mrb[27].mxu0 }
 0x12a   :  { %1141 = vst.msk [vmem:[%s2140_s3 + $0x28] sm:$0xf] %vm1130_vm0, %v1304_v28  ;;  %v1305_v37 = vpack.c.bf16 %v985_v29, %v985_v29  ;;  %v737_v38 = vadd.f32 %v1379_v30, %v1980_v36  ;;  %v1382_v39 = vadd.f32 %v1381_v35, %v1380_v32  ;;  %v1493_v40 = vpop.f32.mrb[27].mxu1 }
 0x12b   :  { %v1494_v41 = vadd.f32 %v1493_v40, %v1492_v34 }
 0x12c   :  { %1142 = vst.msk [vmem:[%s2140_s3 + $0x2c] sm:$0xf] %vm1130_vm0, %v1305_v37  ;;  %v897_v42 = vadd.f32 %v1491_v33, %v737_v38  ;;  %v740_v43 = vadd.f32 %v1382_v39, %v1980_v36 }
 0x12e   :  { %v986_v44 = vmax.f32 %v897_v42, 0.0  ;;  %v900_v45 = vadd.f32 %v1494_v41, %v740_v43  ;;  %v1383_v46 = vpop.f32.mrb[28].mxu0 }
 0x12f   :  { %v1495_v47 = vpop.f32.mrb[28].mxu1  ;;  %v1384_v48 = vpop.f32.mrb[29].mxu0 }
 0x130   :  { %v1306_v49 = vpack.c.bf16 %v986_v44, %v986_v44  ;;  %v987_v50 = vmax.f32 %v900_v45, 0.0  ;;  %v1385_v51 = vadd.f32 %v1384_v48, %v1383_v46  ;;  %v1496_v52 = vpop.f32.mrb[29].mxu1  ;;  %v1386_v53 = vpop.f32.mrb[30].mxu0 }
 0x131   :  { %v1497_v54 = vadd.f32 %v1496_v52, %v1495_v47  ;;  %v1498_v55 = vpop.f32.mrb[30].mxu1  ;;  %v1387_v56 = vpop.f32.mrb[31].mxu0 }
 0x132   :  { %1143 = vst.msk [vmem:[%s2140_s3 + $0x30] sm:$0xf] %vm1130_vm0, %v1306_v49  ;;  %v1307_v57 = vpack.c.bf16 %v987_v50, %v987_v50  ;;  %v745_v58 = vadd.f32 %v1385_v51, %v1980_v36  ;;  %v1388_v59 = vadd.f32 %v1387_v56, %v1386_v53  ;;  %v1499_v60 = vpop.f32.mrb[31].mxu1 }
 0x133   :  { %v1500_v61 = vadd.f32 %v1499_v60, %v1498_v55 }
 0x134   :  { %1144 = vst.msk [vmem:[%s2140_s3 + $0x34] sm:$0xf] %vm1130_vm0, %v1307_v57  ;;  %v905_v62 = vadd.f32 %v1497_v54, %v745_v58  ;;  %v748_v63 = vadd.f32 %v1388_v59, %v1980_v36 }
 0x136   :  { %v988_v0 = vmax.f32 %v905_v62, 0.0  ;;  %v908_v1 = vadd.f32 %v1500_v61, %v748_v63  ;;  %v1389_v2 = vpop.f32.mrb[32].mxu0 }
 0x137   :  { %v1501_v3 = vpop.f32.mrb[32].mxu1  ;;  %v1390_v4 = vpop.f32.mrb[33].mxu0 }
 0x138   :  { %v1308_v5 = vpack.c.bf16 %v988_v0, %v988_v0  ;;  %v989_v6 = vmax.f32 %v908_v1, 0.0  ;;  %v1391_v7 = vadd.f32 %v1390_v4, %v1389_v2  ;;  %v1502_v8 = vpop.f32.mrb[33].mxu1  ;;  %v1392_v9 = vpop.f32.mrb[34].mxu0 }
 0x139   :  { %v1503_v10 = vadd.f32 %v1502_v8, %v1501_v3  ;;  %v1504_v11 = vpop.f32.mrb[34].mxu1  ;;  %v1393_v12 = vpop.f32.mrb[35].mxu0 }
 0x13a   :  { %1145 = vst.msk [vmem:[%s2140_s3 + $0x38] sm:$0xf] %vm1130_vm0, %v1308_v5  ;;  %v1309_v13 = vpack.c.bf16 %v989_v6, %v989_v6  ;;  %v753_v14 = vadd.f32 %v1391_v7, %v1980_v36  ;;  %v1394_v15 = vadd.f32 %v1393_v12, %v1392_v9  ;;  %v1505_v16 = vpop.f32.mrb[35].mxu1 }
 0x13b   :  { %v1506_v17 = vadd.f32 %v1505_v16, %v1504_v11 }
 0x13c   :  { %1146 = vst.msk [vmem:[%s2140_s3 + $0x3c] sm:$0xf] %vm1130_vm0, %v1309_v13  ;;  %v913_v18 = vadd.f32 %v1503_v10, %v753_v14  ;;  %v756_v19 = vadd.f32 %v1394_v15, %v1980_v36 }
 0x13e   :  { %v990_v20 = vmax.f32 %v913_v18, 0.0  ;;  %v916_v21 = vadd.f32 %v1506_v17, %v756_v19  ;;  %v1395_v22 = vpop.f32.mrb[36].mxu0 }
 0x13f   :  { %v1507_v23 = vpop.f32.mrb[36].mxu1  ;;  %v1396_v24 = vpop.f32.mrb[37].mxu0 }
 0x140   :  { %v1310_v25 = vpack.c.bf16 %v990_v20, %v990_v20  ;;  %v991_v26 = vmax.f32 %v916_v21, 0.0  ;;  %v1397_v27 = vadd.f32 %v1396_v24, %v1395_v22  ;;  %v1508_v28 = vpop.f32.mrb[37].mxu1  ;;  %v1398_v29 = vpop.f32.mrb[38].mxu0 }
 0x141   :  { %v1509_v30 = vadd.f32 %v1508_v28, %v1507_v23  ;;  %v1510_v31 = vpop.f32.mrb[38].mxu1  ;;  %v1399_v32 = vpop.f32.mrb[39].mxu0 }
 0x142   :  { %1147 = vst.msk [vmem:[%s2140_s3 + $0x40] sm:$0xf] %vm1130_vm0, %v1310_v25  ;;  %v1311_v33 = vpack.c.bf16 %v991_v26, %v991_v26  ;;  %v761_v34 = vadd.f32 %v1397_v27, %v1980_v36  ;;  %v1400_v35 = vadd.f32 %v1399_v32, %v1398_v29  ;;  %v1511_v37 = vpop.f32.mrb[39].mxu1 }
 0x143   :  { %v1512_v38 = vadd.f32 %v1511_v37, %v1510_v31 }
 0x144   :  { %1148 = vst.msk [vmem:[%s2140_s3 + $0x44] sm:$0xf] %vm1130_vm0, %v1311_v33  ;;  %v921_v39 = vadd.f32 %v1509_v30, %v761_v34  ;;  %v764_v40 = vadd.f32 %v1400_v35, %v1980_v36 }
 0x146   :  { %v992_v41 = vmax.f32 %v921_v39, 0.0  ;;  %v924_v42 = vadd.f32 %v1512_v38, %v764_v40  ;;  %v1401_v43 = vpop.f32.mrb[40].mxu0 }
 0x147   :  { %v1513_v44 = vpop.f32.mrb[40].mxu1  ;;  %v1402_v45 = vpop.f32.mrb[41].mxu0 }
 0x148   :  { %v1312_v46 = vpack.c.bf16 %v992_v41, %v992_v41  ;;  %v993_v47 = vmax.f32 %v924_v42, 0.0  ;;  %v1403_v48 = vadd.f32 %v1402_v45, %v1401_v43  ;;  %v1514_v49 = vpop.f32.mrb[41].mxu1  ;;  %v1404_v50 = vpop.f32.mrb[42].mxu0 }
 0x149   :  { %v1515_v51 = vadd.f32 %v1514_v49, %v1513_v44  ;;  %v1516_v52 = vpop.f32.mrb[42].mxu1  ;;  %v1405_v53 = vpop.f32.mrb[43].mxu0 }
 0x14a   :  { %1149 = vst.msk [vmem:[%s2140_s3 + $0x48] sm:$0xf] %vm1130_vm0, %v1312_v46  ;;  %v1313_v54 = vpack.c.bf16 %v993_v47, %v993_v47  ;;  %v769_v55 = vadd.f32 %v1403_v48, %v1980_v36  ;;  %v1406_v56 = vadd.f32 %v1405_v53, %v1404_v50  ;;  %v1517_v57 = vpop.f32.mrb[43].mxu1 }
 0x14b   :  { %v1518_v58 = vadd.f32 %v1517_v57, %v1516_v52 }
 0x14c   :  { %1150 = vst.msk [vmem:[%s2140_s3 + $0x4c] sm:$0xf] %vm1130_vm0, %v1313_v54  ;;  %v929_v59 = vadd.f32 %v1515_v51, %v769_v55  ;;  %v772_v60 = vadd.f32 %v1406_v56, %v1980_v36 }
 0x14e   :  { %v994_v61 = vmax.f32 %v929_v59, 0.0  ;;  %v932_v62 = vadd.f32 %v1518_v58, %v772_v60  ;;  %v1407_v63 = vpop.f32.mrb[44].mxu0 }
 0x14f   :  { %v1519_v0 = vpop.f32.mrb[44].mxu1  ;;  %v1408_v1 = vpop.f32.mrb[45].mxu0 }
 0x150   :  { %v1314_v2 = vpack.c.bf16 %v994_v61, %v994_v61  ;;  %v995_v3 = vmax.f32 %v932_v62, 0.0  ;;  %v1409_v4 = vadd.f32 %v1408_v1, %v1407_v63  ;;  %v1520_v5 = vpop.f32.mrb[45].mxu1  ;;  %v1410_v6 = vpop.f32.mrb[46].mxu0 }
 0x151   :  { %v1521_v7 = vadd.f32 %v1520_v5, %v1519_v0  ;;  %v1522_v8 = vpop.f32.mrb[46].mxu1  ;;  %v1411_v9 = vpop.f32.mrb[47].mxu0 }
 0x152   :  { %1151 = vst.msk [vmem:[%s2140_s3 + $0x50] sm:$0xf] %vm1130_vm0, %v1314_v2  ;;  %v1315_v10 = vpack.c.bf16 %v995_v3, %v995_v3  ;;  %v777_v11 = vadd.f32 %v1409_v4, %v1980_v36  ;;  %v1412_v12 = vadd.f32 %v1411_v9, %v1410_v6  ;;  %v1523_v13 = vpop.f32.mrb[47].mxu1 }
 0x153   :  { %v1524_v14 = vadd.f32 %v1523_v13, %v1522_v8 }
 0x154   :  { %1152 = vst.msk [vmem:[%s2140_s3 + $0x54] sm:$0xf] %vm1130_vm0, %v1315_v10  ;;  %v937_v15 = vadd.f32 %v1521_v7, %v777_v11  ;;  %v780_v16 = vadd.f32 %v1412_v12, %v1980_v36 }
 0x156   :  { %v996_v17 = vmax.f32 %v937_v15, 0.0  ;;  %v940_v18 = vadd.f32 %v1524_v14, %v780_v16  ;;  %v1413_v19 = vpop.f32.mrb[48].mxu0 }
 0x157   :  { %v1525_v20 = vpop.f32.mrb[48].mxu1  ;;  %v1414_v21 = vpop.f32.mrb[49].mxu0 }
 0x158   :  { %v1316_v22 = vpack.c.bf16 %v996_v17, %v996_v17  ;;  %v997_v23 = vmax.f32 %v940_v18, 0.0  ;;  %v1415_v24 = vadd.f32 %v1414_v21, %v1413_v19  ;;  %v1526_v25 = vpop.f32.mrb[49].mxu1  ;;  %v1416_v26 = vpop.f32.mrb[50].mxu0 }
 0x159   :  { %v1527_v27 = vadd.f32 %v1526_v25, %v1525_v20  ;;  %v1528_v28 = vpop.f32.mrb[50].mxu1  ;;  %v1417_v29 = vpop.f32.mrb[51].mxu0 }
 0x15a   :  { %1153 = vst.msk [vmem:[%s2140_s3 + $0x58] sm:$0xf] %vm1130_vm0, %v1316_v22  ;;  %v1317_v30 = vpack.c.bf16 %v997_v23, %v997_v23  ;;  %v785_v31 = vadd.f32 %v1415_v24, %v1980_v36  ;;  %v1418_v32 = vadd.f32 %v1417_v29, %v1416_v26  ;;  %v1529_v33 = vpop.f32.mrb[51].mxu1 }
 0x15b   :  { %v1530_v34 = vadd.f32 %v1529_v33, %v1528_v28 }
 0x15c   :  { %1154 = vst.msk [vmem:[%s2140_s3 + $0x5c] sm:$0xf] %vm1130_vm0, %v1317_v30  ;;  %v945_v35 = vadd.f32 %v1527_v27, %v785_v31  ;;  %v788_v37 = vadd.f32 %v1418_v32, %v1980_v36 }
 0x15e   :  { %v998_v38 = vmax.f32 %v945_v35, 0.0  ;;  %v948_v39 = vadd.f32 %v1530_v34, %v788_v37  ;;  %v1419_v40 = vpop.f32.mrb[52].mxu0 }
 0x15f   :  { %v1531_v41 = vpop.f32.mrb[52].mxu1  ;;  %v1420_v42 = vpop.f32.mrb[53].mxu0 }
 0x160   :  { %v1318_v43 = vpack.c.bf16 %v998_v38, %v998_v38  ;;  %v999_v44 = vmax.f32 %v948_v39, 0.0  ;;  %v1421_v45 = vadd.f32 %v1420_v42, %v1419_v40  ;;  %v1532_v46 = vpop.f32.mrb[53].mxu1  ;;  %v1422_v47 = vpop.f32.mrb[54].mxu0 }
 0x161   :  { %v1533_v48 = vadd.f32 %v1532_v46, %v1531_v41  ;;  %v1534_v49 = vpop.f32.mrb[54].mxu1  ;;  %v1423_v50 = vpop.f32.mrb[55].mxu0 }
 0x162   :  { %1155 = vst.msk [vmem:[%s2140_s3 + $0x60] sm:$0xf] %vm1130_vm0, %v1318_v43  ;;  %v1319_v51 = vpack.c.bf16 %v999_v44, %v999_v44  ;;  %v793_v52 = vadd.f32 %v1421_v45, %v1980_v36  ;;  %v1424_v53 = vadd.f32 %v1423_v50, %v1422_v47  ;;  %v1535_v54 = vpop.f32.mrb[55].mxu1 }
 0x163   :  { %v1536_v55 = vadd.f32 %v1535_v54, %v1534_v49 }
 0x164   :  { %1156 = vst.msk [vmem:[%s2140_s3 + $0x64] sm:$0xf] %vm1130_vm0, %v1319_v51  ;;  %v953_v56 = vadd.f32 %v1533_v48, %v793_v52  ;;  %v796_v57 = vadd.f32 %v1424_v53, %v1980_v36 }
 0x166   :  { %v1000_v58 = vmax.f32 %v953_v56, 0.0  ;;  %v956_v59 = vadd.f32 %v1536_v55, %v796_v57  ;;  %v1425_v60 = vpop.f32.mrb[56].mxu0 }
 0x167   :  { %v1537_v61 = vpop.f32.mrb[56].mxu1  ;;  %v1426_v62 = vpop.f32.mrb[57].mxu0 }
 0x168   :  { %v1320_v63 = vpack.c.bf16 %v1000_v58, %v1000_v58  ;;  %v1001_v0 = vmax.f32 %v956_v59, 0.0  ;;  %v1427_v1 = vadd.f32 %v1426_v62, %v1425_v60  ;;  %v1538_v2 = vpop.f32.mrb[57].mxu1  ;;  %v1428_v3 = vpop.f32.mrb[58].mxu0 }
 0x169   :  { %v1539_v4 = vadd.f32 %v1538_v2, %v1537_v61  ;;  %v1540_v5 = vpop.f32.mrb[58].mxu1  ;;  %v1429_v6 = vpop.f32.mrb[59].mxu0 }
 0x16a   :  { %1157 = vst.msk [vmem:[%s2140_s3 + $0x68] sm:$0xf] %vm1130_vm0, %v1320_v63  ;;  %v1321_v7 = vpack.c.bf16 %v1001_v0, %v1001_v0  ;;  %v801_v8 = vadd.f32 %v1427_v1, %v1980_v36  ;;  %v1430_v9 = vadd.f32 %v1429_v6, %v1428_v3  ;;  %v1541_v10 = vpop.f32.mrb[59].mxu1 }
 0x16b   :  { %v1542_v11 = vadd.f32 %v1541_v10, %v1540_v5 }
 0x16c   :  { %1158 = vst.msk [vmem:[%s2140_s3 + $0x6c] sm:$0xf] %vm1130_vm0, %v1321_v7  ;;  %v961_v12 = vadd.f32 %v1539_v4, %v801_v8  ;;  %v804_v13 = vadd.f32 %v1430_v9, %v1980_v36 }
 0x16e   :  { %v1002_v14 = vmax.f32 %v961_v12, 0.0  ;;  %v964_v15 = vadd.f32 %v1542_v11, %v804_v13  ;;  %v1431_v16 = vpop.f32.mrb[60].mxu0 }
 0x16f   :  { %v1543_v17 = vpop.f32.mrb[60].mxu1  ;;  %v1432_v18 = vpop.f32.mrb[61].mxu0 }
 0x170   :  { %v1322_v19 = vpack.c.bf16 %v1002_v14, %v1002_v14  ;;  %v1003_v20 = vmax.f32 %v964_v15, 0.0  ;;  %v1433_v21 = vadd.f32 %v1432_v18, %v1431_v16  ;;  %v1544_v22 = vpop.f32.mrb[61].mxu1  ;;  %v1434_v23 = vpop.f32.mrb[62].mxu0 }
 0x171   :  { %v1545_v24 = vadd.f32 %v1544_v22, %v1543_v17  ;;  %v1546_v25 = vpop.f32.mrb[62].mxu1  ;;  %v1435_v26 = vpop.f32.mrb[63].mxu0 }
 0x172   :  { %1159 = vst.msk [vmem:[%s2140_s3 + $0x70] sm:$0xf] %vm1130_vm0, %v1322_v19  ;;  %v1323_v27 = vpack.c.bf16 %v1003_v20, %v1003_v20  ;;  %v809_v28 = vadd.f32 %v1433_v21, %v1980_v36  ;;  %v1547_v29 = vpop.f32.mrb[63].mxu1 }
 0x174   :  { %1160 = vst.msk [vmem:[%s2140_s3 + $0x74] sm:$0xf] %vm1130_vm0, %v1323_v27  ;;  %v969_v30 = vadd.f32 %v1545_v24, %v809_v28 }
 0x176   :  { %v1004_v31 = vmax.f32 %v969_v30, 0.0 }
 0x178   :  { %v1324_v32 = vpack.c.bf16 %v1004_v31, %v1004_v31 }
 0x17a   :  { %1161 = vst.msk [vmem:[%s2140_s3 + $0x78] sm:$0xf] %vm1130_vm0, %v1324_v32 }

// kernel: cnn_base_forward.6
= control target key start
LH: loop header
LB: loop body
LE: loop exit
PB: predicated region body
PF: predicated region fallthrough
CT: control target
= control target key end

     0   :  { %v1689_v23 = vmov 0.0   ;;  %vm1690_vm0 = vmmov 0   ;;  %vm1149_vm1 = vcmask 519168   ;;  %s2193_s1 = inlined_call_operand.vmem [shape: bf16[640,64], index: 1, kind: input, shape index: {}]   ;;  %s2194_s0 = inlined_call_operand.vmem [shape: bf16[168,640], index: 0, kind: input, shape index: {}]   ;;  %s2195_s2 = inlined_call_operand.vmem [shape: f32[1,64], index: 2, kind: input, shape index: {}]   ;;  %s2196_s3 = inlined_call_operand.vmem [shape: bf16[168,64], index: 3, kind: output, shape index: {}]  }
   0x1   :  { %v1574_v0 = vld [vmem:[%s2193_s1 + $0x40] sm:$0xff]   ;;  %v1576_v2 = vld [vmem:[%s2193_s1 + $0x48] sm:$0xff]   ;;  %v1578_v4 = vld [vmem:[%s2193_s1 + $0x50] sm:$0xff]  }
   0x2   :  { %v1575_v1 = vld [vmem:[%s2193_s1] sm:$0xff]   ;;  %1313 = vmatprep.subr.bf16.mxu0 %v1574_v0  ;;  %1556 = vmatprep.subr.bf16.mxu1 %v1574_v0  ;;  %v1577_v3 = vld [vmem:[%s2193_s1 + $0x8] sm:$0xff]   ;;  %v1579_v5 = vld [vmem:[%s2193_s1 + $0x10] sm:$0xff]  }
   0x3   :  { %1314 = vmatpush3.bf16.msra.mxu0 %v1575_v1  ;;  %1564 = vmatpush3.bf16.msra.mxu1 %v1575_v1  ;;  %v1580_v6 = vld [vmem:[%s2193_s1 + $0x58] sm:$0xff]   ;;  %v1582_v8 = vld [vmem:[%s2193_s1 + $0x60] sm:$0xff]   ;;  %v1584_v10 = vld [vmem:[%s2193_s1 + $0x68] sm:$0xff]  }
   0x4   :  { %1315 = vmatprep.subr.bf16.mxu0 %v1576_v2  ;;  %1557 = vmatprep.subr.bf16.mxu1 %v1576_v2  ;;  %v1581_v7 = vld [vmem:[%s2193_s1 + $0x18] sm:$0xff]   ;;  %v1583_v9 = vld [vmem:[%s2193_s1 + $0x20] sm:$0xff]   ;;  %v1595_v12 = vld [vmem:[%s2194_s0 + $0xf4] ss:$20 sps:$4 sm:$0xff]  }
   0x5   :  { %v1592_v11 = vld [vmem:[%s2194_s0 + $0x4] ss:$20 sps:$4 sm:$0xff]   ;;  %v1585_v13 = vld [vmem:[%s2193_s1 + $0x28] sm:$0xff]   ;;  %v1586_v14 = vld [vmem:[%s2193_s1 + $0x70] sm:$0xff]   ;;  %763 = vmatprep.mubr.bf16.mxu1 %v1595_v12 }
   0x6   :  { %715 = vmatprep.mubr.bf16.mxu0 %v1592_v11  ;;  %v1587_v15 = vld [vmem:[%s2193_s1 + $0x30] sm:$0xff]   ;;  %v1588_v16 = vld [vmem:[%s2193_s1 + $0x78] sm:$0xff]   ;;  %v1597_v19 = vld [vmem:[%s2193_s1 + $0xc0] sm:$0xff]  }
   0x7   :  { %1316 = vmatpush3.bf16.msra.mxu0 %v1577_v3  ;;  %1565 = vmatpush3.bf16.msra.mxu1 %v1577_v3  ;;  %v1589_v17 = vld [vmem:[%s2193_s1 + $0x38] sm:$0xff]   ;;  %v1590_v18 = vld [vmem:[%s2194_s0] ss:$20 sps:$4 sm:$0xff]   ;;  %v1593_v20 = vld [vmem:[%s2194_s0 + $0xf0] ss:$20 sps:$4 sm:$0xff]  }
   0x8   :  { %1317 = vmatprep.subr.bf16.mxu0 %v1578_v4  ;;  %1558 = vmatprep.subr.bf16.mxu1 %v1578_v4  ;;  %v1596_v21 = vld [vmem:[%s2193_s1 + $0x100] sm:$0xff]   ;;  %v1601_v25 = vld [vmem:[%s2194_s0 + $0x11c] ss:$20 sps:$4 sm:$0xff]   ;;  %v1606_v26 = vld [vmem:[%s2193_s1 + $0xc8] sm:$0xff]  }
   0x9   :  { %v1598_v22 = vld [vmem:[%s2193_s1 + $0x80] sm:$0xff]   ;;  %v1603_v27 = vld [vmem:[%s2193_s1 + $0x108] sm:$0xff]   ;;  %v1608_v30 = vld [vmem:[%s2193_s1 + $0xd0] sm:$0xff]  }
   0xa   :  { %v1599_v24 = vld [vmem:[%s2194_s0 + $0x2c] ss:$20 sps:$4 sm:$0xff]   ;;  %v1604_v29 = vld [vmem:[%s2194_s0 + $0x28] ss:$20 sps:$4 sm:$0xff]   ;;  %v1609_v32 = vld [vmem:[%s2193_s1 + $0x110] sm:$0xff]  }
   0xb   :  { %1318 = vmatpush3.bf16.msra.mxu0 %v1579_v5  ;;  %1566 = vmatpush3.bf16.msra.mxu1 %v1579_v5  ;;  %v1607_v28 = vld [vmem:[%s2193_s1 + $0x88] sm:$0xff]   ;;  %v1610_v33 = vld [vmem:[%s2193_s1 + $0x90] sm:$0xff]   ;;  %v1613_v35 = vld [vmem:[%s2194_s0 + $0x144] ss:$20 sps:$4 sm:$0xff]  }
   0xc   :  { %1319 = vmatprep.subr.bf16.mxu0 %v1580_v6  ;;  %1559 = vmatprep.subr.bf16.mxu1 %v1580_v6  ;;  %v1605_v31 = vld [vmem:[%s2194_s0 + $0x118] ss:$20 sps:$4 sm:$0xff]   ;;  %v1611_v34 = vld [vmem:[%s2194_s0 + $0x54] ss:$20 sps:$4 sm:$0xff]   ;;  %v1615_v39 = vld [vmem:[%s2194_s0 + $0x50] ss:$20 sps:$4 sm:$0xff]  }
   0xd   :  { %v1617_v36 = vld [vmem:[%s2193_s1 + $0xd8] sm:$0xff]   ;;  %v1616_v40 = vld [vmem:[%s2194_s0 + $0x140] ss:$20 sps:$4 sm:$0xff]   ;;  %v1629_v46 = vld [vmem:[%s2193_s1 + $0xe8] sm:$0xff]  }
   0xe   :  { %v1618_v37 = vld [vmem:[%s2193_s1 + $0x98] sm:$0xff]   ;;  %v1624_v41 = vld [vmem:[%s2193_s1 + $0xe0] sm:$0xff]   ;;  %v1630_v47 = vld [vmem:[%s2193_s1 + $0xa8] sm:$0xff]  }
   0xf   :  { %1320 = vmatpush3.bf16.msra.mxu0 %v1581_v7  ;;  %1567 = vmatpush3.bf16.msra.mxu1 %v1581_v7  ;;  %v1619_v38 = vld [vmem:[%s2193_s1 + $0x118] sm:$0xff]   ;;  %v1622_v43 = vld [vmem:[%s2194_s0 + $0x16c] ss:$20 sps:$4 sm:$0xff]   ;;  %v75_v48 = vld [vmem:[%s2194_s0 + $0x190] sm:$0xff] }
  0x10   :  { %1321 = vmatprep.subr.bf16.mxu0 %v1582_v8  ;;  %1560 = vmatprep.subr.bf16.mxu1 %v1582_v8  ;;  %v1620_v42 = vld [vmem:[%s2194_s0 + $0x7c] ss:$20 sps:$4 sm:$0xff]   ;;  %v1627_v44 = vld [vmem:[%s2193_s1 + $0xa0] sm:$0xff]   ;;  %v1634_v49 = vld [vmem:[%s2193_s1 + $0x128] sm:$0xff]   ;;  %v1227_v54 = vcombine.high %v75_v48, %v75_v48  ;;  %v1226_v61 = vcombine.low %v75_v48, %v75_v48 }
  0x11   :  { %v1628_v45 = vld [vmem:[%s2193_s1 + $0x120] sm:$0xff]   ;;  %v1625_v50 = vld [vmem:[%s2194_s0 + $0x78] ss:$20 sps:$4 sm:$0xff]   ;;  %v1626_v51 = vld [vmem:[%s2194_s0 + $0x168] ss:$20 sps:$4 sm:$0xff]  }
  0x12   :  { %v1637_v52 = vld [vmem:[%s2193_s1 + $0xf0] sm:$0xff]   ;;  %v1631_v53 = vld [vmem:[%s2194_s0 + $0xa4] ss:$20 sps:$4 sm:$0xff]   ;;  %v1642_v62 = vld [vmem:[%s2194_s0 + $0xcc] ss:$20 sps:$4 sm:$0xff]  }
  0x13   :  { %1322 = vmatpush3.bf16.msra.mxu0 %v1583_v9  ;;  %1568 = vmatpush3.bf16.msra.mxu1 %v1583_v9  ;;  %v1638_v55 = vld [vmem:[%s2193_s1 + $0xb0] sm:$0xff]   ;;  %v1639_v57 = vld [vmem:[%s2193_s1 + $0xf8] sm:$0xff]   ;;  %v1646_v63 = vld [vmem:[%s2194_s0 + $0xc] ss:$20 sps:$4 sm:$0xff]  }
  0x14   :  { %1323 = vmatprep.subr.bf16.mxu0 %v1584_v10  ;;  %1561 = vmatprep.subr.bf16.mxu1 %v1584_v10  ;;  %v1641_v56 = vld [vmem:[%s2193_s1 + $0x130] sm:$0xff]   ;;  %v1640_v58 = vld [vmem:[%s2193_s1 + $0xb8] sm:$0xff]   ;;  %v1661_v11 = vld [vmem:[%s2194_s0 + $0xac] ss:$20 sps:$4 sm:$0xff]  }
  0x15   :  { %v1648_v59 = vld [vmem:[%s2193_s1 + $0x138] sm:$0xff]   ;;  %v1635_v60 = vld [vmem:[%s2194_s0 + $0xa0] ss:$20 sps:$4 sm:$0xff]   ;;  %v1651_v3 = vld [vmem:[%s2194_s0 + $0x30] ss:$20 sps:$4 sm:$0xff]  }
  0x16   :  { %v1644_v0 = vld [vmem:[%s2194_s0 + $0x8] ss:$20 sps:$4 sm:$0xff]   ;;  %v1652_v4 = vld [vmem:[%s2194_s0 + $0x10] ss:$20 sps:$4 sm:$0xff]   ;;  %v1655_v6 = vld [vmem:[%s2194_s0 + $0x58] ss:$20 sps:$4 sm:$0xff]  }
  0x17   :  { %1324 = vmatpush3.bf16.msra.mxu0 %v1585_v13  ;;  %1569 = vmatpush3.bf16.msra.mxu1 %v1585_v13  ;;  %v1647_v1 = vld [vmem:[%s2194_s0 + $0xc8] ss:$20 sps:$4 sm:$0xff]   ;;  %v1656_v7 = vld [vmem:[%s2194_s0 + $0x38] ss:$20 sps:$4 sm:$0xff]   ;;  %v1659_v9 = vld [vmem:[%s2194_s0 + $0x80] ss:$20 sps:$4 sm:$0xff]  }
  0x18   :  { %1325 = vmatprep.subr.bf16.mxu0 %v1586_v14  ;;  %1562 = vmatprep.subr.bf16.mxu1 %v1586_v14  ;;  %v1649_v2 = vld [vmem:[%s2194_s0 + $0x34] ss:$20 sps:$4 sm:$0xff]   ;;  %v1653_v5 = vld [vmem:[%s2194_s0 + $0x5c] ss:$20 sps:$4 sm:$0xff]   ;;  %v1657_v8 = vld [vmem:[%s2194_s0 + $0x84] ss:$20 sps:$4 sm:$0xff]  }
  0x19   :  { %v1660_v10 = vld [vmem:[%s2194_s0 + $0x60] ss:$20 sps:$4 sm:$0xff]   ;;  %v1663_v12 = vld [vmem:[%s2194_s0 + $0xa8] ss:$20 sps:$4 sm:$0xff]  }
  0x1a   :  { %v1664_v13 = vld [vmem:[%s2194_s0 + $0x88] ss:$20 sps:$4 sm:$0xff]  }
  0x1b   :  { %1326 = vmatpush3.bf16.msra.mxu0 %v1587_v15  ;;  %1570 = vmatpush3.bf16.msra.mxu1 %v1587_v15  ;;  %v1665_v14 = vld [vmem:[%s2194_s0 + $0xd4] ss:$20 sps:$4 sm:$0xff]   ;;  %v1667_v15 = vld [vmem:[%s2194_s0 + $0xd0] ss:$20 sps:$4 sm:$0xff]  }
  0x1c   :  { %1327 = vmatprep.subr.bf16.mxu0 %v1588_v16  ;;  %1563 = vmatprep.subr.bf16.mxu1 %v1588_v16  ;;  %v1668_v16 = vld [vmem:[%s2194_s0 + $0xb0] ss:$20 sps:$4 sm:$0xff]  }
  0x1f   :  { %1328 = vmatpush3.bf16.msra.mxu0 %v1589_v17  ;;  %1571 = vmatpush3.bf16.msra.mxu1 %v1589_v17  ;;  %v1669_v17 = vld [vmem:[%s2194_s0 + $0xfc] ss:$20 sps:$4 sm:$0xff]  }
  0x20   :  { %1496 = vmatprep.subr.bf16.mxu0 %v1689_v23  ;;  %1395 = vmatprep.subr.bf16.mxu1 %v1597_v19  ;;  %v1672_v19 = vld [vmem:[%s2194_s0 + $0xd8] ss:$20 sps:$4 sm:$0xff]  }
  0x22   :  { %716 = vmatmul.mubr.bf16.vlgmr.msra.gmra.mrb[0].mxu0 %v1590_v18  ;;  %764 = vmatmul.mubr.bf16.vlgmr.msra.gmra.mrb[0].mxu1 %v1593_v20  ;;  %v1671_v18 = vld [vmem:[%s2194_s0 + $0xf8] ss:$20 sps:$4 sm:$0xff]  }
  0x23   :  { %1497 = vmatpush3.bf16.msra.mxu0 %v1596_v21  ;;  %1396 = vmatpush3.bf16.msra.mxu1 %v1598_v22  ;;  %v1673_v20 = vld [vmem:[%s2194_s0 + $0x124] ss:$20 sps:$4 sm:$0xff]   ;;  %v1675_v21 = vld [vmem:[%s2194_s0 + $0x120] ss:$20 sps:$4 sm:$0xff]  }
  0x24   :  { %1498 = vmatprep.subr.bf16.mxu0 %v1689_v23  ;;  %723 = vmatprep.mubr.bf16.mxu0 %v1599_v24  ;;  %v1676_v22 = vld [vmem:[%s2194_s0 + $0x100] ss:$20 sps:$4 sm:$0xff]  }
  0x25   :  { %771 = vmatprep.mubr.bf16.mxu1 %v1601_v25  ;;  %1397 = vmatprep.subr.bf16.mxu1 %v1606_v26  ;;  %v1677_v24 = vld [vmem:[%s2194_s0 + $0x14c] ss:$20 sps:$4 sm:$0xff]   ;;  %v1679_v25 = vld [vmem:[%s2194_s0 + $0x148] ss:$20 sps:$4 sm:$0xff]  }
  0x26   :  { %v1680_v26 = vld [vmem:[%s2194_s0 + $0x128] ss:$20 sps:$4 sm:$0xff]  }
  0x27   :  { %1499 = vmatpush3.bf16.msra.mxu0 %v1603_v27  ;;  %1398 = vmatpush3.bf16.msra.mxu1 %v1607_v28  ;;  %v1681_v27 = vld [vmem:[%s2194_s0 + $0x174] ss:$20 sps:$4 sm:$0xff]   ;;  %v76_v28 = vld [vmem:[%s2194_s0 + $0x198] sm:$0xff] }
  0x28   :  { %1500 = vmatprep.subr.bf16.mxu0 %v1689_v23  ;;  %1399 = vmatprep.subr.bf16.mxu1 %v1608_v30  ;;  %v1684_v30 = vld [vmem:[%s2194_s0 + $0x150] ss:$20 sps:$4 sm:$0xff]  }
  0x2a   :  { %724 = vmatmul.mubr.bf16.gmra.mrb[4].mxu0 %v1604_v29  ;;  %772 = vmatmul.mubr.bf16.gmra.mrb[4].mxu1 %v1605_v31  ;;  %v1683_v29 = vld [vmem:[%s2194_s0 + $0x170] ss:$20 sps:$4 sm:$0xff]   ;;  %v1229_v31 = vcombine.high %v76_v28, %v76_v28 }
  0x2b   :  { %1501 = vmatpush3.bf16.msra.mxu0 %v1609_v32  ;;  %1400 = vmatpush3.bf16.msra.mxu1 %v1610_v33  ;;  %v1228_v32 = vcombine.low %v76_v28, %v76_v28  ;;  %v1687_v33 = vld [vmem:[%s2194_s0 + $0x178] ss:$20 sps:$4 sm:$0xff]  }
  0x2c   :  { %731 = vmatprep.mubr.bf16.mxu0 %v1611_v34  ;;  %779 = vmatprep.mubr.bf16.mxu1 %v1613_v35  ;;  %v1688_v34 = vld [vmem:[%s2194_s0 + $0x1a0] ss:$0 sps:$4 sm:$0xff]  }
  0x2d   :  { %1401 = vmatprep.subr.bf16.mxu1 %v1617_v36  ;;  %1502 = vmatprep.subr.bf16.mxu0 %v1689_v23 }
  0x2f   :  { %1402 = vmatpush3.bf16.msra.mxu1 %v1618_v37  ;;  %1503 = vmatpush3.bf16.msra.mxu0 %v1619_v38 }
  0x30   :  { %1403 = vmatprep.subr.bf16.mxu1 %v1624_v41  ;;  %1504 = vmatprep.subr.bf16.mxu0 %v1689_v23 }
  0x32   :  { %732 = vmatmul.mubr.bf16.gmra.mrb[8].mxu0 %v1615_v39  ;;  %780 = vmatmul.mubr.bf16.gmra.mrb[8].mxu1 %v1616_v40 }
  0x33   :  { %739 = vmatprep.mubr.bf16.mxu0 %v1620_v42  ;;  %787 = vmatprep.mubr.bf16.mxu1 %v1622_v43 }
  0x34   :  { %1404 = vmatpush3.bf16.msra.mxu1 %v1627_v44  ;;  %1505 = vmatpush3.bf16.msra.mxu0 %v1628_v45 }
  0x35   :  { %1405 = vmatprep.subr.bf16.mxu1 %v1629_v46  ;;  %1506 = vmatprep.subr.bf16.mxu0 %v1689_v23 }
  0x38   :  { %1406 = vmatpush3.bf16.msra.mxu1 %v1630_v47  ;;  %1507 = vmatpush3.bf16.msra.mxu0 %v1634_v49 }
  0x39   :  { %1407 = vmatprep.subr.bf16.mxu1 %v1637_v52  ;;  %1508 = vmatprep.subr.bf16.mxu0 %v1689_v23 }
  0x3a   :  { %740 = vmatmul.mubr.bf16.gmra.mrb[12].mxu0 %v1625_v50  ;;  %788 = vmatmul.mubr.bf16.gmra.mrb[12].mxu1 %v1626_v51 }
  0x3b   :  { %747 = vmatprep.mubr.bf16.mxu0 %v1631_v53  ;;  %795 = vmatprep.mubr.bf16.mxu1 %v1227_v54 }
  0x3c   :  { %1408 = vmatpush3.bf16.msra.mxu1 %v1638_v55  ;;  %1509 = vmatpush3.bf16.msra.mxu0 %v1641_v56 }
  0x3d   :  { %1409 = vmatprep.subr.bf16.mxu1 %v1639_v57  ;;  %1510 = vmatprep.subr.bf16.mxu0 %v1689_v23 }
  0x40   :  { %1410 = vmatpush3.bf16.msra.mxu1 %v1640_v58  ;;  %1511 = vmatpush3.bf16.msra.mxu0 %v1648_v59 }
  0x42   :  { %748 = vmatmul.mubr.bf16.gmra.mrb[16].mxu0 %v1635_v60  ;;  %796 = vmatmul.mubr.bf16.gmra.mrb[16].mxu1 %v1226_v61 }
  0x43   :  { %755 = vmatprep.mubr.bf16.mxu0 %v1642_v62  ;;  %835 = vmatprep.mubr.bf16.mxu1 %v1646_v63 }
  0x4a   :  { %756 = vmatmul.mubr.bf16.gmra.mrb[20].mxu0 %v1647_v1  ;;  %836 = vmatmul.mubr.bf16.vlgmr.msra.gmra.mrb[20].mxu1 %v1644_v0 }
  0x4b   :  { %843 = vmatprep.mubr.bf16.mxu1 %v1649_v2  ;;  %1512 = vmatprep.mubr.msk.bf16.mxu0 %vm1690_vm0, %v1689_v23  ;;  %v2041_v2 = vld [vmem:[%s2195_s2] ss:$0 sm:$0xff] }
  0x52   :  { %844 = vmatmul.mubr.bf16.gmra.mrb[24].mxu1 %v1651_v3  ;;  %1513 = vmatmul.mubr.bf16.vlgmr.msra.gmra.mrb[24].mxu0 %v1652_v4 }
  0x53   :  { %851 = vmatprep.mubr.bf16.mxu1 %v1653_v5  ;;  %1516 = vmatprep.mubr.msk.bf16.mxu0 %vm1690_vm0, %v1689_v23 }
  0x5a   :  { %852 = vmatmul.mubr.bf16.gmra.mrb[28].mxu1 %v1655_v6  ;;  %1517 = vmatmul.mubr.bf16.gmra.mrb[28].mxu0 %v1656_v7 }
  0x5b   :  { %859 = vmatprep.mubr.bf16.mxu1 %v1657_v8  ;;  %1520 = vmatprep.mubr.msk.bf16.mxu0 %vm1690_vm0, %v1689_v23 }
  0x62   :  { %860 = vmatmul.mubr.bf16.gmra.mrb[32].mxu1 %v1659_v9  ;;  %1521 = vmatmul.mubr.bf16.gmra.mrb[32].mxu0 %v1660_v10 }
  0x63   :  { %867 = vmatprep.mubr.bf16.mxu1 %v1661_v11  ;;  %1524 = vmatprep.mubr.msk.bf16.mxu0 %vm1690_vm0, %v1689_v23 }
  0x6a   :  { %868 = vmatmul.mubr.bf16.gmra.mrb[36].mxu1 %v1663_v12  ;;  %1525 = vmatmul.mubr.bf16.gmra.mrb[36].mxu0 %v1664_v13 }
  0x6b   :  { %875 = vmatprep.mubr.bf16.mxu1 %v1665_v14  ;;  %1528 = vmatprep.mubr.msk.bf16.mxu0 %vm1690_vm0, %v1689_v23 }
  0x72   :  { %876 = vmatmul.mubr.bf16.gmra.mrb[40].mxu1 %v1667_v15  ;;  %1529 = vmatmul.mubr.bf16.gmra.mrb[40].mxu0 %v1668_v16 }
  0x73   :  { %883 = vmatprep.mubr.bf16.mxu1 %v1669_v17  ;;  %1532 = vmatprep.mubr.msk.bf16.mxu0 %vm1690_vm0, %v1689_v23 }
  0x7a   :  { %884 = vmatmul.mubr.bf16.gmra.mrb[44].mxu1 %v1671_v18  ;;  %1533 = vmatmul.mubr.bf16.gmra.mrb[44].mxu0 %v1672_v19 }
  0x7b   :  { %891 = vmatprep.mubr.bf16.mxu1 %v1673_v20  ;;  %1536 = vmatprep.mubr.msk.bf16.mxu0 %vm1690_vm0, %v1689_v23 }
  0x82   :  { %892 = vmatmul.mubr.bf16.gmra.mrb[48].mxu1 %v1675_v21  ;;  %1537 = vmatmul.mubr.bf16.gmra.mrb[48].mxu0 %v1676_v22 }
  0x83   :  { %899 = vmatprep.mubr.bf16.mxu1 %v1677_v24  ;;  %1540 = vmatprep.mubr.msk.bf16.mxu0 %vm1690_vm0, %v1689_v23 }
  0x8a   :  { %900 = vmatmul.mubr.bf16.gmra.mrb[52].mxu1 %v1679_v25  ;;  %1541 = vmatmul.mubr.bf16.gmra.mrb[52].mxu0 %v1680_v26 }
  0x8b   :  { %907 = vmatprep.mubr.bf16.mxu1 %v1681_v27  ;;  %1544 = vmatprep.mubr.msk.bf16.mxu0 %vm1690_vm0, %v1689_v23 }
  0x92   :  { %908 = vmatmul.mubr.bf16.gmra.mrb[56].mxu1 %v1683_v29  ;;  %1545 = vmatmul.mubr.bf16.gmra.mrb[56].mxu0 %v1684_v30 }
  0x93   :  { %915 = vmatprep.mubr.bf16.mxu1 %v1229_v31  ;;  %1548 = vmatprep.mubr.msk.bf16.mxu0 %vm1690_vm0, %v1689_v23 }
  0x9a   :  { %916 = vmatmul.mubr.bf16.gmra.mrb[60].mxu1 %v1228_v32  ;;  %1549 = vmatmul.mubr.bf16.gmra.mrb[60].mxu0 %v1687_v33 }
  0x9b   :  { %1552 = vmatprep.mubr.msk.bf16.mxu0 %vm1690_vm0, %v1689_v23 }
  0xa2   :  { %1553 = vmatmul.mubr.bf16.gmra.mrb[64].mxu0 %v1688_v34 }
  0xf5   :  { %v1329_v35 = vpop.f32.mrb[0].mxu0  ;;  %v1365_v36 = vpop.f32.mrb[0].mxu1 }
  0xf6   :  { %v1330_v37 = vpop.f32.mrb[1].mxu0  ;;  %v1366_v38 = vpop.f32.mrb[1].mxu1 }
  0xf7   :  { %v2020_v39 = vadd.f32 %v1330_v37, %v1329_v35  ;;  %v1332_v40 = vpop.f32.mrb[2].mxu0  ;;  %v2022_v41 = vadd.f32 %v1366_v38, %v1365_v36  ;;  %v1368_v42 = vpop.f32.mrb[2].mxu1 }
  0xf8   :  { %v1333_v43 = vpop.f32.mrb[3].mxu0  ;;  %v1369_v44 = vpop.f32.mrb[3].mxu1 }
  0xf9   :  { %v2024_v45 = vadd.f32 %v1333_v43, %v1332_v40  ;;  %v2026_v23 = vadd.f32 %v1369_v44, %v1368_v42  ;;  %v718_v42 = vadd.f32 %v2020_v39, %v2041_v2 }
  0xfd   :  { %v1335_v46 = vpop.f32.mrb[4].mxu0  ;;  %v1371_v47 = vpop.f32.mrb[4].mxu1 }
  0xfe   :  { %v1336_v48 = vpop.f32.mrb[5].mxu0  ;;  %v1372_v49 = vpop.f32.mrb[5].mxu1 }
  0xff   :  { %v2028_v50 = vadd.f32 %v1336_v48, %v1335_v46  ;;  %v1338_v51 = vpop.f32.mrb[6].mxu0  ;;  %v2030_v52 = vadd.f32 %v1372_v49, %v1371_v47  ;;  %v1374_v53 = vpop.f32.mrb[6].mxu1 }
 0x100   :  { %v1339_v54 = vpop.f32.mrb[7].mxu0  ;;  %v1375_v55 = vpop.f32.mrb[7].mxu1 }
 0x101   :  { %v2032_v56 = vadd.f32 %v1339_v54, %v1338_v51  ;;  %v2034_v57 = vadd.f32 %v1375_v55, %v1374_v53  ;;  %v721_v51 = vadd.f32 %v2024_v45, %v2041_v2 }
 0x105   :  { %v1341_v58 = vpop.f32.mrb[8].mxu0  ;;  %v1377_v59 = vpop.f32.mrb[8].mxu1 }
 0x106   :  { %v1342_v60 = vpop.f32.mrb[9].mxu0  ;;  %v1378_v61 = vpop.f32.mrb[9].mxu1 }
 0x107   :  { %v2036_v62 = vadd.f32 %v1342_v60, %v1341_v58  ;;  %v1344_v63 = vpop.f32.mrb[10].mxu0  ;;  %v1379_v0 = vadd.f32 %v1378_v61, %v1377_v59  ;;  %v1380_v1 = vpop.f32.mrb[10].mxu1 }
 0x108   :  { %v1345_v3 = vpop.f32.mrb[11].mxu0  ;;  %v1381_v4 = vpop.f32.mrb[11].mxu1 }
 0x109   :  { %v2044_v5 = vadd.f32 %v1379_v0, %v2041_v2  ;;  %v2046_v6 = vadd.f32 %v1345_v3, %v1344_v63  ;;  %v1382_v7 = vadd.f32 %v1381_v4, %v1380_v1  ;;  %v726_v0 = vadd.f32 %v2028_v50, %v2041_v2 }
 0x10b   :  { %v2049_v8 = vadd.f32 %v1382_v7, %v2041_v2 }
 0x10d   :  { %v1347_v9 = vpop.f32.mrb[12].mxu0  ;;  %v1383_v10 = vpop.f32.mrb[12].mxu1 }
 0x10e   :  { %v1348_v11 = vpop.f32.mrb[13].mxu0  ;;  %v1384_v12 = vpop.f32.mrb[13].mxu1 }
 0x10f   :  { %v2051_v13 = vadd.f32 %v1348_v11, %v1347_v9  ;;  %v1350_v14 = vpop.f32.mrb[14].mxu0  ;;  %v1385_v15 = vadd.f32 %v1384_v12, %v1383_v10  ;;  %v1386_v16 = vpop.f32.mrb[14].mxu1  ;;  %v729_v11 = vadd.f32 %v2032_v56, %v2041_v2 }
 0x110   :  { %v1351_v17 = vpop.f32.mrb[15].mxu0  ;;  %v1387_v18 = vpop.f32.mrb[15].mxu1 }
 0x111   :  { %v2054_v19 = vadd.f32 %v1385_v15, %v2041_v2  ;;  %v2056_v20 = vadd.f32 %v1351_v17, %v1350_v14  ;;  %v1388_v21 = vadd.f32 %v1387_v18, %v1386_v16 }
 0x113   :  { %v2059_v22 = vadd.f32 %v1388_v21, %v2041_v2 }
 0x115   :  { %v1353_v24 = vpop.f32.mrb[16].mxu0  ;;  %v1389_v25 = vpop.f32.mrb[16].mxu1 }
 0x116   :  { %v1354_v26 = vpop.f32.mrb[17].mxu0  ;;  %v1390_v27 = vpop.f32.mrb[17].mxu1 }
 0x117   :  { %v2061_v28 = vadd.f32 %v1354_v26, %v1353_v24  ;;  %v1356_v29 = vpop.f32.mrb[18].mxu0  ;;  %v1391_v30 = vadd.f32 %v1390_v27, %v1389_v25  ;;  %v1392_v31 = vpop.f32.mrb[18].mxu1  ;;  %v734_v26 = vadd.f32 %v2036_v62, %v2041_v2 }
 0x118   :  { %v1357_v32 = vpop.f32.mrb[19].mxu0  ;;  %v1393_v33 = vpop.f32.mrb[19].mxu1 }
 0x119   :  { %v2064_v34 = vadd.f32 %v1391_v30, %v2041_v2  ;;  %v2066_v35 = vadd.f32 %v1357_v32, %v1356_v29 }
 0x11d   :  { %v1359_v36 = vpop.f32.mrb[20].mxu0  ;;  %v1411_v37 = vpop.f32.mrb[20].mxu1 }
 0x11e   :  { %v1360_v38 = vpop.f32.mrb[21].mxu0  ;;  %v1412_v40 = vpop.f32.mrb[21].mxu1 }
 0x11f   :  { %v2070_v43 = vadd.f32 %v1360_v38, %v1359_v36  ;;  %v1413_v44 = vadd.f32 %v1412_v40, %v1411_v37  ;;  %v1362_v46 = vpop.f32.mrb[22].mxu0  ;;  %v1414_v47 = vpop.f32.mrb[22].mxu1  ;;  %v737_v37 = vadd.f32 %v2046_v6, %v2041_v2 }
 0x120   :  { %v1363_v48 = vpop.f32.mrb[23].mxu0  ;;  %v1415_v49 = vpop.f32.mrb[23].mxu1 }
 0x121   :  { %v2074_v53 = vadd.f32 %v1363_v48, %v1362_v46  ;;  %v1416_v54 = vadd.f32 %v1415_v49, %v1414_v47  ;;  %v838_v55 = vadd.f32 %v1413_v44, %v718_v42 }
 0x123   :  { %v841_v58 = vadd.f32 %v1416_v54, %v721_v51  ;;  %v742_v54 = vadd.f32 %v2051_v13, %v2041_v2 }
 0x125   :  { %v1417_v59 = vpop.f32.mrb[24].mxu1  ;;  %v957_v60 = vpop.f32.mrb[24].mxu0 }
 0x126   :  { %v958_v61 = vadd.f32 %v957_v60, %v838_v55  ;;  %v1418_v63 = vpop.f32.mrb[25].mxu1  ;;  %v1514_v39 = vpop.f32.mrb[25].mxu0 }
 0x127   :  { %v1419_v1 = vadd.f32 %v1418_v63, %v1417_v59  ;;  %v1420_v3 = vpop.f32.mrb[26].mxu1  ;;  %v960_v4 = vpop.f32.mrb[26].mxu0 }
 0x128   :  { %v1043_v7 = vmax.f32 %v958_v61, 0.0  ;;  %v961_v9 = vadd.f32 %v960_v4, %v841_v58  ;;  %v1421_v10 = vpop.f32.mrb[27].mxu1  ;;  %v1515_v45 = vpop.f32.mrb[27].mxu0 }
 0x129   :  { %v1422_v12 = vadd.f32 %v1421_v10, %v1420_v3  ;;  %v846_v14 = vadd.f32 %v1419_v1, %v726_v0  ;;  %v745_v0 = vadd.f32 %v2056_v20, %v2041_v2 }
 0x12a   :  { %v1292_v15 = vpack.c.bf16 %v1043_v7, %v1043_v7  ;;  %v1044_v16 = vmax.f32 %v961_v9, 0.0 }
 0x12b   :  { %v849_v17 = vadd.f32 %v1422_v12, %v729_v11 }
 0x12c   :  { %1150 = vst.msk [vmem:[%s2196_s3] sm:$0xf] %vm1149_vm1, %v1292_v15  ;;  %v1293_v50 = vpack.c.bf16 %v1044_v16, %v1044_v16 }
 0x12d   :  { %v1423_v18 = vpop.f32.mrb[28].mxu1  ;;  %v965_v21 = vpop.f32.mrb[28].mxu0 }
 0x12e   :  { %1151 = vst.msk [vmem:[%s2196_s3 + $0x4] sm:$0xf] %vm1149_vm1, %v1293_v50  ;;  %v966_v56 = vadd.f32 %v965_v21, %v846_v14  ;;  %v1424_v24 = vpop.f32.mrb[29].mxu1  ;;  %v1518_v25 = vpop.f32.mrb[29].mxu0  ;;  %v750_v14 = vadd.f32 %v2061_v28, %v2041_v2 }
 0x12f   :  { %v1425_v27 = vadd.f32 %v1424_v24, %v1423_v18  ;;  %v1426_v29 = vpop.f32.mrb[30].mxu1  ;;  %v968_v30 = vpop.f32.mrb[30].mxu0  ;;  %v753_v24 = vadd.f32 %v2066_v35, %v2041_v2 }
 0x130   :  { %v1045_v31 = vmax.f32 %v966_v56, 0.0  ;;  %v969_v32 = vadd.f32 %v968_v30, %v849_v17  ;;  %v1427_v33 = vpop.f32.mrb[31].mxu1  ;;  %v1519_v36 = vpop.f32.mrb[31].mxu0 }
 0x131   :  { %v1428_v38 = vadd.f32 %v1427_v33, %v1426_v29  ;;  %v854_v40 = vadd.f32 %v1425_v27, %v734_v26 }
 0x132   :  { %v1294_v42 = vpack.c.bf16 %v1045_v31, %v1045_v31  ;;  %v1046_v44 = vmax.f32 %v969_v32, 0.0 }
 0x133   :  { %v857_v46 = vadd.f32 %v1428_v38, %v737_v37  ;;  %v758_v37 = vadd.f32 %v2070_v43, %v2041_v2 }
 0x134   :  { %1152 = vst.msk [vmem:[%s2196_s3 + $0x8] sm:$0xf] %vm1149_vm1, %v1294_v42  ;;  %v1295_v62 = vpack.c.bf16 %v1046_v44, %v1046_v44 }
 0x135   :  { %v1429_v47 = vpop.f32.mrb[32].mxu1  ;;  %v973_v48 = vpop.f32.mrb[32].mxu0 }
 0x136   :  { %1153 = vst.msk [vmem:[%s2196_s3 + $0xc] sm:$0xf] %vm1149_vm1, %v1295_v62  ;;  %v974_v49 = vadd.f32 %v973_v48, %v854_v40  ;;  %v1430_v6 = vpop.f32.mrb[33].mxu1  ;;  %v1522_v51 = vpop.f32.mrb[33].mxu0  ;;  %v761_v48 = vadd.f32 %v2074_v53, %v2041_v2 }
 0x137   :  { %v1431_v55 = vadd.f32 %v1430_v6, %v1429_v47  ;;  %v1432_v58 = vpop.f32.mrb[34].mxu1  ;;  %v976_v59 = vpop.f32.mrb[34].mxu0 }
 0x138   :  { %v1047_v60 = vmax.f32 %v974_v49, 0.0  ;;  %v977_v61 = vadd.f32 %v976_v59, %v857_v46  ;;  %v1433_v63 = vpop.f32.mrb[35].mxu1  ;;  %v1523_v39 = vpop.f32.mrb[35].mxu0 }
 0x139   :  { %v1434_v1 = vadd.f32 %v1433_v63, %v1432_v58  ;;  %v862_v3 = vadd.f32 %v1431_v55, %v742_v54  ;;  %v766_v63 = vadd.f32 %v2022_v41, %v2041_v2 }
 0x13a   :  { %v1296_v4 = vpack.c.bf16 %v1047_v60, %v1047_v60  ;;  %v1048_v7 = vmax.f32 %v977_v61, 0.0 }
 0x13b   :  { %v865_v9 = vadd.f32 %v1434_v1, %v745_v0 }
 0x13c   :  { %1154 = vst.msk [vmem:[%s2196_s3 + $0x10] sm:$0xf] %vm1149_vm1, %v1296_v4  ;;  %v1297_v13 = vpack.c.bf16 %v1048_v7, %v1048_v7 }
 0x13d   :  { %v1435_v10 = vpop.f32.mrb[36].mxu1  ;;  %v981_v45 = vpop.f32.mrb[36].mxu0 }
 0x13e   :  { %1155 = vst.msk [vmem:[%s2196_s3 + $0x14] sm:$0xf] %vm1149_vm1, %v1297_v13  ;;  %v982_v11 = vadd.f32 %v981_v45, %v862_v3  ;;  %v1436_v20 = vpop.f32.mrb[37].mxu1  ;;  %v1526_v12 = vpop.f32.mrb[37].mxu0  ;;  %v769_v13 = vadd.f32 %v2026_v23, %v2041_v2 }
 0x13f   :  { %v1437_v15 = vadd.f32 %v1436_v20, %v1435_v10  ;;  %v1438_v16 = vpop.f32.mrb[38].mxu1  ;;  %v984_v17 = vpop.f32.mrb[38].mxu0 }
 0x140   :  { %v1049_v50 = vmax.f32 %v982_v11, 0.0  ;;  %v985_v18 = vadd.f32 %v984_v17, %v865_v9  ;;  %v1439_v21 = vpop.f32.mrb[39].mxu1  ;;  %v1527_v56 = vpop.f32.mrb[39].mxu0 }
 0x141   :  { %v1440_v25 = vadd.f32 %v1439_v21, %v1438_v16  ;;  %v870_v26 = vadd.f32 %v1437_v15, %v750_v14 }
 0x142   :  { %v1298_v27 = vpack.c.bf16 %v1049_v50, %v1049_v50  ;;  %v1050_v29 = vmax.f32 %v985_v18, 0.0  ;;  %v774_v50 = vadd.f32 %v2030_v52, %v2041_v2 }
 0x143   :  { %v873_v30 = vadd.f32 %v1440_v25, %v753_v24 }
 0x144   :  { %1156 = vst.msk [vmem:[%s2196_s3 + $0x18] sm:$0xf] %vm1149_vm1, %v1298_v27  ;;  %v1299_v28 = vpack.c.bf16 %v1050_v29, %v1050_v29  ;;  %v777_v29 = vadd.f32 %v2034_v57, %v2041_v2 }
 0x145   :  { %v1441_v31 = vpop.f32.mrb[40].mxu1  ;;  %v989_v32 = vpop.f32.mrb[40].mxu0 }
 0x146   :  { %1157 = vst.msk [vmem:[%s2196_s3 + $0x1c] sm:$0xf] %vm1149_vm1, %v1299_v28  ;;  %v990_v33 = vadd.f32 %v989_v32, %v870_v26  ;;  %v1442_v35 = vpop.f32.mrb[41].mxu1  ;;  %v1530_v36 = vpop.f32.mrb[41].mxu0 }
 0x147   :  { %v1443_v38 = vadd.f32 %v1442_v35, %v1441_v31  ;;  %v1444_v40 = vpop.f32.mrb[42].mxu1  ;;  %v992_v42 = vpop.f32.mrb[42].mxu0 }
 0x148   :  { %v1051_v44 = vmax.f32 %v990_v33, 0.0  ;;  %v993_v46 = vadd.f32 %v992_v42, %v873_v30  ;;  %v1445_v62 = vpop.f32.mrb[43].mxu1  ;;  %v1531_v47 = vpop.f32.mrb[43].mxu0 }
 0x149   :  { %v1446_v49 = vadd.f32 %v1445_v62, %v1444_v40  ;;  %v878_v6 = vadd.f32 %v1443_v38, %v758_v37 }
 0x14a   :  { %v1300_v51 = vpack.c.bf16 %v1051_v44, %v1051_v44  ;;  %v1052_v54 = vmax.f32 %v993_v46, 0.0 }
 0x14b   :  { %v881_v55 = vadd.f32 %v1446_v49, %v761_v48 }
 0x14c   :  { %1158 = vst.msk [vmem:[%s2196_s3 + $0x20] sm:$0xf] %vm1149_vm1, %v1300_v51  ;;  %v1301_v43 = vpack.c.bf16 %v1052_v54, %v1052_v54 }
 0x14d   :  { %v1447_v58 = vpop.f32.mrb[44].mxu1  ;;  %v997_v59 = vpop.f32.mrb[44].mxu0 }
 0x14e   :  { %1159 = vst.msk [vmem:[%s2196_s3 + $0x24] sm:$0xf] %vm1149_vm1, %v1301_v43  ;;  %v998_v60 = vadd.f32 %v997_v59, %v878_v6  ;;  %v1448_v53 = vpop.f32.mrb[45].mxu1  ;;  %v1534_v61 = vpop.f32.mrb[45].mxu0 }
 0x14f   :  { %v1449_v39 = vadd.f32 %v1448_v53, %v1447_v58  ;;  %v1450_v0 = vpop.f32.mrb[46].mxu1  ;;  %v1000_v1 = vpop.f32.mrb[46].mxu0 }
 0x150   :  { %v1053_v3 = vmax.f32 %v998_v60, 0.0  ;;  %v1001_v4 = vadd.f32 %v1000_v1, %v881_v55  ;;  %v1451_v7 = vpop.f32.mrb[47].mxu1  ;;  %v1535_v9 = vpop.f32.mrb[47].mxu0 }
 0x151   :  { %v1452_v10 = vadd.f32 %v1451_v7, %v1450_v0  ;;  %v886_v45 = vadd.f32 %v1449_v39, %v766_v63 }
 0x152   :  { %v1302_v11 = vpack.c.bf16 %v1053_v3, %v1053_v3  ;;  %v1054_v20 = vmax.f32 %v1001_v4, 0.0 }
 0x153   :  { %v889_v12 = vadd.f32 %v1452_v10, %v769_v13 }
 0x154   :  { %1160 = vst.msk [vmem:[%s2196_s3 + $0x28] sm:$0xf] %vm1149_vm1, %v1302_v11  ;;  %v1303_v41 = vpack.c.bf16 %v1054_v20, %v1054_v20 }
 0x155   :  { %v1453_v14 = vpop.f32.mrb[48].mxu1  ;;  %v1005_v15 = vpop.f32.mrb[48].mxu0 }
 0x156   :  { %1161 = vst.msk [vmem:[%s2196_s3 + $0x2c] sm:$0xf] %vm1149_vm1, %v1303_v41  ;;  %v1006_v16 = vadd.f32 %v1005_v15, %v886_v45  ;;  %v1454_v23 = vpop.f32.mrb[49].mxu1  ;;  %v1538_v17 = vpop.f32.mrb[49].mxu0 }
 0x157   :  { %v1455_v18 = vadd.f32 %v1454_v23, %v1453_v14  ;;  %v1456_v21 = vpop.f32.mrb[50].mxu1  ;;  %v1008_v56 = vpop.f32.mrb[50].mxu0 }
 0x158   :  { %v1055_v24 = vmax.f32 %v1006_v16, 0.0  ;;  %v1009_v25 = vadd.f32 %v1008_v56, %v889_v12  ;;  %v1457_v26 = vpop.f32.mrb[51].mxu1  ;;  %v1539_v27 = vpop.f32.mrb[51].mxu0 }
 0x159   :  { %v1458_v30 = vadd.f32 %v1457_v26, %v1456_v21  ;;  %v894_v28 = vadd.f32 %v1455_v18, %v774_v50 }
 0x15a   :  { %v1304_v31 = vpack.c.bf16 %v1055_v24, %v1055_v24  ;;  %v1056_v32 = vmax.f32 %v1009_v25, 0.0 }
 0x15b   :  { %v897_v33 = vadd.f32 %v1458_v30, %v777_v29 }
 0x15c   :  { %1162 = vst.msk [vmem:[%s2196_s3 + $0x30] sm:$0xf] %vm1149_vm1, %v1304_v31  ;;  %v1305_v52 = vpack.c.bf16 %v1056_v32, %v1056_v32 }
 0x15d   :  { %v1459_v35 = vpop.f32.mrb[52].mxu1  ;;  %v1013_v36 = vpop.f32.mrb[52].mxu0 }
 0x15e   :  { %1163 = vst.msk [vmem:[%s2196_s3 + $0x34] sm:$0xf] %vm1149_vm1, %v1305_v52  ;;  %v1014_v37 = vadd.f32 %v1013_v36, %v894_v28  ;;  %v1460_v57 = vpop.f32.mrb[53].mxu1  ;;  %v1542_v2 = vpop.f32.mrb[53].mxu0 }
 0x15f   :  { %v1461_v38 = vadd.f32 %v1460_v57, %v1459_v35  ;;  %v1462_v40 = vpop.f32.mrb[54].mxu1  ;;  %v1016_v42 = vpop.f32.mrb[54].mxu0 }
 0x160   :  { %v1057_v44 = vmax.f32 %v1014_v37, 0.0  ;;  %v1017_v46 = vadd.f32 %v1016_v42, %v897_v33  ;;  %v1463_v62 = vpop.f32.mrb[55].mxu1  ;;  %v1543_v47 = vpop.f32.mrb[55].mxu0 }
 0x161   :  { %v1464_v48 = vadd.f32 %v1463_v62, %v1462_v40  ;;  %v902_v49 = vadd.f32 %v1461_v38, %v2044_v5 }
 0x162   :  { %v1306_v6 = vpack.c.bf16 %v1057_v44, %v1057_v44  ;;  %v1058_v51 = vmax.f32 %v1017_v46, 0.0 }
 0x163   :  { %v905_v54 = vadd.f32 %v1464_v48, %v2049_v8 }
 0x164   :  { %1164 = vst.msk [vmem:[%s2196_s3 + $0x38] sm:$0xf] %vm1149_vm1, %v1306_v6  ;;  %v1307_v55 = vpack.c.bf16 %v1058_v51, %v1058_v51 }
 0x165   :  { %v1465_v43 = vpop.f32.mrb[56].mxu1  ;;  %v1021_v58 = vpop.f32.mrb[56].mxu0 }
 0x166   :  { %1165 = vst.msk [vmem:[%s2196_s3 + $0x3c] sm:$0xf] %vm1149_vm1, %v1307_v55  ;;  %v1022_v59 = vadd.f32 %v1021_v58, %v902_v49  ;;  %v1466_v60 = vpop.f32.mrb[57].mxu1  ;;  %v1546_v5 = vpop.f32.mrb[57].mxu0 }
 0x167   :  { %v1467_v53 = vadd.f32 %v1466_v60, %v1465_v43  ;;  %v1468_v61 = vpop.f32.mrb[58].mxu1  ;;  %v1024_v63 = vpop.f32.mrb[58].mxu0 }
 0x168   :  { %v1059_v8 = vmax.f32 %v1022_v59, 0.0  ;;  %v1025_v39 = vadd.f32 %v1024_v63, %v905_v54  ;;  %v1469_v0 = vpop.f32.mrb[59].mxu1  ;;  %v1547_v1 = vpop.f32.mrb[59].mxu0 }
 0x169   :  { %v1470_v3 = vadd.f32 %v1469_v0, %v1468_v61  ;;  %v910_v4 = vadd.f32 %v1467_v53, %v2054_v19 }
 0x16a   :  { %v1308_v7 = vpack.c.bf16 %v1059_v8, %v1059_v8  ;;  %v1060_v9 = vmax.f32 %v1025_v39, 0.0 }
 0x16b   :  { %v913_v13 = vadd.f32 %v1470_v3, %v2059_v22 }
 0x16c   :  { %1166 = vst.msk [vmem:[%s2196_s3 + $0x40] sm:$0xf] %vm1149_vm1, %v1308_v7  ;;  %v1309_v10 = vpack.c.bf16 %v1060_v9, %v1060_v9 }
 0x16d   :  { %v1471_v45 = vpop.f32.mrb[60].mxu1  ;;  %v1029_v11 = vpop.f32.mrb[60].mxu0 }
 0x16e   :  { %1167 = vst.msk [vmem:[%s2196_s3 + $0x44] sm:$0xf] %vm1149_vm1, %v1309_v10  ;;  %v1030_v20 = vadd.f32 %v1029_v11, %v910_v4  ;;  %v1472_v12 = vpop.f32.mrb[61].mxu1  ;;  %v1550_v19 = vpop.f32.mrb[61].mxu0 }
 0x16f   :  { %v1473_v41 = vadd.f32 %v1472_v12, %v1471_v45  ;;  %v1032_v14 = vpop.f32.mrb[62].mxu0  ;;  %v1474_v15 = vpop.f32.mrb[62].mxu1 }
 0x170   :  { %v1061_v22 = vmax.f32 %v1030_v20, 0.0  ;;  %v1033_v16 = vadd.f32 %v1032_v14, %v913_v13  ;;  %v1551_v23 = vpop.f32.mrb[63].mxu0  ;;  %v1475_v17 = vpop.f32.mrb[63].mxu1 }
 0x171   :  { %v918_v50 = vadd.f32 %v1473_v41, %v2064_v34 }
 0x172   :  { %v1310_v18 = vpack.c.bf16 %v1061_v22, %v1061_v22  ;;  %v1062_v21 = vmax.f32 %v1033_v16, 0.0 }
 0x174   :  { %1168 = vst.msk [vmem:[%s2196_s3 + $0x48] sm:$0xf] %vm1149_vm1, %v1310_v18  ;;  %v1311_v56 = vpack.c.bf16 %v1062_v21, %v1062_v21 }
 0x175   :  { %v1037_v24 = vpop.f32.mrb[64].mxu0 }
 0x176   :  { %1169 = vst.msk [vmem:[%s2196_s3 + $0x4c] sm:$0xf] %vm1149_vm1, %v1311_v56  ;;  %v1038_v25 = vadd.f32 %v1037_v24, %v918_v50  ;;  %v1554_v26 = vpop.f32.mrb[65].mxu0 }
 0x177   :  { %v1040_v27 = vpop.f32.mrb[66].mxu0 }
 0x178   :  { %v1063_v29 = vmax.f32 %v1038_v25, 0.0  ;;  %v1555_v30 = vpop.f32.mrb[67].mxu0 }
 0x17a   :  { %v1312_v34 = vpack.c.bf16 %v1063_v29, %v1063_v29 }
 0x17c   :  { %1170 = vst.msk [vmem:[%s2196_s3 + $0x50] sm:$0xf] %vm1149_vm1, %v1312_v34 }

// kernel: cnn_base_forward.7
= control target key start
LH: loop header
LB: loop body
LE: loop exit
PB: predicated region body
PF: predicated region fallthrough
CT: control target
= control target key end

     0   :  { %vm15697_vm0 = vcmask 7168   ;;  %s27988_s1 = inlined_call_operand.vmem [shape: bf16[5248,512], index: 1, kind: input, shape index: {}]   ;;  %s27989_s0 = inlined_call_operand.vmem [shape: bf16[8,5248], index: 0, kind: input, shape index: {}]   ;;  %s27990_s5 = inlined_call_operand.vmem [shape: bf16[512,1536], index: 5, kind: input, shape index: {}]   ;;  %s27991_s2 = inlined_call_operand.vmem [shape: f32[1,512], index: 2, kind: input, shape index: {}]   ;;  %s27992_s4 = inlined_call_operand.vmem [shape: f32[8,1], index: 4, kind: input, shape index: {}]   ;;  %s27993_s6 = inlined_call_operand.vmem [shape: bf16[512,1536], index: 6, kind: input, shape index: {}]   ;;  %s27994_s3 = inlined_call_operand.vmem [shape: f32[8,512], index: 3, kind: input, shape index: {}]   ;;  %s27995_s7 = inlined_call_operand.vmem [shape: f32[1,1536], index: 7, kind: input, shape index: {}]   ;;  %s27996_s10 = inlined_call_operand.<no memory space> [shape: f32[1,1], index: 10, kind: input, shape index: {}]   ;;  %s27997_s8 = inlined_call_operand.vmem [shape: f32[1,1536], index: 8, kind: input, shape index: {}]   ;;  %s27998_s9 = inlined_call_operand.vmem [shape: f32[1,512], index: 9, kind: input, shape index: {}]   ;;  %s27999_s12 = inlined_call_operand.vmem [shape: f32[8,512], index: 12, kind: output, shape index: {1}]   ;;  %s28000_s11 = inlined_call_operand.vmem [shape: f32[8,1], index: 11, kind: output, shape index: {0}]  }
   0x1   :  { %v18079_v0 = vld [vmem:[%s27988_s1 + $0x4] ss:$16 sps:$4 sm:$0xff]   ;;  %v18081_v1 = vld [vmem:[%s27988_s1 + $0xc] ss:$16 sps:$4 sm:$0xff]   ;;  %v18083_v2 = vld [vmem:[%s27988_s1] ss:$16 sps:$4 sm:$0xff]  }
   0x2   :  { %8102 = vmatprep.subr.bf16.mxu0 %v18079_v0  ;;  %v18084_v3 = vld [vmem:[%s27988_s1 + $0x8] ss:$16 sps:$4 sm:$0xff]   ;;  %8963 = vmatprep.subr.bf16.mxu1 %v18081_v1  ;;  %v18085_v4 = vld [vmem:[%s27988_s1 + $0x24] ss:$16 sps:$4 sm:$0xff]   ;;  %v18087_v5 = vld [vmem:[%s27988_s1 + $0x2c] ss:$16 sps:$4 sm:$0xff]  }
   0x3   :  { %8103 = vmatpush1.bf16.msra.mxu0 %v18083_v2  ;;  %8964 = vmatpush1.bf16.msra.mxu1 %v18084_v3  ;;  %v18089_v6 = vld [vmem:[%s27988_s1 + $0x20] ss:$16 sps:$4 sm:$0xff]   ;;  %v18090_v7 = vld [vmem:[%s27988_s1 + $0x28] ss:$16 sps:$4 sm:$0xff]   ;;  %v18091_v8 = vld [vmem:[%s27988_s1 + $0x44] ss:$16 sps:$4 sm:$0xff]  }
   0x4   :  { %8104 = vmatprep.subr.bf16.mxu0 %v18085_v4  ;;  %8965 = vmatprep.subr.bf16.mxu1 %v18087_v5  ;;  %v18093_v9 = vld [vmem:[%s27988_s1 + $0x4c] ss:$16 sps:$4 sm:$0xff]   ;;  %v18095_v10 = vld [vmem:[%s27988_s1 + $0x40] ss:$16 sps:$4 sm:$0xff]   ;;  %v18096_v11 = vld [vmem:[%s27988_s1 + $0x48] ss:$16 sps:$4 sm:$0xff]  }
   0x5   :  { %v18097_v12 = vld [vmem:[%s27988_s1 + $0x64] ss:$16 sps:$4 sm:$0xff]   ;;  %v18099_v13 = vld [vmem:[%s27988_s1 + $0x6c] ss:$16 sps:$4 sm:$0xff]   ;;  %v18101_v14 = vld [vmem:[%s27988_s1 + $0x60] ss:$16 sps:$4 sm:$0xff]  }
   0x6   :  { %v18102_v15 = vld [vmem:[%s27988_s1 + $0x68] ss:$16 sps:$4 sm:$0xff]   ;;  %v18103_v16 = vld [vmem:[%s27988_s1 + $0x84] ss:$16 sps:$4 sm:$0xff]   ;;  %v18105_v17 = vld [vmem:[%s27988_s1 + $0x8c] ss:$16 sps:$4 sm:$0xff]  }
   0x7   :  { %8105 = vmatpush1.bf16.msra.mxu0 %v18089_v6  ;;  %8966 = vmatpush1.bf16.msra.mxu1 %v18090_v7  ;;  %v18107_v18 = vld [vmem:[%s27988_s1 + $0x80] ss:$16 sps:$4 sm:$0xff]   ;;  %v18108_v19 = vld [vmem:[%s27988_s1 + $0x88] ss:$16 sps:$4 sm:$0xff]   ;;  %v18109_v20 = vld [vmem:[%s27988_s1 + $0xa4] ss:$16 sps:$4 sm:$0xff]  }
   0x8   :  { %8106 = vmatprep.subr.bf16.mxu0 %v18091_v8  ;;  %8967 = vmatprep.subr.bf16.mxu1 %v18093_v9  ;;  %v18111_v21 = vld [vmem:[%s27988_s1 + $0xac] ss:$16 sps:$4 sm:$0xff]   ;;  %v18113_v22 = vld [vmem:[%s27988_s1 + $0xa0] ss:$16 sps:$4 sm:$0xff]   ;;  %v18114_v23 = vld [vmem:[%s27988_s1 + $0xa8] ss:$16 sps:$4 sm:$0xff]  }
   0x9   :  { %v18115_v24 = vld [vmem:[%s27988_s1 + $0xc4] ss:$16 sps:$4 sm:$0xff]   ;;  %v18117_v25 = vld [vmem:[%s27988_s1 + $0xcc] ss:$16 sps:$4 sm:$0xff]   ;;  %v18119_v26 = vld [vmem:[%s27988_s1 + $0xc0] ss:$16 sps:$4 sm:$0xff]  }
   0xa   :  { %v18120_v27 = vld [vmem:[%s27988_s1 + $0xc8] ss:$16 sps:$4 sm:$0xff]   ;;  %v18121_v28 = vld [vmem:[%s27988_s1 + $0xe4] ss:$16 sps:$4 sm:$0xff]   ;;  %v18123_v29 = vld [vmem:[%s27988_s1 + $0xec] ss:$16 sps:$4 sm:$0xff]  }
   0xb   :  { %8107 = vmatpush1.bf16.msra.mxu0 %v18095_v10  ;;  %8968 = vmatpush1.bf16.msra.mxu1 %v18096_v11  ;;  %v18125_v30 = vld [vmem:[%s27988_s1 + $0xe0] ss:$16 sps:$4 sm:$0xff]   ;;  %v18126_v31 = vld [vmem:[%s27988_s1 + $0xe8] ss:$16 sps:$4 sm:$0xff]   ;;  %v18127_v32 = vld [vmem:[%s27988_s1 + $0x104] ss:$16 sps:$4 sm:$0xff]  }
   0xc   :  { %8108 = vmatprep.subr.bf16.mxu0 %v18097_v12  ;;  %8969 = vmatprep.subr.bf16.mxu1 %v18099_v13  ;;  %v18129_v33 = vld [vmem:[%s27988_s1 + $0x10c] ss:$16 sps:$4 sm:$0xff]   ;;  %v18131_v34 = vld [vmem:[%s27988_s1 + $0x100] ss:$16 sps:$4 sm:$0xff]   ;;  %v18132_v35 = vld [vmem:[%s27988_s1 + $0x108] ss:$16 sps:$4 sm:$0xff]  }
   0xd   :  { %v18133_v36 = vld [vmem:[%s27988_s1 + $0x124] ss:$16 sps:$4 sm:$0xff]   ;;  %v18135_v37 = vld [vmem:[%s27988_s1 + $0x12c] ss:$16 sps:$4 sm:$0xff]   ;;  %v18137_v38 = vld [vmem:[%s27988_s1 + $0x120] ss:$16 sps:$4 sm:$0xff]  }
   0xe   :  { %v18138_v39 = vld [vmem:[%s27988_s1 + $0x128] ss:$16 sps:$4 sm:$0xff]   ;;  %v18139_v40 = vld [vmem:[%s27988_s1 + $0x144] ss:$16 sps:$4 sm:$0xff]   ;;  %v18141_v41 = vld [vmem:[%s27988_s1 + $0x14c] ss:$16 sps:$4 sm:$0xff]  }
   0xf   :  { %8109 = vmatpush1.bf16.msra.mxu0 %v18101_v14  ;;  %8970 = vmatpush1.bf16.msra.mxu1 %v18102_v15  ;;  %v18143_v42 = vld [vmem:[%s27988_s1 + $0x140] ss:$16 sps:$4 sm:$0xff]   ;;  %v18144_v43 = vld [vmem:[%s27988_s1 + $0x148] ss:$16 sps:$4 sm:$0xff]   ;;  %v18145_v44 = vld [vmem:[%s27988_s1 + $0x164] ss:$16 sps:$4 sm:$0xff]  }
  0x10   :  { %8110 = vmatprep.subr.bf16.mxu0 %v18103_v16  ;;  %8971 = vmatprep.subr.bf16.mxu1 %v18105_v17  ;;  %v18147_v45 = vld [vmem:[%s27988_s1 + $0x16c] ss:$16 sps:$4 sm:$0xff]   ;;  %v43_v46 = vld [vmem:[%s27989_s0] sm:$0xff]  ;;  %v18150_v49 = vld [vmem:[%s27988_s1 + $0x168] ss:$16 sps:$4 sm:$0xff]  }
  0x11   :  { %v18149_v47 = vld [vmem:[%s27988_s1 + $0x160] ss:$16 sps:$4 sm:$0xff]   ;;  %v15708_v48 = vcombine.high %v43_v46, %v43_v46  ;;  %v18151_v50 = vld [vmem:[%s27988_s1 + $0x184] ss:$16 sps:$4 sm:$0xff]   ;;  %v18153_v51 = vld [vmem:[%s27988_s1 + $0x18c] ss:$16 sps:$4 sm:$0xff]   ;;  %v15707_v4 = vcombine.low %v43_v46, %v43_v46 }
  0x12   :  { %v18155_v52 = vld [vmem:[%s27988_s1 + $0x180] ss:$16 sps:$4 sm:$0xff]   ;;  %v18156_v53 = vld [vmem:[%s27988_s1 + $0x188] ss:$16 sps:$4 sm:$0xff]   ;;  %v18157_v54 = vld [vmem:[%s27988_s1 + $0x1a4] ss:$16 sps:$4 sm:$0xff]  }
  0x13   :  { %8111 = vmatpush1.bf16.msra.mxu0 %v18107_v18  ;;  %8972 = vmatpush1.bf16.msra.mxu1 %v18108_v19  ;;  %v18159_v55 = vld [vmem:[%s27988_s1 + $0x1ac] ss:$16 sps:$4 sm:$0xff]   ;;  %v18161_v56 = vld [vmem:[%s27988_s1 + $0x1a0] ss:$16 sps:$4 sm:$0xff]   ;;  %v18162_v57 = vld [vmem:[%s27988_s1 + $0x1a8] ss:$16 sps:$4 sm:$0xff]  }
  0x14   :  { %8112 = vmatprep.subr.bf16.mxu0 %v18109_v20  ;;  %8973 = vmatprep.subr.bf16.mxu1 %v18111_v21  ;;  %v18163_v58 = vld [vmem:[%s27988_s1 + $0x1c4] ss:$16 sps:$4 sm:$0xff]   ;;  %v18165_v59 = vld [vmem:[%s27988_s1 + $0x1cc] ss:$16 sps:$4 sm:$0xff]   ;;  %v18167_v60 = vld [vmem:[%s27988_s1 + $0x1c0] ss:$16 sps:$4 sm:$0xff]  }
  0x15   :  { %8134 = vmatprep.mubr.bf16.mxu0 %v15708_v48  ;;  %8995 = vmatprep.mubr.bf16.mxu1 %v15708_v48  ;;  %v18168_v61 = vld [vmem:[%s27988_s1 + $0x1c8] ss:$16 sps:$4 sm:$0xff]   ;;  %v18169_v62 = vld [vmem:[%s27988_s1 + $0x1e4] ss:$16 sps:$4 sm:$0xff]   ;;  %v18171_v63 = vld [vmem:[%s27988_s1 + $0x1ec] ss:$16 sps:$4 sm:$0xff]  }
  0x16   :  { %v18173_v0 = vld [vmem:[%s27988_s1 + $0x1e0] ss:$16 sps:$4 sm:$0xff]   ;;  %v18174_v1 = vld [vmem:[%s27988_s1 + $0x1e8] ss:$16 sps:$4 sm:$0xff]   ;;  %v18179_v2 = vld [vmem:[%s27988_s1 + $0x204] ss:$16 sps:$4 sm:$0xff]  }
  0x17   :  { %8113 = vmatpush1.bf16.msra.mxu0 %v18113_v22  ;;  %8974 = vmatpush1.bf16.msra.mxu1 %v18114_v23  ;;  %v18182_v3 = vld [vmem:[%s27988_s1 + $0x20c] ss:$16 sps:$4 sm:$0xff]   ;;  %v18177_v5 = vld [vmem:[%s27988_s1 + $0x200] ss:$16 sps:$4 sm:$0xff]   ;;  %v18180_v6 = vld [vmem:[%s27988_s1 + $0x208] ss:$16 sps:$4 sm:$0xff]  }
  0x18   :  { %8114 = vmatprep.subr.bf16.mxu0 %v18115_v24  ;;  %8975 = vmatprep.subr.bf16.mxu1 %v18117_v25  ;;  %v18185_v7 = vld [vmem:[%s27988_s1 + $0x224] ss:$16 sps:$4 sm:$0xff]   ;;  %v18188_v8 = vld [vmem:[%s27988_s1 + $0x22c] ss:$16 sps:$4 sm:$0xff]   ;;  %v18183_v9 = vld [vmem:[%s27988_s1 + $0x220] ss:$16 sps:$4 sm:$0xff]  }
  0x19   :  { %v18186_v10 = vld [vmem:[%s27988_s1 + $0x228] ss:$16 sps:$4 sm:$0xff]   ;;  %v18191_v11 = vld [vmem:[%s27988_s1 + $0x244] ss:$16 sps:$4 sm:$0xff]   ;;  %v18194_v12 = vld [vmem:[%s27988_s1 + $0x24c] ss:$16 sps:$4 sm:$0xff]  }
  0x1a   :  { %v18189_v13 = vld [vmem:[%s27988_s1 + $0x240] ss:$16 sps:$4 sm:$0xff]   ;;  %v18192_v14 = vld [vmem:[%s27988_s1 + $0x248] ss:$16 sps:$4 sm:$0xff]   ;;  %v18197_v15 = vld [vmem:[%s27988_s1 + $0x264] ss:$16 sps:$4 sm:$0xff]  }
  0x1b   :  { %8115 = vmatpush1.bf16.msra.mxu0 %v18119_v26  ;;  %8976 = vmatpush1.bf16.msra.mxu1 %v18120_v27  ;;  %v18200_v16 = vld [vmem:[%s27988_s1 + $0x26c] ss:$16 sps:$4 sm:$0xff]   ;;  %v18195_v17 = vld [vmem:[%s27988_s1 + $0x260] ss:$16 sps:$4 sm:$0xff]   ;;  %v18198_v18 = vld [vmem:[%s27988_s1 + $0x268] ss:$16 sps:$4 sm:$0xff]  }
  0x1c   :  { %8116 = vmatprep.subr.bf16.mxu0 %v18121_v28  ;;  %8977 = vmatprep.subr.bf16.mxu1 %v18123_v29  ;;  %v18203_v19 = vld [vmem:[%s27988_s1 + $0x284] ss:$16 sps:$4 sm:$0xff]   ;;  %v18206_v20 = vld [vmem:[%s27988_s1 + $0x28c] ss:$16 sps:$4 sm:$0xff]   ;;  %v18201_v21 = vld [vmem:[%s27988_s1 + $0x280] ss:$16 sps:$4 sm:$0xff]  }
  0x1d   :  { %v18204_v22 = vld [vmem:[%s27988_s1 + $0x288] ss:$16 sps:$4 sm:$0xff]   ;;  %v18209_v23 = vld [vmem:[%s27988_s1 + $0x2a4] ss:$16 sps:$4 sm:$0xff]   ;;  %v18212_v24 = vld [vmem:[%s27988_s1 + $0x2ac] ss:$16 sps:$4 sm:$0xff]  }
  0x1e   :  { %v18207_v25 = vld [vmem:[%s27988_s1 + $0x2a0] ss:$16 sps:$4 sm:$0xff]   ;;  %v18210_v26 = vld [vmem:[%s27988_s1 + $0x2a8] ss:$16 sps:$4 sm:$0xff]   ;;  %v18215_v27 = vld [vmem:[%s27988_s1 + $0x2c4] ss:$16 sps:$4 sm:$0xff]  }
  0x1f   :  { %8117 = vmatpush1.bf16.msra.mxu0 %v18125_v30  ;;  %8978 = vmatpush1.bf16.msra.mxu1 %v18126_v31  ;;  %v18218_v28 = vld [vmem:[%s27988_s1 + $0x2cc] ss:$16 sps:$4 sm:$0xff]   ;;  %v18213_v31 = vld [vmem:[%s27988_s1 + $0x2c0] ss:$16 sps:$4 sm:$0xff]   ;;  %v18240_v48 = vld [vmem:[%s27988_s1 + $0x348] ss:$16 sps:$4 sm:$0xff]  }
  0x20   :  { %8118 = vmatprep.subr.bf16.mxu0 %v18127_v32  ;;  %8979 = vmatprep.subr.bf16.mxu1 %v18129_v33  ;;  %v21622_v29 = vld [vmem:[%s27989_s0 + $0x8] sm:$0xff]  ;;  %v18221_v33 = vld [vmem:[%s27988_s1 + $0x2e4] ss:$16 sps:$4 sm:$0xff]  }
  0x21   :  { %v15710_v30 = vcombine.high %v21622_v29, %v21622_v29  ;;  %v18216_v32 = vld [vmem:[%s27988_s1 + $0x2c8] ss:$16 sps:$4 sm:$0xff]   ;;  %v18242_v46 = vld [vmem:[%s27988_s1 + $0x34c] ss:$16 sps:$4 sm:$0xff]  }
  0x23   :  { %8119 = vmatpush1.bf16.msra.mxu0 %v18131_v34  ;;  %8980 = vmatpush1.bf16.msra.mxu1 %v18132_v35  ;;  %v18224_v34 = vld [vmem:[%s27988_s1 + $0x2ec] ss:$16 sps:$4 sm:$0xff]   ;;  %v18219_v35 = vld [vmem:[%s27988_s1 + $0x2e0] ss:$16 sps:$4 sm:$0xff]  }
  0x24   :  { %8120 = vmatprep.subr.bf16.mxu0 %v18133_v36  ;;  %8981 = vmatprep.subr.bf16.mxu1 %v18135_v37  ;;  %v18222_v36 = vld [vmem:[%s27988_s1 + $0x2e8] ss:$16 sps:$4 sm:$0xff]   ;;  %v18227_v37 = vld [vmem:[%s27988_s1 + $0x304] ss:$16 sps:$4 sm:$0xff]  }
  0x27   :  { %8121 = vmatpush1.bf16.msra.mxu0 %v18137_v38  ;;  %8982 = vmatpush1.bf16.msra.mxu1 %v18138_v39  ;;  %v18230_v38 = vld [vmem:[%s27988_s1 + $0x30c] ss:$16 sps:$4 sm:$0xff]   ;;  %v18225_v39 = vld [vmem:[%s27988_s1 + $0x300] ss:$16 sps:$4 sm:$0xff]  }
  0x28   :  { %8122 = vmatprep.subr.bf16.mxu0 %v18139_v40  ;;  %8983 = vmatprep.subr.bf16.mxu1 %v18141_v41  ;;  %v18228_v40 = vld [vmem:[%s27988_s1 + $0x308] ss:$16 sps:$4 sm:$0xff]   ;;  %v18233_v41 = vld [vmem:[%s27988_s1 + $0x324] ss:$16 sps:$4 sm:$0xff]  }
  0x2b   :  { %8123 = vmatpush1.bf16.msra.mxu0 %v18143_v42  ;;  %8984 = vmatpush1.bf16.msra.mxu1 %v18144_v43  ;;  %v18236_v42 = vld [vmem:[%s27988_s1 + $0x32c] ss:$16 sps:$4 sm:$0xff]   ;;  %v18231_v43 = vld [vmem:[%s27988_s1 + $0x320] ss:$16 sps:$4 sm:$0xff]  }
  0x2c   :  { %8124 = vmatprep.subr.bf16.mxu0 %v18145_v44  ;;  %8985 = vmatprep.subr.bf16.mxu1 %v18147_v45  ;;  %v18234_v44 = vld [vmem:[%s27988_s1 + $0x328] ss:$16 sps:$4 sm:$0xff]   ;;  %v18239_v45 = vld [vmem:[%s27988_s1 + $0x344] ss:$16 sps:$4 sm:$0xff]  }
  0x2f   :  { %8125 = vmatpush1.bf16.msra.mxu0 %v18149_v47  ;;  %8986 = vmatpush1.bf16.msra.mxu1 %v18150_v49  ;;  %v18237_v47 = vld [vmem:[%s27988_s1 + $0x340] ss:$16 sps:$4 sm:$0xff]   ;;  %v18245_v49 = vld [vmem:[%s27988_s1 + $0x364] ss:$16 sps:$4 sm:$0xff]  }
  0x30   :  { %8126 = vmatprep.subr.bf16.mxu0 %v18151_v50  ;;  %8987 = vmatprep.subr.bf16.mxu1 %v18153_v51  ;;  %v18248_v50 = vld [vmem:[%s27988_s1 + $0x36c] ss:$16 sps:$4 sm:$0xff]   ;;  %v18243_v51 = vld [vmem:[%s27988_s1 + $0x360] ss:$16 sps:$4 sm:$0xff]  }
  0x33   :  { %8127 = vmatpush1.bf16.msra.mxu0 %v18155_v52  ;;  %8988 = vmatpush1.bf16.msra.mxu1 %v18156_v53  ;;  %v18246_v52 = vld [vmem:[%s27988_s1 + $0x368] ss:$16 sps:$4 sm:$0xff]   ;;  %v18251_v53 = vld [vmem:[%s27988_s1 + $0x384] ss:$16 sps:$4 sm:$0xff]  }
  0x34   :  { %8128 = vmatprep.subr.bf16.mxu0 %v18157_v54  ;;  %8989 = vmatprep.subr.bf16.mxu1 %v18159_v55  ;;  %v18254_v54 = vld [vmem:[%s27988_s1 + $0x38c] ss:$16 sps:$4 sm:$0xff]   ;;  %v18249_v55 = vld [vmem:[%s27988_s1 + $0x380] ss:$16 sps:$4 sm:$0xff]  }
  0x37   :  { %8129 = vmatpush1.bf16.msra.mxu0 %v18161_v56  ;;  %8990 = vmatpush1.bf16.msra.mxu1 %v18162_v57  ;;  %v18252_v56 = vld [vmem:[%s27988_s1 + $0x388] ss:$16 sps:$4 sm:$0xff]   ;;  %v18257_v57 = vld [vmem:[%s27988_s1 + $0x3a4] ss:$16 sps:$4 sm:$0xff]  }
  0x38   :  { %8130 = vmatprep.subr.bf16.mxu0 %v18163_v58  ;;  %8991 = vmatprep.subr.bf16.mxu1 %v18165_v59  ;;  %v18260_v58 = vld [vmem:[%s27988_s1 + $0x3ac] ss:$16 sps:$4 sm:$0xff]   ;;  %v18255_v59 = vld [vmem:[%s27988_s1 + $0x3a0] ss:$16 sps:$4 sm:$0xff]  }
  0x3b   :  { %8131 = vmatpush1.bf16.msra.mxu0 %v18167_v60  ;;  %8992 = vmatpush1.bf16.msra.mxu1 %v18168_v61  ;;  %v18258_v60 = vld [vmem:[%s27988_s1 + $0x3a8] ss:$16 sps:$4 sm:$0xff]   ;;  %v18263_v61 = vld [vmem:[%s27988_s1 + $0x3c4] ss:$16 sps:$4 sm:$0xff]  }
  0x3c   :  { %8132 = vmatprep.subr.bf16.mxu0 %v18169_v62  ;;  %8993 = vmatprep.subr.bf16.mxu1 %v18171_v63  ;;  %v18266_v62 = vld [vmem:[%s27988_s1 + $0x3cc] ss:$16 sps:$4 sm:$0xff]   ;;  %v18261_v63 = vld [vmem:[%s27988_s1 + $0x3c0] ss:$16 sps:$4 sm:$0xff]  }
  0x3f   :  { %8133 = vmatpush1.bf16.msra.mxu0 %v18173_v0  ;;  %8994 = vmatpush1.bf16.msra.mxu1 %v18174_v1  ;;  %v18264_v0 = vld [vmem:[%s27988_s1 + $0x3c8] ss:$16 sps:$4 sm:$0xff]   ;;  %v18269_v1 = vld [vmem:[%s27988_s1 + $0x3e4] ss:$16 sps:$4 sm:$0xff]  }
  0x40   :  { %8143 = vmatprep.subr.bf16.mxu0 %v18179_v2  ;;  %9004 = vmatprep.subr.bf16.mxu1 %v18182_v3  ;;  %v18272_v2 = vld [vmem:[%s27988_s1 + $0x3ec] ss:$16 sps:$4 sm:$0xff]   ;;  %v18267_v3 = vld [vmem:[%s27988_s1 + $0x3e0] ss:$16 sps:$4 sm:$0xff]  }
  0x42   :  { %8135 = vmatmul.mubr.bf16.vlgmr.msra.gmra.mrb[0].mxu0 %v15707_v4  ;;  %8996 = vmatmul.mubr.bf16.vlgmr.msra.gmra.mrb[0].mxu1 %v15707_v4  ;;  %v18270_v4 = vld [vmem:[%s27988_s1 + $0x3e8] ss:$16 sps:$4 sm:$0xff]  }
  0x43   :  { %8144 = vmatpush1.bf16.msra.mxu0 %v18177_v5  ;;  %9005 = vmatpush1.bf16.msra.mxu1 %v18180_v6  ;;  %v18277_v5 = vld [vmem:[%s27988_s1 + $0x404] ss:$16 sps:$4 sm:$0xff]   ;;  %v18280_v6 = vld [vmem:[%s27988_s1 + $0x40c] ss:$16 sps:$4 sm:$0xff]  }
  0x44   :  { %8145 = vmatprep.subr.bf16.mxu0 %v18185_v7  ;;  %9006 = vmatprep.subr.bf16.mxu1 %v18188_v8  ;;  %v15709_v7 = vcombine.low %v21622_v29, %v21622_v29  ;;  %v18275_v8 = vld [vmem:[%s27988_s1 + $0x400] ss:$16 sps:$4 sm:$0xff]   ;;  %v18310_v29 = vld [vmem:[%s27988_s1 + $0x4ac] ss:$16 sps:$4 sm:$0xff]  }
  0x45   :  { %8175 = vmatprep.mubr.bf16.mxu0 %v15710_v30  ;;  %9036 = vmatprep.mubr.bf16.mxu1 %v15710_v30  ;;  %v18305_v30 = vld [vmem:[%s27988_s1 + $0x4a0] ss:$16 sps:$4 sm:$0xff]  }
  0x47   :  { %8146 = vmatpush1.bf16.msra.mxu0 %v18183_v9  ;;  %9007 = vmatpush1.bf16.msra.mxu1 %v18186_v10  ;;  %v18278_v9 = vld [vmem:[%s27988_s1 + $0x408] ss:$16 sps:$4 sm:$0xff]   ;;  %v18283_v10 = vld [vmem:[%s27988_s1 + $0x424] ss:$16 sps:$4 sm:$0xff]  }
  0x48   :  { %8147 = vmatprep.subr.bf16.mxu0 %v18191_v11  ;;  %9008 = vmatprep.subr.bf16.mxu1 %v18194_v12  ;;  %v21760_v11 = vld [vmem:[%s27989_s0 + $0x10] sm:$0xff]  ;;  %v18286_v12 = vld [vmem:[%s27988_s1 + $0x42c] ss:$16 sps:$4 sm:$0xff]  }
  0x4b   :  { %8148 = vmatpush1.bf16.msra.mxu0 %v18189_v13  ;;  %9009 = vmatpush1.bf16.msra.mxu1 %v18192_v14  ;;  %v15712_v13 = vcombine.high %v21760_v11, %v21760_v11  ;;  %v18281_v14 = vld [vmem:[%s27988_s1 + $0x420] ss:$16 sps:$4 sm:$0xff]  }
  0x4c   :  { %8149 = vmatprep.subr.bf16.mxu0 %v18197_v15  ;;  %9010 = vmatprep.subr.bf16.mxu1 %v18200_v16  ;;  %v18284_v15 = vld [vmem:[%s27988_s1 + $0x428] ss:$16 sps:$4 sm:$0xff]   ;;  %v18289_v16 = vld [vmem:[%s27988_s1 + $0x444] ss:$16 sps:$4 sm:$0xff]  }
  0x4f   :  { %8150 = vmatpush1.bf16.msra.mxu0 %v18195_v17  ;;  %9011 = vmatpush1.bf16.msra.mxu1 %v18198_v18  ;;  %v18292_v17 = vld [vmem:[%s27988_s1 + $0x44c] ss:$16 sps:$4 sm:$0xff]   ;;  %v18287_v18 = vld [vmem:[%s27988_s1 + $0x440] ss:$16 sps:$4 sm:$0xff]  }
  0x50   :  { %8151 = vmatprep.subr.bf16.mxu0 %v18203_v19  ;;  %9012 = vmatprep.subr.bf16.mxu1 %v18206_v20  ;;  %v18290_v19 = vld [vmem:[%s27988_s1 + $0x448] ss:$16 sps:$4 sm:$0xff]   ;;  %v18295_v20 = vld [vmem:[%s27988_s1 + $0x464] ss:$16 sps:$4 sm:$0xff]  }
  0x53   :  { %8152 = vmatpush1.bf16.msra.mxu0 %v18201_v21  ;;  %9013 = vmatpush1.bf16.msra.mxu1 %v18204_v22  ;;  %v18298_v21 = vld [vmem:[%s27988_s1 + $0x46c] ss:$16 sps:$4 sm:$0xff]   ;;  %v18293_v22 = vld [vmem:[%s27988_s1 + $0x460] ss:$16 sps:$4 sm:$0xff]  }
  0x54   :  { %8153 = vmatprep.subr.bf16.mxu0 %v18209_v23  ;;  %9014 = vmatprep.subr.bf16.mxu1 %v18212_v24  ;;  %v18296_v23 = vld [vmem:[%s27988_s1 + $0x468] ss:$16 sps:$4 sm:$0xff]   ;;  %v18301_v24 = vld [vmem:[%s27988_s1 + $0x484] ss:$16 sps:$4 sm:$0xff]  }
  0x57   :  { %8154 = vmatpush1.bf16.msra.mxu0 %v18207_v25  ;;  %9015 = vmatpush1.bf16.msra.mxu1 %v18210_v26  ;;  %v18304_v25 = vld [vmem:[%s27988_s1 + $0x48c] ss:$16 sps:$4 sm:$0xff]   ;;  %v18299_v26 = vld [vmem:[%s27988_s1 + $0x480] ss:$16 sps:$4 sm:$0xff]  }
  0x58   :  { %8155 = vmatprep.subr.bf16.mxu0 %v18215_v27  ;;  %9016 = vmatprep.subr.bf16.mxu1 %v18218_v28  ;;  %v18302_v27 = vld [vmem:[%s27988_s1 + $0x488] ss:$16 sps:$4 sm:$0xff]   ;;  %v18307_v28 = vld [vmem:[%s27988_s1 + $0x4a4] ss:$16 sps:$4 sm:$0xff]  }
  0x5b   :  { %8156 = vmatpush1.bf16.msra.mxu0 %v18213_v31  ;;  %9017 = vmatpush1.bf16.msra.mxu1 %v18216_v32  ;;  %v18308_v31 = vld [vmem:[%s27988_s1 + $0x4a8] ss:$16 sps:$4 sm:$0xff]   ;;  %v18313_v32 = vld [vmem:[%s27988_s1 + $0x4c4] ss:$16 sps:$4 sm:$0xff]  }
  0x5c   :  { %8157 = vmatprep.subr.bf16.mxu0 %v18221_v33  ;;  %9018 = vmatprep.subr.bf16.mxu1 %v18224_v34  ;;  %v18316_v33 = vld [vmem:[%s27988_s1 + $0x4cc] ss:$16 sps:$4 sm:$0xff]   ;;  %v18311_v34 = vld [vmem:[%s27988_s1 + $0x4c0] ss:$16 sps:$4 sm:$0xff]  }
  0x5f   :  { %8158 = vmatpush1.bf16.msra.mxu0 %v18219_v35  ;;  %9019 = vmatpush1.bf16.msra.mxu1 %v18222_v36  ;;  %v18314_v35 = vld [vmem:[%s27988_s1 + $0x4c8] ss:$16 sps:$4 sm:$0xff]   ;;  %v18319_v36 = vld [vmem:[%s27988_s1 + $0x4e4] ss:$16 sps:$4 sm:$0xff]  }
  0x60   :  { %8159 = vmatprep.subr.bf16.mxu0 %v18227_v37  ;;  %9020 = vmatprep.subr.bf16.mxu1 %v18230_v38  ;;  %v18322_v37 = vld [vmem:[%s27988_s1 + $0x4ec] ss:$16 sps:$4 sm:$0xff]   ;;  %v18317_v38 = vld [vmem:[%s27988_s1 + $0x4e0] ss:$16 sps:$4 sm:$0xff]  }
  0x63   :  { %8160 = vmatpush1.bf16.msra.mxu0 %v18225_v39  ;;  %9021 = vmatpush1.bf16.msra.mxu1 %v18228_v40  ;;  %v18320_v39 = vld [vmem:[%s27988_s1 + $0x4e8] ss:$16 sps:$4 sm:$0xff]   ;;  %v18325_v40 = vld [vmem:[%s27988_s1 + $0x504] ss:$16 sps:$4 sm:$0xff]  }
  0x64   :  { %8161 = vmatprep.subr.bf16.mxu0 %v18233_v41  ;;  %9022 = vmatprep.subr.bf16.mxu1 %v18236_v42  ;;  %v18328_v41 = vld [vmem:[%s27988_s1 + $0x50c] ss:$16 sps:$4 sm:$0xff]   ;;  %v18323_v42 = vld [vmem:[%s27988_s1 + $0x500] ss:$16 sps:$4 sm:$0xff]  }
  0x67   :  { %8162 = vmatpush1.bf16.msra.mxu0 %v18231_v43  ;;  %9023 = vmatpush1.bf16.msra.mxu1 %v18234_v44  ;;  %v18326_v43 = vld [vmem:[%s27988_s1 + $0x508] ss:$16 sps:$4 sm:$0xff]   ;;  %v18331_v44 = vld [vmem:[%s27988_s1 + $0x524] ss:$16 sps:$4 sm:$0xff]  }
  0x68   :  { %8163 = vmatprep.subr.bf16.mxu0 %v18239_v45  ;;  %9024 = vmatprep.subr.bf16.mxu1 %v18242_v46  ;;  %v18334_v45 = vld [vmem:[%s27988_s1 + $0x52c] ss:$16 sps:$4 sm:$0xff]   ;;  %v18329_v46 = vld [vmem:[%s27988_s1 + $0x520] ss:$16 sps:$4 sm:$0xff]  }
  0x6b   :  { %8164 = vmatpush1.bf16.msra.mxu0 %v18237_v47  ;;  %9025 = vmatpush1.bf16.msra.mxu1 %v18240_v48  ;;  %v18332_v47 = vld [vmem:[%s27988_s1 + $0x528] ss:$16 sps:$4 sm:$0xff]   ;;  %v18337_v48 = vld [vmem:[%s27988_s1 + $0x544] ss:$16 sps:$4 sm:$0xff]  }
  0x6c   :  { %8165 = vmatprep.subr.bf16.mxu0 %v18245_v49  ;;  %9026 = vmatprep.subr.bf16.mxu1 %v18248_v50  ;;  %v18340_v49 = vld [vmem:[%s27988_s1 + $0x54c] ss:$16 sps:$4 sm:$0xff]   ;;  %v18335_v50 = vld [vmem:[%s27988_s1 + $0x540] ss:$16 sps:$4 sm:$0xff]  }
  0x6f   :  { %8166 = vmatpush1.bf16.msra.mxu0 %v18243_v51  ;;  %9027 = vmatpush1.bf16.msra.mxu1 %v18246_v52  ;;  %v18338_v51 = vld [vmem:[%s27988_s1 + $0x548] ss:$16 sps:$4 sm:$0xff]   ;;  %v18343_v52 = vld [vmem:[%s27988_s1 + $0x564] ss:$16 sps:$4 sm:$0xff]  }
  0x70   :  { %8167 = vmatprep.subr.bf16.mxu0 %v18251_v53  ;;  %9028 = vmatprep.subr.bf16.mxu1 %v18254_v54  ;;  %v18346_v53 = vld [vmem:[%s27988_s1 + $0x56c] ss:$16 sps:$4 sm:$0xff]   ;;  %v18341_v54 = vld [vmem:[%s27988_s1 + $0x560] ss:$16 sps:$4 sm:$0xff]  }
  0x73   :  { %8168 = vmatpush1.bf16.msra.mxu0 %v18249_v55  ;;  %9029 = vmatpush1.bf16.msra.mxu1 %v18252_v56  ;;  %v18344_v55 = vld [vmem:[%s27988_s1 + $0x568] ss:$16 sps:$4 sm:$0xff]   ;;  %v18349_v56 = vld [vmem:[%s27988_s1 + $0x584] ss:$16 sps:$4 sm:$0xff]  }
  0x74   :  { %8169 = vmatprep.subr.bf16.mxu0 %v18257_v57  ;;  %9030 = vmatprep.subr.bf16.mxu1 %v18260_v58  ;;  %v18352_v57 = vld [vmem:[%s27988_s1 + $0x58c] ss:$16 sps:$4 sm:$0xff]   ;;  %v18347_v58 = vld [vmem:[%s27988_s1 + $0x580] ss:$16 sps:$4 sm:$0xff]  }
  0x77   :  { %8170 = vmatpush1.bf16.msra.mxu0 %v18255_v59  ;;  %9031 = vmatpush1.bf16.msra.mxu1 %v18258_v60  ;;  %v18350_v59 = vld [vmem:[%s27988_s1 + $0x588] ss:$16 sps:$4 sm:$0xff]   ;;  %v18355_v60 = vld [vmem:[%s27988_s1 + $0x5a4] ss:$16 sps:$4 sm:$0xff]  }
  0x78   :  { %8171 = vmatprep.subr.bf16.mxu0 %v18263_v61  ;;  %9032 = vmatprep.subr.bf16.mxu1 %v18266_v62  ;;  %v18358_v61 = vld [vmem:[%s27988_s1 + $0x5ac] ss:$16 sps:$4 sm:$0xff]   ;;  %v18353_v62 = vld [vmem:[%s27988_s1 + $0x5a0] ss:$16 sps:$4 sm:$0xff]  }
  0x7b   :  { %8172 = vmatpush1.bf16.msra.mxu0 %v18261_v63  ;;  %9033 = vmatpush1.bf16.msra.mxu1 %v18264_v0  ;;  %v18356_v63 = vld [vmem:[%s27988_s1 + $0x5a8] ss:$16 sps:$4 sm:$0xff]   ;;  %v18361_v0 = vld [vmem:[%s27988_s1 + $0x5c4] ss:$16 sps:$4 sm:$0xff]  }
  0x7c   :  { %8173 = vmatprep.subr.bf16.mxu0 %v18269_v1  ;;  %9034 = vmatprep.subr.bf16.mxu1 %v18272_v2  ;;  %v18364_v1 = vld [vmem:[%s27988_s1 + $0x5cc] ss:$16 sps:$4 sm:$0xff]   ;;  %v18359_v2 = vld [vmem:[%s27988_s1 + $0x5c0] ss:$16 sps:$4 sm:$0xff]  }
  0x7f   :  { %8174 = vmatpush1.bf16.msra.mxu0 %v18267_v3  ;;  %9035 = vmatpush1.bf16.msra.mxu1 %v18270_v4  ;;  %v18362_v3 = vld [vmem:[%s27988_s1 + $0x5c8] ss:$16 sps:$4 sm:$0xff]   ;;  %v18367_v4 = vld [vmem:[%s27988_s1 + $0x5e4] ss:$16 sps:$4 sm:$0xff]  }
  0x80   :  { %8184 = vmatprep.subr.bf16.mxu0 %v18277_v5  ;;  %9045 = vmatprep.subr.bf16.mxu1 %v18280_v6  ;;  %v18370_v5 = vld [vmem:[%s27988_s1 + $0x5ec] ss:$16 sps:$4 sm:$0xff]   ;;  %v18365_v6 = vld [vmem:[%s27988_s1 + $0x5e0] ss:$16 sps:$4 sm:$0xff]  }
  0x82   :  { %8176 = vmatmul.mubr.bf16.vlgmr.msra.gmra.mrb[0].mxu0 %v15709_v7  ;;  %9037 = vmatmul.mubr.bf16.vlgmr.msra.gmra.mrb[0].mxu1 %v15709_v7  ;;  %v18368_v7 = vld [vmem:[%s27988_s1 + $0x5e8] ss:$16 sps:$4 sm:$0xff]  }
  0x83   :  { %8185 = vmatpush1.bf16.msra.mxu0 %v18275_v8  ;;  %9046 = vmatpush1.bf16.msra.mxu1 %v18278_v9  ;;  %v18375_v8 = vld [vmem:[%s27988_s1 + $0x604] ss:$16 sps:$4 sm:$0xff]   ;;  %v18378_v9 = vld [vmem:[%s27988_s1 + $0x60c] ss:$16 sps:$4 sm:$0xff]  }
  0x84   :  { %8186 = vmatprep.subr.bf16.mxu0 %v18283_v10  ;;  %9047 = vmatprep.subr.bf16.mxu1 %v18286_v12  ;;  %v18373_v10 = vld [vmem:[%s27988_s1 + $0x600] ss:$16 sps:$4 sm:$0xff]   ;;  %v15711_v12 = vcombine.low %v21760_v11, %v21760_v11  ;;  %v18384_v11 = vld [vmem:[%s27988_s1 + $0x62c] ss:$16 sps:$4 sm:$0xff]  }
  0x85   :  { %8216 = vmatprep.mubr.bf16.mxu0 %v15712_v13  ;;  %9077 = vmatprep.mubr.bf16.mxu1 %v15712_v13  ;;  %v18376_v13 = vld [vmem:[%s27988_s1 + $0x608] ss:$16 sps:$4 sm:$0xff]  }
  0x87   :  { %8187 = vmatpush1.bf16.msra.mxu0 %v18281_v14  ;;  %9048 = vmatpush1.bf16.msra.mxu1 %v18284_v15  ;;  %v21958_v14 = vld [vmem:[%s27989_s0 + $0x18] sm:$0xff]  ;;  %v18381_v15 = vld [vmem:[%s27988_s1 + $0x624] ss:$16 sps:$4 sm:$0xff]  }
  0x88   :  { %8188 = vmatprep.subr.bf16.mxu0 %v18289_v16  ;;  %9049 = vmatprep.subr.bf16.mxu1 %v18292_v17  ;;  %v15714_v16 = vcombine.high %v21958_v14, %v21958_v14  ;;  %v18379_v17 = vld [vmem:[%s27988_s1 + $0x620] ss:$16 sps:$4 sm:$0xff]  }
  0x8b   :  { %8189 = vmatpush1.bf16.msra.mxu0 %v18287_v18  ;;  %9050 = vmatpush1.bf16.msra.mxu1 %v18290_v19  ;;  %v18382_v18 = vld [vmem:[%s27988_s1 + $0x628] ss:$16 sps:$4 sm:$0xff]   ;;  %v18387_v19 = vld [vmem:[%s27988_s1 + $0x644] ss:$16 sps:$4 sm:$0xff]  }
  0x8c   :  { %8190 = vmatprep.subr.bf16.mxu0 %v18295_v20  ;;  %9051 = vmatprep.subr.bf16.mxu1 %v18298_v21  ;;  %v18390_v20 = vld [vmem:[%s27988_s1 + $0x64c] ss:$16 sps:$4 sm:$0xff]   ;;  %v18385_v21 = vld [vmem:[%s27988_s1 + $0x640] ss:$16 sps:$4 sm:$0xff]  }
  0x8f   :  { %8191 = vmatpush1.bf16.msra.mxu0 %v18293_v22  ;;  %9052 = vmatpush1.bf16.msra.mxu1 %v18296_v23  ;;  %v18388_v22 = vld [vmem:[%s27988_s1 + $0x648] ss:$16 sps:$4 sm:$0xff]   ;;  %v18393_v23 = vld [vmem:[%s27988_s1 + $0x664] ss:$16 sps:$4 sm:$0xff]  }
  0x90   :  { %8192 = vmatprep.subr.bf16.mxu0 %v18301_v24  ;;  %9053 = vmatprep.subr.bf16.mxu1 %v18304_v25  ;;  %v18396_v24 = vld [vmem:[%s27988_s1 + $0x66c] ss:$16 sps:$4 sm:$0xff]   ;;  %v18391_v25 = vld [vmem:[%s27988_s1 + $0x660] ss:$16 sps:$4 sm:$0xff]  }
  0x93   :  { %8193 = vmatpush1.bf16.msra.mxu0 %v18299_v26  ;;  %9054 = vmatpush1.bf16.msra.mxu1 %v18302_v27  ;;  %v18394_v26 = vld [vmem:[%s27988_s1 + $0x668] ss:$16 sps:$4 sm:$0xff]   ;;  %v18399_v27 = vld [vmem:[%s27988_s1 + $0x684] ss:$16 sps:$4 sm:$0xff]  }
  0x94   :  { %8194 = vmatprep.subr.bf16.mxu0 %v18307_v28  ;;  %9055 = vmatprep.subr.bf16.mxu1 %v18310_v29  ;;  %v18402_v28 = vld [vmem:[%s27988_s1 + $0x68c] ss:$16 sps:$4 sm:$0xff]   ;;  %v18397_v29 = vld [vmem:[%s27988_s1 + $0x680] ss:$16 sps:$4 sm:$0xff]  }
  0x97   :  { %8195 = vmatpush1.bf16.msra.mxu0 %v18305_v30  ;;  %9056 = vmatpush1.bf16.msra.mxu1 %v18308_v31  ;;  %v18400_v30 = vld [vmem:[%s27988_s1 + $0x688] ss:$16 sps:$4 sm:$0xff]   ;;  %v18405_v31 = vld [vmem:[%s27988_s1 + $0x6a4] ss:$16 sps:$4 sm:$0xff]  }
  0x98   :  { %8196 = vmatprep.subr.bf16.mxu0 %v18313_v32  ;;  %9057 = vmatprep.subr.bf16.mxu1 %v18316_v33  ;;  %v18408_v32 = vld [vmem:[%s27988_s1 + $0x6ac] ss:$16 sps:$4 sm:$0xff]   ;;  %v18403_v33 = vld [vmem:[%s27988_s1 + $0x6a0] ss:$16 sps:$4 sm:$0xff]  }
  0x9b   :  { %8197 = vmatpush1.bf16.msra.mxu0 %v18311_v34  ;;  %9058 = vmatpush1.bf16.msra.mxu1 %v18314_v35  ;;  %v18406_v34 = vld [vmem:[%s27988_s1 + $0x6a8] ss:$16 sps:$4 sm:$0xff]   ;;  %v18411_v35 = vld [vmem:[%s27988_s1 + $0x6c4] ss:$16 sps:$4 sm:$0xff]  }
  0x9c   :  { %8198 = vmatprep.subr.bf16.mxu0 %v18319_v36  ;;  %9059 = vmatprep.subr.bf16.mxu1 %v18322_v37  ;;  %v18414_v36 = vld [vmem:[%s27988_s1 + $0x6cc] ss:$16 sps:$4 sm:$0xff]   ;;  %v18409_v37 = vld [vmem:[%s27988_s1 + $0x6c0] ss:$16 sps:$4 sm:$0xff]  }
  0x9f   :  { %8199 = vmatpush1.bf16.msra.mxu0 %v18317_v38  ;;  %9060 = vmatpush1.bf16.msra.mxu1 %v18320_v39  ;;  %v18412_v38 = vld [vmem:[%s27988_s1 + $0x6c8] ss:$16 sps:$4 sm:$0xff]   ;;  %v18417_v39 = vld [vmem:[%s27988_s1 + $0x6e4] ss:$16 sps:$4 sm:$0xff]  }
  0xa0   :  { %8200 = vmatprep.subr.bf16.mxu0 %v18325_v40  ;;  %9061 = vmatprep.subr.bf16.mxu1 %v18328_v41  ;;  %v18420_v40 = vld [vmem:[%s27988_s1 + $0x6ec] ss:$16 sps:$4 sm:$0xff]   ;;  %v18415_v41 = vld [vmem:[%s27988_s1 + $0x6e0] ss:$16 sps:$4 sm:$0xff]  }
  0xa3   :  { %8201 = vmatpush1.bf16.msra.mxu0 %v18323_v42  ;;  %9062 = vmatpush1.bf16.msra.mxu1 %v18326_v43  ;;  %v18418_v42 = vld [vmem:[%s27988_s1 + $0x6e8] ss:$16 sps:$4 sm:$0xff]   ;;  %v18423_v43 = vld [vmem:[%s27988_s1 + $0x704] ss:$16 sps:$4 sm:$0xff]  }
  0xa4   :  { %8202 = vmatprep.subr.bf16.mxu0 %v18331_v44  ;;  %9063 = vmatprep.subr.bf16.mxu1 %v18334_v45  ;;  %v18426_v44 = vld [vmem:[%s27988_s1 + $0x70c] ss:$16 sps:$4 sm:$0xff]   ;;  %v18421_v45 = vld [vmem:[%s27988_s1 + $0x700] ss:$16 sps:$4 sm:$0xff]  }
  0xa7   :  { %8203 = vmatpush1.bf16.msra.mxu0 %v18329_v46  ;;  %9064 = vmatpush1.bf16.msra.mxu1 %v18332_v47  ;;  %v18424_v46 = vld [vmem:[%s27988_s1 + $0x708] ss:$16 sps:$4 sm:$0xff]   ;;  %v18429_v47 = vld [vmem:[%s27988_s1 + $0x724] ss:$16 sps:$4 sm:$0xff]  }
  0xa8   :  { %8204 = vmatprep.subr.bf16.mxu0 %v18337_v48  ;;  %9065 = vmatprep.subr.bf16.mxu1 %v18340_v49  ;;  %v18432_v48 = vld [vmem:[%s27988_s1 + $0x72c] ss:$16 sps:$4 sm:$0xff]   ;;  %v18427_v49 = vld [vmem:[%s27988_s1 + $0x720] ss:$16 sps:$4 sm:$0xff]  }
  0xab   :  { %8205 = vmatpush1.bf16.msra.mxu0 %v18335_v50  ;;  %9066 = vmatpush1.bf16.msra.mxu1 %v18338_v51  ;;  %v18430_v50 = vld [vmem:[%s27988_s1 + $0x728] ss:$16 sps:$4 sm:$0xff]   ;;  %v18435_v51 = vld [vmem:[%s27988_s1 + $0x744] ss:$16 sps:$4 sm:$0xff]  }
  0xac   :  { %8206 = vmatprep.subr.bf16.mxu0 %v18343_v52  ;;  %9067 = vmatprep.subr.bf16.mxu1 %v18346_v53  ;;  %v18438_v52 = vld [vmem:[%s27988_s1 + $0x74c] ss:$16 sps:$4 sm:$0xff]   ;;  %v18433_v53 = vld [vmem:[%s27988_s1 + $0x740] ss:$16 sps:$4 sm:$0xff]  }
  0xaf   :  { %8207 = vmatpush1.bf16.msra.mxu0 %v18341_v54  ;;  %9068 = vmatpush1.bf16.msra.mxu1 %v18344_v55  ;;  %v18436_v54 = vld [vmem:[%s27988_s1 + $0x748] ss:$16 sps:$4 sm:$0xff]   ;;  %v18441_v55 = vld [vmem:[%s27988_s1 + $0x764] ss:$16 sps:$4 sm:$0xff]  }
  0xb0   :  { %8208 = vmatprep.subr.bf16.mxu0 %v18349_v56  ;;  %9069 = vmatprep.subr.bf16.mxu1 %v18352_v57  ;;  %v18444_v56 = vld [vmem:[%s27988_s1 + $0x76c] ss:$16 sps:$4 sm:$0xff]   ;;  %v18439_v57 = vld [vmem:[%s27988_s1 + $0x760] ss:$16 sps:$4 sm:$0xff]  }
  0xb3   :  { %8209 = vmatpush1.bf16.msra.mxu0 %v18347_v58  ;;  %9070 = vmatpush1.bf16.msra.mxu1 %v18350_v59  ;;  %v18442_v58 = vld [vmem:[%s27988_s1 + $0x768] ss:$16 sps:$4 sm:$0xff]   ;;  %v18447_v59 = vld [vmem:[%s27988_s1 + $0x784] ss:$16 sps:$4 sm:$0xff]  }
  0xb4   :  { %8210 = vmatprep.subr.bf16.mxu0 %v18355_v60  ;;  %9071 = vmatprep.subr.bf16.mxu1 %v18358_v61  ;;  %v18450_v60 = vld [vmem:[%s27988_s1 + $0x78c] ss:$16 sps:$4 sm:$0xff]   ;;  %v18445_v61 = vld [vmem:[%s27988_s1 + $0x780] ss:$16 sps:$4 sm:$0xff]  }
  0xb7   :  { %8211 = vmatpush1.bf16.msra.mxu0 %v18353_v62  ;;  %9072 = vmatpush1.bf16.msra.mxu1 %v18356_v63  ;;  %v18448_v62 = vld [vmem:[%s27988_s1 + $0x788] ss:$16 sps:$4 sm:$0xff]   ;;  %v18453_v63 = vld [vmem:[%s27988_s1 + $0x7a4] ss:$16 sps:$4 sm:$0xff]  }
  0xb8   :  { %8212 = vmatprep.subr.bf16.mxu0 %v18361_v0  ;;  %9073 = vmatprep.subr.bf16.mxu1 %v18364_v1  ;;  %v18456_v0 = vld [vmem:[%s27988_s1 + $0x7ac] ss:$16 sps:$4 sm:$0xff]   ;;  %v18451_v1 = vld [vmem:[%s27988_s1 + $0x7a0] ss:$16 sps:$4 sm:$0xff]  }
  0xbb   :  { %8213 = vmatpush1.bf16.msra.mxu0 %v18359_v2  ;;  %9074 = vmatpush1.bf16.msra.mxu1 %v18362_v3  ;;  %v18454_v2 = vld [vmem:[%s27988_s1 + $0x7a8] ss:$16 sps:$4 sm:$0xff]   ;;  %v18459_v3 = vld [vmem:[%s27988_s1 + $0x7c4] ss:$16 sps:$4 sm:$0xff]  }
  0xbc   :  { %8214 = vmatprep.subr.bf16.mxu0 %v18367_v4  ;;  %9075 = vmatprep.subr.bf16.mxu1 %v18370_v5  ;;  %v18462_v4 = vld [vmem:[%s27988_s1 + $0x7cc] ss:$16 sps:$4 sm:$0xff]   ;;  %v18457_v5 = vld [vmem:[%s27988_s1 + $0x7c0] ss:$16 sps:$4 sm:$0xff]  }
  0xbf   :  { %8215 = vmatpush1.bf16.msra.mxu0 %v18365_v6  ;;  %9076 = vmatpush1.bf16.msra.mxu1 %v18368_v7  ;;  %v18460_v6 = vld [vmem:[%s27988_s1 + $0x7c8] ss:$16 sps:$4 sm:$0xff]   ;;  %v18465_v7 = vld [vmem:[%s27988_s1 + $0x7e4] ss:$16 sps:$4 sm:$0xff]  }
  0xc0   :  { %8225 = vmatprep.subr.bf16.mxu0 %v18375_v8  ;;  %9086 = vmatprep.subr.bf16.mxu1 %v18378_v9  ;;  %v18468_v8 = vld [vmem:[%s27988_s1 + $0x7ec] ss:$16 sps:$4 sm:$0xff]   ;;  %v18463_v9 = vld [vmem:[%s27988_s1 + $0x7e0] ss:$16 sps:$4 sm:$0xff]  }
  0xc2   :  { %8217 = vmatmul.mubr.bf16.vlgmr.msra.gmra.mrb[0].mxu0 %v15711_v12  ;;  %9078 = vmatmul.mubr.bf16.vlgmr.msra.gmra.mrb[0].mxu1 %v15711_v12  ;;  %v18473_v12 = vld [vmem:[%s27988_s1 + $0x804] ss:$16 sps:$4 sm:$0xff]  }
  0xc3   :  { %8226 = vmatpush1.bf16.msra.mxu0 %v18373_v10  ;;  %9087 = vmatpush1.bf16.msra.mxu1 %v18376_v13  ;;  %v18466_v10 = vld [vmem:[%s27988_s1 + $0x7e8] ss:$16 sps:$4 sm:$0xff]   ;;  %v18476_v13 = vld [vmem:[%s27988_s1 + $0x80c] ss:$16 sps:$4 sm:$0xff]  }
  0xc4   :  { %8227 = vmatprep.subr.bf16.mxu0 %v18381_v15  ;;  %9088 = vmatprep.subr.bf16.mxu1 %v18384_v11  ;;  %v18471_v15 = vld [vmem:[%s27988_s1 + $0x800] ss:$16 sps:$4 sm:$0xff]   ;;  %v15713_v11 = vcombine.low %v21958_v14, %v21958_v14  ;;  %v18482_v14 = vld [vmem:[%s27988_s1 + $0x82c] ss:$16 sps:$4 sm:$0xff]  }
  0xc5   :  { %8257 = vmatprep.mubr.bf16.mxu0 %v15714_v16  ;;  %9118 = vmatprep.mubr.bf16.mxu1 %v15714_v16  ;;  %v22156_v16 = vld [vmem:[%s27989_s0 + $0x20] sm:$0xff] }
  0xc7   :  { %8228 = vmatpush1.bf16.msra.mxu0 %v18379_v17  ;;  %9089 = vmatpush1.bf16.msra.mxu1 %v18382_v18  ;;  %v18474_v17 = vld [vmem:[%s27988_s1 + $0x808] ss:$16 sps:$4 sm:$0xff]   ;;  %v18479_v18 = vld [vmem:[%s27988_s1 + $0x824] ss:$16 sps:$4 sm:$0xff]  }
  0xc8   :  { %8229 = vmatprep.subr.bf16.mxu0 %v18387_v19  ;;  %9090 = vmatprep.subr.bf16.mxu1 %v18390_v20  ;;  %v15716_v19 = vcombine.high %v22156_v16, %v22156_v16  ;;  %v18477_v20 = vld [vmem:[%s27988_s1 + $0x820] ss:$16 sps:$4 sm:$0xff]  }
  0xcb   :  { %8230 = vmatpush1.bf16.msra.mxu0 %v18385_v21  ;;  %9091 = vmatpush1.bf16.msra.mxu1 %v18388_v22  ;;  %v18480_v21 = vld [vmem:[%s27988_s1 + $0x828] ss:$16 sps:$4 sm:$0xff]   ;;  %v18485_v22 = vld [vmem:[%s27988_s1 + $0x844] ss:$16 sps:$4 sm:$0xff]  }
  0xcc   :  { %8231 = vmatprep.subr.bf16.mxu0 %v18393_v23  ;;  %9092 = vmatprep.subr.bf16.mxu1 %v18396_v24  ;;  %v18488_v23 = vld [vmem:[%s27988_s1 + $0x84c] ss:$16 sps:$4 sm:$0xff]   ;;  %v18483_v24 = vld [vmem:[%s27988_s1 + $0x840] ss:$16 sps:$4 sm:$0xff]  }
  0xcf   :  { %8232 = vmatpush1.bf16.msra.mxu0 %v18391_v25  ;;  %9093 = vmatpush1.bf16.msra.mxu1 %v18394_v26  ;;  %v18486_v25 = vld [vmem:[%s27988_s1 + $0x848] ss:$16 sps:$4 sm:$0xff]   ;;  %v18491_v26 = vld [vmem:[%s27988_s1 + $0x864] ss:$16 sps:$4 sm:$0xff]  }
  0xd0   :  { %8233 = vmatprep.subr.bf16.mxu0 %v18399_v27  ;;  %9094 = vmatprep.subr.bf16.mxu1 %v18402_v28  ;;  %v18494_v27 = vld [vmem:[%s27988_s1 + $0x86c] ss:$16 sps:$4 sm:$0xff]   ;;  %v18489_v28 = vld [vmem:[%s27988_s1 + $0x860] ss:$16 sps:$4 sm:$0xff]  }
  0xd3   :  { %8234 = vmatpush1.bf16.msra.mxu0 %v18397_v29  ;;  %9095 = vmatpush1.bf16.msra.mxu1 %v18400_v30  ;;  %v18492_v29 = vld [vmem:[%s27988_s1 + $0x868] ss:$16 sps:$4 sm:$0xff]   ;;  %v18497_v30 = vld [vmem:[%s27988_s1 + $0x884] ss:$16 sps:$4 sm:$0xff]  }
  0xd4   :  { %8235 = vmatprep.subr.bf16.mxu0 %v18405_v31  ;;  %9096 = vmatprep.subr.bf16.mxu1 %v18408_v32  ;;  %v18500_v31 = vld [vmem:[%s27988_s1 + $0x88c] ss:$16 sps:$4 sm:$0xff]   ;;  %v18495_v32 = vld [vmem:[%s27988_s1 + $0x880] ss:$16 sps:$4 sm:$0xff]  }
  0xd7   :  { %8236 = vmatpush1.bf16.msra.mxu0 %v18403_v33  ;;  %9097 = vmatpush1.bf16.msra.mxu1 %v18406_v34  ;;  %v18498_v33 = vld [vmem:[%s27988_s1 + $0x888] ss:$16 sps:$4 sm:$0xff]   ;;  %v18503_v34 = vld [vmem:[%s27988_s1 + $0x8a4] ss:$16 sps:$4 sm:$0xff]  }
  0xd8   :  { %8237 = vmatprep.subr.bf16.mxu0 %v18411_v35  ;;  %9098 = vmatprep.subr.bf16.mxu1 %v18414_v36  ;;  %v18506_v35 = vld [vmem:[%s27988_s1 + $0x8ac] ss:$16 sps:$4 sm:$0xff]   ;;  %v18501_v36 = vld [vmem:[%s27988_s1 + $0x8a0] ss:$16 sps:$4 sm:$0xff]  }
  0xdb   :  { %8238 = vmatpush1.bf16.msra.mxu0 %v18409_v37  ;;  %9099 = vmatpush1.bf16.msra.mxu1 %v18412_v38  ;;  %v18504_v37 = vld [vmem:[%s27988_s1 + $0x8a8] ss:$16 sps:$4 sm:$0xff]   ;;  %v18509_v38 = vld [vmem:[%s27988_s1 + $0x8c4] ss:$16 sps:$4 sm:$0xff]  }
  0xdc   :  { %8239 = vmatprep.subr.bf16.mxu0 %v18417_v39  ;;  %9100 = vmatprep.subr.bf16.mxu1 %v18420_v40  ;;  %v18512_v39 = vld [vmem:[%s27988_s1 + $0x8cc] ss:$16 sps:$4 sm:$0xff]   ;;  %v18507_v40 = vld [vmem:[%s27988_s1 + $0x8c0] ss:$16 sps:$4 sm:$0xff]  }
  0xdf   :  { %8240 = vmatpush1.bf16.msra.mxu0 %v18415_v41  ;;  %9101 = vmatpush1.bf16.msra.mxu1 %v18418_v42  ;;  %v18510_v41 = vld [vmem:[%s27988_s1 + $0x8c8] ss:$16 sps:$4 sm:$0xff]   ;;  %v18515_v42 = vld [vmem:[%s27988_s1 + $0x8e4] ss:$16 sps:$4 sm:$0xff]  }
  0xe0   :  { %8241 = vmatprep.subr.bf16.mxu0 %v18423_v43  ;;  %9102 = vmatprep.subr.bf16.mxu1 %v18426_v44  ;;  %v18518_v43 = vld [vmem:[%s27988_s1 + $0x8ec] ss:$16 sps:$4 sm:$0xff]   ;;  %v18513_v44 = vld [vmem:[%s27988_s1 + $0x8e0] ss:$16 sps:$4 sm:$0xff]  }
  0xe3   :  { %8242 = vmatpush1.bf16.msra.mxu0 %v18421_v45  ;;  %9103 = vmatpush1.bf16.msra.mxu1 %v18424_v46  ;;  %v18516_v45 = vld [vmem:[%s27988_s1 + $0x8e8] ss:$16 sps:$4 sm:$0xff]   ;;  %v18521_v46 = vld [vmem:[%s27988_s1 + $0x904] ss:$16 sps:$4 sm:$0xff]  }
  0xe4   :  { %8243 = vmatprep.subr.bf16.mxu0 %v18429_v47  ;;  %9104 = vmatprep.subr.bf16.mxu1 %v18432_v48  ;;  %v18524_v47 = vld [vmem:[%s27988_s1 + $0x90c] ss:$16 sps:$4 sm:$0xff]   ;;  %v18519_v48 = vld [vmem:[%s27988_s1 + $0x900] ss:$16 sps:$4 sm:$0xff]  }
  0xe7   :  { %8244 = vmatpush1.bf16.msra.mxu0 %v18427_v49  ;;  %9105 = vmatpush1.bf16.msra.mxu1 %v18430_v50  ;;  %v18522_v49 = vld [vmem:[%s27988_s1 + $0x908] ss:$16 sps:$4 sm:$0xff]   ;;  %v18527_v50 = vld [vmem:[%s27988_s1 + $0x924] ss:$16 sps:$4 sm:$0xff]  }
  0xe8   :  { %8245 = vmatprep.subr.bf16.mxu0 %v18435_v51  ;;  %9106 = vmatprep.subr.bf16.mxu1 %v18438_v52  ;;  %v18530_v51 = vld [vmem:[%s27988_s1 + $0x92c] ss:$16 sps:$4 sm:$0xff]   ;;  %v18525_v52 = vld [vmem:[%s27988_s1 + $0x920] ss:$16 sps:$4 sm:$0xff]  }
  0xeb   :  { %8246 = vmatpush1.bf16.msra.mxu0 %v18433_v53  ;;  %9107 = vmatpush1.bf16.msra.mxu1 %v18436_v54  ;;  %v18528_v53 = vld [vmem:[%s27988_s1 + $0x928] ss:$16 sps:$4 sm:$0xff]   ;;  %v18533_v54 = vld [vmem:[%s27988_s1 + $0x944] ss:$16 sps:$4 sm:$0xff]  }
  0xec   :  { %8247 = vmatprep.subr.bf16.mxu0 %v18441_v55  ;;  %9108 = vmatprep.subr.bf16.mxu1 %v18444_v56  ;;  %v18536_v55 = vld [vmem:[%s27988_s1 + $0x94c] ss:$16 sps:$4 sm:$0xff]   ;;  %v18531_v56 = vld [vmem:[%s27988_s1 + $0x940] ss:$16 sps:$4 sm:$0xff]  }
  0xef   :  { %8248 = vmatpush1.bf16.msra.mxu0 %v18439_v57  ;;  %9109 = vmatpush1.bf16.msra.mxu1 %v18442_v58  ;;  %v18534_v57 = vld [vmem:[%s27988_s1 + $0x948] ss:$16 sps:$4 sm:$0xff]   ;;  %v18539_v58 = vld [vmem:[%s27988_s1 + $0x964] ss:$16 sps:$4 sm:$0xff]  }
  0xf0   :  { %8249 = vmatprep.subr.bf16.mxu0 %v18447_v59  ;;  %9110 = vmatprep.subr.bf16.mxu1 %v18450_v60  ;;  %v18542_v59 = vld [vmem:[%s27988_s1 + $0x96c] ss:$16 sps:$4 sm:$0xff]   ;;  %v18537_v60 = vld [vmem:[%s27988_s1 + $0x960] ss:$16 sps:$4 sm:$0xff]  }
  0xf3   :  { %8250 = vmatpush1.bf16.msra.mxu0 %v18445_v61  ;;  %9111 = vmatpush1.bf16.msra.mxu1 %v18448_v62  ;;  %v18540_v61 = vld [vmem:[%s27988_s1 + $0x968] ss:$16 sps:$4 sm:$0xff]   ;;  %v18545_v62 = vld [vmem:[%s27988_s1 + $0x984] ss:$16 sps:$4 sm:$0xff]  }
  0xf4   :  { %8251 = vmatprep.subr.bf16.mxu0 %v18453_v63  ;;  %9112 = vmatprep.subr.bf16.mxu1 %v18456_v0  ;;  %v18548_v63 = vld [vmem:[%s27988_s1 + $0x98c] ss:$16 sps:$4 sm:$0xff]   ;;  %v18543_v0 = vld [vmem:[%s27988_s1 + $0x980] ss:$16 sps:$4 sm:$0xff]  }
  0xf7   :  { %8252 = vmatpush1.bf16.msra.mxu0 %v18451_v1  ;;  %9113 = vmatpush1.bf16.msra.mxu1 %v18454_v2  ;;  %v18546_v1 = vld [vmem:[%s27988_s1 + $0x988] ss:$16 sps:$4 sm:$0xff]   ;;  %v18551_v2 = vld [vmem:[%s27988_s1 + $0x9a4] ss:$16 sps:$4 sm:$0xff]  }
  0xf8   :  { %8253 = vmatprep.subr.bf16.mxu0 %v18459_v3  ;;  %9114 = vmatprep.subr.bf16.mxu1 %v18462_v4  ;;  %v18554_v3 = vld [vmem:[%s27988_s1 + $0x9ac] ss:$16 sps:$4 sm:$0xff]   ;;  %v18549_v4 = vld [vmem:[%s27988_s1 + $0x9a0] ss:$16 sps:$4 sm:$0xff]  }
  0xfb   :  { %8254 = vmatpush1.bf16.msra.mxu0 %v18457_v5  ;;  %9115 = vmatpush1.bf16.msra.mxu1 %v18460_v6  ;;  %v18552_v5 = vld [vmem:[%s27988_s1 + $0x9a8] ss:$16 sps:$4 sm:$0xff]   ;;  %v18557_v6 = vld [vmem:[%s27988_s1 + $0x9c4] ss:$16 sps:$4 sm:$0xff]  }
  0xfc   :  { %8255 = vmatprep.subr.bf16.mxu0 %v18465_v7  ;;  %9116 = vmatprep.subr.bf16.mxu1 %v18468_v8  ;;  %v18560_v7 = vld [vmem:[%s27988_s1 + $0x9cc] ss:$16 sps:$4 sm:$0xff]   ;;  %v18555_v8 = vld [vmem:[%s27988_s1 + $0x9c0] ss:$16 sps:$4 sm:$0xff]  }
  0xff   :  { %8256 = vmatpush1.bf16.msra.mxu0 %v18463_v9  ;;  %9117 = vmatpush1.bf16.msra.mxu1 %v18466_v10  ;;  %v18558_v9 = vld [vmem:[%s27988_s1 + $0x9c8] ss:$16 sps:$4 sm:$0xff]   ;;  %v18563_v10 = vld [vmem:[%s27988_s1 + $0x9e4] ss:$16 sps:$4 sm:$0xff]  }
 0x100   :  { %8266 = vmatprep.subr.bf16.mxu0 %v18473_v12  ;;  %9127 = vmatprep.subr.bf16.mxu1 %v18476_v13  ;;  %v18566_v12 = vld [vmem:[%s27988_s1 + $0x9ec] ss:$16 sps:$4 sm:$0xff]   ;;  %v18561_v13 = vld [vmem:[%s27988_s1 + $0x9e0] ss:$16 sps:$4 sm:$0xff]  }
 0x102   :  { %8258 = vmatmul.mubr.bf16.vlgmr.msra.gmra.mrb[0].mxu0 %v15713_v11  ;;  %9119 = vmatmul.mubr.bf16.vlgmr.msra.gmra.mrb[0].mxu1 %v15713_v11  ;;  %v18571_v11 = vld [vmem:[%s27988_s1 + $0xa04] ss:$16 sps:$4 sm:$0xff]  }
 0x103   :  { %8267 = vmatpush1.bf16.msra.mxu0 %v18471_v15  ;;  %9128 = vmatpush1.bf16.msra.mxu1 %v18474_v17  ;;  %v18564_v15 = vld [vmem:[%s27988_s1 + $0x9e8] ss:$16 sps:$4 sm:$0xff]   ;;  %v18574_v17 = vld [vmem:[%s27988_s1 + $0xa0c] ss:$16 sps:$4 sm:$0xff]  }
 0x104   :  { %8268 = vmatprep.subr.bf16.mxu0 %v18479_v18  ;;  %9129 = vmatprep.subr.bf16.mxu1 %v18482_v14  ;;  %v22352_v18 = vld [vmem:[%s27989_s0 + $0x28] sm:$0xff]  ;;  %v15715_v14 = vcombine.low %v22156_v16, %v22156_v16 }
 0x105   :  { %8298 = vmatprep.mubr.bf16.mxu0 %v15716_v19  ;;  %9159 = vmatprep.mubr.bf16.mxu1 %v15716_v19  ;;  %v18569_v19 = vld [vmem:[%s27988_s1 + $0xa00] ss:$16 sps:$4 sm:$0xff]   ;;  %v18580_v16 = vld [vmem:[%s27988_s1 + $0xa2c] ss:$16 sps:$4 sm:$0xff]  }
 0x107   :  { %8269 = vmatpush1.bf16.msra.mxu0 %v18477_v20  ;;  %9130 = vmatpush1.bf16.msra.mxu1 %v18480_v21  ;;  %v18572_v20 = vld [vmem:[%s27988_s1 + $0xa08] ss:$16 sps:$4 sm:$0xff]   ;;  %v18577_v21 = vld [vmem:[%s27988_s1 + $0xa24] ss:$16 sps:$4 sm:$0xff]  }
 0x108   :  { %8270 = vmatprep.subr.bf16.mxu0 %v18485_v22  ;;  %9131 = vmatprep.subr.bf16.mxu1 %v18488_v23  ;;  %v15718_v22 = vcombine.high %v22352_v18, %v22352_v18  ;;  %v18575_v23 = vld [vmem:[%s27988_s1 + $0xa20] ss:$16 sps:$4 sm:$0xff]  }
 0x10b   :  { %8271 = vmatpush1.bf16.msra.mxu0 %v18483_v24  ;;  %9132 = vmatpush1.bf16.msra.mxu1 %v18486_v25  ;;  %v18578_v24 = vld [vmem:[%s27988_s1 + $0xa28] ss:$16 sps:$4 sm:$0xff]   ;;  %v18583_v25 = vld [vmem:[%s27988_s1 + $0xa44] ss:$16 sps:$4 sm:$0xff]  }
 0x10c   :  { %8272 = vmatprep.subr.bf16.mxu0 %v18491_v26  ;;  %9133 = vmatprep.subr.bf16.mxu1 %v18494_v27  ;;  %v18586_v26 = vld [vmem:[%s27988_s1 + $0xa4c] ss:$16 sps:$4 sm:$0xff]   ;;  %v18581_v27 = vld [vmem:[%s27988_s1 + $0xa40] ss:$16 sps:$4 sm:$0xff]  }
 0x10f   :  { %8273 = vmatpush1.bf16.msra.mxu0 %v18489_v28  ;;  %9134 = vmatpush1.bf16.msra.mxu1 %v18492_v29  ;;  %v18584_v28 = vld [vmem:[%s27988_s1 + $0xa48] ss:$16 sps:$4 sm:$0xff]   ;;  %v18589_v29 = vld [vmem:[%s27988_s1 + $0xa64] ss:$16 sps:$4 sm:$0xff]  }
 0x110   :  { %8274 = vmatprep.subr.bf16.mxu0 %v18497_v30  ;;  %9135 = vmatprep.subr.bf16.mxu1 %v18500_v31  ;;  %v18592_v30 = vld [vmem:[%s27988_s1 + $0xa6c] ss:$16 sps:$4 sm:$0xff]   ;;  %v18587_v31 = vld [vmem:[%s27988_s1 + $0xa60] ss:$16 sps:$4 sm:$0xff]  }
 0x113   :  { %8275 = vmatpush1.bf16.msra.mxu0 %v18495_v32  ;;  %9136 = vmatpush1.bf16.msra.mxu1 %v18498_v33  ;;  %v18590_v32 = vld [vmem:[%s27988_s1 + $0xa68] ss:$16 sps:$4 sm:$0xff]   ;;  %v18595_v33 = vld [vmem:[%s27988_s1 + $0xa84] ss:$16 sps:$4 sm:$0xff]  }
 0x114   :  { %8276 = vmatprep.subr.bf16.mxu0 %v18503_v34  ;;  %9137 = vmatprep.subr.bf16.mxu1 %v18506_v35  ;;  %v18598_v34 = vld [vmem:[%s27988_s1 + $0xa8c] ss:$16 sps:$4 sm:$0xff]   ;;  %v18593_v35 = vld [vmem:[%s27988_s1 + $0xa80] ss:$16 sps:$4 sm:$0xff]  }
 0x117   :  { %8277 = vmatpush1.bf16.msra.mxu0 %v18501_v36  ;;  %9138 = vmatpush1.bf16.msra.mxu1 %v18504_v37  ;;  %v18596_v36 = vld [vmem:[%s27988_s1 + $0xa88] ss:$16 sps:$4 sm:$0xff]   ;;  %v18601_v37 = vld [vmem:[%s27988_s1 + $0xaa4] ss:$16 sps:$4 sm:$0xff]  }
 0x118   :  { %8278 = vmatprep.subr.bf16.mxu0 %v18509_v38  ;;  %9139 = vmatprep.subr.bf16.mxu1 %v18512_v39  ;;  %v18604_v38 = vld [vmem:[%s27988_s1 + $0xaac] ss:$16 sps:$4 sm:$0xff]   ;;  %v18599_v39 = vld [vmem:[%s27988_s1 + $0xaa0] ss:$16 sps:$4 sm:$0xff]  }
 0x11b   :  { %8279 = vmatpush1.bf16.msra.mxu0 %v18507_v40  ;;  %9140 = vmatpush1.bf16.msra.mxu1 %v18510_v41  ;;  %v18602_v40 = vld [vmem:[%s27988_s1 + $0xaa8] ss:$16 sps:$4 sm:$0xff]   ;;  %v18607_v41 = vld [vmem:[%s27988_s1 + $0xac4] ss:$16 sps:$4 sm:$0xff]  }
 0x11c   :  { %8280 = vmatprep.subr.bf16.mxu0 %v18515_v42  ;;  %9141 = vmatprep.subr.bf16.mxu1 %v18518_v43  ;;  %v18610_v42 = vld [vmem:[%s27988_s1 + $0xacc] ss:$16 sps:$4 sm:$0xff]   ;;  %v18605_v43 = vld [vmem:[%s27988_s1 + $0xac0] ss:$16 sps:$4 sm:$0xff]  }
 0x11f   :  { %8281 = vmatpush1.bf16.msra.mxu0 %v18513_v44  ;;  %9142 = vmatpush1.bf16.msra.mxu1 %v18516_v45  ;;  %v18608_v44 = vld [vmem:[%s27988_s1 + $0xac8] ss:$16 sps:$4 sm:$0xff]   ;;  %v18613_v45 = vld [vmem:[%s27988_s1 + $0xae4] ss:$16 sps:$4 sm:$0xff]  }
 0x120   :  { %8282 = vmatprep.subr.bf16.mxu0 %v18521_v46  ;;  %9143 = vmatprep.subr.bf16.mxu1 %v18524_v47  ;;  %v18616_v46 = vld [vmem:[%s27988_s1 + $0xaec] ss:$16 sps:$4 sm:$0xff]   ;;  %v18611_v47 = vld [vmem:[%s27988_s1 + $0xae0] ss:$16 sps:$4 sm:$0xff]  }
 0x123   :  { %8283 = vmatpush1.bf16.msra.mxu0 %v18519_v48  ;;  %9144 = vmatpush1.bf16.msra.mxu1 %v18522_v49  ;;  %v18614_v48 = vld [vmem:[%s27988_s1 + $0xae8] ss:$16 sps:$4 sm:$0xff]   ;;  %v18619_v49 = vld [vmem:[%s27988_s1 + $0xb04] ss:$16 sps:$4 sm:$0xff]  }
 0x124   :  { %8284 = vmatprep.subr.bf16.mxu0 %v18527_v50  ;;  %9145 = vmatprep.subr.bf16.mxu1 %v18530_v51  ;;  %v18622_v50 = vld [vmem:[%s27988_s1 + $0xb0c] ss:$16 sps:$4 sm:$0xff]   ;;  %v18617_v51 = vld [vmem:[%s27988_s1 + $0xb00] ss:$16 sps:$4 sm:$0xff]  }
 0x127   :  { %8285 = vmatpush1.bf16.msra.mxu0 %v18525_v52  ;;  %9146 = vmatpush1.bf16.msra.mxu1 %v18528_v53  ;;  %v18620_v52 = vld [vmem:[%s27988_s1 + $0xb08] ss:$16 sps:$4 sm:$0xff]   ;;  %v18625_v53 = vld [vmem:[%s27988_s1 + $0xb24] ss:$16 sps:$4 sm:$0xff]  }
 0x128   :  { %8286 = vmatprep.subr.bf16.mxu0 %v18533_v54  ;;  %9147 = vmatprep.subr.bf16.mxu1 %v18536_v55  ;;  %v18628_v54 = vld [vmem:[%s27988_s1 + $0xb2c] ss:$16 sps:$4 sm:$0xff]   ;;  %v18623_v55 = vld [vmem:[%s27988_s1 + $0xb20] ss:$16 sps:$4 sm:$0xff]  }
 0x12b   :  { %8287 = vmatpush1.bf16.msra.mxu0 %v18531_v56  ;;  %9148 = vmatpush1.bf16.msra.mxu1 %v18534_v57  ;;  %v18626_v56 = vld [vmem:[%s27988_s1 + $0xb28] ss:$16 sps:$4 sm:$0xff]   ;;  %v18631_v57 = vld [vmem:[%s27988_s1 + $0xb44] ss:$16 sps:$4 sm:$0xff]  }
 0x12c   :  { %8288 = vmatprep.subr.bf16.mxu0 %v18539_v58  ;;  %9149 = vmatprep.subr.bf16.mxu1 %v18542_v59  ;;  %v18634_v58 = vld [vmem:[%s27988_s1 + $0xb4c] ss:$16 sps:$4 sm:$0xff]   ;;  %v18629_v59 = vld [vmem:[%s27988_s1 + $0xb40] ss:$16 sps:$4 sm:$0xff]  }
 0x12f   :  { %8289 = vmatpush1.bf16.msra.mxu0 %v18537_v60  ;;  %9150 = vmatpush1.bf16.msra.mxu1 %v18540_v61  ;;  %v18632_v60 = vld [vmem:[%s27988_s1 + $0xb48] ss:$16 sps:$4 sm:$0xff]   ;;  %v18637_v61 = vld [vmem:[%s27988_s1 + $0xb64] ss:$16 sps:$4 sm:$0xff]  }
 0x130   :  { %8290 = vmatprep.subr.bf16.mxu0 %v18545_v62  ;;  %9151 = vmatprep.subr.bf16.mxu1 %v18548_v63  ;;  %v18640_v62 = vld [vmem:[%s27988_s1 + $0xb6c] ss:$16 sps:$4 sm:$0xff]   ;;  %v18635_v63 = vld [vmem:[%s27988_s1 + $0xb60] ss:$16 sps:$4 sm:$0xff]  }
 0x133   :  { %8291 = vmatpush1.bf16.msra.mxu0 %v18543_v0  ;;  %9152 = vmatpush1.bf16.msra.mxu1 %v18546_v1  ;;  %v18638_v0 = vld [vmem:[%s27988_s1 + $0xb68] ss:$16 sps:$4 sm:$0xff]   ;;  %v18643_v1 = vld [vmem:[%s27988_s1 + $0xb84] ss:$16 sps:$4 sm:$0xff]  }
 0x134   :  { %8292 = vmatprep.subr.bf16.mxu0 %v18551_v2  ;;  %9153 = vmatprep.subr.bf16.mxu1 %v18554_v3  ;;  %v18646_v2 = vld [vmem:[%s27988_s1 + $0xb8c] ss:$16 sps:$4 sm:$0xff]   ;;  %v18641_v3 = vld [vmem:[%s27988_s1 + $0xb80] ss:$16 sps:$4 sm:$0xff]  }
 0x137   :  { %8293 = vmatpush1.bf16.msra.mxu0 %v18549_v4  ;;  %9154 = vmatpush1.bf16.msra.mxu1 %v18552_v5  ;;  %v18644_v4 = vld [vmem:[%s27988_s1 + $0xb88] ss:$16 sps:$4 sm:$0xff]   ;;  %v18649_v5 = vld [vmem:[%s27988_s1 + $0xba4] ss:$16 sps:$4 sm:$0xff]  }
 0x138   :  { %8294 = vmatprep.subr.bf16.mxu0 %v18557_v6  ;;  %9155 = vmatprep.subr.bf16.mxu1 %v18560_v7  ;;  %v18652_v6 = vld [vmem:[%s27988_s1 + $0xbac] ss:$16 sps:$4 sm:$0xff]   ;;  %v18647_v7 = vld [vmem:[%s27988_s1 + $0xba0] ss:$16 sps:$4 sm:$0xff]  }
 0x13b   :  { %8295 = vmatpush1.bf16.msra.mxu0 %v18555_v8  ;;  %9156 = vmatpush1.bf16.msra.mxu1 %v18558_v9  ;;  %v18650_v8 = vld [vmem:[%s27988_s1 + $0xba8] ss:$16 sps:$4 sm:$0xff]   ;;  %v18655_v9 = vld [vmem:[%s27988_s1 + $0xbc4] ss:$16 sps:$4 sm:$0xff]  }
 0x13c   :  { %8296 = vmatprep.subr.bf16.mxu0 %v18563_v10  ;;  %9157 = vmatprep.subr.bf16.mxu1 %v18566_v12  ;;  %v18658_v10 = vld [vmem:[%s27988_s1 + $0xbcc] ss:$16 sps:$4 sm:$0xff]   ;;  %v18653_v12 = vld [vmem:[%s27988_s1 + $0xbc0] ss:$16 sps:$4 sm:$0xff]  }
 0x13f   :  { %8297 = vmatpush1.bf16.msra.mxu0 %v18561_v13  ;;  %9158 = vmatpush1.bf16.msra.mxu1 %v18564_v15  ;;  %v18656_v13 = vld [vmem:[%s27988_s1 + $0xbc8] ss:$16 sps:$4 sm:$0xff]   ;;  %v18661_v15 = vld [vmem:[%s27988_s1 + $0xbe4] ss:$16 sps:$4 sm:$0xff]  }
 0x140   :  { %8307 = vmatprep.subr.bf16.mxu0 %v18571_v11  ;;  %9168 = vmatprep.subr.bf16.mxu1 %v18574_v17  ;;  %v18664_v11 = vld [vmem:[%s27988_s1 + $0xbec] ss:$16 sps:$4 sm:$0xff]   ;;  %v18659_v17 = vld [vmem:[%s27988_s1 + $0xbe0] ss:$16 sps:$4 sm:$0xff]  }
 0x142   :  { %8299 = vmatmul.mubr.bf16.vlgmr.msra.gmra.mrb[0].mxu0 %v15715_v14  ;;  %9160 = vmatmul.mubr.bf16.vlgmr.msra.gmra.mrb[0].mxu1 %v15715_v14  ;;  %v18662_v14 = vld [vmem:[%s27988_s1 + $0xbe8] ss:$16 sps:$4 sm:$0xff]  }
 0x143   :  { %8308 = vmatpush1.bf16.msra.mxu0 %v18569_v19  ;;  %9169 = vmatpush1.bf16.msra.mxu1 %v18572_v20  ;;  %v18669_v19 = vld [vmem:[%s27988_s1 + $0xc04] ss:$16 sps:$4 sm:$0xff]   ;;  %v18672_v20 = vld [vmem:[%s27988_s1 + $0xc0c] ss:$16 sps:$4 sm:$0xff]  }
 0x144   :  { %8309 = vmatprep.subr.bf16.mxu0 %v18577_v21  ;;  %9170 = vmatprep.subr.bf16.mxu1 %v18580_v16  ;;  %v22553_v21 = vld [vmem:[%s27989_s0 + $0x30] sm:$0xff]  ;;  %v15717_v16 = vcombine.low %v22352_v18, %v22352_v18  ;;  %v18678_v18 = vld [vmem:[%s27988_s1 + $0xc2c] ss:$16 sps:$4 sm:$0xff]  }
 0x145   :  { %8339 = vmatprep.mubr.bf16.mxu0 %v15718_v22  ;;  %9200 = vmatprep.mubr.bf16.mxu1 %v15718_v22  ;;  %v18667_v22 = vld [vmem:[%s27988_s1 + $0xc00] ss:$16 sps:$4 sm:$0xff]  }
 0x147   :  { %8310 = vmatpush1.bf16.msra.mxu0 %v18575_v23  ;;  %9171 = vmatpush1.bf16.msra.mxu1 %v18578_v24  ;;  %v18670_v23 = vld [vmem:[%s27988_s1 + $0xc08] ss:$16 sps:$4 sm:$0xff]   ;;  %v18675_v24 = vld [vmem:[%s27988_s1 + $0xc24] ss:$16 sps:$4 sm:$0xff]  }
 0x148   :  { %8311 = vmatprep.subr.bf16.mxu0 %v18583_v25  ;;  %9172 = vmatprep.subr.bf16.mxu1 %v18586_v26  ;;  %v15720_v25 = vcombine.high %v22553_v21, %v22553_v21  ;;  %v18673_v26 = vld [vmem:[%s27988_s1 + $0xc20] ss:$16 sps:$4 sm:$0xff]  }
 0x14b   :  { %8312 = vmatpush1.bf16.msra.mxu0 %v18581_v27  ;;  %9173 = vmatpush1.bf16.msra.mxu1 %v18584_v28  ;;  %v18676_v27 = vld [vmem:[%s27988_s1 + $0xc28] ss:$16 sps:$4 sm:$0xff]   ;;  %v18681_v28 = vld [vmem:[%s27988_s1 + $0xc44] ss:$16 sps:$4 sm:$0xff]  }
 0x14c   :  { %8313 = vmatprep.subr.bf16.mxu0 %v18589_v29  ;;  %9174 = vmatprep.subr.bf16.mxu1 %v18592_v30  ;;  %v18684_v29 = vld [vmem:[%s27988_s1 + $0xc4c] ss:$16 sps:$4 sm:$0xff]   ;;  %v18679_v30 = vld [vmem:[%s27988_s1 + $0xc40] ss:$16 sps:$4 sm:$0xff]  }
 0x14f   :  { %8314 = vmatpush1.bf16.msra.mxu0 %v18587_v31  ;;  %9175 = vmatpush1.bf16.msra.mxu1 %v18590_v32  ;;  %v18682_v31 = vld [vmem:[%s27988_s1 + $0xc48] ss:$16 sps:$4 sm:$0xff]   ;;  %v18687_v32 = vld [vmem:[%s27988_s1 + $0xc64] ss:$16 sps:$4 sm:$0xff]  }
 0x150   :  { %8315 = vmatprep.subr.bf16.mxu0 %v18595_v33  ;;  %9176 = vmatprep.subr.bf16.mxu1 %v18598_v34  ;;  %v18690_v33 = vld [vmem:[%s27988_s1 + $0xc6c] ss:$16 sps:$4 sm:$0xff]   ;;  %v18685_v34 = vld [vmem:[%s27988_s1 + $0xc60] ss:$16 sps:$4 sm:$0xff]  }
 0x153   :  { %8316 = vmatpush1.bf16.msra.mxu0 %v18593_v35  ;;  %9177 = vmatpush1.bf16.msra.mxu1 %v18596_v36  ;;  %v18688_v35 = vld [vmem:[%s27988_s1 + $0xc68] ss:$16 sps:$4 sm:$0xff]   ;;  %v18693_v36 = vld [vmem:[%s27988_s1 + $0xc84] ss:$16 sps:$4 sm:$0xff]  }
 0x154   :  { %8317 = vmatprep.subr.bf16.mxu0 %v18601_v37  ;;  %9178 = vmatprep.subr.bf16.mxu1 %v18604_v38  ;;  %v18696_v37 = vld [vmem:[%s27988_s1 + $0xc8c] ss:$16 sps:$4 sm:$0xff]   ;;  %v18691_v38 = vld [vmem:[%s27988_s1 + $0xc80] ss:$16 sps:$4 sm:$0xff]  }
 0x157   :  { %8318 = vmatpush1.bf16.msra.mxu0 %v18599_v39  ;;  %9179 = vmatpush1.bf16.msra.mxu1 %v18602_v40  ;;  %v18694_v39 = vld [vmem:[%s27988_s1 + $0xc88] ss:$16 sps:$4 sm:$0xff]   ;;  %v18699_v40 = vld [vmem:[%s27988_s1 + $0xca4] ss:$16 sps:$4 sm:$0xff]  }
 0x158   :  { %8319 = vmatprep.subr.bf16.mxu0 %v18607_v41  ;;  %9180 = vmatprep.subr.bf16.mxu1 %v18610_v42  ;;  %v18702_v41 = vld [vmem:[%s27988_s1 + $0xcac] ss:$16 sps:$4 sm:$0xff]   ;;  %v18697_v42 = vld [vmem:[%s27988_s1 + $0xca0] ss:$16 sps:$4 sm:$0xff]  }
 0x15b   :  { %8320 = vmatpush1.bf16.msra.mxu0 %v18605_v43  ;;  %9181 = vmatpush1.bf16.msra.mxu1 %v18608_v44  ;;  %v18700_v43 = vld [vmem:[%s27988_s1 + $0xca8] ss:$16 sps:$4 sm:$0xff]   ;;  %v18705_v44 = vld [vmem:[%s27988_s1 + $0xcc4] ss:$16 sps:$4 sm:$0xff]  }
 0x15c   :  { %8321 = vmatprep.subr.bf16.mxu0 %v18613_v45  ;;  %9182 = vmatprep.subr.bf16.mxu1 %v18616_v46  ;;  %v18708_v45 = vld [vmem:[%s27988_s1 + $0xccc] ss:$16 sps:$4 sm:$0xff]   ;;  %v18703_v46 = vld [vmem:[%s27988_s1 + $0xcc0] ss:$16 sps:$4 sm:$0xff]  }
 0x15f   :  { %8322 = vmatpush1.bf16.msra.mxu0 %v18611_v47  ;;  %9183 = vmatpush1.bf16.msra.mxu1 %v18614_v48  ;;  %v18706_v47 = vld [vmem:[%s27988_s1 + $0xcc8] ss:$16 sps:$4 sm:$0xff]   ;;  %v18711_v48 = vld [vmem:[%s27988_s1 + $0xce4] ss:$16 sps:$4 sm:$0xff]  }
 0x160   :  { %8323 = vmatprep.subr.bf16.mxu0 %v18619_v49  ;;  %9184 = vmatprep.subr.bf16.mxu1 %v18622_v50  ;;  %v18714_v49 = vld [vmem:[%s27988_s1 + $0xcec] ss:$16 sps:$4 sm:$0xff]   ;;  %v18709_v50 = vld [vmem:[%s27988_s1 + $0xce0] ss:$16 sps:$4 sm:$0xff]  }
 0x163   :  { %8324 = vmatpush1.bf16.msra.mxu0 %v18617_v51  ;;  %9185 = vmatpush1.bf16.msra.mxu1 %v18620_v52  ;;  %v18712_v51 = vld [vmem:[%s27988_s1 + $0xce8] ss:$16 sps:$4 sm:$0xff]   ;;  %v18717_v52 = vld [vmem:[%s27988_s1 + $0xd04] ss:$16 sps:$4 sm:$0xff]  }
 0x164   :  { %8325 = vmatprep.subr.bf16.mxu0 %v18625_v53  ;;  %9186 = vmatprep.subr.bf16.mxu1 %v18628_v54  ;;  %v18720_v53 = vld [vmem:[%s27988_s1 + $0xd0c] ss:$16 sps:$4 sm:$0xff]   ;;  %v18715_v54 = vld [vmem:[%s27988_s1 + $0xd00] ss:$16 sps:$4 sm:$0xff]  }
 0x167   :  { %8326 = vmatpush1.bf16.msra.mxu0 %v18623_v55  ;;  %9187 = vmatpush1.bf16.msra.mxu1 %v18626_v56  ;;  %v18718_v55 = vld [vmem:[%s27988_s1 + $0xd08] ss:$16 sps:$4 sm:$0xff]   ;;  %v18723_v56 = vld [vmem:[%s27988_s1 + $0xd24] ss:$16 sps:$4 sm:$0xff]  }
 0x168   :  { %8327 = vmatprep.subr.bf16.mxu0 %v18631_v57  ;;  %9188 = vmatprep.subr.bf16.mxu1 %v18634_v58  ;;  %v18726_v57 = vld [vmem:[%s27988_s1 + $0xd2c] ss:$16 sps:$4 sm:$0xff]   ;;  %v18721_v58 = vld [vmem:[%s27988_s1 + $0xd20] ss:$16 sps:$4 sm:$0xff]  }
 0x16b   :  { %8328 = vmatpush1.bf16.msra.mxu0 %v18629_v59  ;;  %9189 = vmatpush1.bf16.msra.mxu1 %v18632_v60  ;;  %v18724_v59 = vld [vmem:[%s27988_s1 + $0xd28] ss:$16 sps:$4 sm:$0xff]   ;;  %v18729_v60 = vld [vmem:[%s27988_s1 + $0xd44] ss:$16 sps:$4 sm:$0xff]  }
 0x16c   :  { %8329 = vmatprep.subr.bf16.mxu0 %v18637_v61  ;;  %9190 = vmatprep.subr.bf16.mxu1 %v18640_v62  ;;  %v18732_v61 = vld [vmem:[%s27988_s1 + $0xd4c] ss:$16 sps:$4 sm:$0xff]   ;;  %v18727_v62 = vld [vmem:[%s27988_s1 + $0xd40] ss:$16 sps:$4 sm:$0xff]  }
 0x16f   :  { %8330 = vmatpush1.bf16.msra.mxu0 %v18635_v63  ;;  %9191 = vmatpush1.bf16.msra.mxu1 %v18638_v0  ;;  %v18730_v63 = vld [vmem:[%s27988_s1 + $0xd48] ss:$16 sps:$4 sm:$0xff]   ;;  %v18735_v0 = vld [vmem:[%s27988_s1 + $0xd64] ss:$16 sps:$4 sm:$0xff]  }
 0x170   :  { %8331 = vmatprep.subr.bf16.mxu0 %v18643_v1  ;;  %9192 = vmatprep.subr.bf16.mxu1 %v18646_v2  ;;  %v18738_v1 = vld [vmem:[%s27988_s1 + $0xd6c] ss:$16 sps:$4 sm:$0xff]   ;;  %v18733_v2 = vld [vmem:[%s27988_s1 + $0xd60] ss:$16 sps:$4 sm:$0xff]  }
 0x173   :  { %8332 = vmatpush1.bf16.msra.mxu0 %v18641_v3  ;;  %9193 = vmatpush1.bf16.msra.mxu1 %v18644_v4  ;;  %v18736_v3 = vld [vmem:[%s27988_s1 + $0xd68] ss:$16 sps:$4 sm:$0xff]   ;;  %v18741_v4 = vld [vmem:[%s27988_s1 + $0xd84] ss:$16 sps:$4 sm:$0xff]  }
 0x174   :  { %8333 = vmatprep.subr.bf16.mxu0 %v18649_v5  ;;  %9194 = vmatprep.subr.bf16.mxu1 %v18652_v6  ;;  %v18744_v5 = vld [vmem:[%s27988_s1 + $0xd8c] ss:$16 sps:$4 sm:$0xff]   ;;  %v18739_v6 = vld [vmem:[%s27988_s1 + $0xd80] ss:$16 sps:$4 sm:$0xff]  }
 0x177   :  { %8334 = vmatpush1.bf16.msra.mxu0 %v18647_v7  ;;  %9195 = vmatpush1.bf16.msra.mxu1 %v18650_v8  ;;  %v18742_v7 = vld [vmem:[%s27988_s1 + $0xd88] ss:$16 sps:$4 sm:$0xff]   ;;  %v18747_v8 = vld [vmem:[%s27988_s1 + $0xda4] ss:$16 sps:$4 sm:$0xff]  }
 0x178   :  { %8335 = vmatprep.subr.bf16.mxu0 %v18655_v9  ;;  %9196 = vmatprep.subr.bf16.mxu1 %v18658_v10  ;;  %v18750_v9 = vld [vmem:[%s27988_s1 + $0xdac] ss:$16 sps:$4 sm:$0xff]   ;;  %v18745_v10 = vld [vmem:[%s27988_s1 + $0xda0] ss:$16 sps:$4 sm:$0xff]  }
 0x17b   :  { %8336 = vmatpush1.bf16.msra.mxu0 %v18653_v12  ;;  %9197 = vmatpush1.bf16.msra.mxu1 %v18656_v13  ;;  %v18748_v12 = vld [vmem:[%s27988_s1 + $0xda8] ss:$16 sps:$4 sm:$0xff]   ;;  %v18753_v13 = vld [vmem:[%s27988_s1 + $0xdc4] ss:$16 sps:$4 sm:$0xff]  }
 0x17c   :  { %8337 = vmatprep.subr.bf16.mxu0 %v18661_v15  ;;  %9198 = vmatprep.subr.bf16.mxu1 %v18664_v11  ;;  %v18756_v15 = vld [vmem:[%s27988_s1 + $0xdcc] ss:$16 sps:$4 sm:$0xff]   ;;  %v18751_v11 = vld [vmem:[%s27988_s1 + $0xdc0] ss:$16 sps:$4 sm:$0xff]  }
 0x17f   :  { %8338 = vmatpush1.bf16.msra.mxu0 %v18659_v17  ;;  %9199 = vmatpush1.bf16.msra.mxu1 %v18662_v14  ;;  %v18754_v17 = vld [vmem:[%s27988_s1 + $0xdc8] ss:$16 sps:$4 sm:$0xff]   ;;  %v18759_v14 = vld [vmem:[%s27988_s1 + $0xde4] ss:$16 sps:$4 sm:$0xff]  }
 0x180   :  { %8348 = vmatprep.subr.bf16.mxu0 %v18669_v19  ;;  %9209 = vmatprep.subr.bf16.mxu1 %v18672_v20  ;;  %v18762_v19 = vld [vmem:[%s27988_s1 + $0xdec] ss:$16 sps:$4 sm:$0xff]   ;;  %v18757_v20 = vld [vmem:[%s27988_s1 + $0xde0] ss:$16 sps:$4 sm:$0xff]  }
 0x182   :  { %8340 = vmatmul.mubr.bf16.vlgmr.msra.gmra.mrb[0].mxu0 %v15717_v16  ;;  %9201 = vmatmul.mubr.bf16.vlgmr.msra.gmra.mrb[0].mxu1 %v15717_v16  ;;  %v18760_v16 = vld [vmem:[%s27988_s1 + $0xde8] ss:$16 sps:$4 sm:$0xff]  }
 0x183   :  { %8349 = vmatpush1.bf16.msra.mxu0 %v18667_v22  ;;  %9210 = vmatpush1.bf16.msra.mxu1 %v18670_v23  ;;  %v18767_v22 = vld [vmem:[%s27988_s1 + $0xe04] ss:$16 sps:$4 sm:$0xff]   ;;  %v18770_v23 = vld [vmem:[%s27988_s1 + $0xe0c] ss:$16 sps:$4 sm:$0xff]  }
 0x184   :  { %8350 = vmatprep.subr.bf16.mxu0 %v18675_v24  ;;  %9211 = vmatprep.subr.bf16.mxu1 %v18678_v18  ;;  %v22754_v24 = vld [vmem:[%s27989_s0 + $0x38] sm:$0xff]  ;;  %v15719_v18 = vcombine.low %v22553_v21, %v22553_v21 }
 0x185   :  { %8380 = vmatprep.mubr.bf16.mxu0 %v15720_v25  ;;  %9241 = vmatprep.mubr.bf16.mxu1 %v15720_v25  ;;  %v18765_v25 = vld [vmem:[%s27988_s1 + $0xe00] ss:$16 sps:$4 sm:$0xff]   ;;  %v18776_v21 = vld [vmem:[%s27988_s1 + $0xe2c] ss:$16 sps:$4 sm:$0xff]  }
 0x187   :  { %8351 = vmatpush1.bf16.msra.mxu0 %v18673_v26  ;;  %9212 = vmatpush1.bf16.msra.mxu1 %v18676_v27  ;;  %v18768_v26 = vld [vmem:[%s27988_s1 + $0xe08] ss:$16 sps:$4 sm:$0xff]   ;;  %v18773_v27 = vld [vmem:[%s27988_s1 + $0xe24] ss:$16 sps:$4 sm:$0xff]  }
 0x188   :  { %8352 = vmatprep.subr.bf16.mxu0 %v18681_v28  ;;  %9213 = vmatprep.subr.bf16.mxu1 %v18684_v29  ;;  %v15722_v28 = vcombine.high %v22754_v24, %v22754_v24  ;;  %v18771_v29 = vld [vmem:[%s27988_s1 + $0xe20] ss:$16 sps:$4 sm:$0xff]  }
 0x18b   :  { %8353 = vmatpush1.bf16.msra.mxu0 %v18679_v30  ;;  %9214 = vmatpush1.bf16.msra.mxu1 %v18682_v31  ;;  %v18774_v30 = vld [vmem:[%s27988_s1 + $0xe28] ss:$16 sps:$4 sm:$0xff]   ;;  %v18779_v31 = vld [vmem:[%s27988_s1 + $0xe44] ss:$16 sps:$4 sm:$0xff]  }
 0x18c   :  { %8354 = vmatprep.subr.bf16.mxu0 %v18687_v32  ;;  %9215 = vmatprep.subr.bf16.mxu1 %v18690_v33  ;;  %v18782_v32 = vld [vmem:[%s27988_s1 + $0xe4c] ss:$16 sps:$4 sm:$0xff]   ;;  %v18777_v33 = vld [vmem:[%s27988_s1 + $0xe40] ss:$16 sps:$4 sm:$0xff]  }
 0x18f   :  { %8355 = vmatpush1.bf16.msra.mxu0 %v18685_v34  ;;  %9216 = vmatpush1.bf16.msra.mxu1 %v18688_v35  ;;  %v18780_v34 = vld [vmem:[%s27988_s1 + $0xe48] ss:$16 sps:$4 sm:$0xff]   ;;  %v18785_v35 = vld [vmem:[%s27988_s1 + $0xe64] ss:$16 sps:$4 sm:$0xff]  }
 0x190   :  { %8356 = vmatprep.subr.bf16.mxu0 %v18693_v36  ;;  %9217 = vmatprep.subr.bf16.mxu1 %v18696_v37  ;;  %v18788_v36 = vld [vmem:[%s27988_s1 + $0xe6c] ss:$16 sps:$4 sm:$0xff]   ;;  %v18783_v37 = vld [vmem:[%s27988_s1 + $0xe60] ss:$16 sps:$4 sm:$0xff]  }
 0x193   :  { %8357 = vmatpush1.bf16.msra.mxu0 %v18691_v38  ;;  %9218 = vmatpush1.bf16.msra.mxu1 %v18694_v39  ;;  %v18786_v38 = vld [vmem:[%s27988_s1 + $0xe68] ss:$16 sps:$4 sm:$0xff]   ;;  %v18791_v39 = vld [vmem:[%s27988_s1 + $0xe84] ss:$16 sps:$4 sm:$0xff]  }
 0x194   :  { %8358 = vmatprep.subr.bf16.mxu0 %v18699_v40  ;;  %9219 = vmatprep.subr.bf16.mxu1 %v18702_v41  ;;  %v18794_v40 = vld [vmem:[%s27988_s1 + $0xe8c] ss:$16 sps:$4 sm:$0xff]   ;;  %v18789_v41 = vld [vmem:[%s27988_s1 + $0xe80] ss:$16 sps:$4 sm:$0xff]  }
 0x197   :  { %8359 = vmatpush1.bf16.msra.mxu0 %v18697_v42  ;;  %9220 = vmatpush1.bf16.msra.mxu1 %v18700_v43  ;;  %v18792_v42 = vld [vmem:[%s27988_s1 + $0xe88] ss:$16 sps:$4 sm:$0xff]   ;;  %v18797_v43 = vld [vmem:[%s27988_s1 + $0xea4] ss:$16 sps:$4 sm:$0xff]  }
 0x198   :  { %8360 = vmatprep.subr.bf16.mxu0 %v18705_v44  ;;  %9221 = vmatprep.subr.bf16.mxu1 %v18708_v45  ;;  %v18800_v44 = vld [vmem:[%s27988_s1 + $0xeac] ss:$16 sps:$4 sm:$0xff]   ;;  %v18795_v45 = vld [vmem:[%s27988_s1 + $0xea0] ss:$16 sps:$4 sm:$0xff]  }
 0x19b   :  { %8361 = vmatpush1.bf16.msra.mxu0 %v18703_v46  ;;  %9222 = vmatpush1.bf16.msra.mxu1 %v18706_v47  ;;  %v18798_v46 = vld [vmem:[%s27988_s1 + $0xea8] ss:$16 sps:$4 sm:$0xff]   ;;  %v18803_v47 = vld [vmem:[%s27988_s1 + $0xec4] ss:$16 sps:$4 sm:$0xff]  }
 0x19c   :  { %8362 = vmatprep.subr.bf16.mxu0 %v18711_v48  ;;  %9223 = vmatprep.subr.bf16.mxu1 %v18714_v49  ;;  %v18806_v48 = vld [vmem:[%s27988_s1 + $0xecc] ss:$16 sps:$4 sm:$0xff]   ;;  %v18801_v49 = vld [vmem:[%s27988_s1 + $0xec0] ss:$16 sps:$4 sm:$0xff]  }
 0x19f   :  { %8363 = vmatpush1.bf16.msra.mxu0 %v18709_v50  ;;  %9224 = vmatpush1.bf16.msra.mxu1 %v18712_v51  ;;  %v18804_v50 = vld [vmem:[%s27988_s1 + $0xec8] ss:$16 sps:$4 sm:$0xff]   ;;  %v18809_v51 = vld [vmem:[%s27988_s1 + $0xee4] ss:$16 sps:$4 sm:$0xff]  }
 0x1a0   :  { %8364 = vmatprep.subr.bf16.mxu0 %v18717_v52  ;;  %9225 = vmatprep.subr.bf16.mxu1 %v18720_v53  ;;  %v18812_v52 = vld [vmem:[%s27988_s1 + $0xeec] ss:$16 sps:$4 sm:$0xff]   ;;  %v18807_v53 = vld [vmem:[%s27988_s1 + $0xee0] ss:$16 sps:$4 sm:$0xff]  }
 0x1a3   :  { %8365 = vmatpush1.bf16.msra.mxu0 %v18715_v54  ;;  %9226 = vmatpush1.bf16.msra.mxu1 %v18718_v55  ;;  %v18810_v54 = vld [vmem:[%s27988_s1 + $0xee8] ss:$16 sps:$4 sm:$0xff]   ;;  %v18815_v55 = vld [vmem:[%s27988_s1 + $0xf04] ss:$16 sps:$4 sm:$0xff]  }
 0x1a4   :  { %8366 = vmatprep.subr.bf16.mxu0 %v18723_v56  ;;  %9227 = vmatprep.subr.bf16.mxu1 %v18726_v57  ;;  %v18818_v56 = vld [vmem:[%s27988_s1 + $0xf0c] ss:$16 sps:$4 sm:$0xff]   ;;  %v18813_v57 = vld [vmem:[%s27988_s1 + $0xf00] ss:$16 sps:$4 sm:$0xff]  }
 0x1a7   :  { %8367 = vmatpush1.bf16.msra.mxu0 %v18721_v58  ;;  %9228 = vmatpush1.bf16.msra.mxu1 %v18724_v59  ;;  %v18816_v58 = vld [vmem:[%s27988_s1 + $0xf08] ss:$16 sps:$4 sm:$0xff]   ;;  %v18821_v59 = vld [vmem:[%s27988_s1 + $0xf24] ss:$16 sps:$4 sm:$0xff]  }
 0x1a8   :  { %8368 = vmatprep.subr.bf16.mxu0 %v18729_v60  ;;  %9229 = vmatprep.subr.bf16.mxu1 %v18732_v61  ;;  %v18824_v60 = vld [vmem:[%s27988_s1 + $0xf2c] ss:$16 sps:$4 sm:$0xff]   ;;  %v18819_v61 = vld [vmem:[%s27988_s1 + $0xf20] ss:$16 sps:$4 sm:$0xff]  }
 0x1ab   :  { %8369 = vmatpush1.bf16.msra.mxu0 %v18727_v62  ;;  %9230 = vmatpush1.bf16.msra.mxu1 %v18730_v63  ;;  %v18822_v62 = vld [vmem:[%s27988_s1 + $0xf28] ss:$16 sps:$4 sm:$0xff]   ;;  %v18827_v63 = vld [vmem:[%s27988_s1 + $0xf44] ss:$16 sps:$4 sm:$0xff]  }
 0x1ac   :  { %8370 = vmatprep.subr.bf16.mxu0 %v18735_v0  ;;  %9231 = vmatprep.subr.bf16.mxu1 %v18738_v1  ;;  %v18830_v0 = vld [vmem:[%s27988_s1 + $0xf4c] ss:$16 sps:$4 sm:$0xff]   ;;  %v18825_v1 = vld [vmem:[%s27988_s1 + $0xf40] ss:$16 sps:$4 sm:$0xff]  }
 0x1af   :  { %8371 = vmatpush1.bf16.msra.mxu0 %v18733_v2  ;;  %9232 = vmatpush1.bf16.msra.mxu1 %v18736_v3  ;;  %v18828_v2 = vld [vmem:[%s27988_s1 + $0xf48] ss:$16 sps:$4 sm:$0xff]   ;;  %v18833_v3 = vld [vmem:[%s27988_s1 + $0xf64] ss:$16 sps:$4 sm:$0xff]  }
 0x1b0   :  { %8372 = vmatprep.subr.bf16.mxu0 %v18741_v4  ;;  %9233 = vmatprep.subr.bf16.mxu1 %v18744_v5  ;;  %v18836_v4 = vld [vmem:[%s27988_s1 + $0xf6c] ss:$16 sps:$4 sm:$0xff]   ;;  %v18831_v5 = vld [vmem:[%s27988_s1 + $0xf60] ss:$16 sps:$4 sm:$0xff]  }
 0x1b3   :  { %8373 = vmatpush1.bf16.msra.mxu0 %v18739_v6  ;;  %9234 = vmatpush1.bf16.msra.mxu1 %v18742_v7  ;;  %v18834_v6 = vld [vmem:[%s27988_s1 + $0xf68] ss:$16 sps:$4 sm:$0xff]   ;;  %v18839_v7 = vld [vmem:[%s27988_s1 + $0xf84] ss:$16 sps:$4 sm:$0xff]  }
 0x1b4   :  { %8374 = vmatprep.subr.bf16.mxu0 %v18747_v8  ;;  %9235 = vmatprep.subr.bf16.mxu1 %v18750_v9  ;;  %v18842_v8 = vld [vmem:[%s27988_s1 + $0xf8c] ss:$16 sps:$4 sm:$0xff]   ;;  %v18837_v9 = vld [vmem:[%s27988_s1 + $0xf80] ss:$16 sps:$4 sm:$0xff]  }
 0x1b7   :  { %8375 = vmatpush1.bf16.msra.mxu0 %v18745_v10  ;;  %9236 = vmatpush1.bf16.msra.mxu1 %v18748_v12  ;;  %v18840_v10 = vld [vmem:[%s27988_s1 + $0xf88] ss:$16 sps:$4 sm:$0xff]   ;;  %v18845_v12 = vld [vmem:[%s27988_s1 + $0xfa4] ss:$16 sps:$4 sm:$0xff]  }
 0x1b8   :  { %8376 = vmatprep.subr.bf16.mxu0 %v18753_v13  ;;  %9237 = vmatprep.subr.bf16.mxu1 %v18756_v15  ;;  %v18848_v13 = vld [vmem:[%s27988_s1 + $0xfac] ss:$16 sps:$4 sm:$0xff]   ;;  %v18843_v15 = vld [vmem:[%s27988_s1 + $0xfa0] ss:$16 sps:$4 sm:$0xff]  }
 0x1bb   :  { %8377 = vmatpush1.bf16.msra.mxu0 %v18751_v11  ;;  %9238 = vmatpush1.bf16.msra.mxu1 %v18754_v17  ;;  %v18846_v11 = vld [vmem:[%s27988_s1 + $0xfa8] ss:$16 sps:$4 sm:$0xff]   ;;  %v18851_v17 = vld [vmem:[%s27988_s1 + $0xfc4] ss:$16 sps:$4 sm:$0xff]  }
 0x1bc   :  { %8378 = vmatprep.subr.bf16.mxu0 %v18759_v14  ;;  %9239 = vmatprep.subr.bf16.mxu1 %v18762_v19  ;;  %v18854_v14 = vld [vmem:[%s27988_s1 + $0xfcc] ss:$16 sps:$4 sm:$0xff]   ;;  %v18849_v19 = vld [vmem:[%s27988_s1 + $0xfc0] ss:$16 sps:$4 sm:$0xff]  }
 0x1bf   :  { %8379 = vmatpush1.bf16.msra.mxu0 %v18757_v20  ;;  %9240 = vmatpush1.bf16.msra.mxu1 %v18760_v16  ;;  %v18852_v20 = vld [vmem:[%s27988_s1 + $0xfc8] ss:$16 sps:$4 sm:$0xff]   ;;  %v18857_v16 = vld [vmem:[%s27988_s1 + $0xfe4] ss:$16 sps:$4 sm:$0xff]  }
 0x1c0   :  { %8389 = vmatprep.subr.bf16.mxu0 %v18767_v22  ;;  %9250 = vmatprep.subr.bf16.mxu1 %v18770_v23  ;;  %v18860_v22 = vld [vmem:[%s27988_s1 + $0xfec] ss:$16 sps:$4 sm:$0xff]   ;;  %v18855_v23 = vld [vmem:[%s27988_s1 + $0xfe0] ss:$16 sps:$4 sm:$0xff]  }
 0x1c2   :  { %8381 = vmatmul.mubr.bf16.vlgmr.msra.gmra.mrb[0].mxu0 %v15719_v18  ;;  %9242 = vmatmul.mubr.bf16.vlgmr.msra.gmra.mrb[0].mxu1 %v15719_v18  ;;  %v18858_v18 = vld [vmem:[%s27988_s1 + $0xfe8] ss:$16 sps:$4 sm:$0xff]  }
 0x1c3   :  { %8390 = vmatpush1.bf16.msra.mxu0 %v18765_v25  ;;  %9251 = vmatpush1.bf16.msra.mxu1 %v18768_v26  ;;  %v18865_v25 = vld [vmem:[%s27988_s1 + $0x1004] ss:$16 sps:$4 sm:$0xff]   ;;  %v18868_v26 = vld [vmem:[%s27988_s1 + $0x100c] ss:$16 sps:$4 sm:$0xff]  }
 0x1c4   :  { %8391 = vmatprep.subr.bf16.mxu0 %v18773_v27  ;;  %9252 = vmatprep.subr.bf16.mxu1 %v18776_v21  ;;  %v22955_v27 = vld [vmem:[%s27989_s0 + $0x40] sm:$0xff]  ;;  %v15721_v21 = vcombine.low %v22754_v24, %v22754_v24  ;;  %v18874_v24 = vld [vmem:[%s27988_s1 + $0x102c] ss:$16 sps:$4 sm:$0xff]  }
 0x1c5   :  { %8421 = vmatprep.mubr.bf16.mxu0 %v15722_v28  ;;  %9282 = vmatprep.mubr.bf16.mxu1 %v15722_v28  ;;  %v18863_v28 = vld [vmem:[%s27988_s1 + $0x1000] ss:$16 sps:$4 sm:$0xff]  }
 0x1c7   :  { %8392 = vmatpush1.bf16.msra.mxu0 %v18771_v29  ;;  %9253 = vmatpush1.bf16.msra.mxu1 %v18774_v30  ;;  %v18866_v29 = vld [vmem:[%s27988_s1 + $0x1008] ss:$16 sps:$4 sm:$0xff]   ;;  %v18871_v30 = vld [vmem:[%s27988_s1 + $0x1024] ss:$16 sps:$4 sm:$0xff]  }
 0x1c8   :  { %8393 = vmatprep.subr.bf16.mxu0 %v18779_v31  ;;  %9254 = vmatprep.subr.bf16.mxu1 %v18782_v32  ;;  %v15724_v31 = vcombine.high %v22955_v27, %v22955_v27  ;;  %v18869_v32 = vld [vmem:[%s27988_s1 + $0x1020] ss:$16 sps:$4 sm:$0xff]  }
 0x1cb   :  { %8394 = vmatpush1.bf16.msra.mxu0 %v18777_v33  ;;  %9255 = vmatpush1.bf16.msra.mxu1 %v18780_v34  ;;  %v18872_v33 = vld [vmem:[%s27988_s1 + $0x1028] ss:$16 sps:$4 sm:$0xff]   ;;  %v18877_v34 = vld [vmem:[%s27988_s1 + $0x1044] ss:$16 sps:$4 sm:$0xff]  }
 0x1cc   :  { %8395 = vmatprep.subr.bf16.mxu0 %v18785_v35  ;;  %9256 = vmatprep.subr.bf16.mxu1 %v18788_v36  ;;  %v18880_v35 = vld [vmem:[%s27988_s1 + $0x104c] ss:$16 sps:$4 sm:$0xff]   ;;  %v18875_v36 = vld [vmem:[%s27988_s1 + $0x1040] ss:$16 sps:$4 sm:$0xff]  }
 0x1cf   :  { %8396 = vmatpush1.bf16.msra.mxu0 %v18783_v37  ;;  %9257 = vmatpush1.bf16.msra.mxu1 %v18786_v38  ;;  %v18878_v37 = vld [vmem:[%s27988_s1 + $0x1048] ss:$16 sps:$4 sm:$0xff]   ;;  %v18883_v38 = vld [vmem:[%s27988_s1 + $0x1064] ss:$16 sps:$4 sm:$0xff]  }
 0x1d0   :  { %8397 = vmatprep.subr.bf16.mxu0 %v18791_v39  ;;  %9258 = vmatprep.subr.bf16.mxu1 %v18794_v40  ;;  %v18886_v39 = vld [vmem:[%s27988_s1 + $0x106c] ss:$16 sps:$4 sm:$0xff]   ;;  %v18881_v40 = vld [vmem:[%s27988_s1 + $0x1060] ss:$16 sps:$4 sm:$0xff]  }
 0x1d3   :  { %8398 = vmatpush1.bf16.msra.mxu0 %v18789_v41  ;;  %9259 = vmatpush1.bf16.msra.mxu1 %v18792_v42  ;;  %v18884_v41 = vld [vmem:[%s27988_s1 + $0x1068] ss:$16 sps:$4 sm:$0xff]   ;;  %v18889_v42 = vld [vmem:[%s27988_s1 + $0x1084] ss:$16 sps:$4 sm:$0xff]  }
 0x1d4   :  { %8399 = vmatprep.subr.bf16.mxu0 %v18797_v43  ;;  %9260 = vmatprep.subr.bf16.mxu1 %v18800_v44  ;;  %v18892_v43 = vld [vmem:[%s27988_s1 + $0x108c] ss:$16 sps:$4 sm:$0xff]   ;;  %v18887_v44 = vld [vmem:[%s27988_s1 + $0x1080] ss:$16 sps:$4 sm:$0xff]  }
 0x1d7   :  { %8400 = vmatpush1.bf16.msra.mxu0 %v18795_v45  ;;  %9261 = vmatpush1.bf16.msra.mxu1 %v18798_v46  ;;  %v18890_v45 = vld [vmem:[%s27988_s1 + $0x1088] ss:$16 sps:$4 sm:$0xff]   ;;  %v18895_v46 = vld [vmem:[%s27988_s1 + $0x10a4] ss:$16 sps:$4 sm:$0xff]  }
 0x1d8   :  { %8401 = vmatprep.subr.bf16.mxu0 %v18803_v47  ;;  %9262 = vmatprep.subr.bf16.mxu1 %v18806_v48  ;;  %v18898_v47 = vld [vmem:[%s27988_s1 + $0x10ac] ss:$16 sps:$4 sm:$0xff]   ;;  %v18893_v48 = vld [vmem:[%s27988_s1 + $0x10a0] ss:$16 sps:$4 sm:$0xff]  }
 0x1db   :  { %8402 = vmatpush1.bf16.msra.mxu0 %v18801_v49  ;;  %9263 = vmatpush1.bf16.msra.mxu1 %v18804_v50  ;;  %v18896_v49 = vld [vmem:[%s27988_s1 + $0x10a8] ss:$16 sps:$4 sm:$0xff]   ;;  %v18901_v50 = vld [vmem:[%s27988_s1 + $0x10c4] ss:$16 sps:$4 sm:$0xff]  }
 0x1dc   :  { %8403 = vmatprep.subr.bf16.mxu0 %v18809_v51  ;;  %9264 = vmatprep.subr.bf16.mxu1 %v18812_v52  ;;  %v18904_v51 = vld [vmem:[%s27988_s1 + $0x10cc] ss:$16 sps:$4 sm:$0xff]   ;;  %v18899_v52 = vld [vmem:[%s27988_s1 + $0x10c0] ss:$16 sps:$4 sm:$0xff]  }
 0x1df   :  { %8404 = vmatpush1.bf16.msra.mxu0 %v18807_v53  ;;  %9265 = vmatpush1.bf16.msra.mxu1 %v18810_v54  ;;  %v18902_v53 = vld [vmem:[%s27988_s1 + $0x10c8] ss:$16 sps:$4 sm:$0xff]   ;;  %v18907_v54 = vld [vmem:[%s27988_s1 + $0x10e4] ss:$16 sps:$4 sm:$0xff]  }
 0x1e0   :  { %8405 = vmatprep.subr.bf16.mxu0 %v18815_v55  ;;  %9266 = vmatprep.subr.bf16.mxu1 %v18818_v56  ;;  %v18910_v55 = vld [vmem:[%s27988_s1 + $0x10ec] ss:$16 sps:$4 sm:$0xff]   ;;  %v18905_v56 = vld [vmem:[%s27988_s1 + $0x10e0] ss:$16 sps:$4 sm:$0xff]  }
 0x1e3   :  { %8406 = vmatpush1.bf16.msra.mxu0 %v18813_v57  ;;  %9267 = vmatpush1.bf16.msra.mxu1 %v18816_v58  ;;  %v18908_v57 = vld [vmem:[%s27988_s1 + $0x10e8] ss:$16 sps:$4 sm:$0xff]   ;;  %v18913_v58 = vld [vmem:[%s27988_s1 + $0x1104] ss:$16 sps:$4 sm:$0xff]  }
 0x1e4   :  { %8407 = vmatprep.subr.bf16.mxu0 %v18821_v59  ;;  %9268 = vmatprep.subr.bf16.mxu1 %v18824_v60  ;;  %v18916_v59 = vld [vmem:[%s27988_s1 + $0x110c] ss:$16 sps:$4 sm:$0xff]   ;;  %v18911_v60 = vld [vmem:[%s27988_s1 + $0x1100] ss:$16 sps:$4 sm:$0xff]  }
 0x1e7   :  { %8408 = vmatpush1.bf16.msra.mxu0 %v18819_v61  ;;  %9269 = vmatpush1.bf16.msra.mxu1 %v18822_v62  ;;  %v18914_v61 = vld [vmem:[%s27988_s1 + $0x1108] ss:$16 sps:$4 sm:$0xff]   ;;  %v18919_v62 = vld [vmem:[%s27988_s1 + $0x1124] ss:$16 sps:$4 sm:$0xff]  }
 0x1e8   :  { %8409 = vmatprep.subr.bf16.mxu0 %v18827_v63  ;;  %9270 = vmatprep.subr.bf16.mxu1 %v18830_v0  ;;  %v18922_v63 = vld [vmem:[%s27988_s1 + $0x112c] ss:$16 sps:$4 sm:$0xff]   ;;  %v18917_v0 = vld [vmem:[%s27988_s1 + $0x1120] ss:$16 sps:$4 sm:$0xff]  }
 0x1eb   :  { %8410 = vmatpush1.bf16.msra.mxu0 %v18825_v1  ;;  %9271 = vmatpush1.bf16.msra.mxu1 %v18828_v2  ;;  %v18920_v1 = vld [vmem:[%s27988_s1 + $0x1128] ss:$16 sps:$4 sm:$0xff]   ;;  %v18925_v2 = vld [vmem:[%s27988_s1 + $0x1144] ss:$16 sps:$4 sm:$0xff]  }
 0x1ec   :  { %8411 = vmatprep.subr.bf16.mxu0 %v18833_v3  ;;  %9272 = vmatprep.subr.bf16.mxu1 %v18836_v4  ;;  %v18928_v3 = vld [vmem:[%s27988_s1 + $0x114c] ss:$16 sps:$4 sm:$0xff]   ;;  %v18923_v4 = vld [vmem:[%s27988_s1 + $0x1140] ss:$16 sps:$4 sm:$0xff]  }
 0x1ef   :  { %8412 = vmatpush1.bf16.msra.mxu0 %v18831_v5  ;;  %9273 = vmatpush1.bf16.msra.mxu1 %v18834_v6  ;;  %v18926_v5 = vld [vmem:[%s27988_s1 + $0x1148] ss:$16 sps:$4 sm:$0xff]   ;;  %v18931_v6 = vld [vmem:[%s27988_s1 + $0x1164] ss:$16 sps:$4 sm:$0xff]  }
 0x1f0   :  { %8413 = vmatprep.subr.bf16.mxu0 %v18839_v7  ;;  %9274 = vmatprep.subr.bf16.mxu1 %v18842_v8  ;;  %v18934_v7 = vld [vmem:[%s27988_s1 + $0x116c] ss:$16 sps:$4 sm:$0xff]   ;;  %v18929_v8 = vld [vmem:[%s27988_s1 + $0x1160] ss:$16 sps:$4 sm:$0xff]  }
 0x1f3   :  { %8414 = vmatpush1.bf16.msra.mxu0 %v18837_v9  ;;  %9275 = vmatpush1.bf16.msra.mxu1 %v18840_v10  ;;  %v18932_v9 = vld [vmem:[%s27988_s1 + $0x1168] ss:$16 sps:$4 sm:$0xff]   ;;  %v18937_v10 = vld [vmem:[%s27988_s1 + $0x1184] ss:$16 sps:$4 sm:$0xff]  }
 0x1f4   :  { %8415 = vmatprep.subr.bf16.mxu0 %v18845_v12  ;;  %9276 = vmatprep.subr.bf16.mxu1 %v18848_v13  ;;  %v18940_v12 = vld [vmem:[%s27988_s1 + $0x118c] ss:$16 sps:$4 sm:$0xff]   ;;  %v18935_v13 = vld [vmem:[%s27988_s1 + $0x1180] ss:$16 sps:$4 sm:$0xff]  }
 0x1f7   :  { %8416 = vmatpush1.bf16.msra.mxu0 %v18843_v15  ;;  %9277 = vmatpush1.bf16.msra.mxu1 %v18846_v11  ;;  %v18938_v15 = vld [vmem:[%s27988_s1 + $0x1188] ss:$16 sps:$4 sm:$0xff]   ;;  %v18943_v11 = vld [vmem:[%s27988_s1 + $0x11a4] ss:$16 sps:$4 sm:$0xff]  }
 0x1f8   :  { %8417 = vmatprep.subr.bf16.mxu0 %v18851_v17  ;;  %9278 = vmatprep.subr.bf16.mxu1 %v18854_v14  ;;  %v18946_v17 = vld [vmem:[%s27988_s1 + $0x11ac] ss:$16 sps:$4 sm:$0xff]   ;;  %v18941_v14 = vld [vmem:[%s27988_s1 + $0x11a0] ss:$16 sps:$4 sm:$0xff]  }
 0x1fb   :  { %8418 = vmatpush1.bf16.msra.mxu0 %v18849_v19  ;;  %9279 = vmatpush1.bf16.msra.mxu1 %v18852_v20  ;;  %v18944_v19 = vld [vmem:[%s27988_s1 + $0x11a8] ss:$16 sps:$4 sm:$0xff]   ;;  %v18949_v20 = vld [vmem:[%s27988_s1 + $0x11c4] ss:$16 sps:$4 sm:$0xff]  }
 0x1fc   :  { %8419 = vmatprep.subr.bf16.mxu0 %v18857_v16  ;;  %9280 = vmatprep.subr.bf16.mxu1 %v18860_v22  ;;  %v18952_v16 = vld [vmem:[%s27988_s1 + $0x11cc] ss:$16 sps:$4 sm:$0xff]   ;;  %v18947_v22 = vld [vmem:[%s27988_s1 + $0x11c0] ss:$16 sps:$4 sm:$0xff]  }
 0x1ff   :  { %8420 = vmatpush1.bf16.msra.mxu0 %v18855_v23  ;;  %9281 = vmatpush1.bf16.msra.mxu1 %v18858_v18  ;;  %v18950_v23 = vld [vmem:[%s27988_s1 + $0x11c8] ss:$16 sps:$4 sm:$0xff]   ;;  %v18955_v18 = vld [vmem:[%s27988_s1 + $0x11e4] ss:$16 sps:$4 sm:$0xff]  }
 0x200   :  { %8430 = vmatprep.subr.bf16.mxu0 %v18865_v25  ;;  %9291 = vmatprep.subr.bf16.mxu1 %v18868_v26  ;;  %v18958_v25 = vld [vmem:[%s27988_s1 + $0x11ec] ss:$16 sps:$4 sm:$0xff]   ;;  %v18953_v26 = vld [vmem:[%s27988_s1 + $0x11e0] ss:$16 sps:$4 sm:$0xff]  }
 0x202   :  { %8422 = vmatmul.mubr.bf16.vlgmr.msra.gmra.mrb[0].mxu0 %v15721_v21  ;;  %9283 = vmatmul.mubr.bf16.vlgmr.msra.gmra.mrb[0].mxu1 %v15721_v21  ;;  %v18956_v21 = vld [vmem:[%s27988_s1 + $0x11e8] ss:$16 sps:$4 sm:$0xff]  }
 0x203   :  { %8431 = vmatpush1.bf16.msra.mxu0 %v18863_v28  ;;  %9292 = vmatpush1.bf16.msra.mxu1 %v18866_v29  ;;  %v18963_v28 = vld [vmem:[%s27988_s1 + $0x1204] ss:$16 sps:$4 sm:$0xff]   ;;  %v18966_v29 = vld [vmem:[%s27988_s1 + $0x120c] ss:$16 sps:$4 sm:$0xff]  }
 0x204   :  { %8432 = vmatprep.subr.bf16.mxu0 %v18871_v30  ;;  %9293 = vmatprep.subr.bf16.mxu1 %v18874_v24  ;;  %v23156_v30 = vld [vmem:[%s27989_s0 + $0x48] sm:$0xff]  ;;  %v15723_v24 = vcombine.low %v22955_v27, %v22955_v27 }
 0x205   :  { %8462 = vmatprep.mubr.bf16.mxu0 %v15724_v31  ;;  %9323 = vmatprep.mubr.bf16.mxu1 %v15724_v31  ;;  %v18961_v31 = vld [vmem:[%s27988_s1 + $0x1200] ss:$16 sps:$4 sm:$0xff]   ;;  %v18972_v27 = vld [vmem:[%s27988_s1 + $0x122c] ss:$16 sps:$4 sm:$0xff]  }
 0x207   :  { %8433 = vmatpush1.bf16.msra.mxu0 %v18869_v32  ;;  %9294 = vmatpush1.bf16.msra.mxu1 %v18872_v33  ;;  %v18964_v32 = vld [vmem:[%s27988_s1 + $0x1208] ss:$16 sps:$4 sm:$0xff]   ;;  %v18969_v33 = vld [vmem:[%s27988_s1 + $0x1224] ss:$16 sps:$4 sm:$0xff]  }
 0x208   :  { %8434 = vmatprep.subr.bf16.mxu0 %v18877_v34  ;;  %9295 = vmatprep.subr.bf16.mxu1 %v18880_v35  ;;  %v15726_v34 = vcombine.high %v23156_v30, %v23156_v30  ;;  %v18967_v35 = vld [vmem:[%s27988_s1 + $0x1220] ss:$16 sps:$4 sm:$0xff]  }
 0x20b   :  { %8435 = vmatpush1.bf16.msra.mxu0 %v18875_v36  ;;  %9296 = vmatpush1.bf16.msra.mxu1 %v18878_v37  ;;  %v18970_v36 = vld [vmem:[%s27988_s1 + $0x1228] ss:$16 sps:$4 sm:$0xff]   ;;  %v18975_v37 = vld [vmem:[%s27988_s1 + $0x1244] ss:$16 sps:$4 sm:$0xff]  }
 0x20c   :  { %8436 = vmatprep.subr.bf16.mxu0 %v18883_v38  ;;  %9297 = vmatprep.subr.bf16.mxu1 %v18886_v39  ;;  %v18978_v38 = vld [vmem:[%s27988_s1 + $0x124c] ss:$16 sps:$4 sm:$0xff]   ;;  %v18973_v39 = vld [vmem:[%s27988_s1 + $0x1240] ss:$16 sps:$4 sm:$0xff]  }
 0x20f   :  { %8437 = vmatpush1.bf16.msra.mxu0 %v18881_v40  ;;  %9298 = vmatpush1.bf16.msra.mxu1 %v18884_v41  ;;  %v18976_v40 = vld [vmem:[%s27988_s1 + $0x1248] ss:$16 sps:$4 sm:$0xff]   ;;  %v18981_v41 = vld [vmem:[%s27988_s1 + $0x1264] ss:$16 sps:$4 sm:$0xff]  }
 0x210   :  { %8438 = vmatprep.subr.bf16.mxu0 %v18889_v42  ;;  %9299 = vmatprep.subr.bf16.mxu1 %v18892_v43  ;;  %v18984_v42 = vld [vmem:[%s27988_s1 + $0x126c] ss:$16 sps:$4 sm:$0xff]   ;;  %v18979_v43 = vld [vmem:[%s27988_s1 + $0x1260] ss:$16 sps:$4 sm:$0xff]  }
 0x213   :  { %8439 = vmatpush1.bf16.msra.mxu0 %v18887_v44  ;;  %9300 = vmatpush1.bf16.msra.mxu1 %v18890_v45  ;;  %v18982_v44 = vld [vmem:[%s27988_s1 + $0x1268] ss:$16 sps:$4 sm:$0xff]   ;;  %v18987_v45 = vld [vmem:[%s27988_s1 + $0x1284] ss:$16 sps:$4 sm:$0xff]  }
 0x214   :  { %8440 = vmatprep.subr.bf16.mxu0 %v18895_v46  ;;  %9301 = vmatprep.subr.bf16.mxu1 %v18898_v47  ;;  %v18990_v46 = vld [vmem:[%s27988_s1 + $0x128c] ss:$16 sps:$4 sm:$0xff]   ;;  %v18985_v47 = vld [vmem:[%s27988_s1 + $0x1280] ss:$16 sps:$4 sm:$0xff]  }
 0x217   :  { %8441 = vmatpush1.bf16.msra.mxu0 %v18893_v48  ;;  %9302 = vmatpush1.bf16.msra.mxu1 %v18896_v49  ;;  %v18988_v48 = vld [vmem:[%s27988_s1 + $0x1288] ss:$16 sps:$4 sm:$0xff]   ;;  %v18993_v49 = vld [vmem:[%s27988_s1 + $0x12a4] ss:$16 sps:$4 sm:$0xff]  }
 0x218   :  { %8442 = vmatprep.subr.bf16.mxu0 %v18901_v50  ;;  %9303 = vmatprep.subr.bf16.mxu1 %v18904_v51  ;;  %v18996_v50 = vld [vmem:[%s27988_s1 + $0x12ac] ss:$16 sps:$4 sm:$0xff]   ;;  %v18991_v51 = vld [vmem:[%s27988_s1 + $0x12a0] ss:$16 sps:$4 sm:$0xff]  }
 0x21b   :  { %8443 = vmatpush1.bf16.msra.mxu0 %v18899_v52  ;;  %9304 = vmatpush1.bf16.msra.mxu1 %v18902_v53  ;;  %v18994_v52 = vld [vmem:[%s27988_s1 + $0x12a8] ss:$16 sps:$4 sm:$0xff]   ;;  %v18999_v53 = vld [vmem:[%s27988_s1 + $0x12c4] ss:$16 sps:$4 sm:$0xff]  }
 0x21c   :  { %8444 = vmatprep.subr.bf16.mxu0 %v18907_v54  ;;  %9305 = vmatprep.subr.bf16.mxu1 %v18910_v55  ;;  %v19002_v54 = vld [vmem:[%s27988_s1 + $0x12cc] ss:$16 sps:$4 sm:$0xff]   ;;  %v18997_v55 = vld [vmem:[%s27988_s1 + $0x12c0] ss:$16 sps:$4 sm:$0xff]  }
 0x21f   :  { %8445 = vmatpush1.bf16.msra.mxu0 %v18905_v56  ;;  %9306 = vmatpush1.bf16.msra.mxu1 %v18908_v57  ;;  %v19000_v56 = vld [vmem:[%s27988_s1 + $0x12c8] ss:$16 sps:$4 sm:$0xff]   ;;  %v19005_v57 = vld [vmem:[%s27988_s1 + $0x12e4] ss:$16 sps:$4 sm:$0xff]  }
 0x220   :  { %8446 = vmatprep.subr.bf16.mxu0 %v18913_v58  ;;  %9307 = vmatprep.subr.bf16.mxu1 %v18916_v59  ;;  %v19008_v58 = vld [vmem:[%s27988_s1 + $0x12ec] ss:$16 sps:$4 sm:$0xff]   ;;  %v19003_v59 = vld [vmem:[%s27988_s1 + $0x12e0] ss:$16 sps:$4 sm:$0xff]  }
 0x223   :  { %8447 = vmatpush1.bf16.msra.mxu0 %v18911_v60  ;;  %9308 = vmatpush1.bf16.msra.mxu1 %v18914_v61  ;;  %v19006_v60 = vld [vmem:[%s27988_s1 + $0x12e8] ss:$16 sps:$4 sm:$0xff]   ;;  %v19011_v61 = vld [vmem:[%s27988_s1 + $0x1304] ss:$16 sps:$4 sm:$0xff]  }
 0x224   :  { %8448 = vmatprep.subr.bf16.mxu0 %v18919_v62  ;;  %9309 = vmatprep.subr.bf16.mxu1 %v18922_v63  ;;  %v19014_v62 = vld [vmem:[%s27988_s1 + $0x130c] ss:$16 sps:$4 sm:$0xff]   ;;  %v19009_v63 = vld [vmem:[%s27988_s1 + $0x1300] ss:$16 sps:$4 sm:$0xff]  }
 0x227   :  { %8449 = vmatpush1.bf16.msra.mxu0 %v18917_v0  ;;  %9310 = vmatpush1.bf16.msra.mxu1 %v18920_v1  ;;  %v19012_v0 = vld [vmem:[%s27988_s1 + $0x1308] ss:$16 sps:$4 sm:$0xff]   ;;  %v19017_v1 = vld [vmem:[%s27988_s1 + $0x1324] ss:$16 sps:$4 sm:$0xff]  }
 0x228   :  { %8450 = vmatprep.subr.bf16.mxu0 %v18925_v2  ;;  %9311 = vmatprep.subr.bf16.mxu1 %v18928_v3  ;;  %v19020_v2 = vld [vmem:[%s27988_s1 + $0x132c] ss:$16 sps:$4 sm:$0xff]   ;;  %v19015_v3 = vld [vmem:[%s27988_s1 + $0x1320] ss:$16 sps:$4 sm:$0xff]  }
 0x22b   :  { %8451 = vmatpush1.bf16.msra.mxu0 %v18923_v4  ;;  %9312 = vmatpush1.bf16.msra.mxu1 %v18926_v5  ;;  %v19018_v4 = vld [vmem:[%s27988_s1 + $0x1328] ss:$16 sps:$4 sm:$0xff]   ;;  %v19023_v5 = vld [vmem:[%s27988_s1 + $0x1344] ss:$16 sps:$4 sm:$0xff]  }
 0x22c   :  { %8452 = vmatprep.subr.bf16.mxu0 %v18931_v6  ;;  %9313 = vmatprep.subr.bf16.mxu1 %v18934_v7  ;;  %v19026_v6 = vld [vmem:[%s27988_s1 + $0x134c] ss:$16 sps:$4 sm:$0xff]   ;;  %v19021_v7 = vld [vmem:[%s27988_s1 + $0x1340] ss:$16 sps:$4 sm:$0xff]  }
 0x22f   :  { %8453 = vmatpush1.bf16.msra.mxu0 %v18929_v8  ;;  %9314 = vmatpush1.bf16.msra.mxu1 %v18932_v9  ;;  %v19024_v8 = vld [vmem:[%s27988_s1 + $0x1348] ss:$16 sps:$4 sm:$0xff]   ;;  %v19029_v9 = vld [vmem:[%s27988_s1 + $0x1364] ss:$16 sps:$4 sm:$0xff]  }
 0x230   :  { %8454 = vmatprep.subr.bf16.mxu0 %v18937_v10  ;;  %9315 = vmatprep.subr.bf16.mxu1 %v18940_v12  ;;  %v19032_v10 = vld [vmem:[%s27988_s1 + $0x136c] ss:$16 sps:$4 sm:$0xff]   ;;  %v19027_v12 = vld [vmem:[%s27988_s1 + $0x1360] ss:$16 sps:$4 sm:$0xff]  }
 0x233   :  { %8455 = vmatpush1.bf16.msra.mxu0 %v18935_v13  ;;  %9316 = vmatpush1.bf16.msra.mxu1 %v18938_v15  ;;  %v19030_v13 = vld [vmem:[%s27988_s1 + $0x1368] ss:$16 sps:$4 sm:$0xff]   ;;  %v19035_v15 = vld [vmem:[%s27988_s1 + $0x1384] ss:$16 sps:$4 sm:$0xff]  }
 0x234   :  { %8456 = vmatprep.subr.bf16.mxu0 %v18943_v11  ;;  %9317 = vmatprep.subr.bf16.mxu1 %v18946_v17  ;;  %v19038_v11 = vld [vmem:[%s27988_s1 + $0x138c] ss:$16 sps:$4 sm:$0xff]   ;;  %v19033_v17 = vld [vmem:[%s27988_s1 + $0x1380] ss:$16 sps:$4 sm:$0xff]  }
 0x237   :  { %8457 = vmatpush1.bf16.msra.mxu0 %v18941_v14  ;;  %9318 = vmatpush1.bf16.msra.mxu1 %v18944_v19  ;;  %v19036_v14 = vld [vmem:[%s27988_s1 + $0x1388] ss:$16 sps:$4 sm:$0xff]   ;;  %v19041_v19 = vld [vmem:[%s27988_s1 + $0x13a4] ss:$16 sps:$4 sm:$0xff]  }
 0x238   :  { %8458 = vmatprep.subr.bf16.mxu0 %v18949_v20  ;;  %9319 = vmatprep.subr.bf16.mxu1 %v18952_v16  ;;  %v19044_v20 = vld [vmem:[%s27988_s1 + $0x13ac] ss:$16 sps:$4 sm:$0xff]   ;;  %v19039_v16 = vld [vmem:[%s27988_s1 + $0x13a0] ss:$16 sps:$4 sm:$0xff]  }
 0x23b   :  { %8459 = vmatpush1.bf16.msra.mxu0 %v18947_v22  ;;  %9320 = vmatpush1.bf16.msra.mxu1 %v18950_v23  ;;  %v19042_v22 = vld [vmem:[%s27988_s1 + $0x13a8] ss:$16 sps:$4 sm:$0xff]   ;;  %v19047_v23 = vld [vmem:[%s27988_s1 + $0x13c4] ss:$16 sps:$4 sm:$0xff]  }
 0x23c   :  { %8460 = vmatprep.subr.bf16.mxu0 %v18955_v18  ;;  %9321 = vmatprep.subr.bf16.mxu1 %v18958_v25  ;;  %v19050_v18 = vld [vmem:[%s27988_s1 + $0x13cc] ss:$16 sps:$4 sm:$0xff]   ;;  %v19045_v25 = vld [vmem:[%s27988_s1 + $0x13c0] ss:$16 sps:$4 sm:$0xff]  }
 0x23f   :  { %8461 = vmatpush1.bf16.msra.mxu0 %v18953_v26  ;;  %9322 = vmatpush1.bf16.msra.mxu1 %v18956_v21  ;;  %v19048_v26 = vld [vmem:[%s27988_s1 + $0x13c8] ss:$16 sps:$4 sm:$0xff]   ;;  %v19053_v21 = vld [vmem:[%s27988_s1 + $0x13e4] ss:$16 sps:$4 sm:$0xff]  }
 0x240   :  { %8471 = vmatprep.subr.bf16.mxu0 %v18963_v28  ;;  %9332 = vmatprep.subr.bf16.mxu1 %v18966_v29  ;;  %v19056_v28 = vld [vmem:[%s27988_s1 + $0x13ec] ss:$16 sps:$4 sm:$0xff]   ;;  %v19051_v29 = vld [vmem:[%s27988_s1 + $0x13e0] ss:$16 sps:$4 sm:$0xff]  }
 0x242   :  { %8463 = vmatmul.mubr.bf16.vlgmr.msra.gmra.mrb[0].mxu0 %v15723_v24  ;;  %9324 = vmatmul.mubr.bf16.vlgmr.msra.gmra.mrb[0].mxu1 %v15723_v24  ;;  %v19054_v24 = vld [vmem:[%s27988_s1 + $0x13e8] ss:$16 sps:$4 sm:$0xff]  }
 0x243   :  { %8472 = vmatpush1.bf16.msra.mxu0 %v18961_v31  ;;  %9333 = vmatpush1.bf16.msra.mxu1 %v18964_v32  ;;  %v19061_v31 = vld [vmem:[%s27988_s1 + $0x1404] ss:$16 sps:$4 sm:$0xff]   ;;  %v19064_v32 = vld [vmem:[%s27988_s1 + $0x140c] ss:$16 sps:$4 sm:$0xff]  }
 0x244   :  { %8473 = vmatprep.subr.bf16.mxu0 %v18969_v33  ;;  %9334 = vmatprep.subr.bf16.mxu1 %v18972_v27  ;;  %v23357_v33 = vld [vmem:[%s27989_s0 + $0x50] sm:$0xff]  ;;  %v15725_v27 = vcombine.low %v23156_v30, %v23156_v30  ;;  %v19070_v30 = vld [vmem:[%s27988_s1 + $0x142c] ss:$16 sps:$4 sm:$0xff]  }
 0x245   :  { %8503 = vmatprep.mubr.bf16.mxu0 %v15726_v34  ;;  %9364 = vmatprep.mubr.bf16.mxu1 %v15726_v34  ;;  %v19059_v34 = vld [vmem:[%s27988_s1 + $0x1400] ss:$16 sps:$4 sm:$0xff]  }
 0x247   :  { %8474 = vmatpush1.bf16.msra.mxu0 %v18967_v35  ;;  %9335 = vmatpush1.bf16.msra.mxu1 %v18970_v36  ;;  %v19062_v35 = vld [vmem:[%s27988_s1 + $0x1408] ss:$16 sps:$4 sm:$0xff]   ;;  %v19067_v36 = vld [vmem:[%s27988_s1 + $0x1424] ss:$16 sps:$4 sm:$0xff]  }
 0x248   :  { %8475 = vmatprep.subr.bf16.mxu0 %v18975_v37  ;;  %9336 = vmatprep.subr.bf16.mxu1 %v18978_v38  ;;  %v15728_v37 = vcombine.high %v23357_v33, %v23357_v33  ;;  %v19065_v38 = vld [vmem:[%s27988_s1 + $0x1420] ss:$16 sps:$4 sm:$0xff]  }
 0x24b   :  { %8476 = vmatpush1.bf16.msra.mxu0 %v18973_v39  ;;  %9337 = vmatpush1.bf16.msra.mxu1 %v18976_v40  ;;  %v19068_v39 = vld [vmem:[%s27988_s1 + $0x1428] ss:$16 sps:$4 sm:$0xff]   ;;  %v19073_v40 = vld [vmem:[%s27988_s1 + $0x1444] ss:$16 sps:$4 sm:$0xff]  }
 0x24c   :  { %8477 = vmatprep.subr.bf16.mxu0 %v18981_v41  ;;  %9338 = vmatprep.subr.bf16.mxu1 %v18984_v42  ;;  %v19076_v41 = vld [vmem:[%s27988_s1 + $0x144c] ss:$16 sps:$4 sm:$0xff]   ;;  %v19071_v42 = vld [vmem:[%s27988_s1 + $0x1440] ss:$16 sps:$4 sm:$0xff]  }
 0x24f   :  { %8478 = vmatpush1.bf16.msra.mxu0 %v18979_v43  ;;  %9339 = vmatpush1.bf16.msra.mxu1 %v18982_v44  ;;  %v19074_v43 = vld [vmem:[%s27988_s1 + $0x1448] ss:$16 sps:$4 sm:$0xff]   ;;  %v19079_v44 = vld [vmem:[%s27988_s1 + $0x1464] ss:$16 sps:$4 sm:$0xff]  }
 0x250   :  { %8479 = vmatprep.subr.bf16.mxu0 %v18987_v45  ;;  %9340 = vmatprep.subr.bf16.mxu1 %v18990_v46  ;;  %v19082_v45 = vld [vmem:[%s27988_s1 + $0x146c] ss:$16 sps:$4 sm:$0xff]   ;;  %v19077_v46 = vld [vmem:[%s27988_s1 + $0x1460] ss:$16 sps:$4 sm:$0xff]  }
 0x253   :  { %8480 = vmatpush1.bf16.msra.mxu0 %v18985_v47  ;;  %9341 = vmatpush1.bf16.msra.mxu1 %v18988_v48  ;;  %v19080_v47 = vld [vmem:[%s27988_s1 + $0x1468] ss:$16 sps:$4 sm:$0xff]   ;;  %v19085_v48 = vld [vmem:[%s27988_s1 + $0x1484] ss:$16 sps:$4 sm:$0xff]  }
 0x254   :  { %8481 = vmatprep.subr.bf16.mxu0 %v18993_v49  ;;  %9342 = vmatprep.subr.bf16.mxu1 %v18996_v50  ;;  %v19088_v49 = vld [vmem:[%s27988_s1 + $0x148c] ss:$16 sps:$4 sm:$0xff]   ;;  %v19083_v50 = vld [vmem:[%s27988_s1 + $0x1480] ss:$16 sps:$4 sm:$0xff]  }
 0x257   :  { %8482 = vmatpush1.bf16.msra.mxu0 %v18991_v51  ;;  %9343 = vmatpush1.bf16.msra.mxu1 %v18994_v52  ;;  %v19086_v51 = vld [vmem:[%s27988_s1 + $0x1488] ss:$16 sps:$4 sm:$0xff]   ;;  %v19091_v52 = vld [vmem:[%s27988_s1 + $0x14a4] ss:$16 sps:$4 sm:$0xff]  }
 0x258   :  { %8483 = vmatprep.subr.bf16.mxu0 %v18999_v53  ;;  %9344 = vmatprep.subr.bf16.mxu1 %v19002_v54  ;;  %v19094_v53 = vld [vmem:[%s27988_s1 + $0x14ac] ss:$16 sps:$4 sm:$0xff]   ;;  %v19089_v54 = vld [vmem:[%s27988_s1 + $0x14a0] ss:$16 sps:$4 sm:$0xff]  }
 0x25b   :  { %8484 = vmatpush1.bf16.msra.mxu0 %v18997_v55  ;;  %9345 = vmatpush1.bf16.msra.mxu1 %v19000_v56  ;;  %v19092_v55 = vld [vmem:[%s27988_s1 + $0x14a8] ss:$16 sps:$4 sm:$0xff]   ;;  %v19097_v56 = vld [vmem:[%s27988_s1 + $0x14c4] ss:$16 sps:$4 sm:$0xff]  }
 0x25c   :  { %8485 = vmatprep.subr.bf16.mxu0 %v19005_v57  ;;  %9346 = vmatprep.subr.bf16.mxu1 %v19008_v58  ;;  %v19100_v57 = vld [vmem:[%s27988_s1 + $0x14cc] ss:$16 sps:$4 sm:$0xff]   ;;  %v19095_v58 = vld [vmem:[%s27988_s1 + $0x14c0] ss:$16 sps:$4 sm:$0xff]  }
 0x25f   :  { %8486 = vmatpush1.bf16.msra.mxu0 %v19003_v59  ;;  %9347 = vmatpush1.bf16.msra.mxu1 %v19006_v60  ;;  %v19098_v59 = vld [vmem:[%s27988_s1 + $0x14c8] ss:$16 sps:$4 sm:$0xff]   ;;  %v19103_v60 = vld [vmem:[%s27988_s1 + $0x14e4] ss:$16 sps:$4 sm:$0xff]  }
 0x260   :  { %8487 = vmatprep.subr.bf16.mxu0 %v19011_v61  ;;  %9348 = vmatprep.subr.bf16.mxu1 %v19014_v62  ;;  %v19106_v61 = vld [vmem:[%s27988_s1 + $0x14ec] ss:$16 sps:$4 sm:$0xff]   ;;  %v19101_v62 = vld [vmem:[%s27988_s1 + $0x14e0] ss:$16 sps:$4 sm:$0xff]  }
 0x263   :  { %8488 = vmatpush1.bf16.msra.mxu0 %v19009_v63  ;;  %9349 = vmatpush1.bf16.msra.mxu1 %v19012_v0  ;;  %v19104_v63 = vld [vmem:[%s27988_s1 + $0x14e8] ss:$16 sps:$4 sm:$0xff]   ;;  %v19109_v0 = vld [vmem:[%s27988_s1 + $0x1504] ss:$16 sps:$4 sm:$0xff]  }
 0x264   :  { %8489 = vmatprep.subr.bf16.mxu0 %v19017_v1  ;;  %9350 = vmatprep.subr.bf16.mxu1 %v19020_v2  ;;  %v19112_v1 = vld [vmem:[%s27988_s1 + $0x150c] ss:$16 sps:$4 sm:$0xff]   ;;  %v19107_v2 = vld [vmem:[%s27988_s1 + $0x1500] ss:$16 sps:$4 sm:$0xff]  }
 0x267   :  { %8490 = vmatpush1.bf16.msra.mxu0 %v19015_v3  ;;  %9351 = vmatpush1.bf16.msra.mxu1 %v19018_v4  ;;  %v19110_v3 = vld [vmem:[%s27988_s1 + $0x1508] ss:$16 sps:$4 sm:$0xff]   ;;  %v19115_v4 = vld [vmem:[%s27988_s1 + $0x1524] ss:$16 sps:$4 sm:$0xff]  }
 0x268   :  { %8491 = vmatprep.subr.bf16.mxu0 %v19023_v5  ;;  %9352 = vmatprep.subr.bf16.mxu1 %v19026_v6  ;;  %v19118_v5 = vld [vmem:[%s27988_s1 + $0x152c] ss:$16 sps:$4 sm:$0xff]   ;;  %v19113_v6 = vld [vmem:[%s27988_s1 + $0x1520] ss:$16 sps:$4 sm:$0xff]  }
 0x26b   :  { %8492 = vmatpush1.bf16.msra.mxu0 %v19021_v7  ;;  %9353 = vmatpush1.bf16.msra.mxu1 %v19024_v8  ;;  %v19116_v7 = vld [vmem:[%s27988_s1 + $0x1528] ss:$16 sps:$4 sm:$0xff]   ;;  %v19121_v8 = vld [vmem:[%s27988_s1 + $0x1544] ss:$16 sps:$4 sm:$0xff]  }
 0x26c   :  { %8493 = vmatprep.subr.bf16.mxu0 %v19029_v9  ;;  %9354 = vmatprep.subr.bf16.mxu1 %v19032_v10  ;;  %v19124_v9 = vld [vmem:[%s27988_s1 + $0x154c] ss:$16 sps:$4 sm:$0xff]   ;;  %v19119_v10 = vld [vmem:[%s27988_s1 + $0x1540] ss:$16 sps:$4 sm:$0xff]  }
 0x26f   :  { %8494 = vmatpush1.bf16.msra.mxu0 %v19027_v12  ;;  %9355 = vmatpush1.bf16.msra.mxu1 %v19030_v13  ;;  %v19122_v12 = vld [vmem:[%s27988_s1 + $0x1548] ss:$16 sps:$4 sm:$0xff]   ;;  %v19127_v13 = vld [vmem:[%s27988_s1 + $0x1564] ss:$16 sps:$4 sm:$0xff]  }
 0x270   :  { %8495 = vmatprep.subr.bf16.mxu0 %v19035_v15  ;;  %9356 = vmatprep.subr.bf16.mxu1 %v19038_v11  ;;  %v19130_v15 = vld [vmem:[%s27988_s1 + $0x156c] ss:$16 sps:$4 sm:$0xff]   ;;  %v19125_v11 = vld [vmem:[%s27988_s1 + $0x1560] ss:$16 sps:$4 sm:$0xff]  }
 0x273   :  { %8496 = vmatpush1.bf16.msra.mxu0 %v19033_v17  ;;  %9357 = vmatpush1.bf16.msra.mxu1 %v19036_v14  ;;  %v19128_v17 = vld [vmem:[%s27988_s1 + $0x1568] ss:$16 sps:$4 sm:$0xff]   ;;  %v19133_v14 = vld [vmem:[%s27988_s1 + $0x1584] ss:$16 sps:$4 sm:$0xff]  }
 0x274   :  { %8497 = vmatprep.subr.bf16.mxu0 %v19041_v19  ;;  %9358 = vmatprep.subr.bf16.mxu1 %v19044_v20  ;;  %v19136_v19 = vld [vmem:[%s27988_s1 + $0x158c] ss:$16 sps:$4 sm:$0xff]   ;;  %v19131_v20 = vld [vmem:[%s27988_s1 + $0x1580] ss:$16 sps:$4 sm:$0xff]  }
 0x277   :  { %8498 = vmatpush1.bf16.msra.mxu0 %v19039_v16  ;;  %9359 = vmatpush1.bf16.msra.mxu1 %v19042_v22  ;;  %v19134_v16 = vld [vmem:[%s27988_s1 + $0x1588] ss:$16 sps:$4 sm:$0xff]   ;;  %v19139_v22 = vld [vmem:[%s27988_s1 + $0x15a4] ss:$16 sps:$4 sm:$0xff]  }
 0x278   :  { %8499 = vmatprep.subr.bf16.mxu0 %v19047_v23  ;;  %9360 = vmatprep.subr.bf16.mxu1 %v19050_v18  ;;  %v19142_v23 = vld [vmem:[%s27988_s1 + $0x15ac] ss:$16 sps:$4 sm:$0xff]   ;;  %v19137_v18 = vld [vmem:[%s27988_s1 + $0x15a0] ss:$16 sps:$4 sm:$0xff]  }
 0x27b   :  { %8500 = vmatpush1.bf16.msra.mxu0 %v19045_v25  ;;  %9361 = vmatpush1.bf16.msra.mxu1 %v19048_v26  ;;  %v19140_v25 = vld [vmem:[%s27988_s1 + $0x15a8] ss:$16 sps:$4 sm:$0xff]   ;;  %v19145_v26 = vld [vmem:[%s27988_s1 + $0x15c4] ss:$16 sps:$4 sm:$0xff]  }
 0x27c   :  { %8501 = vmatprep.subr.bf16.mxu0 %v19053_v21  ;;  %9362 = vmatprep.subr.bf16.mxu1 %v19056_v28  ;;  %v19148_v21 = vld [vmem:[%s27988_s1 + $0x15cc] ss:$16 sps:$4 sm:$0xff]   ;;  %v19143_v28 = vld [vmem:[%s27988_s1 + $0x15c0] ss:$16 sps:$4 sm:$0xff]  }
 0x27f   :  { %8502 = vmatpush1.bf16.msra.mxu0 %v19051_v29  ;;  %9363 = vmatpush1.bf16.msra.mxu1 %v19054_v24  ;;  %v19146_v29 = vld [vmem:[%s27988_s1 + $0x15c8] ss:$16 sps:$4 sm:$0xff]   ;;  %v19151_v24 = vld [vmem:[%s27988_s1 + $0x15e4] ss:$16 sps:$4 sm:$0xff]  }
 0x280   :  { %8512 = vmatprep.subr.bf16.mxu0 %v19061_v31  ;;  %9373 = vmatprep.subr.bf16.mxu1 %v19064_v32  ;;  %v19154_v31 = vld [vmem:[%s27988_s1 + $0x15ec] ss:$16 sps:$4 sm:$0xff]   ;;  %v19149_v32 = vld [vmem:[%s27988_s1 + $0x15e0] ss:$16 sps:$4 sm:$0xff]  }
 0x282   :  { %8504 = vmatmul.mubr.bf16.vlgmr.msra.gmra.mrb[0].mxu0 %v15725_v27  ;;  %9365 = vmatmul.mubr.bf16.vlgmr.msra.gmra.mrb[0].mxu1 %v15725_v27  ;;  %v19152_v27 = vld [vmem:[%s27988_s1 + $0x15e8] ss:$16 sps:$4 sm:$0xff]  }
 0x283   :  { %8513 = vmatpush1.bf16.msra.mxu0 %v19059_v34  ;;  %9374 = vmatpush1.bf16.msra.mxu1 %v19062_v35  ;;  %v19159_v34 = vld [vmem:[%s27988_s1 + $0x1604] ss:$16 sps:$4 sm:$0xff]   ;;  %v19162_v35 = vld [vmem:[%s27988_s1 + $0x160c] ss:$16 sps:$4 sm:$0xff]  }
 0x284   :  { %8514 = vmatprep.subr.bf16.mxu0 %v19067_v36  ;;  %9375 = vmatprep.subr.bf16.mxu1 %v19070_v30  ;;  %v23558_v36 = vld [vmem:[%s27989_s0 + $0x58] sm:$0xff]  ;;  %v15727_v30 = vcombine.low %v23357_v33, %v23357_v33 }
 0x285   :  { %8544 = vmatprep.mubr.bf16.mxu0 %v15728_v37  ;;  %9405 = vmatprep.mubr.bf16.mxu1 %v15728_v37  ;;  %v19157_v37 = vld [vmem:[%s27988_s1 + $0x1600] ss:$16 sps:$4 sm:$0xff]   ;;  %v19168_v33 = vld [vmem:[%s27988_s1 + $0x162c] ss:$16 sps:$4 sm:$0xff]  }
 0x287   :  { %8515 = vmatpush1.bf16.msra.mxu0 %v19065_v38  ;;  %9376 = vmatpush1.bf16.msra.mxu1 %v19068_v39  ;;  %v19160_v38 = vld [vmem:[%s27988_s1 + $0x1608] ss:$16 sps:$4 sm:$0xff]   ;;  %v19165_v39 = vld [vmem:[%s27988_s1 + $0x1624] ss:$16 sps:$4 sm:$0xff]  }
 0x288   :  { %8516 = vmatprep.subr.bf16.mxu0 %v19073_v40  ;;  %9377 = vmatprep.subr.bf16.mxu1 %v19076_v41  ;;  %v15730_v40 = vcombine.high %v23558_v36, %v23558_v36  ;;  %v19163_v41 = vld [vmem:[%s27988_s1 + $0x1620] ss:$16 sps:$4 sm:$0xff]  }
 0x28b   :  { %8517 = vmatpush1.bf16.msra.mxu0 %v19071_v42  ;;  %9378 = vmatpush1.bf16.msra.mxu1 %v19074_v43  ;;  %v19166_v42 = vld [vmem:[%s27988_s1 + $0x1628] ss:$16 sps:$4 sm:$0xff]   ;;  %v19171_v43 = vld [vmem:[%s27988_s1 + $0x1644] ss:$16 sps:$4 sm:$0xff]  }
 0x28c   :  { %8518 = vmatprep.subr.bf16.mxu0 %v19079_v44  ;;  %9379 = vmatprep.subr.bf16.mxu1 %v19082_v45  ;;  %v19174_v44 = vld [vmem:[%s27988_s1 + $0x164c] ss:$16 sps:$4 sm:$0xff]   ;;  %v19169_v45 = vld [vmem:[%s27988_s1 + $0x1640] ss:$16 sps:$4 sm:$0xff]  }
 0x28f   :  { %8519 = vmatpush1.bf16.msra.mxu0 %v19077_v46  ;;  %9380 = vmatpush1.bf16.msra.mxu1 %v19080_v47  ;;  %v19172_v46 = vld [vmem:[%s27988_s1 + $0x1648] ss:$16 sps:$4 sm:$0xff]   ;;  %v19177_v47 = vld [vmem:[%s27988_s1 + $0x1664] ss:$16 sps:$4 sm:$0xff]  }
 0x290   :  { %8520 = vmatprep.subr.bf16.mxu0 %v19085_v48  ;;  %9381 = vmatprep.subr.bf16.mxu1 %v19088_v49  ;;  %v19180_v48 = vld [vmem:[%s27988_s1 + $0x166c] ss:$16 sps:$4 sm:$0xff]   ;;  %v19175_v49 = vld [vmem:[%s27988_s1 + $0x1660] ss:$16 sps:$4 sm:$0xff]  }
 0x293   :  { %8521 = vmatpush1.bf16.msra.mxu0 %v19083_v50  ;;  %9382 = vmatpush1.bf16.msra.mxu1 %v19086_v51  ;;  %v19178_v50 = vld [vmem:[%s27988_s1 + $0x1668] ss:$16 sps:$4 sm:$0xff]   ;;  %v19183_v51 = vld [vmem:[%s27988_s1 + $0x1684] ss:$16 sps:$4 sm:$0xff]  }
 0x294   :  { %8522 = vmatprep.subr.bf16.mxu0 %v19091_v52  ;;  %9383 = vmatprep.subr.bf16.mxu1 %v19094_v53  ;;  %v19186_v52 = vld [vmem:[%s27988_s1 + $0x168c] ss:$16 sps:$4 sm:$0xff]   ;;  %v19181_v53 = vld [vmem:[%s27988_s1 + $0x1680] ss:$16 sps:$4 sm:$0xff]  }
 0x297   :  { %8523 = vmatpush1.bf16.msra.mxu0 %v19089_v54  ;;  %9384 = vmatpush1.bf16.msra.mxu1 %v19092_v55  ;;  %v19184_v54 = vld [vmem:[%s27988_s1 + $0x1688] ss:$16 sps:$4 sm:$0xff]   ;;  %v19189_v55 = vld [vmem:[%s27988_s1 + $0x16a4] ss:$16 sps:$4 sm:$0xff]  }
 0x298   :  { %8524 = vmatprep.subr.bf16.mxu0 %v19097_v56  ;;  %9385 = vmatprep.subr.bf16.mxu1 %v19100_v57  ;;  %v19192_v56 = vld [vmem:[%s27988_s1 + $0x16ac] ss:$16 sps:$4 sm:$0xff]   ;;  %v19187_v57 = vld [vmem:[%s27988_s1 + $0x16a0] ss:$16 sps:$4 sm:$0xff]  }
 0x29b   :  { %8525 = vmatpush1.bf16.msra.mxu0 %v19095_v58  ;;  %9386 = vmatpush1.bf16.msra.mxu1 %v19098_v59  ;;  %v19190_v58 = vld [vmem:[%s27988_s1 + $0x16a8] ss:$16 sps:$4 sm:$0xff]   ;;  %v19195_v59 = vld [vmem:[%s27988_s1 + $0x16c4] ss:$16 sps:$4 sm:$0xff]  }
 0x29c   :  { %8526 = vmatprep.subr.bf16.mxu0 %v19103_v60  ;;  %9387 = vmatprep.subr.bf16.mxu1 %v19106_v61  ;;  %v19198_v60 = vld [vmem:[%s27988_s1 + $0x16cc] ss:$16 sps:$4 sm:$0xff]   ;;  %v19193_v61 = vld [vmem:[%s27988_s1 + $0x16c0] ss:$16 sps:$4 sm:$0xff]  }
 0x29f   :  { %8527 = vmatpush1.bf16.msra.mxu0 %v19101_v62  ;;  %9388 = vmatpush1.bf16.msra.mxu1 %v19104_v63  ;;  %v19196_v62 = vld [vmem:[%s27988_s1 + $0x16c8] ss:$16 sps:$4 sm:$0xff]   ;;  %v19201_v63 = vld [vmem:[%s27988_s1 + $0x16e4] ss:$16 sps:$4 sm:$0xff]  }
 0x2a0   :  { %8528 = vmatprep.subr.bf16.mxu0 %v19109_v0  ;;  %9389 = vmatprep.subr.bf16.mxu1 %v19112_v1  ;;  %v19204_v0 = vld [vmem:[%s27988_s1 + $0x16ec] ss:$16 sps:$4 sm:$0xff]   ;;  %v19199_v1 = vld [vmem:[%s27988_s1 + $0x16e0] ss:$16 sps:$4 sm:$0xff]  }
 0x2a3   :  { %8529 = vmatpush1.bf16.msra.mxu0 %v19107_v2  ;;  %9390 = vmatpush1.bf16.msra.mxu1 %v19110_v3  ;;  %v19202_v2 = vld [vmem:[%s27988_s1 + $0x16e8] ss:$16 sps:$4 sm:$0xff]   ;;  %v19207_v3 = vld [vmem:[%s27988_s1 + $0x1704] ss:$16 sps:$4 sm:$0xff]  }
 0x2a4   :  { %8530 = vmatprep.subr.bf16.mxu0 %v19115_v4  ;;  %9391 = vmatprep.subr.bf16.mxu1 %v19118_v5  ;;  %v19210_v4 = vld [vmem:[%s27988_s1 + $0x170c] ss:$16 sps:$4 sm:$0xff]   ;;  %v19205_v5 = vld [vmem:[%s27988_s1 + $0x1700] ss:$16 sps:$4 sm:$0xff]  }
 0x2a7   :  { %8531 = vmatpush1.bf16.msra.mxu0 %v19113_v6  ;;  %9392 = vmatpush1.bf16.msra.mxu1 %v19116_v7  ;;  %v19208_v6 = vld [vmem:[%s27988_s1 + $0x1708] ss:$16 sps:$4 sm:$0xff]   ;;  %v19213_v7 = vld [vmem:[%s27988_s1 + $0x1724] ss:$16 sps:$4 sm:$0xff]  }
 0x2a8   :  { %8532 = vmatprep.subr.bf16.mxu0 %v19121_v8  ;;  %9393 = vmatprep.subr.bf16.mxu1 %v19124_v9  ;;  %v19216_v8 = vld [vmem:[%s27988_s1 + $0x172c] ss:$16 sps:$4 sm:$0xff]   ;;  %v19211_v9 = vld [vmem:[%s27988_s1 + $0x1720] ss:$16 sps:$4 sm:$0xff]  }
 0x2ab   :  { %8533 = vmatpush1.bf16.msra.mxu0 %v19119_v10  ;;  %9394 = vmatpush1.bf16.msra.mxu1 %v19122_v12  ;;  %v19214_v10 = vld [vmem:[%s27988_s1 + $0x1728] ss:$16 sps:$4 sm:$0xff]   ;;  %v19219_v12 = vld [vmem:[%s27988_s1 + $0x1744] ss:$16 sps:$4 sm:$0xff]  }
 0x2ac   :  { %8534 = vmatprep.subr.bf16.mxu0 %v19127_v13  ;;  %9395 = vmatprep.subr.bf16.mxu1 %v19130_v15  ;;  %v19222_v13 = vld [vmem:[%s27988_s1 + $0x174c] ss:$16 sps:$4 sm:$0xff]   ;;  %v19217_v15 = vld [vmem:[%s27988_s1 + $0x1740] ss:$16 sps:$4 sm:$0xff]  }
 0x2af   :  { %8535 = vmatpush1.bf16.msra.mxu0 %v19125_v11  ;;  %9396 = vmatpush1.bf16.msra.mxu1 %v19128_v17  ;;  %v19220_v11 = vld [vmem:[%s27988_s1 + $0x1748] ss:$16 sps:$4 sm:$0xff]   ;;  %v19225_v17 = vld [vmem:[%s27988_s1 + $0x1764] ss:$16 sps:$4 sm:$0xff]  }
 0x2b0   :  { %8536 = vmatprep.subr.bf16.mxu0 %v19133_v14  ;;  %9397 = vmatprep.subr.bf16.mxu1 %v19136_v19  ;;  %v19228_v14 = vld [vmem:[%s27988_s1 + $0x176c] ss:$16 sps:$4 sm:$0xff]   ;;  %v19223_v19 = vld [vmem:[%s27988_s1 + $0x1760] ss:$16 sps:$4 sm:$0xff]  }
 0x2b3   :  { %8537 = vmatpush1.bf16.msra.mxu0 %v19131_v20  ;;  %9398 = vmatpush1.bf16.msra.mxu1 %v19134_v16  ;;  %v19226_v20 = vld [vmem:[%s27988_s1 + $0x1768] ss:$16 sps:$4 sm:$0xff]   ;;  %v19231_v16 = vld [vmem:[%s27988_s1 + $0x1784] ss:$16 sps:$4 sm:$0xff]  }
 0x2b4   :  { %8538 = vmatprep.subr.bf16.mxu0 %v19139_v22  ;;  %9399 = vmatprep.subr.bf16.mxu1 %v19142_v23  ;;  %v19234_v22 = vld [vmem:[%s27988_s1 + $0x178c] ss:$16 sps:$4 sm:$0xff]   ;;  %v19229_v23 = vld [vmem:[%s27988_s1 + $0x1780] ss:$16 sps:$4 sm:$0xff]  }
 0x2b7   :  { %8539 = vmatpush1.bf16.msra.mxu0 %v19137_v18  ;;  %9400 = vmatpush1.bf16.msra.mxu1 %v19140_v25  ;;  %v19232_v18 = vld [vmem:[%s27988_s1 + $0x1788] ss:$16 sps:$4 sm:$0xff]   ;;  %v19237_v25 = vld [vmem:[%s27988_s1 + $0x17a4] ss:$16 sps:$4 sm:$0xff]  }
 0x2b8   :  { %8540 = vmatprep.subr.bf16.mxu0 %v19145_v26  ;;  %9401 = vmatprep.subr.bf16.mxu1 %v19148_v21  ;;  %v19240_v26 = vld [vmem:[%s27988_s1 + $0x17ac] ss:$16 sps:$4 sm:$0xff]   ;;  %v19235_v21 = vld [vmem:[%s27988_s1 + $0x17a0] ss:$16 sps:$4 sm:$0xff]  }
 0x2bb   :  { %8541 = vmatpush1.bf16.msra.mxu0 %v19143_v28  ;;  %9402 = vmatpush1.bf16.msra.mxu1 %v19146_v29  ;;  %v19238_v28 = vld [vmem:[%s27988_s1 + $0x17a8] ss:$16 sps:$4 sm:$0xff]   ;;  %v19243_v29 = vld [vmem:[%s27988_s1 + $0x17c4] ss:$16 sps:$4 sm:$0xff]  }
 0x2bc   :  { %8542 = vmatprep.subr.bf16.mxu0 %v19151_v24  ;;  %9403 = vmatprep.subr.bf16.mxu1 %v19154_v31  ;;  %v19246_v24 = vld [vmem:[%s27988_s1 + $0x17cc] ss:$16 sps:$4 sm:$0xff]   ;;  %v19241_v31 = vld [vmem:[%s27988_s1 + $0x17c0] ss:$16 sps:$4 sm:$0xff]  }
 0x2bf   :  { %8543 = vmatpush1.bf16.msra.mxu0 %v19149_v32  ;;  %9404 = vmatpush1.bf16.msra.mxu1 %v19152_v27  ;;  %v19244_v32 = vld [vmem:[%s27988_s1 + $0x17c8] ss:$16 sps:$4 sm:$0xff]   ;;  %v19249_v27 = vld [vmem:[%s27988_s1 + $0x17e4] ss:$16 sps:$4 sm:$0xff]  }
 0x2c0   :  { %8553 = vmatprep.subr.bf16.mxu0 %v19159_v34  ;;  %9414 = vmatprep.subr.bf16.mxu1 %v19162_v35  ;;  %v19252_v34 = vld [vmem:[%s27988_s1 + $0x17ec] ss:$16 sps:$4 sm:$0xff]   ;;  %v19247_v35 = vld [vmem:[%s27988_s1 + $0x17e0] ss:$16 sps:$4 sm:$0xff]  }
 0x2c2   :  { %8545 = vmatmul.mubr.bf16.vlgmr.msra.gmra.mrb[0].mxu0 %v15727_v30  ;;  %9406 = vmatmul.mubr.bf16.vlgmr.msra.gmra.mrb[0].mxu1 %v15727_v30  ;;  %v19250_v30 = vld [vmem:[%s27988_s1 + $0x17e8] ss:$16 sps:$4 sm:$0xff]  }
 0x2c3   :  { %8554 = vmatpush1.bf16.msra.mxu0 %v19157_v37  ;;  %9415 = vmatpush1.bf16.msra.mxu1 %v19160_v38  ;;  %v19257_v37 = vld [vmem:[%s27988_s1 + $0x1804] ss:$16 sps:$4 sm:$0xff]   ;;  %v19260_v38 = vld [vmem:[%s27988_s1 + $0x180c] ss:$16 sps:$4 sm:$0xff]  }
 0x2c4   :  { %8555 = vmatprep.subr.bf16.mxu0 %v19165_v39  ;;  %9416 = vmatprep.subr.bf16.mxu1 %v19168_v33  ;;  %v15729_v39 = vcombine.low %v23558_v36, %v23558_v36  ;;  %v23761_v33 = vld [vmem:[%s27989_s0 + $0x60] sm:$0xff] }
 0x2c5   :  { %8585 = vmatprep.mubr.bf16.mxu0 %v15730_v40  ;;  %9446 = vmatprep.mubr.bf16.mxu1 %v15730_v40  ;;  %v19255_v40 = vld [vmem:[%s27988_s1 + $0x1800] ss:$16 sps:$4 sm:$0xff]   ;;  %v19263_v36 = vld [vmem:[%s27988_s1 + $0x1824] ss:$16 sps:$4 sm:$0xff]  }
 0x2c7   :  { %8556 = vmatpush1.bf16.msra.mxu0 %v19163_v41  ;;  %9417 = vmatpush1.bf16.msra.mxu1 %v19166_v42  ;;  %v19258_v41 = vld [vmem:[%s27988_s1 + $0x1808] ss:$16 sps:$4 sm:$0xff]   ;;  %v19266_v42 = vld [vmem:[%s27988_s1 + $0x182c] ss:$16 sps:$4 sm:$0xff]  }
 0x2c8   :  { %8557 = vmatprep.subr.bf16.mxu0 %v19171_v43  ;;  %9418 = vmatprep.subr.bf16.mxu1 %v19174_v44  ;;  %v15732_v43 = vcombine.high %v23761_v33, %v23761_v33  ;;  %v19261_v44 = vld [vmem:[%s27988_s1 + $0x1820] ss:$16 sps:$4 sm:$0xff]  }
 0x2cb   :  { %8558 = vmatpush1.bf16.msra.mxu0 %v19169_v45  ;;  %9419 = vmatpush1.bf16.msra.mxu1 %v19172_v46  ;;  %v19264_v45 = vld [vmem:[%s27988_s1 + $0x1828] ss:$16 sps:$4 sm:$0xff]   ;;  %v19269_v46 = vld [vmem:[%s27988_s1 + $0x1844] ss:$16 sps:$4 sm:$0xff]  }
 0x2cc   :  { %8559 = vmatprep.subr.bf16.mxu0 %v19177_v47  ;;  %9420 = vmatprep.subr.bf16.mxu1 %v19180_v48  ;;  %v19272_v47 = vld [vmem:[%s27988_s1 + $0x184c] ss:$16 sps:$4 sm:$0xff]   ;;  %v19267_v48 = vld [vmem:[%s27988_s1 + $0x1840] ss:$16 sps:$4 sm:$0xff]  }
 0x2cf   :  { %8560 = vmatpush1.bf16.msra.mxu0 %v19175_v49  ;;  %9421 = vmatpush1.bf16.msra.mxu1 %v19178_v50  ;;  %v19270_v49 = vld [vmem:[%s27988_s1 + $0x1848] ss:$16 sps:$4 sm:$0xff]   ;;  %v19275_v50 = vld [vmem:[%s27988_s1 + $0x1864] ss:$16 sps:$4 sm:$0xff]  }
 0x2d0   :  { %8561 = vmatprep.subr.bf16.mxu0 %v19183_v51  ;;  %9422 = vmatprep.subr.bf16.mxu1 %v19186_v52  ;;  %v19278_v51 = vld [vmem:[%s27988_s1 + $0x186c] ss:$16 sps:$4 sm:$0xff]   ;;  %v19273_v52 = vld [vmem:[%s27988_s1 + $0x1860] ss:$16 sps:$4 sm:$0xff]  }
 0x2d3   :  { %8562 = vmatpush1.bf16.msra.mxu0 %v19181_v53  ;;  %9423 = vmatpush1.bf16.msra.mxu1 %v19184_v54  ;;  %v19276_v53 = vld [vmem:[%s27988_s1 + $0x1868] ss:$16 sps:$4 sm:$0xff]   ;;  %v19281_v54 = vld [vmem:[%s27988_s1 + $0x1884] ss:$16 sps:$4 sm:$0xff]  }
 0x2d4   :  { %8563 = vmatprep.subr.bf16.mxu0 %v19189_v55  ;;  %9424 = vmatprep.subr.bf16.mxu1 %v19192_v56  ;;  %v19284_v55 = vld [vmem:[%s27988_s1 + $0x188c] ss:$16 sps:$4 sm:$0xff]   ;;  %v19279_v56 = vld [vmem:[%s27988_s1 + $0x1880] ss:$16 sps:$4 sm:$0xff]  }
 0x2d7   :  { %8564 = vmatpush1.bf16.msra.mxu0 %v19187_v57  ;;  %9425 = vmatpush1.bf16.msra.mxu1 %v19190_v58  ;;  %v19282_v57 = vld [vmem:[%s27988_s1 + $0x1888] ss:$16 sps:$4 sm:$0xff]   ;;  %v19287_v58 = vld [vmem:[%s27988_s1 + $0x18a4] ss:$16 sps:$4 sm:$0xff]  }
 0x2d8   :  { %8565 = vmatprep.subr.bf16.mxu0 %v19195_v59  ;;  %9426 = vmatprep.subr.bf16.mxu1 %v19198_v60  ;;  %v19290_v59 = vld [vmem:[%s27988_s1 + $0x18ac] ss:$16 sps:$4 sm:$0xff]   ;;  %v19285_v60 = vld [vmem:[%s27988_s1 + $0x18a0] ss:$16 sps:$4 sm:$0xff]  }
 0x2db   :  { %8566 = vmatpush1.bf16.msra.mxu0 %v19193_v61  ;;  %9427 = vmatpush1.bf16.msra.mxu1 %v19196_v62  ;;  %v19288_v61 = vld [vmem:[%s27988_s1 + $0x18a8] ss:$16 sps:$4 sm:$0xff]   ;;  %v19293_v62 = vld [vmem:[%s27988_s1 + $0x18c4] ss:$16 sps:$4 sm:$0xff]  }
 0x2dc   :  { %8567 = vmatprep.subr.bf16.mxu0 %v19201_v63  ;;  %9428 = vmatprep.subr.bf16.mxu1 %v19204_v0  ;;  %v19296_v63 = vld [vmem:[%s27988_s1 + $0x18cc] ss:$16 sps:$4 sm:$0xff]   ;;  %v19291_v0 = vld [vmem:[%s27988_s1 + $0x18c0] ss:$16 sps:$4 sm:$0xff]  }
 0x2df   :  { %8568 = vmatpush1.bf16.msra.mxu0 %v19199_v1  ;;  %9429 = vmatpush1.bf16.msra.mxu1 %v19202_v2  ;;  %v19294_v1 = vld [vmem:[%s27988_s1 + $0x18c8] ss:$16 sps:$4 sm:$0xff]   ;;  %v19299_v2 = vld [vmem:[%s27988_s1 + $0x18e4] ss:$16 sps:$4 sm:$0xff]  }
 0x2e0   :  { %8569 = vmatprep.subr.bf16.mxu0 %v19207_v3  ;;  %9430 = vmatprep.subr.bf16.mxu1 %v19210_v4  ;;  %v19302_v3 = vld [vmem:[%s27988_s1 + $0x18ec] ss:$16 sps:$4 sm:$0xff]   ;;  %v19297_v4 = vld [vmem:[%s27988_s1 + $0x18e0] ss:$16 sps:$4 sm:$0xff]  }
 0x2e3   :  { %8570 = vmatpush1.bf16.msra.mxu0 %v19205_v5  ;;  %9431 = vmatpush1.bf16.msra.mxu1 %v19208_v6  ;;  %v19300_v5 = vld [vmem:[%s27988_s1 + $0x18e8] ss:$16 sps:$4 sm:$0xff]   ;;  %v19305_v6 = vld [vmem:[%s27988_s1 + $0x1904] ss:$16 sps:$4 sm:$0xff]  }
 0x2e4   :  { %8571 = vmatprep.subr.bf16.mxu0 %v19213_v7  ;;  %9432 = vmatprep.subr.bf16.mxu1 %v19216_v8  ;;  %v19308_v7 = vld [vmem:[%s27988_s1 + $0x190c] ss:$16 sps:$4 sm:$0xff]   ;;  %v19303_v8 = vld [vmem:[%s27988_s1 + $0x1900] ss:$16 sps:$4 sm:$0xff]  }
 0x2e7   :  { %8572 = vmatpush1.bf16.msra.mxu0 %v19211_v9  ;;  %9433 = vmatpush1.bf16.msra.mxu1 %v19214_v10  ;;  %v19306_v9 = vld [vmem:[%s27988_s1 + $0x1908] ss:$16 sps:$4 sm:$0xff]   ;;  %v19311_v10 = vld [vmem:[%s27988_s1 + $0x1924] ss:$16 sps:$4 sm:$0xff]  }
 0x2e8   :  { %8573 = vmatprep.subr.bf16.mxu0 %v19219_v12  ;;  %9434 = vmatprep.subr.bf16.mxu1 %v19222_v13  ;;  %v19314_v12 = vld [vmem:[%s27988_s1 + $0x192c] ss:$16 sps:$4 sm:$0xff]   ;;  %v19309_v13 = vld [vmem:[%s27988_s1 + $0x1920] ss:$16 sps:$4 sm:$0xff]  }
 0x2eb   :  { %8574 = vmatpush1.bf16.msra.mxu0 %v19217_v15  ;;  %9435 = vmatpush1.bf16.msra.mxu1 %v19220_v11  ;;  %v19312_v15 = vld [vmem:[%s27988_s1 + $0x1928] ss:$16 sps:$4 sm:$0xff]   ;;  %v19317_v11 = vld [vmem:[%s27988_s1 + $0x1944] ss:$16 sps:$4 sm:$0xff]  }
 0x2ec   :  { %8575 = vmatprep.subr.bf16.mxu0 %v19225_v17  ;;  %9436 = vmatprep.subr.bf16.mxu1 %v19228_v14  ;;  %v19320_v17 = vld [vmem:[%s27988_s1 + $0x194c] ss:$16 sps:$4 sm:$0xff]   ;;  %v19315_v14 = vld [vmem:[%s27988_s1 + $0x1940] ss:$16 sps:$4 sm:$0xff]  }
 0x2ef   :  { %8576 = vmatpush1.bf16.msra.mxu0 %v19223_v19  ;;  %9437 = vmatpush1.bf16.msra.mxu1 %v19226_v20  ;;  %v19318_v19 = vld [vmem:[%s27988_s1 + $0x1948] ss:$16 sps:$4 sm:$0xff]   ;;  %v19323_v20 = vld [vmem:[%s27988_s1 + $0x1964] ss:$16 sps:$4 sm:$0xff]  }
 0x2f0   :  { %8577 = vmatprep.subr.bf16.mxu0 %v19231_v16  ;;  %9438 = vmatprep.subr.bf16.mxu1 %v19234_v22  ;;  %v19326_v16 = vld [vmem:[%s27988_s1 + $0x196c] ss:$16 sps:$4 sm:$0xff]   ;;  %v19321_v22 = vld [vmem:[%s27988_s1 + $0x1960] ss:$16 sps:$4 sm:$0xff]  }
 0x2f3   :  { %8578 = vmatpush1.bf16.msra.mxu0 %v19229_v23  ;;  %9439 = vmatpush1.bf16.msra.mxu1 %v19232_v18  ;;  %v19324_v23 = vld [vmem:[%s27988_s1 + $0x1968] ss:$16 sps:$4 sm:$0xff]   ;;  %v19329_v18 = vld [vmem:[%s27988_s1 + $0x1984] ss:$16 sps:$4 sm:$0xff]  }
 0x2f4   :  { %8579 = vmatprep.subr.bf16.mxu0 %v19237_v25  ;;  %9440 = vmatprep.subr.bf16.mxu1 %v19240_v26  ;;  %v19332_v25 = vld [vmem:[%s27988_s1 + $0x198c] ss:$16 sps:$4 sm:$0xff]   ;;  %v19327_v26 = vld [vmem:[%s27988_s1 + $0x1980] ss:$16 sps:$4 sm:$0xff]  }
 0x2f7   :  { %8580 = vmatpush1.bf16.msra.mxu0 %v19235_v21  ;;  %9441 = vmatpush1.bf16.msra.mxu1 %v19238_v28  ;;  %v19330_v21 = vld [vmem:[%s27988_s1 + $0x1988] ss:$16 sps:$4 sm:$0xff]   ;;  %v19335_v28 = vld [vmem:[%s27988_s1 + $0x19a4] ss:$16 sps:$4 sm:$0xff]  }
 0x2f8   :  { %8581 = vmatprep.subr.bf16.mxu0 %v19243_v29  ;;  %9442 = vmatprep.subr.bf16.mxu1 %v19246_v24  ;;  %v19338_v29 = vld [vmem:[%s27988_s1 + $0x19ac] ss:$16 sps:$4 sm:$0xff]   ;;  %v19333_v24 = vld [vmem:[%s27988_s1 + $0x19a0] ss:$16 sps:$4 sm:$0xff]  }
 0x2fb   :  { %8582 = vmatpush1.bf16.msra.mxu0 %v19241_v31  ;;  %9443 = vmatpush1.bf16.msra.mxu1 %v19244_v32  ;;  %v19336_v31 = vld [vmem:[%s27988_s1 + $0x19a8] ss:$16 sps:$4 sm:$0xff]   ;;  %v19341_v32 = vld [vmem:[%s27988_s1 + $0x19c4] ss:$16 sps:$4 sm:$0xff]  }
 0x2fc   :  { %8583 = vmatprep.subr.bf16.mxu0 %v19249_v27  ;;  %9444 = vmatprep.subr.bf16.mxu1 %v19252_v34  ;;  %v19344_v27 = vld [vmem:[%s27988_s1 + $0x19cc] ss:$16 sps:$4 sm:$0xff]   ;;  %v19339_v34 = vld [vmem:[%s27988_s1 + $0x19c0] ss:$16 sps:$4 sm:$0xff]  }
 0x2ff   :  { %8584 = vmatpush1.bf16.msra.mxu0 %v19247_v35  ;;  %9445 = vmatpush1.bf16.msra.mxu1 %v19250_v30  ;;  %v19342_v35 = vld [vmem:[%s27988_s1 + $0x19c8] ss:$16 sps:$4 sm:$0xff]   ;;  %v19347_v30 = vld [vmem:[%s27988_s1 + $0x19e4] ss:$16 sps:$4 sm:$0xff]  }
 0x300   :  { %8594 = vmatprep.subr.bf16.mxu0 %v19257_v37  ;;  %9455 = vmatprep.subr.bf16.mxu1 %v19260_v38  ;;  %v19350_v37 = vld [vmem:[%s27988_s1 + $0x19ec] ss:$16 sps:$4 sm:$0xff]   ;;  %v19345_v38 = vld [vmem:[%s27988_s1 + $0x19e0] ss:$16 sps:$4 sm:$0xff]  }
 0x302   :  { %8586 = vmatmul.mubr.bf16.vlgmr.msra.gmra.mrb[0].mxu0 %v15729_v39  ;;  %9447 = vmatmul.mubr.bf16.vlgmr.msra.gmra.mrb[0].mxu1 %v15729_v39  ;;  %v19348_v39 = vld [vmem:[%s27988_s1 + $0x19e8] ss:$16 sps:$4 sm:$0xff]  }
 0x303   :  { %8595 = vmatpush1.bf16.msra.mxu0 %v19255_v40  ;;  %9456 = vmatpush1.bf16.msra.mxu1 %v19258_v41  ;;  %v19355_v40 = vld [vmem:[%s27988_s1 + $0x1a04] ss:$16 sps:$4 sm:$0xff]   ;;  %v19358_v41 = vld [vmem:[%s27988_s1 + $0x1a0c] ss:$16 sps:$4 sm:$0xff]  }
 0x304   :  { %8596 = vmatprep.subr.bf16.mxu0 %v19263_v36  ;;  %9457 = vmatprep.subr.bf16.mxu1 %v19266_v42  ;;  %v15731_v36 = vcombine.low %v23761_v33, %v23761_v33  ;;  %v23962_v42 = vld [vmem:[%s27989_s0 + $0x68] sm:$0xff]  ;;  %v19361_v33 = vld [vmem:[%s27988_s1 + $0x1a24] ss:$16 sps:$4 sm:$0xff]  }
 0x305   :  { %8626 = vmatprep.mubr.bf16.mxu0 %v15732_v43  ;;  %9487 = vmatprep.mubr.bf16.mxu1 %v15732_v43  ;;  %v19353_v43 = vld [vmem:[%s27988_s1 + $0x1a00] ss:$16 sps:$4 sm:$0xff]  }
 0x307   :  { %8597 = vmatpush1.bf16.msra.mxu0 %v19261_v44  ;;  %9458 = vmatpush1.bf16.msra.mxu1 %v19264_v45  ;;  %v19356_v44 = vld [vmem:[%s27988_s1 + $0x1a08] ss:$16 sps:$4 sm:$0xff]   ;;  %v19364_v45 = vld [vmem:[%s27988_s1 + $0x1a2c] ss:$16 sps:$4 sm:$0xff]  }
 0x308   :  { %8598 = vmatprep.subr.bf16.mxu0 %v19269_v46  ;;  %9459 = vmatprep.subr.bf16.mxu1 %v19272_v47  ;;  %v15734_v46 = vcombine.high %v23962_v42, %v23962_v42  ;;  %v19359_v47 = vld [vmem:[%s27988_s1 + $0x1a20] ss:$16 sps:$4 sm:$0xff]  }
 0x30b   :  { %8599 = vmatpush1.bf16.msra.mxu0 %v19267_v48  ;;  %9460 = vmatpush1.bf16.msra.mxu1 %v19270_v49  ;;  %v19362_v48 = vld [vmem:[%s27988_s1 + $0x1a28] ss:$16 sps:$4 sm:$0xff]   ;;  %v19367_v49 = vld [vmem:[%s27988_s1 + $0x1a44] ss:$16 sps:$4 sm:$0xff]  }
 0x30c   :  { %8600 = vmatprep.subr.bf16.mxu0 %v19275_v50  ;;  %9461 = vmatprep.subr.bf16.mxu1 %v19278_v51  ;;  %v19370_v50 = vld [vmem:[%s27988_s1 + $0x1a4c] ss:$16 sps:$4 sm:$0xff]   ;;  %v19365_v51 = vld [vmem:[%s27988_s1 + $0x1a40] ss:$16 sps:$4 sm:$0xff]  }
 0x30f   :  { %8601 = vmatpush1.bf16.msra.mxu0 %v19273_v52  ;;  %9462 = vmatpush1.bf16.msra.mxu1 %v19276_v53  ;;  %v19368_v52 = vld [vmem:[%s27988_s1 + $0x1a48] ss:$16 sps:$4 sm:$0xff]   ;;  %v19373_v53 = vld [vmem:[%s27988_s1 + $0x1a64] ss:$16 sps:$4 sm:$0xff]  }
 0x310   :  { %8602 = vmatprep.subr.bf16.mxu0 %v19281_v54  ;;  %9463 = vmatprep.subr.bf16.mxu1 %v19284_v55  ;;  %v19376_v54 = vld [vmem:[%s27988_s1 + $0x1a6c] ss:$16 sps:$4 sm:$0xff]   ;;  %v19371_v55 = vld [vmem:[%s27988_s1 + $0x1a60] ss:$16 sps:$4 sm:$0xff]  }
 0x313   :  { %8603 = vmatpush1.bf16.msra.mxu0 %v19279_v56  ;;  %9464 = vmatpush1.bf16.msra.mxu1 %v19282_v57  ;;  %v19374_v56 = vld [vmem:[%s27988_s1 + $0x1a68] ss:$16 sps:$4 sm:$0xff]   ;;  %v19379_v57 = vld [vmem:[%s27988_s1 + $0x1a84] ss:$16 sps:$4 sm:$0xff]  }
 0x314   :  { %8604 = vmatprep.subr.bf16.mxu0 %v19287_v58  ;;  %9465 = vmatprep.subr.bf16.mxu1 %v19290_v59  ;;  %v19382_v58 = vld [vmem:[%s27988_s1 + $0x1a8c] ss:$16 sps:$4 sm:$0xff]   ;;  %v19377_v59 = vld [vmem:[%s27988_s1 + $0x1a80] ss:$16 sps:$4 sm:$0xff]  }
 0x317   :  { %8605 = vmatpush1.bf16.msra.mxu0 %v19285_v60  ;;  %9466 = vmatpush1.bf16.msra.mxu1 %v19288_v61  ;;  %v19380_v60 = vld [vmem:[%s27988_s1 + $0x1a88] ss:$16 sps:$4 sm:$0xff]   ;;  %v19385_v61 = vld [vmem:[%s27988_s1 + $0x1aa4] ss:$16 sps:$4 sm:$0xff]  }
 0x318   :  { %8606 = vmatprep.subr.bf16.mxu0 %v19293_v62  ;;  %9467 = vmatprep.subr.bf16.mxu1 %v19296_v63  ;;  %v19388_v62 = vld [vmem:[%s27988_s1 + $0x1aac] ss:$16 sps:$4 sm:$0xff]   ;;  %v19383_v63 = vld [vmem:[%s27988_s1 + $0x1aa0] ss:$16 sps:$4 sm:$0xff]  }
 0x31b   :  { %8607 = vmatpush1.bf16.msra.mxu0 %v19291_v0  ;;  %9468 = vmatpush1.bf16.msra.mxu1 %v19294_v1  ;;  %v19386_v0 = vld [vmem:[%s27988_s1 + $0x1aa8] ss:$16 sps:$4 sm:$0xff]   ;;  %v19391_v1 = vld [vmem:[%s27988_s1 + $0x1ac4] ss:$16 sps:$4 sm:$0xff]  }
 0x31c   :  { %8608 = vmatprep.subr.bf16.mxu0 %v19299_v2  ;;  %9469 = vmatprep.subr.bf16.mxu1 %v19302_v3  ;;  %v19394_v2 = vld [vmem:[%s27988_s1 + $0x1acc] ss:$16 sps:$4 sm:$0xff]   ;;  %v19389_v3 = vld [vmem:[%s27988_s1 + $0x1ac0] ss:$16 sps:$4 sm:$0xff]  }
 0x31f   :  { %8609 = vmatpush1.bf16.msra.mxu0 %v19297_v4  ;;  %9470 = vmatpush1.bf16.msra.mxu1 %v19300_v5  ;;  %v19392_v4 = vld [vmem:[%s27988_s1 + $0x1ac8] ss:$16 sps:$4 sm:$0xff]   ;;  %v19397_v5 = vld [vmem:[%s27988_s1 + $0x1ae4] ss:$16 sps:$4 sm:$0xff]  }
 0x320   :  { %8610 = vmatprep.subr.bf16.mxu0 %v19305_v6  ;;  %9471 = vmatprep.subr.bf16.mxu1 %v19308_v7  ;;  %v19400_v6 = vld [vmem:[%s27988_s1 + $0x1aec] ss:$16 sps:$4 sm:$0xff]   ;;  %v19395_v7 = vld [vmem:[%s27988_s1 + $0x1ae0] ss:$16 sps:$4 sm:$0xff]  }
 0x323   :  { %8611 = vmatpush1.bf16.msra.mxu0 %v19303_v8  ;;  %9472 = vmatpush1.bf16.msra.mxu1 %v19306_v9  ;;  %v19398_v8 = vld [vmem:[%s27988_s1 + $0x1ae8] ss:$16 sps:$4 sm:$0xff]   ;;  %v19403_v9 = vld [vmem:[%s27988_s1 + $0x1b04] ss:$16 sps:$4 sm:$0xff]  }
 0x324   :  { %8612 = vmatprep.subr.bf16.mxu0 %v19311_v10  ;;  %9473 = vmatprep.subr.bf16.mxu1 %v19314_v12  ;;  %v19406_v10 = vld [vmem:[%s27988_s1 + $0x1b0c] ss:$16 sps:$4 sm:$0xff]   ;;  %v19401_v12 = vld [vmem:[%s27988_s1 + $0x1b00] ss:$16 sps:$4 sm:$0xff]  }
 0x327   :  { %8613 = vmatpush1.bf16.msra.mxu0 %v19309_v13  ;;  %9474 = vmatpush1.bf16.msra.mxu1 %v19312_v15  ;;  %v19404_v13 = vld [vmem:[%s27988_s1 + $0x1b08] ss:$16 sps:$4 sm:$0xff]   ;;  %v19409_v15 = vld [vmem:[%s27988_s1 + $0x1b24] ss:$16 sps:$4 sm:$0xff]  }
 0x328   :  { %8614 = vmatprep.subr.bf16.mxu0 %v19317_v11  ;;  %9475 = vmatprep.subr.bf16.mxu1 %v19320_v17  ;;  %v19412_v11 = vld [vmem:[%s27988_s1 + $0x1b2c] ss:$16 sps:$4 sm:$0xff]   ;;  %v19407_v17 = vld [vmem:[%s27988_s1 + $0x1b20] ss:$16 sps:$4 sm:$0xff]  }
 0x32b   :  { %8615 = vmatpush1.bf16.msra.mxu0 %v19315_v14  ;;  %9476 = vmatpush1.bf16.msra.mxu1 %v19318_v19  ;;  %v19410_v14 = vld [vmem:[%s27988_s1 + $0x1b28] ss:$16 sps:$4 sm:$0xff]   ;;  %v19415_v19 = vld [vmem:[%s27988_s1 + $0x1b44] ss:$16 sps:$4 sm:$0xff]  }
 0x32c   :  { %8616 = vmatprep.subr.bf16.mxu0 %v19323_v20  ;;  %9477 = vmatprep.subr.bf16.mxu1 %v19326_v16  ;;  %v19418_v20 = vld [vmem:[%s27988_s1 + $0x1b4c] ss:$16 sps:$4 sm:$0xff]   ;;  %v19413_v16 = vld [vmem:[%s27988_s1 + $0x1b40] ss:$16 sps:$4 sm:$0xff]  }
 0x32f   :  { %8617 = vmatpush1.bf16.msra.mxu0 %v19321_v22  ;;  %9478 = vmatpush1.bf16.msra.mxu1 %v19324_v23  ;;  %v19416_v22 = vld [vmem:[%s27988_s1 + $0x1b48] ss:$16 sps:$4 sm:$0xff]   ;;  %v19421_v23 = vld [vmem:[%s27988_s1 + $0x1b64] ss:$16 sps:$4 sm:$0xff]  }
 0x330   :  { %8618 = vmatprep.subr.bf16.mxu0 %v19329_v18  ;;  %9479 = vmatprep.subr.bf16.mxu1 %v19332_v25  ;;  %v19424_v18 = vld [vmem:[%s27988_s1 + $0x1b6c] ss:$16 sps:$4 sm:$0xff]   ;;  %v19419_v25 = vld [vmem:[%s27988_s1 + $0x1b60] ss:$16 sps:$4 sm:$0xff]  }
 0x333   :  { %8619 = vmatpush1.bf16.msra.mxu0 %v19327_v26  ;;  %9480 = vmatpush1.bf16.msra.mxu1 %v19330_v21  ;;  %v19422_v26 = vld [vmem:[%s27988_s1 + $0x1b68] ss:$16 sps:$4 sm:$0xff]   ;;  %v19427_v21 = vld [vmem:[%s27988_s1 + $0x1b84] ss:$16 sps:$4 sm:$0xff]  }
 0x334   :  { %8620 = vmatprep.subr.bf16.mxu0 %v19335_v28  ;;  %9481 = vmatprep.subr.bf16.mxu1 %v19338_v29  ;;  %v19430_v28 = vld [vmem:[%s27988_s1 + $0x1b8c] ss:$16 sps:$4 sm:$0xff]   ;;  %v19425_v29 = vld [vmem:[%s27988_s1 + $0x1b80] ss:$16 sps:$4 sm:$0xff]  }
 0x337   :  { %8621 = vmatpush1.bf16.msra.mxu0 %v19333_v24  ;;  %9482 = vmatpush1.bf16.msra.mxu1 %v19336_v31  ;;  %v19428_v24 = vld [vmem:[%s27988_s1 + $0x1b88] ss:$16 sps:$4 sm:$0xff]   ;;  %v19433_v31 = vld [vmem:[%s27988_s1 + $0x1ba4] ss:$16 sps:$4 sm:$0xff]  }
 0x338   :  { %8622 = vmatprep.subr.bf16.mxu0 %v19341_v32  ;;  %9483 = vmatprep.subr.bf16.mxu1 %v19344_v27  ;;  %v19436_v32 = vld [vmem:[%s27988_s1 + $0x1bac] ss:$16 sps:$4 sm:$0xff]   ;;  %v19431_v27 = vld [vmem:[%s27988_s1 + $0x1ba0] ss:$16 sps:$4 sm:$0xff]  }
 0x33b   :  { %8623 = vmatpush1.bf16.msra.mxu0 %v19339_v34  ;;  %9484 = vmatpush1.bf16.msra.mxu1 %v19342_v35  ;;  %v19434_v34 = vld [vmem:[%s27988_s1 + $0x1ba8] ss:$16 sps:$4 sm:$0xff]   ;;  %v19439_v35 = vld [vmem:[%s27988_s1 + $0x1bc4] ss:$16 sps:$4 sm:$0xff]  }
 0x33c   :  { %8624 = vmatprep.subr.bf16.mxu0 %v19347_v30  ;;  %9485 = vmatprep.subr.bf16.mxu1 %v19350_v37  ;;  %v19442_v30 = vld [vmem:[%s27988_s1 + $0x1bcc] ss:$16 sps:$4 sm:$0xff]   ;;  %v19437_v37 = vld [vmem:[%s27988_s1 + $0x1bc0] ss:$16 sps:$4 sm:$0xff]  }
 0x33f   :  { %8625 = vmatpush1.bf16.msra.mxu0 %v19345_v38  ;;  %9486 = vmatpush1.bf16.msra.mxu1 %v19348_v39  ;;  %v19440_v38 = vld [vmem:[%s27988_s1 + $0x1bc8] ss:$16 sps:$4 sm:$0xff]   ;;  %v19445_v39 = vld [vmem:[%s27988_s1 + $0x1be4] ss:$16 sps:$4 sm:$0xff]  }
 0x340   :  { %8635 = vmatprep.subr.bf16.mxu0 %v19355_v40  ;;  %9496 = vmatprep.subr.bf16.mxu1 %v19358_v41  ;;  %v19448_v40 = vld [vmem:[%s27988_s1 + $0x1bec] ss:$16 sps:$4 sm:$0xff]   ;;  %v19443_v41 = vld [vmem:[%s27988_s1 + $0x1be0] ss:$16 sps:$4 sm:$0xff]  }
 0x342   :  { %8627 = vmatmul.mubr.bf16.vlgmr.msra.gmra.mrb[0].mxu0 %v15731_v36  ;;  %9488 = vmatmul.mubr.bf16.vlgmr.msra.gmra.mrb[0].mxu1 %v15731_v36  ;;  %v19446_v36 = vld [vmem:[%s27988_s1 + $0x1be8] ss:$16 sps:$4 sm:$0xff]  }
 0x343   :  { %8636 = vmatpush1.bf16.msra.mxu0 %v19353_v43  ;;  %9497 = vmatpush1.bf16.msra.mxu1 %v19356_v44  ;;  %v19453_v43 = vld [vmem:[%s27988_s1 + $0x1c04] ss:$16 sps:$4 sm:$0xff]   ;;  %v19456_v44 = vld [vmem:[%s27988_s1 + $0x1c0c] ss:$16 sps:$4 sm:$0xff]  }
 0x344   :  { %8637 = vmatprep.subr.bf16.mxu0 %v19361_v33  ;;  %9498 = vmatprep.subr.bf16.mxu1 %v19364_v45  ;;  %v15733_v33 = vcombine.low %v23962_v42, %v23962_v42  ;;  %v24163_v45 = vld [vmem:[%s27989_s0 + $0x70] sm:$0xff] }
 0x345   :  { %8667 = vmatprep.mubr.bf16.mxu0 %v15734_v46  ;;  %9528 = vmatprep.mubr.bf16.mxu1 %v15734_v46  ;;  %v19451_v46 = vld [vmem:[%s27988_s1 + $0x1c00] ss:$16 sps:$4 sm:$0xff]   ;;  %v19459_v42 = vld [vmem:[%s27988_s1 + $0x1c24] ss:$16 sps:$4 sm:$0xff]  }
 0x347   :  { %8638 = vmatpush1.bf16.msra.mxu0 %v19359_v47  ;;  %9499 = vmatpush1.bf16.msra.mxu1 %v19362_v48  ;;  %v19454_v47 = vld [vmem:[%s27988_s1 + $0x1c08] ss:$16 sps:$4 sm:$0xff]   ;;  %v19462_v48 = vld [vmem:[%s27988_s1 + $0x1c2c] ss:$16 sps:$4 sm:$0xff]  }
 0x348   :  { %8639 = vmatprep.subr.bf16.mxu0 %v19367_v49  ;;  %9500 = vmatprep.subr.bf16.mxu1 %v19370_v50  ;;  %v15736_v49 = vcombine.high %v24163_v45, %v24163_v45  ;;  %v19457_v50 = vld [vmem:[%s27988_s1 + $0x1c20] ss:$16 sps:$4 sm:$0xff]  }
 0x34b   :  { %8640 = vmatpush1.bf16.msra.mxu0 %v19365_v51  ;;  %9501 = vmatpush1.bf16.msra.mxu1 %v19368_v52  ;;  %v19460_v51 = vld [vmem:[%s27988_s1 + $0x1c28] ss:$16 sps:$4 sm:$0xff]   ;;  %v19465_v52 = vld [vmem:[%s27988_s1 + $0x1c44] ss:$16 sps:$4 sm:$0xff]  }
 0x34c   :  { %8641 = vmatprep.subr.bf16.mxu0 %v19373_v53  ;;  %9502 = vmatprep.subr.bf16.mxu1 %v19376_v54  ;;  %v19468_v53 = vld [vmem:[%s27988_s1 + $0x1c4c] ss:$16 sps:$4 sm:$0xff]   ;;  %v19463_v54 = vld [vmem:[%s27988_s1 + $0x1c40] ss:$16 sps:$4 sm:$0xff]  }
 0x34f   :  { %8642 = vmatpush1.bf16.msra.mxu0 %v19371_v55  ;;  %9503 = vmatpush1.bf16.msra.mxu1 %v19374_v56  ;;  %v19466_v55 = vld [vmem:[%s27988_s1 + $0x1c48] ss:$16 sps:$4 sm:$0xff]   ;;  %v19471_v56 = vld [vmem:[%s27988_s1 + $0x1c64] ss:$16 sps:$4 sm:$0xff]  }
 0x350   :  { %8643 = vmatprep.subr.bf16.mxu0 %v19379_v57  ;;  %9504 = vmatprep.subr.bf16.mxu1 %v19382_v58  ;;  %v19474_v57 = vld [vmem:[%s27988_s1 + $0x1c6c] ss:$16 sps:$4 sm:$0xff]   ;;  %v19469_v58 = vld [vmem:[%s27988_s1 + $0x1c60] ss:$16 sps:$4 sm:$0xff]  }
 0x353   :  { %8644 = vmatpush1.bf16.msra.mxu0 %v19377_v59  ;;  %9505 = vmatpush1.bf16.msra.mxu1 %v19380_v60  ;;  %v19472_v59 = vld [vmem:[%s27988_s1 + $0x1c68] ss:$16 sps:$4 sm:$0xff]   ;;  %v19477_v60 = vld [vmem:[%s27988_s1 + $0x1c84] ss:$16 sps:$4 sm:$0xff]  }
 0x354   :  { %8645 = vmatprep.subr.bf16.mxu0 %v19385_v61  ;;  %9506 = vmatprep.subr.bf16.mxu1 %v19388_v62  ;;  %v19480_v61 = vld [vmem:[%s27988_s1 + $0x1c8c] ss:$16 sps:$4 sm:$0xff]   ;;  %v19475_v62 = vld [vmem:[%s27988_s1 + $0x1c80] ss:$16 sps:$4 sm:$0xff]  }
 0x357   :  { %8646 = vmatpush1.bf16.msra.mxu0 %v19383_v63  ;;  %9507 = vmatpush1.bf16.msra.mxu1 %v19386_v0  ;;  %v19478_v63 = vld [vmem:[%s27988_s1 + $0x1c88] ss:$16 sps:$4 sm:$0xff]   ;;  %v19483_v0 = vld [vmem:[%s27988_s1 + $0x1ca4] ss:$16 sps:$4 sm:$0xff]  }
 0x358   :  { %8647 = vmatprep.subr.bf16.mxu0 %v19391_v1  ;;  %9508 = vmatprep.subr.bf16.mxu1 %v19394_v2  ;;  %v19486_v1 = vld [vmem:[%s27988_s1 + $0x1cac] ss:$16 sps:$4 sm:$0xff]   ;;  %v19481_v2 = vld [vmem:[%s27988_s1 + $0x1ca0] ss:$16 sps:$4 sm:$0xff]  }
 0x35b   :  { %8648 = vmatpush1.bf16.msra.mxu0 %v19389_v3  ;;  %9509 = vmatpush1.bf16.msra.mxu1 %v19392_v4  ;;  %v19484_v3 = vld [vmem:[%s27988_s1 + $0x1ca8] ss:$16 sps:$4 sm:$0xff]   ;;  %v19489_v4 = vld [vmem:[%s27988_s1 + $0x1cc4] ss:$16 sps:$4 sm:$0xff]  }
 0x35c   :  { %8649 = vmatprep.subr.bf16.mxu0 %v19397_v5  ;;  %9510 = vmatprep.subr.bf16.mxu1 %v19400_v6  ;;  %v19492_v5 = vld [vmem:[%s27988_s1 + $0x1ccc] ss:$16 sps:$4 sm:$0xff]   ;;  %v19487_v6 = vld [vmem:[%s27988_s1 + $0x1cc0] ss:$16 sps:$4 sm:$0xff]  }
 0x35f   :  { %8650 = vmatpush1.bf16.msra.mxu0 %v19395_v7  ;;  %9511 = vmatpush1.bf16.msra.mxu1 %v19398_v8  ;;  %v19490_v7 = vld [vmem:[%s27988_s1 + $0x1cc8] ss:$16 sps:$4 sm:$0xff]   ;;  %v19495_v8 = vld [vmem:[%s27988_s1 + $0x1ce4] ss:$16 sps:$4 sm:$0xff]  }
 0x360   :  { %8651 = vmatprep.subr.bf16.mxu0 %v19403_v9  ;;  %9512 = vmatprep.subr.bf16.mxu1 %v19406_v10  ;;  %v19498_v9 = vld [vmem:[%s27988_s1 + $0x1cec] ss:$16 sps:$4 sm:$0xff]   ;;  %v19493_v10 = vld [vmem:[%s27988_s1 + $0x1ce0] ss:$16 sps:$4 sm:$0xff]  }
 0x363   :  { %8652 = vmatpush1.bf16.msra.mxu0 %v19401_v12  ;;  %9513 = vmatpush1.bf16.msra.mxu1 %v19404_v13  ;;  %v19496_v12 = vld [vmem:[%s27988_s1 + $0x1ce8] ss:$16 sps:$4 sm:$0xff]   ;;  %v19501_v13 = vld [vmem:[%s27988_s1 + $0x1d04] ss:$16 sps:$4 sm:$0xff]  }
 0x364   :  { %8653 = vmatprep.subr.bf16.mxu0 %v19409_v15  ;;  %9514 = vmatprep.subr.bf16.mxu1 %v19412_v11  ;;  %v19504_v15 = vld [vmem:[%s27988_s1 + $0x1d0c] ss:$16 sps:$4 sm:$0xff]   ;;  %v19499_v11 = vld [vmem:[%s27988_s1 + $0x1d00] ss:$16 sps:$4 sm:$0xff]  }
 0x367   :  { %8654 = vmatpush1.bf16.msra.mxu0 %v19407_v17  ;;  %9515 = vmatpush1.bf16.msra.mxu1 %v19410_v14  ;;  %v19502_v17 = vld [vmem:[%s27988_s1 + $0x1d08] ss:$16 sps:$4 sm:$0xff]   ;;  %v19507_v14 = vld [vmem:[%s27988_s1 + $0x1d24] ss:$16 sps:$4 sm:$0xff]  }
 0x368   :  { %8655 = vmatprep.subr.bf16.mxu0 %v19415_v19  ;;  %9516 = vmatprep.subr.bf16.mxu1 %v19418_v20  ;;  %v19510_v19 = vld [vmem:[%s27988_s1 + $0x1d2c] ss:$16 sps:$4 sm:$0xff]   ;;  %v19505_v20 = vld [vmem:[%s27988_s1 + $0x1d20] ss:$16 sps:$4 sm:$0xff]  }
 0x36b   :  { %8656 = vmatpush1.bf16.msra.mxu0 %v19413_v16  ;;  %9517 = vmatpush1.bf16.msra.mxu1 %v19416_v22  ;;  %v19508_v16 = vld [vmem:[%s27988_s1 + $0x1d28] ss:$16 sps:$4 sm:$0xff]   ;;  %v19513_v22 = vld [vmem:[%s27988_s1 + $0x1d44] ss:$16 sps:$4 sm:$0xff]  }
 0x36c   :  { %8657 = vmatprep.subr.bf16.mxu0 %v19421_v23  ;;  %9518 = vmatprep.subr.bf16.mxu1 %v19424_v18  ;;  %v19516_v23 = vld [vmem:[%s27988_s1 + $0x1d4c] ss:$16 sps:$4 sm:$0xff]   ;;  %v19511_v18 = vld [vmem:[%s27988_s1 + $0x1d40] ss:$16 sps:$4 sm:$0xff]  }
 0x36f   :  { %8658 = vmatpush1.bf16.msra.mxu0 %v19419_v25  ;;  %9519 = vmatpush1.bf16.msra.mxu1 %v19422_v26  ;;  %v19514_v25 = vld [vmem:[%s27988_s1 + $0x1d48] ss:$16 sps:$4 sm:$0xff]   ;;  %v19519_v26 = vld [vmem:[%s27988_s1 + $0x1d64] ss:$16 sps:$4 sm:$0xff]  }
 0x370   :  { %8659 = vmatprep.subr.bf16.mxu0 %v19427_v21  ;;  %9520 = vmatprep.subr.bf16.mxu1 %v19430_v28  ;;  %v19522_v21 = vld [vmem:[%s27988_s1 + $0x1d6c] ss:$16 sps:$4 sm:$0xff]   ;;  %v19517_v28 = vld [vmem:[%s27988_s1 + $0x1d60] ss:$16 sps:$4 sm:$0xff]  }
 0x373   :  { %8660 = vmatpush1.bf16.msra.mxu0 %v19425_v29  ;;  %9521 = vmatpush1.bf16.msra.mxu1 %v19428_v24  ;;  %v19520_v29 = vld [vmem:[%s27988_s1 + $0x1d68] ss:$16 sps:$4 sm:$0xff]   ;;  %v19525_v24 = vld [vmem:[%s27988_s1 + $0x1d84] ss:$16 sps:$4 sm:$0xff]  }
 0x374   :  { %8661 = vmatprep.subr.bf16.mxu0 %v19433_v31  ;;  %9522 = vmatprep.subr.bf16.mxu1 %v19436_v32  ;;  %v19528_v31 = vld [vmem:[%s27988_s1 + $0x1d8c] ss:$16 sps:$4 sm:$0xff]   ;;  %v19523_v32 = vld [vmem:[%s27988_s1 + $0x1d80] ss:$16 sps:$4 sm:$0xff]  }
 0x377   :  { %8662 = vmatpush1.bf16.msra.mxu0 %v19431_v27  ;;  %9523 = vmatpush1.bf16.msra.mxu1 %v19434_v34  ;;  %v19526_v27 = vld [vmem:[%s27988_s1 + $0x1d88] ss:$16 sps:$4 sm:$0xff]   ;;  %v19531_v34 = vld [vmem:[%s27988_s1 + $0x1da4] ss:$16 sps:$4 sm:$0xff]  }
 0x378   :  { %8663 = vmatprep.subr.bf16.mxu0 %v19439_v35  ;;  %9524 = vmatprep.subr.bf16.mxu1 %v19442_v30  ;;  %v19534_v35 = vld [vmem:[%s27988_s1 + $0x1dac] ss:$16 sps:$4 sm:$0xff]   ;;  %v19529_v30 = vld [vmem:[%s27988_s1 + $0x1da0] ss:$16 sps:$4 sm:$0xff]  }
 0x37b   :  { %8664 = vmatpush1.bf16.msra.mxu0 %v19437_v37  ;;  %9525 = vmatpush1.bf16.msra.mxu1 %v19440_v38  ;;  %v19532_v37 = vld [vmem:[%s27988_s1 + $0x1da8] ss:$16 sps:$4 sm:$0xff]   ;;  %v19537_v38 = vld [vmem:[%s27988_s1 + $0x1dc4] ss:$16 sps:$4 sm:$0xff]  }
 0x37c   :  { %8665 = vmatprep.subr.bf16.mxu0 %v19445_v39  ;;  %9526 = vmatprep.subr.bf16.mxu1 %v19448_v40  ;;  %v19540_v39 = vld [vmem:[%s27988_s1 + $0x1dcc] ss:$16 sps:$4 sm:$0xff]   ;;  %v19535_v40 = vld [vmem:[%s27988_s1 + $0x1dc0] ss:$16 sps:$4 sm:$0xff]  }
 0x37f   :  { %8666 = vmatpush1.bf16.msra.mxu0 %v19443_v41  ;;  %9527 = vmatpush1.bf16.msra.mxu1 %v19446_v36  ;;  %v19538_v41 = vld [vmem:[%s27988_s1 + $0x1dc8] ss:$16 sps:$4 sm:$0xff]   ;;  %v19543_v36 = vld [vmem:[%s27988_s1 + $0x1de4] ss:$16 sps:$4 sm:$0xff]  }
 0x380   :  { %8676 = vmatprep.subr.bf16.mxu0 %v19453_v43  ;;  %9537 = vmatprep.subr.bf16.mxu1 %v19456_v44  ;;  %v19546_v43 = vld [vmem:[%s27988_s1 + $0x1dec] ss:$16 sps:$4 sm:$0xff]   ;;  %v19541_v44 = vld [vmem:[%s27988_s1 + $0x1de0] ss:$16 sps:$4 sm:$0xff]  }
 0x382   :  { %8668 = vmatmul.mubr.bf16.vlgmr.msra.gmra.mrb[0].mxu0 %v15733_v33  ;;  %9529 = vmatmul.mubr.bf16.vlgmr.msra.gmra.mrb[0].mxu1 %v15733_v33  ;;  %v19544_v33 = vld [vmem:[%s27988_s1 + $0x1de8] ss:$16 sps:$4 sm:$0xff]  }
 0x383   :  { %8677 = vmatpush1.bf16.msra.mxu0 %v19451_v46  ;;  %9538 = vmatpush1.bf16.msra.mxu1 %v19454_v47  ;;  %v19551_v46 = vld [vmem:[%s27988_s1 + $0x1e04] ss:$16 sps:$4 sm:$0xff]   ;;  %v19554_v47 = vld [vmem:[%s27988_s1 + $0x1e0c] ss:$16 sps:$4 sm:$0xff]  }
 0x384   :  { %8678 = vmatprep.subr.bf16.mxu0 %v19459_v42  ;;  %9539 = vmatprep.subr.bf16.mxu1 %v19462_v48  ;;  %v15735_v42 = vcombine.low %v24163_v45, %v24163_v45  ;;  %v24364_v48 = vld [vmem:[%s27989_s0 + $0x78] sm:$0xff]  ;;  %v19557_v45 = vld [vmem:[%s27988_s1 + $0x1e24] ss:$16 sps:$4 sm:$0xff]  }
 0x385   :  { %8708 = vmatprep.mubr.bf16.mxu0 %v15736_v49  ;;  %9569 = vmatprep.mubr.bf16.mxu1 %v15736_v49  ;;  %v19549_v49 = vld [vmem:[%s27988_s1 + $0x1e00] ss:$16 sps:$4 sm:$0xff]  }
 0x387   :  { %8679 = vmatpush1.bf16.msra.mxu0 %v19457_v50  ;;  %9540 = vmatpush1.bf16.msra.mxu1 %v19460_v51  ;;  %v19552_v50 = vld [vmem:[%s27988_s1 + $0x1e08] ss:$16 sps:$4 sm:$0xff]   ;;  %v19560_v51 = vld [vmem:[%s27988_s1 + $0x1e2c] ss:$16 sps:$4 sm:$0xff]  }
 0x388   :  { %8680 = vmatprep.subr.bf16.mxu0 %v19465_v52  ;;  %9541 = vmatprep.subr.bf16.mxu1 %v19468_v53  ;;  %v15738_v52 = vcombine.high %v24364_v48, %v24364_v48  ;;  %v19555_v53 = vld [vmem:[%s27988_s1 + $0x1e20] ss:$16 sps:$4 sm:$0xff]  }
 0x38b   :  { %8681 = vmatpush1.bf16.msra.mxu0 %v19463_v54  ;;  %9542 = vmatpush1.bf16.msra.mxu1 %v19466_v55  ;;  %v19558_v54 = vld [vmem:[%s27988_s1 + $0x1e28] ss:$16 sps:$4 sm:$0xff]   ;;  %v19563_v55 = vld [vmem:[%s27988_s1 + $0x1e44] ss:$16 sps:$4 sm:$0xff]  }
 0x38c   :  { %8682 = vmatprep.subr.bf16.mxu0 %v19471_v56  ;;  %9543 = vmatprep.subr.bf16.mxu1 %v19474_v57  ;;  %v19566_v56 = vld [vmem:[%s27988_s1 + $0x1e4c] ss:$16 sps:$4 sm:$0xff]   ;;  %v19561_v57 = vld [vmem:[%s27988_s1 + $0x1e40] ss:$16 sps:$4 sm:$0xff]  }
 0x38f   :  { %8683 = vmatpush1.bf16.msra.mxu0 %v19469_v58  ;;  %9544 = vmatpush1.bf16.msra.mxu1 %v19472_v59  ;;  %v19564_v58 = vld [vmem:[%s27988_s1 + $0x1e48] ss:$16 sps:$4 sm:$0xff]   ;;  %v19569_v59 = vld [vmem:[%s27988_s1 + $0x1e64] ss:$16 sps:$4 sm:$0xff]  }
 0x390   :  { %8684 = vmatprep.subr.bf16.mxu0 %v19477_v60  ;;  %9545 = vmatprep.subr.bf16.mxu1 %v19480_v61  ;;  %v19572_v60 = vld [vmem:[%s27988_s1 + $0x1e6c] ss:$16 sps:$4 sm:$0xff]   ;;  %v19567_v61 = vld [vmem:[%s27988_s1 + $0x1e60] ss:$16 sps:$4 sm:$0xff]  }
 0x393   :  { %8685 = vmatpush1.bf16.msra.mxu0 %v19475_v62  ;;  %9546 = vmatpush1.bf16.msra.mxu1 %v19478_v63  ;;  %v19570_v62 = vld [vmem:[%s27988_s1 + $0x1e68] ss:$16 sps:$4 sm:$0xff]   ;;  %v19575_v63 = vld [vmem:[%s27988_s1 + $0x1e84] ss:$16 sps:$4 sm:$0xff]  }
 0x394   :  { %8686 = vmatprep.subr.bf16.mxu0 %v19483_v0  ;;  %9547 = vmatprep.subr.bf16.mxu1 %v19486_v1  ;;  %v19578_v0 = vld [vmem:[%s27988_s1 + $0x1e8c] ss:$16 sps:$4 sm:$0xff]   ;;  %v19573_v1 = vld [vmem:[%s27988_s1 + $0x1e80] ss:$16 sps:$4 sm:$0xff]  }
 0x397   :  { %8687 = vmatpush1.bf16.msra.mxu0 %v19481_v2  ;;  %9548 = vmatpush1.bf16.msra.mxu1 %v19484_v3  ;;  %v19576_v2 = vld [vmem:[%s27988_s1 + $0x1e88] ss:$16 sps:$4 sm:$0xff]   ;;  %v19581_v3 = vld [vmem:[%s27988_s1 + $0x1ea4] ss:$16 sps:$4 sm:$0xff]  }
 0x398   :  { %8688 = vmatprep.subr.bf16.mxu0 %v19489_v4  ;;  %9549 = vmatprep.subr.bf16.mxu1 %v19492_v5  ;;  %v19584_v4 = vld [vmem:[%s27988_s1 + $0x1eac] ss:$16 sps:$4 sm:$0xff]   ;;  %v19579_v5 = vld [vmem:[%s27988_s1 + $0x1ea0] ss:$16 sps:$4 sm:$0xff]  }
 0x39b   :  { %8689 = vmatpush1.bf16.msra.mxu0 %v19487_v6  ;;  %9550 = vmatpush1.bf16.msra.mxu1 %v19490_v7  ;;  %v19582_v6 = vld [vmem:[%s27988_s1 + $0x1ea8] ss:$16 sps:$4 sm:$0xff]   ;;  %v19587_v7 = vld [vmem:[%s27988_s1 + $0x1ec4] ss:$16 sps:$4 sm:$0xff]  }
 0x39c   :  { %8690 = vmatprep.subr.bf16.mxu0 %v19495_v8  ;;  %9551 = vmatprep.subr.bf16.mxu1 %v19498_v9  ;;  %v19590_v8 = vld [vmem:[%s27988_s1 + $0x1ecc] ss:$16 sps:$4 sm:$0xff]   ;;  %v19585_v9 = vld [vmem:[%s27988_s1 + $0x1ec0] ss:$16 sps:$4 sm:$0xff]  }
 0x39f   :  { %8691 = vmatpush1.bf16.msra.mxu0 %v19493_v10  ;;  %9552 = vmatpush1.bf16.msra.mxu1 %v19496_v12  ;;  %v19588_v10 = vld [vmem:[%s27988_s1 + $0x1ec8] ss:$16 sps:$4 sm:$0xff]   ;;  %v19593_v12 = vld [vmem:[%s27988_s1 + $0x1ee4] ss:$16 sps:$4 sm:$0xff]  }
 0x3a0   :  { %8692 = vmatprep.subr.bf16.mxu0 %v19501_v13  ;;  %9553 = vmatprep.subr.bf16.mxu1 %v19504_v15  ;;  %v19596_v13 = vld [vmem:[%s27988_s1 + $0x1eec] ss:$16 sps:$4 sm:$0xff]   ;;  %v19591_v15 = vld [vmem:[%s27988_s1 + $0x1ee0] ss:$16 sps:$4 sm:$0xff]  }
 0x3a3   :  { %8693 = vmatpush1.bf16.msra.mxu0 %v19499_v11  ;;  %9554 = vmatpush1.bf16.msra.mxu1 %v19502_v17  ;;  %v19594_v11 = vld [vmem:[%s27988_s1 + $0x1ee8] ss:$16 sps:$4 sm:$0xff]   ;;  %v19599_v17 = vld [vmem:[%s27988_s1 + $0x1f04] ss:$16 sps:$4 sm:$0xff]  }
 0x3a4   :  { %8694 = vmatprep.subr.bf16.mxu0 %v19507_v14  ;;  %9555 = vmatprep.subr.bf16.mxu1 %v19510_v19  ;;  %v19602_v14 = vld [vmem:[%s27988_s1 + $0x1f0c] ss:$16 sps:$4 sm:$0xff]   ;;  %v19597_v19 = vld [vmem:[%s27988_s1 + $0x1f00] ss:$16 sps:$4 sm:$0xff]  }
 0x3a7   :  { %8695 = vmatpush1.bf16.msra.mxu0 %v19505_v20  ;;  %9556 = vmatpush1.bf16.msra.mxu1 %v19508_v16  ;;  %v19600_v20 = vld [vmem:[%s27988_s1 + $0x1f08] ss:$16 sps:$4 sm:$0xff]   ;;  %v19605_v16 = vld [vmem:[%s27988_s1 + $0x1f24] ss:$16 sps:$4 sm:$0xff]  }
 0x3a8   :  { %8696 = vmatprep.subr.bf16.mxu0 %v19513_v22  ;;  %9557 = vmatprep.subr.bf16.mxu1 %v19516_v23  ;;  %v19608_v22 = vld [vmem:[%s27988_s1 + $0x1f2c] ss:$16 sps:$4 sm:$0xff]   ;;  %v19603_v23 = vld [vmem:[%s27988_s1 + $0x1f20] ss:$16 sps:$4 sm:$0xff]  }
 0x3ab   :  { %8697 = vmatpush1.bf16.msra.mxu0 %v19511_v18  ;;  %9558 = vmatpush1.bf16.msra.mxu1 %v19514_v25  ;;  %v19606_v18 = vld [vmem:[%s27988_s1 + $0x1f28] ss:$16 sps:$4 sm:$0xff]   ;;  %v19611_v25 = vld [vmem:[%s27988_s1 + $0x1f44] ss:$16 sps:$4 sm:$0xff]  }
 0x3ac   :  { %8698 = vmatprep.subr.bf16.mxu0 %v19519_v26  ;;  %9559 = vmatprep.subr.bf16.mxu1 %v19522_v21  ;;  %v19614_v26 = vld [vmem:[%s27988_s1 + $0x1f4c] ss:$16 sps:$4 sm:$0xff]   ;;  %v19609_v21 = vld [vmem:[%s27988_s1 + $0x1f40] ss:$16 sps:$4 sm:$0xff]  }
 0x3af   :  { %8699 = vmatpush1.bf16.msra.mxu0 %v19517_v28  ;;  %9560 = vmatpush1.bf16.msra.mxu1 %v19520_v29  ;;  %v19612_v28 = vld [vmem:[%s27988_s1 + $0x1f48] ss:$16 sps:$4 sm:$0xff]   ;;  %v19617_v29 = vld [vmem:[%s27988_s1 + $0x1f64] ss:$16 sps:$4 sm:$0xff]  }
 0x3b0   :  { %8700 = vmatprep.subr.bf16.mxu0 %v19525_v24  ;;  %9561 = vmatprep.subr.bf16.mxu1 %v19528_v31  ;;  %v19620_v24 = vld [vmem:[%s27988_s1 + $0x1f6c] ss:$16 sps:$4 sm:$0xff]   ;;  %v19615_v31 = vld [vmem:[%s27988_s1 + $0x1f60] ss:$16 sps:$4 sm:$0xff]  }
 0x3b3   :  { %8701 = vmatpush1.bf16.msra.mxu0 %v19523_v32  ;;  %9562 = vmatpush1.bf16.msra.mxu1 %v19526_v27  ;;  %v19618_v32 = vld [vmem:[%s27988_s1 + $0x1f68] ss:$16 sps:$4 sm:$0xff]   ;;  %v19623_v27 = vld [vmem:[%s27988_s1 + $0x1f84] ss:$16 sps:$4 sm:$0xff]  }
 0x3b4   :  { %8702 = vmatprep.subr.bf16.mxu0 %v19531_v34  ;;  %9563 = vmatprep.subr.bf16.mxu1 %v19534_v35  ;;  %v19626_v34 = vld [vmem:[%s27988_s1 + $0x1f8c] ss:$16 sps:$4 sm:$0xff]   ;;  %v19621_v35 = vld [vmem:[%s27988_s1 + $0x1f80] ss:$16 sps:$4 sm:$0xff]  }
 0x3b7   :  { %8703 = vmatpush1.bf16.msra.mxu0 %v19529_v30  ;;  %9564 = vmatpush1.bf16.msra.mxu1 %v19532_v37  ;;  %v19624_v30 = vld [vmem:[%s27988_s1 + $0x1f88] ss:$16 sps:$4 sm:$0xff]   ;;  %v19629_v37 = vld [vmem:[%s27988_s1 + $0x1fa4] ss:$16 sps:$4 sm:$0xff]  }
 0x3b8   :  { %8704 = vmatprep.subr.bf16.mxu0 %v19537_v38  ;;  %9565 = vmatprep.subr.bf16.mxu1 %v19540_v39  ;;  %v19632_v38 = vld [vmem:[%s27988_s1 + $0x1fac] ss:$16 sps:$4 sm:$0xff]   ;;  %v19627_v39 = vld [vmem:[%s27988_s1 + $0x1fa0] ss:$16 sps:$4 sm:$0xff]  }
 0x3bb   :  { %8705 = vmatpush1.bf16.msra.mxu0 %v19535_v40  ;;  %9566 = vmatpush1.bf16.msra.mxu1 %v19538_v41  ;;  %v19630_v40 = vld [vmem:[%s27988_s1 + $0x1fa8] ss:$16 sps:$4 sm:$0xff]   ;;  %v19635_v41 = vld [vmem:[%s27988_s1 + $0x1fc4] ss:$16 sps:$4 sm:$0xff]  }
 0x3bc   :  { %8706 = vmatprep.subr.bf16.mxu0 %v19543_v36  ;;  %9567 = vmatprep.subr.bf16.mxu1 %v19546_v43  ;;  %v19638_v36 = vld [vmem:[%s27988_s1 + $0x1fcc] ss:$16 sps:$4 sm:$0xff]   ;;  %v19633_v43 = vld [vmem:[%s27988_s1 + $0x1fc0] ss:$16 sps:$4 sm:$0xff]  }
 0x3bf   :  { %8707 = vmatpush1.bf16.msra.mxu0 %v19541_v44  ;;  %9568 = vmatpush1.bf16.msra.mxu1 %v19544_v33  ;;  %v19636_v44 = vld [vmem:[%s27988_s1 + $0x1fc8] ss:$16 sps:$4 sm:$0xff]   ;;  %v19641_v33 = vld [vmem:[%s27988_s1 + $0x1fe4] ss:$16 sps:$4 sm:$0xff]  }
 0x3c0   :  { %8717 = vmatprep.subr.bf16.mxu0 %v19551_v46  ;;  %9578 = vmatprep.subr.bf16.mxu1 %v19554_v47  ;;  %v19644_v46 = vld [vmem:[%s27988_s1 + $0x1fec] ss:$16 sps:$4 sm:$0xff]   ;;  %v19639_v47 = vld [vmem:[%s27988_s1 + $0x1fe0] ss:$16 sps:$4 sm:$0xff]  }
 0x3c2   :  { %8709 = vmatmul.mubr.bf16.vlgmr.msra.gmra.mrb[0].mxu0 %v15735_v42  ;;  %9570 = vmatmul.mubr.bf16.vlgmr.msra.gmra.mrb[0].mxu1 %v15735_v42  ;;  %v19642_v42 = vld [vmem:[%s27988_s1 + $0x1fe8] ss:$16 sps:$4 sm:$0xff]  }
 0x3c3   :  { %8718 = vmatpush1.bf16.msra.mxu0 %v19549_v49  ;;  %9579 = vmatpush1.bf16.msra.mxu1 %v19552_v50  ;;  %v19649_v49 = vld [vmem:[%s27988_s1 + $0x2004] ss:$16 sps:$4 sm:$0xff]   ;;  %v19652_v50 = vld [vmem:[%s27988_s1 + $0x200c] ss:$16 sps:$4 sm:$0xff]  }
 0x3c4   :  { %8719 = vmatprep.subr.bf16.mxu0 %v19557_v45  ;;  %9580 = vmatprep.subr.bf16.mxu1 %v19560_v51  ;;  %v15737_v45 = vcombine.low %v24364_v48, %v24364_v48  ;;  %v24565_v51 = vld [vmem:[%s27989_s0 + $0x80] sm:$0xff] }
 0x3c5   :  { %8749 = vmatprep.mubr.bf16.mxu0 %v15738_v52  ;;  %9610 = vmatprep.mubr.bf16.mxu1 %v15738_v52  ;;  %v19647_v52 = vld [vmem:[%s27988_s1 + $0x2000] ss:$16 sps:$4 sm:$0xff]   ;;  %v19655_v48 = vld [vmem:[%s27988_s1 + $0x2024] ss:$16 sps:$4 sm:$0xff]  }
 0x3c7   :  { %8720 = vmatpush1.bf16.msra.mxu0 %v19555_v53  ;;  %9581 = vmatpush1.bf16.msra.mxu1 %v19558_v54  ;;  %v19650_v53 = vld [vmem:[%s27988_s1 + $0x2008] ss:$16 sps:$4 sm:$0xff]   ;;  %v19658_v54 = vld [vmem:[%s27988_s1 + $0x202c] ss:$16 sps:$4 sm:$0xff]  }
 0x3c8   :  { %8721 = vmatprep.subr.bf16.mxu0 %v19563_v55  ;;  %9582 = vmatprep.subr.bf16.mxu1 %v19566_v56  ;;  %v15740_v55 = vcombine.high %v24565_v51, %v24565_v51  ;;  %v19653_v56 = vld [vmem:[%s27988_s1 + $0x2020] ss:$16 sps:$4 sm:$0xff]  }
 0x3cb   :  { %8722 = vmatpush1.bf16.msra.mxu0 %v19561_v57  ;;  %9583 = vmatpush1.bf16.msra.mxu1 %v19564_v58  ;;  %v19656_v57 = vld [vmem:[%s27988_s1 + $0x2028] ss:$16 sps:$4 sm:$0xff]   ;;  %v19661_v58 = vld [vmem:[%s27988_s1 + $0x2044] ss:$16 sps:$4 sm:$0xff]  }
 0x3cc   :  { %8723 = vmatprep.subr.bf16.mxu0 %v19569_v59  ;;  %9584 = vmatprep.subr.bf16.mxu1 %v19572_v60  ;;  %v19664_v59 = vld [vmem:[%s27988_s1 + $0x204c] ss:$16 sps:$4 sm:$0xff]   ;;  %v19659_v60 = vld [vmem:[%s27988_s1 + $0x2040] ss:$16 sps:$4 sm:$0xff]  }
 0x3cf   :  { %8724 = vmatpush1.bf16.msra.mxu0 %v19567_v61  ;;  %9585 = vmatpush1.bf16.msra.mxu1 %v19570_v62  ;;  %v19662_v61 = vld [vmem:[%s27988_s1 + $0x2048] ss:$16 sps:$4 sm:$0xff]   ;;  %v19667_v62 = vld [vmem:[%s27988_s1 + $0x2064] ss:$16 sps:$4 sm:$0xff]  }
 0x3d0   :  { %8725 = vmatprep.subr.bf16.mxu0 %v19575_v63  ;;  %9586 = vmatprep.subr.bf16.mxu1 %v19578_v0  ;;  %v19670_v63 = vld [vmem:[%s27988_s1 + $0x206c] ss:$16 sps:$4 sm:$0xff]   ;;  %v19665_v0 = vld [vmem:[%s27988_s1 + $0x2060] ss:$16 sps:$4 sm:$0xff]  }
 0x3d3   :  { %8726 = vmatpush1.bf16.msra.mxu0 %v19573_v1  ;;  %9587 = vmatpush1.bf16.msra.mxu1 %v19576_v2  ;;  %v19668_v1 = vld [vmem:[%s27988_s1 + $0x2068] ss:$16 sps:$4 sm:$0xff]   ;;  %v19673_v2 = vld [vmem:[%s27988_s1 + $0x2084] ss:$16 sps:$4 sm:$0xff]  }
 0x3d4   :  { %8727 = vmatprep.subr.bf16.mxu0 %v19581_v3  ;;  %9588 = vmatprep.subr.bf16.mxu1 %v19584_v4  ;;  %v19676_v3 = vld [vmem:[%s27988_s1 + $0x208c] ss:$16 sps:$4 sm:$0xff]   ;;  %v19671_v4 = vld [vmem:[%s27988_s1 + $0x2080] ss:$16 sps:$4 sm:$0xff]  }
 0x3d7   :  { %8728 = vmatpush1.bf16.msra.mxu0 %v19579_v5  ;;  %9589 = vmatpush1.bf16.msra.mxu1 %v19582_v6  ;;  %v19674_v5 = vld [vmem:[%s27988_s1 + $0x2088] ss:$16 sps:$4 sm:$0xff]   ;;  %v19679_v6 = vld [vmem:[%s27988_s1 + $0x20a4] ss:$16 sps:$4 sm:$0xff]  }
 0x3d8   :  { %8729 = vmatprep.subr.bf16.mxu0 %v19587_v7  ;;  %9590 = vmatprep.subr.bf16.mxu1 %v19590_v8  ;;  %v19682_v7 = vld [vmem:[%s27988_s1 + $0x20ac] ss:$16 sps:$4 sm:$0xff]   ;;  %v19677_v8 = vld [vmem:[%s27988_s1 + $0x20a0] ss:$16 sps:$4 sm:$0xff]  }
 0x3db   :  { %8730 = vmatpush1.bf16.msra.mxu0 %v19585_v9  ;;  %9591 = vmatpush1.bf16.msra.mxu1 %v19588_v10  ;;  %v19680_v9 = vld [vmem:[%s27988_s1 + $0x20a8] ss:$16 sps:$4 sm:$0xff]   ;;  %v19685_v10 = vld [vmem:[%s27988_s1 + $0x20c4] ss:$16 sps:$4 sm:$0xff]  }
 0x3dc   :  { %8731 = vmatprep.subr.bf16.mxu0 %v19593_v12  ;;  %9592 = vmatprep.subr.bf16.mxu1 %v19596_v13  ;;  %v19688_v12 = vld [vmem:[%s27988_s1 + $0x20cc] ss:$16 sps:$4 sm:$0xff]   ;;  %v19683_v13 = vld [vmem:[%s27988_s1 + $0x20c0] ss:$16 sps:$4 sm:$0xff]  }
 0x3df   :  { %8732 = vmatpush1.bf16.msra.mxu0 %v19591_v15  ;;  %9593 = vmatpush1.bf16.msra.mxu1 %v19594_v11  ;;  %v19686_v15 = vld [vmem:[%s27988_s1 + $0x20c8] ss:$16 sps:$4 sm:$0xff]   ;;  %v19691_v11 = vld [vmem:[%s27988_s1 + $0x20e4] ss:$16 sps:$4 sm:$0xff]  }
 0x3e0   :  { %8733 = vmatprep.subr.bf16.mxu0 %v19599_v17  ;;  %9594 = vmatprep.subr.bf16.mxu1 %v19602_v14  ;;  %v19694_v17 = vld [vmem:[%s27988_s1 + $0x20ec] ss:$16 sps:$4 sm:$0xff]   ;;  %v19689_v14 = vld [vmem:[%s27988_s1 + $0x20e0] ss:$16 sps:$4 sm:$0xff]  }
 0x3e3   :  { %8734 = vmatpush1.bf16.msra.mxu0 %v19597_v19  ;;  %9595 = vmatpush1.bf16.msra.mxu1 %v19600_v20  ;;  %v19692_v19 = vld [vmem:[%s27988_s1 + $0x20e8] ss:$16 sps:$4 sm:$0xff]   ;;  %v19697_v20 = vld [vmem:[%s27988_s1 + $0x2104] ss:$16 sps:$4 sm:$0xff]  }
 0x3e4   :  { %8735 = vmatprep.subr.bf16.mxu0 %v19605_v16  ;;  %9596 = vmatprep.subr.bf16.mxu1 %v19608_v22  ;;  %v19700_v16 = vld [vmem:[%s27988_s1 + $0x210c] ss:$16 sps:$4 sm:$0xff]   ;;  %v19695_v22 = vld [vmem:[%s27988_s1 + $0x2100] ss:$16 sps:$4 sm:$0xff]  }
 0x3e7   :  { %8736 = vmatpush1.bf16.msra.mxu0 %v19603_v23  ;;  %9597 = vmatpush1.bf16.msra.mxu1 %v19606_v18  ;;  %v19698_v23 = vld [vmem:[%s27988_s1 + $0x2108] ss:$16 sps:$4 sm:$0xff]   ;;  %v19703_v18 = vld [vmem:[%s27988_s1 + $0x2124] ss:$16 sps:$4 sm:$0xff]  }
 0x3e8   :  { %8737 = vmatprep.subr.bf16.mxu0 %v19611_v25  ;;  %9598 = vmatprep.subr.bf16.mxu1 %v19614_v26  ;;  %v19706_v25 = vld [vmem:[%s27988_s1 + $0x212c] ss:$16 sps:$4 sm:$0xff]   ;;  %v19701_v26 = vld [vmem:[%s27988_s1 + $0x2120] ss:$16 sps:$4 sm:$0xff]  }
 0x3eb   :  { %8738 = vmatpush1.bf16.msra.mxu0 %v19609_v21  ;;  %9599 = vmatpush1.bf16.msra.mxu1 %v19612_v28  ;;  %v19704_v21 = vld [vmem:[%s27988_s1 + $0x2128] ss:$16 sps:$4 sm:$0xff]   ;;  %v19709_v28 = vld [vmem:[%s27988_s1 + $0x2144] ss:$16 sps:$4 sm:$0xff]  }
 0x3ec   :  { %8739 = vmatprep.subr.bf16.mxu0 %v19617_v29  ;;  %9600 = vmatprep.subr.bf16.mxu1 %v19620_v24  ;;  %v19712_v29 = vld [vmem:[%s27988_s1 + $0x214c] ss:$16 sps:$4 sm:$0xff]   ;;  %v19707_v24 = vld [vmem:[%s27988_s1 + $0x2140] ss:$16 sps:$4 sm:$0xff]  }
 0x3ef   :  { %8740 = vmatpush1.bf16.msra.mxu0 %v19615_v31  ;;  %9601 = vmatpush1.bf16.msra.mxu1 %v19618_v32  ;;  %v19710_v31 = vld [vmem:[%s27988_s1 + $0x2148] ss:$16 sps:$4 sm:$0xff]   ;;  %v19715_v32 = vld [vmem:[%s27988_s1 + $0x2164] ss:$16 sps:$4 sm:$0xff]  }
 0x3f0   :  { %8741 = vmatprep.subr.bf16.mxu0 %v19623_v27  ;;  %9602 = vmatprep.subr.bf16.mxu1 %v19626_v34  ;;  %v19718_v27 = vld [vmem:[%s27988_s1 + $0x216c] ss:$16 sps:$4 sm:$0xff]   ;;  %v19713_v34 = vld [vmem:[%s27988_s1 + $0x2160] ss:$16 sps:$4 sm:$0xff]  }
 0x3f3   :  { %8742 = vmatpush1.bf16.msra.mxu0 %v19621_v35  ;;  %9603 = vmatpush1.bf16.msra.mxu1 %v19624_v30  ;;  %v19716_v35 = vld [vmem:[%s27988_s1 + $0x2168] ss:$16 sps:$4 sm:$0xff]   ;;  %v19721_v30 = vld [vmem:[%s27988_s1 + $0x2184] ss:$16 sps:$4 sm:$0xff]  }
 0x3f4   :  { %8743 = vmatprep.subr.bf16.mxu0 %v19629_v37  ;;  %9604 = vmatprep.subr.bf16.mxu1 %v19632_v38  ;;  %v19724_v37 = vld [vmem:[%s27988_s1 + $0x218c] ss:$16 sps:$4 sm:$0xff]   ;;  %v19719_v38 = vld [vmem:[%s27988_s1 + $0x2180] ss:$16 sps:$4 sm:$0xff]  }
 0x3f7   :  { %8744 = vmatpush1.bf16.msra.mxu0 %v19627_v39  ;;  %9605 = vmatpush1.bf16.msra.mxu1 %v19630_v40  ;;  %v19722_v39 = vld [vmem:[%s27988_s1 + $0x2188] ss:$16 sps:$4 sm:$0xff]   ;;  %v19727_v40 = vld [vmem:[%s27988_s1 + $0x21a4] ss:$16 sps:$4 sm:$0xff]  }
 0x3f8   :  { %8745 = vmatprep.subr.bf16.mxu0 %v19635_v41  ;;  %9606 = vmatprep.subr.bf16.mxu1 %v19638_v36  ;;  %v19730_v41 = vld [vmem:[%s27988_s1 + $0x21ac] ss:$16 sps:$4 sm:$0xff]   ;;  %v19725_v36 = vld [vmem:[%s27988_s1 + $0x21a0] ss:$16 sps:$4 sm:$0xff]  }
 0x3fb   :  { %8746 = vmatpush1.bf16.msra.mxu0 %v19633_v43  ;;  %9607 = vmatpush1.bf16.msra.mxu1 %v19636_v44  ;;  %v19728_v43 = vld [vmem:[%s27988_s1 + $0x21a8] ss:$16 sps:$4 sm:$0xff]   ;;  %v19733_v44 = vld [vmem:[%s27988_s1 + $0x21c4] ss:$16 sps:$4 sm:$0xff]  }
 0x3fc   :  { %8747 = vmatprep.subr.bf16.mxu0 %v19641_v33  ;;  %9608 = vmatprep.subr.bf16.mxu1 %v19644_v46  ;;  %v19736_v33 = vld [vmem:[%s27988_s1 + $0x21cc] ss:$16 sps:$4 sm:$0xff]   ;;  %v19731_v46 = vld [vmem:[%s27988_s1 + $0x21c0] ss:$16 sps:$4 sm:$0xff]  }
 0x3ff   :  { %8748 = vmatpush1.bf16.msra.mxu0 %v19639_v47  ;;  %9609 = vmatpush1.bf16.msra.mxu1 %v19642_v42  ;;  %v19734_v47 = vld [vmem:[%s27988_s1 + $0x21c8] ss:$16 sps:$4 sm:$0xff]   ;;  %v19739_v42 = vld [vmem:[%s27988_s1 + $0x21e4] ss:$16 sps:$4 sm:$0xff]  }
 0x400   :  { %8758 = vmatprep.subr.bf16.mxu0 %v19649_v49  ;;  %9619 = vmatprep.subr.bf16.mxu1 %v19652_v50  ;;  %v19742_v49 = vld [vmem:[%s27988_s1 + $0x21ec] ss:$16 sps:$4 sm:$0xff]   ;;  %v19737_v50 = vld [vmem:[%s27988_s1 + $0x21e0] ss:$16 sps:$4 sm:$0xff]  }
 0x402   :  { %8750 = vmatmul.mubr.bf16.vlgmr.msra.gmra.mrb[0].mxu0 %v15737_v45  ;;  %9611 = vmatmul.mubr.bf16.vlgmr.msra.gmra.mrb[0].mxu1 %v15737_v45  ;;  %v19740_v45 = vld [vmem:[%s27988_s1 + $0x21e8] ss:$16 sps:$4 sm:$0xff]  }
 0x403   :  { %8759 = vmatpush1.bf16.msra.mxu0 %v19647_v52  ;;  %9620 = vmatpush1.bf16.msra.mxu1 %v19650_v53  ;;  %v19747_v52 = vld [vmem:[%s27988_s1 + $0x2204] ss:$16 sps:$4 sm:$0xff]   ;;  %v19750_v53 = vld [vmem:[%s27988_s1 + $0x220c] ss:$16 sps:$4 sm:$0xff]  }
 0x404   :  { %8760 = vmatprep.subr.bf16.mxu0 %v19655_v48  ;;  %9621 = vmatprep.subr.bf16.mxu1 %v19658_v54  ;;  %v15739_v48 = vcombine.low %v24565_v51, %v24565_v51  ;;  %v24766_v54 = vld [vmem:[%s27989_s0 + $0x88] sm:$0xff]  ;;  %v19753_v51 = vld [vmem:[%s27988_s1 + $0x2224] ss:$16 sps:$4 sm:$0xff]  }
 0x405   :  { %8790 = vmatprep.mubr.bf16.mxu0 %v15740_v55  ;;  %9651 = vmatprep.mubr.bf16.mxu1 %v15740_v55  ;;  %v19745_v55 = vld [vmem:[%s27988_s1 + $0x2200] ss:$16 sps:$4 sm:$0xff]  }
 0x407   :  { %8761 = vmatpush1.bf16.msra.mxu0 %v19653_v56  ;;  %9622 = vmatpush1.bf16.msra.mxu1 %v19656_v57  ;;  %v19748_v56 = vld [vmem:[%s27988_s1 + $0x2208] ss:$16 sps:$4 sm:$0xff]   ;;  %v19756_v57 = vld [vmem:[%s27988_s1 + $0x222c] ss:$16 sps:$4 sm:$0xff]  }
 0x408   :  { %8762 = vmatprep.subr.bf16.mxu0 %v19661_v58  ;;  %9623 = vmatprep.subr.bf16.mxu1 %v19664_v59  ;;  %v15742_v58 = vcombine.high %v24766_v54, %v24766_v54  ;;  %v19751_v59 = vld [vmem:[%s27988_s1 + $0x2220] ss:$16 sps:$4 sm:$0xff]  }
 0x40b   :  { %8763 = vmatpush1.bf16.msra.mxu0 %v19659_v60  ;;  %9624 = vmatpush1.bf16.msra.mxu1 %v19662_v61  ;;  %v19754_v60 = vld [vmem:[%s27988_s1 + $0x2228] ss:$16 sps:$4 sm:$0xff]   ;;  %v19759_v61 = vld [vmem:[%s27988_s1 + $0x2244] ss:$16 sps:$4 sm:$0xff]  }
 0x40c   :  { %8764 = vmatprep.subr.bf16.mxu0 %v19667_v62  ;;  %9625 = vmatprep.subr.bf16.mxu1 %v19670_v63  ;;  %v19762_v62 = vld [vmem:[%s27988_s1 + $0x224c] ss:$16 sps:$4 sm:$0xff]   ;;  %v19757_v63 = vld [vmem:[%s27988_s1 + $0x2240] ss:$16 sps:$4 sm:$0xff]  }
 0x40f   :  { %8765 = vmatpush1.bf16.msra.mxu0 %v19665_v0  ;;  %9626 = vmatpush1.bf16.msra.mxu1 %v19668_v1  ;;  %v19760_v0 = vld [vmem:[%s27988_s1 + $0x2248] ss:$16 sps:$4 sm:$0xff]   ;;  %v19765_v1 = vld [vmem:[%s27988_s1 + $0x2264] ss:$16 sps:$4 sm:$0xff]  }
 0x410   :  { %8766 = vmatprep.subr.bf16.mxu0 %v19673_v2  ;;  %9627 = vmatprep.subr.bf16.mxu1 %v19676_v3  ;;  %v19768_v2 = vld [vmem:[%s27988_s1 + $0x226c] ss:$16 sps:$4 sm:$0xff]   ;;  %v19763_v3 = vld [vmem:[%s27988_s1 + $0x2260] ss:$16 sps:$4 sm:$0xff]  }
 0x413   :  { %8767 = vmatpush1.bf16.msra.mxu0 %v19671_v4  ;;  %9628 = vmatpush1.bf16.msra.mxu1 %v19674_v5  ;;  %v19766_v4 = vld [vmem:[%s27988_s1 + $0x2268] ss:$16 sps:$4 sm:$0xff]   ;;  %v19771_v5 = vld [vmem:[%s27988_s1 + $0x2284] ss:$16 sps:$4 sm:$0xff]  }
 0x414   :  { %8768 = vmatprep.subr.bf16.mxu0 %v19679_v6  ;;  %9629 = vmatprep.subr.bf16.mxu1 %v19682_v7  ;;  %v19774_v6 = vld [vmem:[%s27988_s1 + $0x228c] ss:$16 sps:$4 sm:$0xff]   ;;  %v19769_v7 = vld [vmem:[%s27988_s1 + $0x2280] ss:$16 sps:$4 sm:$0xff]  }
 0x417   :  { %8769 = vmatpush1.bf16.msra.mxu0 %v19677_v8  ;;  %9630 = vmatpush1.bf16.msra.mxu1 %v19680_v9  ;;  %v19772_v8 = vld [vmem:[%s27988_s1 + $0x2288] ss:$16 sps:$4 sm:$0xff]   ;;  %v19777_v9 = vld [vmem:[%s27988_s1 + $0x22a4] ss:$16 sps:$4 sm:$0xff]  }
 0x418   :  { %8770 = vmatprep.subr.bf16.mxu0 %v19685_v10  ;;  %9631 = vmatprep.subr.bf16.mxu1 %v19688_v12  ;;  %v19780_v10 = vld [vmem:[%s27988_s1 + $0x22ac] ss:$16 sps:$4 sm:$0xff]   ;;  %v19775_v12 = vld [vmem:[%s27988_s1 + $0x22a0] ss:$16 sps:$4 sm:$0xff]  }
 0x41b   :  { %8771 = vmatpush1.bf16.msra.mxu0 %v19683_v13  ;;  %9632 = vmatpush1.bf16.msra.mxu1 %v19686_v15  ;;  %v19778_v13 = vld [vmem:[%s27988_s1 + $0x22a8] ss:$16 sps:$4 sm:$0xff]   ;;  %v19783_v15 = vld [vmem:[%s27988_s1 + $0x22c4] ss:$16 sps:$4 sm:$0xff]  }
 0x41c   :  { %8772 = vmatprep.subr.bf16.mxu0 %v19691_v11  ;;  %9633 = vmatprep.subr.bf16.mxu1 %v19694_v17  ;;  %v19786_v11 = vld [vmem:[%s27988_s1 + $0x22cc] ss:$16 sps:$4 sm:$0xff]   ;;  %v19781_v17 = vld [vmem:[%s27988_s1 + $0x22c0] ss:$16 sps:$4 sm:$0xff]  }
 0x41f   :  { %8773 = vmatpush1.bf16.msra.mxu0 %v19689_v14  ;;  %9634 = vmatpush1.bf16.msra.mxu1 %v19692_v19  ;;  %v19784_v14 = vld [vmem:[%s27988_s1 + $0x22c8] ss:$16 sps:$4 sm:$0xff]   ;;  %v19789_v19 = vld [vmem:[%s27988_s1 + $0x22e4] ss:$16 sps:$4 sm:$0xff]  }
 0x420   :  { %8774 = vmatprep.subr.bf16.mxu0 %v19697_v20  ;;  %9635 = vmatprep.subr.bf16.mxu1 %v19700_v16  ;;  %v19792_v20 = vld [vmem:[%s27988_s1 + $0x22ec] ss:$16 sps:$4 sm:$0xff]   ;;  %v19787_v16 = vld [vmem:[%s27988_s1 + $0x22e0] ss:$16 sps:$4 sm:$0xff]  }
 0x423   :  { %8775 = vmatpush1.bf16.msra.mxu0 %v19695_v22  ;;  %9636 = vmatpush1.bf16.msra.mxu1 %v19698_v23  ;;  %v19790_v22 = vld [vmem:[%s27988_s1 + $0x22e8] ss:$16 sps:$4 sm:$0xff]   ;;  %v19795_v23 = vld [vmem:[%s27988_s1 + $0x2304] ss:$16 sps:$4 sm:$0xff]  }
 0x424   :  { %8776 = vmatprep.subr.bf16.mxu0 %v19703_v18  ;;  %9637 = vmatprep.subr.bf16.mxu1 %v19706_v25  ;;  %v19798_v18 = vld [vmem:[%s27988_s1 + $0x230c] ss:$16 sps:$4 sm:$0xff]   ;;  %v19793_v25 = vld [vmem:[%s27988_s1 + $0x2300] ss:$16 sps:$4 sm:$0xff]  }
 0x427   :  { %8777 = vmatpush1.bf16.msra.mxu0 %v19701_v26  ;;  %9638 = vmatpush1.bf16.msra.mxu1 %v19704_v21  ;;  %v19796_v26 = vld [vmem:[%s27988_s1 + $0x2308] ss:$16 sps:$4 sm:$0xff]   ;;  %v19801_v21 = vld [vmem:[%s27988_s1 + $0x2324] ss:$16 sps:$4 sm:$0xff]  }
 0x428   :  { %8778 = vmatprep.subr.bf16.mxu0 %v19709_v28  ;;  %9639 = vmatprep.subr.bf16.mxu1 %v19712_v29  ;;  %v19804_v28 = vld [vmem:[%s27988_s1 + $0x232c] ss:$16 sps:$4 sm:$0xff]   ;;  %v19799_v29 = vld [vmem:[%s27988_s1 + $0x2320] ss:$16 sps:$4 sm:$0xff]  }
 0x42b   :  { %8779 = vmatpush1.bf16.msra.mxu0 %v19707_v24  ;;  %9640 = vmatpush1.bf16.msra.mxu1 %v19710_v31  ;;  %v19802_v24 = vld [vmem:[%s27988_s1 + $0x2328] ss:$16 sps:$4 sm:$0xff]   ;;  %v19807_v31 = vld [vmem:[%s27988_s1 + $0x2344] ss:$16 sps:$4 sm:$0xff]  }
 0x42c   :  { %8780 = vmatprep.subr.bf16.mxu0 %v19715_v32  ;;  %9641 = vmatprep.subr.bf16.mxu1 %v19718_v27  ;;  %v19810_v32 = vld [vmem:[%s27988_s1 + $0x234c] ss:$16 sps:$4 sm:$0xff]   ;;  %v19805_v27 = vld [vmem:[%s27988_s1 + $0x2340] ss:$16 sps:$4 sm:$0xff]  }
 0x42f   :  { %8781 = vmatpush1.bf16.msra.mxu0 %v19713_v34  ;;  %9642 = vmatpush1.bf16.msra.mxu1 %v19716_v35  ;;  %v19808_v34 = vld [vmem:[%s27988_s1 + $0x2348] ss:$16 sps:$4 sm:$0xff]   ;;  %v19813_v35 = vld [vmem:[%s27988_s1 + $0x2364] ss:$16 sps:$4 sm:$0xff]  }
 0x430   :  { %8782 = vmatprep.subr.bf16.mxu0 %v19721_v30  ;;  %9643 = vmatprep.subr.bf16.mxu1 %v19724_v37  ;;  %v19816_v30 = vld [vmem:[%s27988_s1 + $0x236c] ss:$16 sps:$4 sm:$0xff]   ;;  %v19811_v37 = vld [vmem:[%s27988_s1 + $0x2360] ss:$16 sps:$4 sm:$0xff]  }
 0x433   :  { %8783 = vmatpush1.bf16.msra.mxu0 %v19719_v38  ;;  %9644 = vmatpush1.bf16.msra.mxu1 %v19722_v39  ;;  %v19814_v38 = vld [vmem:[%s27988_s1 + $0x2368] ss:$16 sps:$4 sm:$0xff]   ;;  %v19819_v39 = vld [vmem:[%s27988_s1 + $0x2384] ss:$16 sps:$4 sm:$0xff]  }
 0x434   :  { %8784 = vmatprep.subr.bf16.mxu0 %v19727_v40  ;;  %9645 = vmatprep.subr.bf16.mxu1 %v19730_v41  ;;  %v19822_v40 = vld [vmem:[%s27988_s1 + $0x238c] ss:$16 sps:$4 sm:$0xff]   ;;  %v19817_v41 = vld [vmem:[%s27988_s1 + $0x2380] ss:$16 sps:$4 sm:$0xff]  }
 0x437   :  { %8785 = vmatpush1.bf16.msra.mxu0 %v19725_v36  ;;  %9646 = vmatpush1.bf16.msra.mxu1 %v19728_v43  ;;  %v19820_v36 = vld [vmem:[%s27988_s1 + $0x2388] ss:$16 sps:$4 sm:$0xff]   ;;  %v19825_v43 = vld [vmem:[%s27988_s1 + $0x23a4] ss:$16 sps:$4 sm:$0xff]  }
 0x438   :  { %8786 = vmatprep.subr.bf16.mxu0 %v19733_v44  ;;  %9647 = vmatprep.subr.bf16.mxu1 %v19736_v33  ;;  %v19828_v44 = vld [vmem:[%s27988_s1 + $0x23ac] ss:$16 sps:$4 sm:$0xff]   ;;  %v19823_v33 = vld [vmem:[%s27988_s1 + $0x23a0] ss:$16 sps:$4 sm:$0xff]  }
 0x43b   :  { %8787 = vmatpush1.bf16.msra.mxu0 %v19731_v46  ;;  %9648 = vmatpush1.bf16.msra.mxu1 %v19734_v47  ;;  %v19826_v46 = vld [vmem:[%s27988_s1 + $0x23a8] ss:$16 sps:$4 sm:$0xff]   ;;  %v19831_v47 = vld [vmem:[%s27988_s1 + $0x23c4] ss:$16 sps:$4 sm:$0xff]  }
 0x43c   :  { %8788 = vmatprep.subr.bf16.mxu0 %v19739_v42  ;;  %9649 = vmatprep.subr.bf16.mxu1 %v19742_v49  ;;  %v19834_v42 = vld [vmem:[%s27988_s1 + $0x23cc] ss:$16 sps:$4 sm:$0xff]   ;;  %v19829_v49 = vld [vmem:[%s27988_s1 + $0x23c0] ss:$16 sps:$4 sm:$0xff]  }
 0x43f   :  { %8789 = vmatpush1.bf16.msra.mxu0 %v19737_v50  ;;  %9650 = vmatpush1.bf16.msra.mxu1 %v19740_v45  ;;  %v19832_v50 = vld [vmem:[%s27988_s1 + $0x23c8] ss:$16 sps:$4 sm:$0xff]   ;;  %v19837_v45 = vld [vmem:[%s27988_s1 + $0x23e4] ss:$16 sps:$4 sm:$0xff]  }
 0x440   :  { %8799 = vmatprep.subr.bf16.mxu0 %v19747_v52  ;;  %9660 = vmatprep.subr.bf16.mxu1 %v19750_v53  ;;  %v19840_v52 = vld [vmem:[%s27988_s1 + $0x23ec] ss:$16 sps:$4 sm:$0xff]   ;;  %v19835_v53 = vld [vmem:[%s27988_s1 + $0x23e0] ss:$16 sps:$4 sm:$0xff]  }
 0x442   :  { %8791 = vmatmul.mubr.bf16.vlgmr.msra.gmra.mrb[0].mxu0 %v15739_v48  ;;  %9652 = vmatmul.mubr.bf16.vlgmr.msra.gmra.mrb[0].mxu1 %v15739_v48  ;;  %v19838_v48 = vld [vmem:[%s27988_s1 + $0x23e8] ss:$16 sps:$4 sm:$0xff]  }
 0x443   :  { %8800 = vmatpush1.bf16.msra.mxu0 %v19745_v55  ;;  %9661 = vmatpush1.bf16.msra.mxu1 %v19748_v56  ;;  %v19845_v55 = vld [vmem:[%s27988_s1 + $0x2404] ss:$16 sps:$4 sm:$0xff]   ;;  %v19848_v56 = vld [vmem:[%s27988_s1 + $0x240c] ss:$16 sps:$4 sm:$0xff]  }
 0x444   :  { %8801 = vmatprep.subr.bf16.mxu0 %v19753_v51  ;;  %9662 = vmatprep.subr.bf16.mxu1 %v19756_v57  ;;  %v15741_v51 = vcombine.low %v24766_v54, %v24766_v54  ;;  %v24967_v57 = vld [vmem:[%s27989_s0 + $0x90] sm:$0xff] }
 0x445   :  { %8831 = vmatprep.mubr.bf16.mxu0 %v15742_v58  ;;  %9692 = vmatprep.mubr.bf16.mxu1 %v15742_v58  ;;  %v19843_v58 = vld [vmem:[%s27988_s1 + $0x2400] ss:$16 sps:$4 sm:$0xff]   ;;  %v19851_v54 = vld [vmem:[%s27988_s1 + $0x2424] ss:$16 sps:$4 sm:$0xff]  }
 0x447   :  { %8802 = vmatpush1.bf16.msra.mxu0 %v19751_v59  ;;  %9663 = vmatpush1.bf16.msra.mxu1 %v19754_v60  ;;  %v19846_v59 = vld [vmem:[%s27988_s1 + $0x2408] ss:$16 sps:$4 sm:$0xff]   ;;  %v19854_v60 = vld [vmem:[%s27988_s1 + $0x242c] ss:$16 sps:$4 sm:$0xff]  }
 0x448   :  { %8803 = vmatprep.subr.bf16.mxu0 %v19759_v61  ;;  %9664 = vmatprep.subr.bf16.mxu1 %v19762_v62  ;;  %v15744_v61 = vcombine.high %v24967_v57, %v24967_v57  ;;  %v19849_v62 = vld [vmem:[%s27988_s1 + $0x2420] ss:$16 sps:$4 sm:$0xff]  }
 0x44b   :  { %8804 = vmatpush1.bf16.msra.mxu0 %v19757_v63  ;;  %9665 = vmatpush1.bf16.msra.mxu1 %v19760_v0  ;;  %v19852_v63 = vld [vmem:[%s27988_s1 + $0x2428] ss:$16 sps:$4 sm:$0xff]   ;;  %v19857_v0 = vld [vmem:[%s27988_s1 + $0x2444] ss:$16 sps:$4 sm:$0xff]  }
 0x44c   :  { %8805 = vmatprep.subr.bf16.mxu0 %v19765_v1  ;;  %9666 = vmatprep.subr.bf16.mxu1 %v19768_v2  ;;  %v19860_v1 = vld [vmem:[%s27988_s1 + $0x244c] ss:$16 sps:$4 sm:$0xff]   ;;  %v19855_v2 = vld [vmem:[%s27988_s1 + $0x2440] ss:$16 sps:$4 sm:$0xff]  }
 0x44f   :  { %8806 = vmatpush1.bf16.msra.mxu0 %v19763_v3  ;;  %9667 = vmatpush1.bf16.msra.mxu1 %v19766_v4  ;;  %v19858_v3 = vld [vmem:[%s27988_s1 + $0x2448] ss:$16 sps:$4 sm:$0xff]   ;;  %v19863_v4 = vld [vmem:[%s27988_s1 + $0x2464] ss:$16 sps:$4 sm:$0xff]  }
 0x450   :  { %8807 = vmatprep.subr.bf16.mxu0 %v19771_v5  ;;  %9668 = vmatprep.subr.bf16.mxu1 %v19774_v6  ;;  %v19866_v5 = vld [vmem:[%s27988_s1 + $0x246c] ss:$16 sps:$4 sm:$0xff]   ;;  %v19861_v6 = vld [vmem:[%s27988_s1 + $0x2460] ss:$16 sps:$4 sm:$0xff]  }
 0x453   :  { %8808 = vmatpush1.bf16.msra.mxu0 %v19769_v7  ;;  %9669 = vmatpush1.bf16.msra.mxu1 %v19772_v8  ;;  %v19864_v7 = vld [vmem:[%s27988_s1 + $0x2468] ss:$16 sps:$4 sm:$0xff]   ;;  %v19869_v8 = vld [vmem:[%s27988_s1 + $0x2484] ss:$16 sps:$4 sm:$0xff]  }
 0x454   :  { %8809 = vmatprep.subr.bf16.mxu0 %v19777_v9  ;;  %9670 = vmatprep.subr.bf16.mxu1 %v19780_v10  ;;  %v19872_v9 = vld [vmem:[%s27988_s1 + $0x248c] ss:$16 sps:$4 sm:$0xff]   ;;  %v19867_v10 = vld [vmem:[%s27988_s1 + $0x2480] ss:$16 sps:$4 sm:$0xff]  }
 0x457   :  { %8810 = vmatpush1.bf16.msra.mxu0 %v19775_v12  ;;  %9671 = vmatpush1.bf16.msra.mxu1 %v19778_v13  ;;  %v19870_v12 = vld [vmem:[%s27988_s1 + $0x2488] ss:$16 sps:$4 sm:$0xff]   ;;  %v19875_v13 = vld [vmem:[%s27988_s1 + $0x24a4] ss:$16 sps:$4 sm:$0xff]  }
 0x458   :  { %8811 = vmatprep.subr.bf16.mxu0 %v19783_v15  ;;  %9672 = vmatprep.subr.bf16.mxu1 %v19786_v11  ;;  %v19878_v15 = vld [vmem:[%s27988_s1 + $0x24ac] ss:$16 sps:$4 sm:$0xff]   ;;  %v19873_v11 = vld [vmem:[%s27988_s1 + $0x24a0] ss:$16 sps:$4 sm:$0xff]  }
 0x45b   :  { %8812 = vmatpush1.bf16.msra.mxu0 %v19781_v17  ;;  %9673 = vmatpush1.bf16.msra.mxu1 %v19784_v14  ;;  %v19876_v17 = vld [vmem:[%s27988_s1 + $0x24a8] ss:$16 sps:$4 sm:$0xff]   ;;  %v19881_v14 = vld [vmem:[%s27988_s1 + $0x24c4] ss:$16 sps:$4 sm:$0xff]  }
 0x45c   :  { %8813 = vmatprep.subr.bf16.mxu0 %v19789_v19  ;;  %9674 = vmatprep.subr.bf16.mxu1 %v19792_v20  ;;  %v19884_v19 = vld [vmem:[%s27988_s1 + $0x24cc] ss:$16 sps:$4 sm:$0xff]   ;;  %v19879_v20 = vld [vmem:[%s27988_s1 + $0x24c0] ss:$16 sps:$4 sm:$0xff]  }
 0x45f   :  { %8814 = vmatpush1.bf16.msra.mxu0 %v19787_v16  ;;  %9675 = vmatpush1.bf16.msra.mxu1 %v19790_v22  ;;  %v19882_v16 = vld [vmem:[%s27988_s1 + $0x24c8] ss:$16 sps:$4 sm:$0xff]   ;;  %v19887_v22 = vld [vmem:[%s27988_s1 + $0x24e4] ss:$16 sps:$4 sm:$0xff]  }
 0x460   :  { %8815 = vmatprep.subr.bf16.mxu0 %v19795_v23  ;;  %9676 = vmatprep.subr.bf16.mxu1 %v19798_v18  ;;  %v19890_v23 = vld [vmem:[%s27988_s1 + $0x24ec] ss:$16 sps:$4 sm:$0xff]   ;;  %v19885_v18 = vld [vmem:[%s27988_s1 + $0x24e0] ss:$16 sps:$4 sm:$0xff]  }
 0x463   :  { %8816 = vmatpush1.bf16.msra.mxu0 %v19793_v25  ;;  %9677 = vmatpush1.bf16.msra.mxu1 %v19796_v26  ;;  %v19888_v25 = vld [vmem:[%s27988_s1 + $0x24e8] ss:$16 sps:$4 sm:$0xff]   ;;  %v19893_v26 = vld [vmem:[%s27988_s1 + $0x2504] ss:$16 sps:$4 sm:$0xff]  }
 0x464   :  { %8817 = vmatprep.subr.bf16.mxu0 %v19801_v21  ;;  %9678 = vmatprep.subr.bf16.mxu1 %v19804_v28  ;;  %v19896_v21 = vld [vmem:[%s27988_s1 + $0x250c] ss:$16 sps:$4 sm:$0xff]   ;;  %v19891_v28 = vld [vmem:[%s27988_s1 + $0x2500] ss:$16 sps:$4 sm:$0xff]  }
 0x467   :  { %8818 = vmatpush1.bf16.msra.mxu0 %v19799_v29  ;;  %9679 = vmatpush1.bf16.msra.mxu1 %v19802_v24  ;;  %v19894_v29 = vld [vmem:[%s27988_s1 + $0x2508] ss:$16 sps:$4 sm:$0xff]   ;;  %v19899_v24 = vld [vmem:[%s27988_s1 + $0x2524] ss:$16 sps:$4 sm:$0xff]  }
 0x468   :  { %8819 = vmatprep.subr.bf16.mxu0 %v19807_v31  ;;  %9680 = vmatprep.subr.bf16.mxu1 %v19810_v32  ;;  %v19902_v31 = vld [vmem:[%s27988_s1 + $0x252c] ss:$16 sps:$4 sm:$0xff]   ;;  %v21280_v32 = vmov 0  }
 0x469   :  { %18078 = vset.pattern.permute.xlu0 %v21280_v32 }
 0x46b   :  { %8820 = vmatpush1.bf16.msra.mxu0 %v19805_v27  ;;  %9681 = vmatpush1.bf16.msra.mxu1 %v19808_v34  ;;  %v19897_v27 = vld [vmem:[%s27988_s1 + $0x2520] ss:$16 sps:$4 sm:$0xff]   ;;  %v19900_v34 = vld [vmem:[%s27988_s1 + $0x2528] ss:$16 sps:$4 sm:$0xff]  }
 0x46c   :  { %8821 = vmatprep.subr.bf16.mxu0 %v19813_v35  ;;  %9682 = vmatprep.subr.bf16.mxu1 %v19816_v30  ;;  %v19905_v35 = vld [vmem:[%s27988_s1 + $0x2544] ss:$16 sps:$4 sm:$0xff]   ;;  %v19908_v30 = vld [vmem:[%s27988_s1 + $0x254c] ss:$16 sps:$4 sm:$0xff]  }
 0x46f   :  { %8822 = vmatpush1.bf16.msra.mxu0 %v19811_v37  ;;  %9683 = vmatpush1.bf16.msra.mxu1 %v19814_v38  ;;  %v19903_v37 = vld [vmem:[%s27988_s1 + $0x2540] ss:$16 sps:$4 sm:$0xff]   ;;  %v19906_v38 = vld [vmem:[%s27988_s1 + $0x2548] ss:$16 sps:$4 sm:$0xff]  }
 0x470   :  { %8823 = vmatprep.subr.bf16.mxu0 %v19819_v39  ;;  %9684 = vmatprep.subr.bf16.mxu1 %v19822_v40  ;;  %v19911_v39 = vld [vmem:[%s27988_s1 + $0x2564] ss:$16 sps:$4 sm:$0xff]   ;;  %v19914_v40 = vld [vmem:[%s27988_s1 + $0x256c] ss:$16 sps:$4 sm:$0xff]  }
 0x473   :  { %8824 = vmatpush1.bf16.msra.mxu0 %v19817_v41  ;;  %9685 = vmatpush1.bf16.msra.mxu1 %v19820_v36  ;;  %v19909_v41 = vld [vmem:[%s27988_s1 + $0x2560] ss:$16 sps:$4 sm:$0xff]   ;;  %v19912_v36 = vld [vmem:[%s27988_s1 + $0x2568] ss:$16 sps:$4 sm:$0xff]  }
 0x474   :  { %8825 = vmatprep.subr.bf16.mxu0 %v19825_v43  ;;  %9686 = vmatprep.subr.bf16.mxu1 %v19828_v44  ;;  %v19917_v43 = vld [vmem:[%s27988_s1 + $0x2584] ss:$16 sps:$4 sm:$0xff]   ;;  %v19920_v44 = vld [vmem:[%s27988_s1 + $0x258c] ss:$16 sps:$4 sm:$0xff]  }
 0x477   :  { %8826 = vmatpush1.bf16.msra.mxu0 %v19823_v33  ;;  %9687 = vmatpush1.bf16.msra.mxu1 %v19826_v46  ;;  %v19915_v33 = vld [vmem:[%s27988_s1 + $0x2580] ss:$16 sps:$4 sm:$0xff]   ;;  %v19918_v46 = vld [vmem:[%s27988_s1 + $0x2588] ss:$16 sps:$4 sm:$0xff]  }
 0x478   :  { %8827 = vmatprep.subr.bf16.mxu0 %v19831_v47  ;;  %9688 = vmatprep.subr.bf16.mxu1 %v19834_v42  ;;  %v19923_v47 = vld [vmem:[%s27988_s1 + $0x25a4] ss:$16 sps:$4 sm:$0xff]   ;;  %v19926_v42 = vld [vmem:[%s27988_s1 + $0x25ac] ss:$16 sps:$4 sm:$0xff]  }
 0x47b   :  { %8828 = vmatpush1.bf16.msra.mxu0 %v19829_v49  ;;  %9689 = vmatpush1.bf16.msra.mxu1 %v19832_v50  ;;  %v19921_v49 = vld [vmem:[%s27988_s1 + $0x25a0] ss:$16 sps:$4 sm:$0xff]   ;;  %v19924_v50 = vld [vmem:[%s27988_s1 + $0x25a8] ss:$16 sps:$4 sm:$0xff]  }
 0x47c   :  { %8829 = vmatprep.subr.bf16.mxu0 %v19837_v45  ;;  %9690 = vmatprep.subr.bf16.mxu1 %v19840_v52  ;;  %v19929_v45 = vld [vmem:[%s27988_s1 + $0x25c4] ss:$16 sps:$4 sm:$0xff]   ;;  %v19932_v52 = vld [vmem:[%s27988_s1 + $0x25cc] ss:$16 sps:$4 sm:$0xff]  }
 0x47f   :  { %8830 = vmatpush1.bf16.msra.mxu0 %v19835_v53  ;;  %9691 = vmatpush1.bf16.msra.mxu1 %v19838_v48  ;;  %v19927_v53 = vld [vmem:[%s27988_s1 + $0x25c0] ss:$16 sps:$4 sm:$0xff]   ;;  %v19930_v48 = vld [vmem:[%s27988_s1 + $0x25c8] ss:$16 sps:$4 sm:$0xff]  }
 0x480   :  { %8840 = vmatprep.subr.bf16.mxu0 %v19845_v55  ;;  %9701 = vmatprep.subr.bf16.mxu1 %v19848_v56  ;;  %v19935_v55 = vld [vmem:[%s27988_s1 + $0x25e4] ss:$16 sps:$4 sm:$0xff]   ;;  %v19938_v56 = vld [vmem:[%s27988_s1 + $0x25ec] ss:$16 sps:$4 sm:$0xff]  }
 0x482   :  { %8832 = vmatmul.mubr.bf16.vlgmr.msra.gmra.mrb[0].mxu0 %v15741_v51  ;;  %9693 = vmatmul.mubr.bf16.vlgmr.msra.gmra.mrb[0].mxu1 %v15741_v51  ;;  %v19933_v51 = vld [vmem:[%s27988_s1 + $0x25e0] ss:$16 sps:$4 sm:$0xff]  }
 0x483   :  { %8841 = vmatpush1.bf16.msra.mxu0 %v19843_v58  ;;  %9702 = vmatpush1.bf16.msra.mxu1 %v19846_v59  ;;  %v19936_v58 = vld [vmem:[%s27988_s1 + $0x25e8] ss:$16 sps:$4 sm:$0xff]   ;;  %v19943_v59 = vld [vmem:[%s27988_s1 + $0x2604] ss:$16 sps:$4 sm:$0xff]  }
 0x484   :  { %8842 = vmatprep.subr.bf16.mxu0 %v19851_v54  ;;  %9703 = vmatprep.subr.bf16.mxu1 %v19854_v60  ;;  %v19946_v54 = vld [vmem:[%s27988_s1 + $0x260c] ss:$16 sps:$4 sm:$0xff]  }
 0x485   :  { %8872 = vmatprep.mubr.bf16.mxu0 %v15744_v61  ;;  %9733 = vmatprep.mubr.bf16.mxu1 %v15744_v61  ;;  %v25167_v60 = vld [vmem:[%s27989_s0 + $0x98] sm:$0xff]  ;;  %v15743_v61 = vcombine.low %v24967_v57, %v24967_v57 }
 0x486   :  { %v19952_v57 = vld [vmem:[%s27988_s1 + $0x262c] ss:$16 sps:$4 sm:$0xff]  }
 0x487   :  { %8843 = vmatpush1.bf16.msra.mxu0 %v19849_v62  ;;  %9704 = vmatpush1.bf16.msra.mxu1 %v19852_v63  ;;  %v19941_v62 = vld [vmem:[%s27988_s1 + $0x2600] ss:$16 sps:$4 sm:$0xff]   ;;  %v19944_v63 = vld [vmem:[%s27988_s1 + $0x2608] ss:$16 sps:$4 sm:$0xff]  }
 0x488   :  { %8844 = vmatprep.subr.bf16.mxu0 %v19857_v0  ;;  %9705 = vmatprep.subr.bf16.mxu1 %v19860_v1  ;;  %v19949_v0 = vld [vmem:[%s27988_s1 + $0x2624] ss:$16 sps:$4 sm:$0xff]   ;;  %v15746_v1 = vcombine.high %v25167_v60, %v25167_v60 }
 0x48b   :  { %8845 = vmatpush1.bf16.msra.mxu0 %v19855_v2  ;;  %9706 = vmatpush1.bf16.msra.mxu1 %v19858_v3  ;;  %v19947_v2 = vld [vmem:[%s27988_s1 + $0x2620] ss:$16 sps:$4 sm:$0xff]   ;;  %v19950_v3 = vld [vmem:[%s27988_s1 + $0x2628] ss:$16 sps:$4 sm:$0xff]  }
 0x48c   :  { %8846 = vmatprep.subr.bf16.mxu0 %v19863_v4  ;;  %9707 = vmatprep.subr.bf16.mxu1 %v19866_v5  ;;  %v19955_v4 = vld [vmem:[%s27988_s1 + $0x2644] ss:$16 sps:$4 sm:$0xff]   ;;  %v19958_v5 = vld [vmem:[%s27988_s1 + $0x264c] ss:$16 sps:$4 sm:$0xff]  }
 0x48f   :  { %8847 = vmatpush1.bf16.msra.mxu0 %v19861_v6  ;;  %9708 = vmatpush1.bf16.msra.mxu1 %v19864_v7  ;;  %v19953_v6 = vld [vmem:[%s27988_s1 + $0x2640] ss:$16 sps:$4 sm:$0xff]   ;;  %v19956_v7 = vld [vmem:[%s27988_s1 + $0x2648] ss:$16 sps:$4 sm:$0xff]  }
 0x490   :  { %8848 = vmatprep.subr.bf16.mxu0 %v19869_v8  ;;  %9709 = vmatprep.subr.bf16.mxu1 %v19872_v9  ;;  %v19961_v8 = vld [vmem:[%s27988_s1 + $0x2664] ss:$16 sps:$4 sm:$0xff]   ;;  %v19964_v9 = vld [vmem:[%s27988_s1 + $0x266c] ss:$16 sps:$4 sm:$0xff]  }
 0x493   :  { %8849 = vmatpush1.bf16.msra.mxu0 %v19867_v10  ;;  %9710 = vmatpush1.bf16.msra.mxu1 %v19870_v12  ;;  %v19959_v10 = vld [vmem:[%s27988_s1 + $0x2660] ss:$16 sps:$4 sm:$0xff]   ;;  %v19962_v12 = vld [vmem:[%s27988_s1 + $0x2668] ss:$16 sps:$4 sm:$0xff]  }
 0x494   :  { %8850 = vmatprep.subr.bf16.mxu0 %v19875_v13  ;;  %9711 = vmatprep.subr.bf16.mxu1 %v19878_v15  ;;  %v19967_v13 = vld [vmem:[%s27988_s1 + $0x2684] ss:$16 sps:$4 sm:$0xff]   ;;  %v19970_v15 = vld [vmem:[%s27988_s1 + $0x268c] ss:$16 sps:$4 sm:$0xff]  }
 0x497   :  { %8851 = vmatpush1.bf16.msra.mxu0 %v19873_v11  ;;  %9712 = vmatpush1.bf16.msra.mxu1 %v19876_v17  ;;  %v19965_v11 = vld [vmem:[%s27988_s1 + $0x2680] ss:$16 sps:$4 sm:$0xff]   ;;  %v19968_v17 = vld [vmem:[%s27988_s1 + $0x2688] ss:$16 sps:$4 sm:$0xff]  }
 0x498   :  { %8852 = vmatprep.subr.bf16.mxu0 %v19881_v14  ;;  %9713 = vmatprep.subr.bf16.mxu1 %v19884_v19  ;;  %v19973_v14 = vld [vmem:[%s27988_s1 + $0x26a4] ss:$16 sps:$4 sm:$0xff]   ;;  %v19976_v19 = vld [vmem:[%s27988_s1 + $0x26ac] ss:$16 sps:$4 sm:$0xff]  }
 0x49b   :  { %8853 = vmatpush1.bf16.msra.mxu0 %v19879_v20  ;;  %9714 = vmatpush1.bf16.msra.mxu1 %v19882_v16  ;;  %v19971_v20 = vld [vmem:[%s27988_s1 + $0x26a0] ss:$16 sps:$4 sm:$0xff]   ;;  %v19974_v16 = vld [vmem:[%s27988_s1 + $0x26a8] ss:$16 sps:$4 sm:$0xff]  }
 0x49c   :  { %8854 = vmatprep.subr.bf16.mxu0 %v19887_v22  ;;  %9715 = vmatprep.subr.bf16.mxu1 %v19890_v23  ;;  %v19979_v22 = vld [vmem:[%s27988_s1 + $0x26c4] ss:$16 sps:$4 sm:$0xff]   ;;  %v19982_v23 = vld [vmem:[%s27988_s1 + $0x26cc] ss:$16 sps:$4 sm:$0xff]  }
 0x49f   :  { %8855 = vmatpush1.bf16.msra.mxu0 %v19885_v18  ;;  %9716 = vmatpush1.bf16.msra.mxu1 %v19888_v25  ;;  %v19977_v18 = vld [vmem:[%s27988_s1 + $0x26c0] ss:$16 sps:$4 sm:$0xff]   ;;  %v19980_v25 = vld [vmem:[%s27988_s1 + $0x26c8] ss:$16 sps:$4 sm:$0xff]  }
 0x4a0   :  { %8856 = vmatprep.subr.bf16.mxu0 %v19893_v26  ;;  %9717 = vmatprep.subr.bf16.mxu1 %v19896_v21  ;;  %v19985_v26 = vld [vmem:[%s27988_s1 + $0x26e4] ss:$16 sps:$4 sm:$0xff]   ;;  %v19988_v21 = vld [vmem:[%s27988_s1 + $0x26ec] ss:$16 sps:$4 sm:$0xff]  }
 0x4a3   :  { %8857 = vmatpush1.bf16.msra.mxu0 %v19891_v28  ;;  %9718 = vmatpush1.bf16.msra.mxu1 %v19894_v29  ;;  %v19983_v28 = vld [vmem:[%s27988_s1 + $0x26e0] ss:$16 sps:$4 sm:$0xff]   ;;  %v19986_v29 = vld [vmem:[%s27988_s1 + $0x26e8] ss:$16 sps:$4 sm:$0xff]  }
 0x4a4   :  { %8858 = vmatprep.subr.bf16.mxu0 %v19899_v24  ;;  %9719 = vmatprep.subr.bf16.mxu1 %v19902_v31  ;;  %v19991_v24 = vld [vmem:[%s27988_s1 + $0x2704] ss:$16 sps:$4 sm:$0xff]   ;;  %v19994_v31 = vld [vmem:[%s27988_s1 + $0x270c] ss:$16 sps:$4 sm:$0xff]  }
 0x4a7   :  { %8859 = vmatpush1.bf16.msra.mxu0 %v19897_v27  ;;  %9720 = vmatpush1.bf16.msra.mxu1 %v19900_v34  ;;  %v19989_v27 = vld [vmem:[%s27988_s1 + $0x2700] ss:$16 sps:$4 sm:$0xff]   ;;  %v19992_v34 = vld [vmem:[%s27988_s1 + $0x2708] ss:$16 sps:$4 sm:$0xff]  }
 0x4a8   :  { %8860 = vmatprep.subr.bf16.mxu0 %v19905_v35  ;;  %9721 = vmatprep.subr.bf16.mxu1 %v19908_v30  ;;  %v19997_v35 = vld [vmem:[%s27988_s1 + $0x2724] ss:$16 sps:$4 sm:$0xff]   ;;  %v20000_v30 = vld [vmem:[%s27988_s1 + $0x272c] ss:$16 sps:$4 sm:$0xff]  }
 0x4ab   :  { %8861 = vmatpush1.bf16.msra.mxu0 %v19903_v37  ;;  %9722 = vmatpush1.bf16.msra.mxu1 %v19906_v38  ;;  %v19995_v37 = vld [vmem:[%s27988_s1 + $0x2720] ss:$16 sps:$4 sm:$0xff]   ;;  %v19998_v38 = vld [vmem:[%s27988_s1 + $0x2728] ss:$16 sps:$4 sm:$0xff]  }
 0x4ac   :  { %8862 = vmatprep.subr.bf16.mxu0 %v19911_v39  ;;  %9723 = vmatprep.subr.bf16.mxu1 %v19914_v40  ;;  %v20003_v39 = vld [vmem:[%s27988_s1 + $0x2744] ss:$16 sps:$4 sm:$0xff]   ;;  %v20006_v40 = vld [vmem:[%s27988_s1 + $0x274c] ss:$16 sps:$4 sm:$0xff]  }
 0x4af   :  { %8863 = vmatpush1.bf16.msra.mxu0 %v19909_v41  ;;  %9724 = vmatpush1.bf16.msra.mxu1 %v19912_v36  ;;  %v20001_v41 = vld [vmem:[%s27988_s1 + $0x2740] ss:$16 sps:$4 sm:$0xff]   ;;  %v20004_v36 = vld [vmem:[%s27988_s1 + $0x2748] ss:$16 sps:$4 sm:$0xff]  }
 0x4b0   :  { %8864 = vmatprep.subr.bf16.mxu0 %v19917_v43  ;;  %9725 = vmatprep.subr.bf16.mxu1 %v19920_v44  ;;  %v20009_v43 = vld [vmem:[%s27988_s1 + $0x2764] ss:$16 sps:$4 sm:$0xff]   ;;  %v20012_v44 = vld [vmem:[%s27988_s1 + $0x276c] ss:$16 sps:$4 sm:$0xff]  }
 0x4b3   :  { %8865 = vmatpush1.bf16.msra.mxu0 %v19915_v33  ;;  %9726 = vmatpush1.bf16.msra.mxu1 %v19918_v46  ;;  %v20007_v33 = vld [vmem:[%s27988_s1 + $0x2760] ss:$16 sps:$4 sm:$0xff]   ;;  %v20010_v46 = vld [vmem:[%s27988_s1 + $0x2768] ss:$16 sps:$4 sm:$0xff]  }
 0x4b4   :  { %8866 = vmatprep.subr.bf16.mxu0 %v19923_v47  ;;  %9727 = vmatprep.subr.bf16.mxu1 %v19926_v42  ;;  %v20015_v47 = vld [vmem:[%s27988_s1 + $0x2784] ss:$16 sps:$4 sm:$0xff]   ;;  %v20018_v42 = vld [vmem:[%s27988_s1 + $0x278c] ss:$16 sps:$4 sm:$0xff]  }
 0x4b7   :  { %8867 = vmatpush1.bf16.msra.mxu0 %v19921_v49  ;;  %9728 = vmatpush1.bf16.msra.mxu1 %v19924_v50  ;;  %v20013_v49 = vld [vmem:[%s27988_s1 + $0x2780] ss:$16 sps:$4 sm:$0xff]   ;;  %v20016_v50 = vld [vmem:[%s27988_s1 + $0x2788] ss:$16 sps:$4 sm:$0xff]  }
 0x4b8   :  { %8868 = vmatprep.subr.bf16.mxu0 %v19929_v45  ;;  %9729 = vmatprep.subr.bf16.mxu1 %v19932_v52  ;;  %v20021_v45 = vld [vmem:[%s27988_s1 + $0x27a4] ss:$16 sps:$4 sm:$0xff]   ;;  %v20024_v52 = vld [vmem:[%s27988_s1 + $0x27ac] ss:$16 sps:$4 sm:$0xff]  }
 0x4bb   :  { %8869 = vmatpush1.bf16.msra.mxu0 %v19927_v53  ;;  %9730 = vmatpush1.bf16.msra.mxu1 %v19930_v48  ;;  %v20019_v53 = vld [vmem:[%s27988_s1 + $0x27a0] ss:$16 sps:$4 sm:$0xff]   ;;  %v20022_v48 = vld [vmem:[%s27988_s1 + $0x27a8] ss:$16 sps:$4 sm:$0xff]  }
 0x4bc   :  { %8870 = vmatprep.subr.bf16.mxu0 %v19935_v55  ;;  %9731 = vmatprep.subr.bf16.mxu1 %v19938_v56  ;;  %v20027_v55 = vld [vmem:[%s27988_s1 + $0x27c4] ss:$16 sps:$4 sm:$0xff]   ;;  %v20030_v56 = vld [vmem:[%s27988_s1 + $0x27cc] ss:$16 sps:$4 sm:$0xff]  }
 0x4bf   :  { %8871 = vmatpush1.bf16.msra.mxu0 %v19933_v51  ;;  %9732 = vmatpush1.bf16.msra.mxu1 %v19936_v58  ;;  %v20025_v51 = vld [vmem:[%s27988_s1 + $0x27c0] ss:$16 sps:$4 sm:$0xff]   ;;  %v20028_v58 = vld [vmem:[%s27988_s1 + $0x27c8] ss:$16 sps:$4 sm:$0xff]  }
 0x4c0   :  { %8881 = vmatprep.subr.bf16.mxu0 %v19943_v59  ;;  %9742 = vmatprep.subr.bf16.mxu1 %v19946_v54  ;;  %v20033_v59 = vld [vmem:[%s27988_s1 + $0x27e4] ss:$16 sps:$4 sm:$0xff]   ;;  %v20036_v54 = vld [vmem:[%s27988_s1 + $0x27ec] ss:$16 sps:$4 sm:$0xff]  }
 0x4c2   :  { %8873 = vmatmul.mubr.bf16.vlgmr.msra.gmra.mrb[0].mxu0 %v15743_v61  ;;  %9734 = vmatmul.mubr.bf16.vlgmr.msra.gmra.mrb[0].mxu1 %v15743_v61  ;;  %v20031_v61 = vld [vmem:[%s27988_s1 + $0x27e0] ss:$16 sps:$4 sm:$0xff]  }
 0x4c3   :  { %8882 = vmatpush1.bf16.msra.mxu0 %v19941_v62  ;;  %9743 = vmatpush1.bf16.msra.mxu1 %v19944_v63  ;;  %v20034_v62 = vld [vmem:[%s27988_s1 + $0x27e8] ss:$16 sps:$4 sm:$0xff]   ;;  %v20041_v63 = vld [vmem:[%s27988_s1 + $0x2804] ss:$16 sps:$4 sm:$0xff]  }
 0x4c4   :  { %8883 = vmatprep.subr.bf16.mxu0 %v19949_v0  ;;  %9744 = vmatprep.subr.bf16.mxu1 %v19952_v57  ;;  %v20044_v0 = vld [vmem:[%s27988_s1 + $0x280c] ss:$16 sps:$4 sm:$0xff]   ;;  %v20039_v57 = vld [vmem:[%s27988_s1 + $0x2800] ss:$16 sps:$4 sm:$0xff]  }
 0x4c5   :  { %8913 = vmatprep.mubr.bf16.mxu0 %v15746_v1  ;;  %9774 = vmatprep.mubr.bf16.mxu1 %v15746_v1  ;;  %v20042_v1 = vld [vmem:[%s27988_s1 + $0x2808] ss:$16 sps:$4 sm:$0xff]  }
 0x4c7   :  { %8884 = vmatpush1.bf16.msra.mxu0 %v19947_v2  ;;  %9745 = vmatpush1.bf16.msra.mxu1 %v19950_v3  ;;  %v15745_v2 = vcombine.low %v25167_v60, %v25167_v60  ;;  %v20047_v3 = vld [vmem:[%s27988_s1 + $0x2824] ss:$16 sps:$4 sm:$0xff]   ;;  %v20048_v60 = vld [vmem:[%s27988_s1 + $0x2828] ss:$16 sps:$4 sm:$0xff]  }
 0x4c8   :  { %8885 = vmatprep.subr.bf16.mxu0 %v19955_v4  ;;  %9746 = vmatprep.subr.bf16.mxu1 %v19958_v5  ;;  %v20050_v4 = vld [vmem:[%s27988_s1 + $0x282c] ss:$16 sps:$4 sm:$0xff]   ;;  %v20045_v5 = vld [vmem:[%s27988_s1 + $0x2820] ss:$16 sps:$4 sm:$0xff]  }
 0x4cb   :  { %8886 = vmatpush1.bf16.msra.mxu0 %v19953_v6  ;;  %9747 = vmatpush1.bf16.msra.mxu1 %v19956_v7  ;;  %v20053_v6 = vld [vmem:[%s27988_s1 + $0x2844] ss:$16 sps:$4 sm:$0xff]   ;;  %v20056_v7 = vld [vmem:[%s27988_s1 + $0x284c] ss:$16 sps:$4 sm:$0xff]  }
 0x4cc   :  { %8887 = vmatprep.subr.bf16.mxu0 %v19961_v8  ;;  %9748 = vmatprep.subr.bf16.mxu1 %v19964_v9  ;;  %v20051_v8 = vld [vmem:[%s27988_s1 + $0x2840] ss:$16 sps:$4 sm:$0xff]   ;;  %v20054_v9 = vld [vmem:[%s27988_s1 + $0x2848] ss:$16 sps:$4 sm:$0xff]  }
 0x4cf   :  { %8888 = vmatpush1.bf16.msra.mxu0 %v19959_v10  ;;  %9749 = vmatpush1.bf16.msra.mxu1 %v19962_v12  ;;  %v20059_v10 = vld [vmem:[%s27988_s1 + $0x2864] ss:$16 sps:$4 sm:$0xff]   ;;  %v20062_v12 = vld [vmem:[%s27988_s1 + $0x286c] ss:$16 sps:$4 sm:$0xff]  }
 0x4d0   :  { %8889 = vmatprep.subr.bf16.mxu0 %v19967_v13  ;;  %9750 = vmatprep.subr.bf16.mxu1 %v19970_v15  ;;  %v20057_v13 = vld [vmem:[%s27988_s1 + $0x2860] ss:$16 sps:$4 sm:$0xff]   ;;  %v20065_v15 = vld [vmem:[%s27988_s1 + $0x2884] ss:$16 sps:$4 sm:$0xff]  }
 0x4d3   :  { %8890 = vmatpush1.bf16.msra.mxu0 %v19965_v11  ;;  %9751 = vmatpush1.bf16.msra.mxu1 %v19968_v17  ;;  %v20068_v11 = vld [vmem:[%s27988_s1 + $0x288c] ss:$16 sps:$4 sm:$0xff]   ;;  %v20063_v17 = vld [vmem:[%s27988_s1 + $0x2880] ss:$16 sps:$4 sm:$0xff]  }
 0x4d4   :  { %8891 = vmatprep.subr.bf16.mxu0 %v19973_v14  ;;  %9752 = vmatprep.subr.bf16.mxu1 %v19976_v19  ;;  %v20066_v14 = vld [vmem:[%s27988_s1 + $0x2888] ss:$16 sps:$4 sm:$0xff]   ;;  %v20071_v19 = vld [vmem:[%s27988_s1 + $0x28a4] ss:$16 sps:$4 sm:$0xff]  }
 0x4d7   :  { %8892 = vmatpush1.bf16.msra.mxu0 %v19971_v20  ;;  %9753 = vmatpush1.bf16.msra.mxu1 %v19974_v16  ;;  %v20074_v20 = vld [vmem:[%s27988_s1 + $0x28ac] ss:$16 sps:$4 sm:$0xff]   ;;  %v20069_v16 = vld [vmem:[%s27988_s1 + $0x28a0] ss:$16 sps:$4 sm:$0xff]  }
 0x4d8   :  { %8893 = vmatprep.subr.bf16.mxu0 %v19979_v22  ;;  %9754 = vmatprep.subr.bf16.mxu1 %v19982_v23  ;;  %v20072_v22 = vld [vmem:[%s27988_s1 + $0x28a8] ss:$16 sps:$4 sm:$0xff]   ;;  %v20077_v23 = vld [vmem:[%s27988_s1 + $0x28c4] ss:$16 sps:$4 sm:$0xff]  }
 0x4db   :  { %8894 = vmatpush1.bf16.msra.mxu0 %v19977_v18  ;;  %9755 = vmatpush1.bf16.msra.mxu1 %v19980_v25  ;;  %v20080_v18 = vld [vmem:[%s27988_s1 + $0x28cc] ss:$16 sps:$4 sm:$0xff]   ;;  %v20075_v25 = vld [vmem:[%s27988_s1 + $0x28c0] ss:$16 sps:$4 sm:$0xff]  }
 0x4dc   :  { %8895 = vmatprep.subr.bf16.mxu0 %v19985_v26  ;;  %9756 = vmatprep.subr.bf16.mxu1 %v19988_v21  ;;  %v20078_v26 = vld [vmem:[%s27988_s1 + $0x28c8] ss:$16 sps:$4 sm:$0xff]   ;;  %v20083_v21 = vld [vmem:[%s27988_s1 + $0x28e4] ss:$16 sps:$4 sm:$0xff]  }
 0x4df   :  { %8896 = vmatpush1.bf16.msra.mxu0 %v19983_v28  ;;  %9757 = vmatpush1.bf16.msra.mxu1 %v19986_v29  ;;  %v20086_v28 = vld [vmem:[%s27988_s1 + $0x28ec] ss:$16 sps:$4 sm:$0xff]   ;;  %v20081_v29 = vld [vmem:[%s27988_s1 + $0x28e0] ss:$16 sps:$4 sm:$0xff]  }
 0x4e0   :  { %8897 = vmatprep.subr.bf16.mxu0 %v19991_v24  ;;  %9758 = vmatprep.subr.bf16.mxu1 %v19994_v31  ;;  %v20084_v24 = vld [vmem:[%s27988_s1 + $0x28e8] ss:$16 sps:$4 sm:$0xff]   ;;  %v20090_v31 = vld [vmem:[%s27990_s5 + $0x4] ss:$48 sps:$4 sm:$0xff]  }
 0x4e3   :  { %8898 = vmatpush1.bf16.msra.mxu0 %v19989_v27  ;;  %9759 = vmatpush1.bf16.msra.mxu1 %v19992_v34  ;;  %v20093_v27 = vld [vmem:[%s27990_s5 + $0xc] ss:$48 sps:$4 sm:$0xff]   ;;  %v20087_v34 = vld [vmem:[%s27989_s0 + $0xa0] ss:$0 sps:$4 sm:$0xff]  }
 0x4e4   :  { %8899 = vmatprep.subr.bf16.mxu0 %v19997_v35  ;;  %9760 = vmatprep.subr.bf16.mxu1 %v20000_v30  ;;  %v20088_v35 = vld [vmem:[%s27990_s5] ss:$48 sps:$4 sm:$0xff]   ;;  %v20091_v30 = vld [vmem:[%s27990_s5 + $0x8] ss:$48 sps:$4 sm:$0xff]  }
 0x4e7   :  { %8900 = vmatpush1.bf16.msra.mxu0 %v19995_v37  ;;  %9761 = vmatpush1.bf16.msra.mxu1 %v19998_v38  ;;  %v20096_v37 = vld [vmem:[%s27990_s5 + $0x64] ss:$48 sps:$4 sm:$0xff]   ;;  %v20099_v38 = vld [vmem:[%s27990_s5 + $0x6c] ss:$48 sps:$4 sm:$0xff]  }
 0x4e8   :  { %8901 = vmatprep.subr.bf16.mxu0 %v20003_v39  ;;  %9762 = vmatprep.subr.bf16.mxu1 %v20006_v40  ;;  %v20094_v39 = vld [vmem:[%s27990_s5 + $0x60] ss:$48 sps:$4 sm:$0xff]   ;;  %v20097_v40 = vld [vmem:[%s27990_s5 + $0x68] ss:$48 sps:$4 sm:$0xff]  }
 0x4eb   :  { %8902 = vmatpush1.bf16.msra.mxu0 %v20001_v41  ;;  %9763 = vmatpush1.bf16.msra.mxu1 %v20004_v36  ;;  %v20102_v41 = vld [vmem:[%s27990_s5 + $0xc4] ss:$48 sps:$4 sm:$0xff]   ;;  %v20105_v36 = vld [vmem:[%s27990_s5 + $0xcc] ss:$48 sps:$4 sm:$0xff]  }
 0x4ec   :  { %8903 = vmatprep.subr.bf16.mxu0 %v20009_v43  ;;  %9764 = vmatprep.subr.bf16.mxu1 %v20012_v44  ;;  %v20100_v43 = vld [vmem:[%s27990_s5 + $0xc0] ss:$48 sps:$4 sm:$0xff]   ;;  %v20103_v44 = vld [vmem:[%s27990_s5 + $0xc8] ss:$48 sps:$4 sm:$0xff]  }
 0x4ef   :  { %8904 = vmatpush1.bf16.msra.mxu0 %v20007_v33  ;;  %9765 = vmatpush1.bf16.msra.mxu1 %v20010_v46  ;;  %v20108_v33 = vld [vmem:[%s27990_s5 + $0x124] ss:$48 sps:$4 sm:$0xff]   ;;  %v20111_v46 = vld [vmem:[%s27990_s5 + $0x12c] ss:$48 sps:$4 sm:$0xff]  }
 0x4f0   :  { %8905 = vmatprep.subr.bf16.mxu0 %v20015_v47  ;;  %9766 = vmatprep.subr.bf16.mxu1 %v20018_v42  ;;  %v20106_v47 = vld [vmem:[%s27990_s5 + $0x120] ss:$48 sps:$4 sm:$0xff]   ;;  %v20109_v42 = vld [vmem:[%s27990_s5 + $0x128] ss:$48 sps:$4 sm:$0xff]  }
 0x4f3   :  { %8906 = vmatpush1.bf16.msra.mxu0 %v20013_v49  ;;  %9767 = vmatpush1.bf16.msra.mxu1 %v20016_v50  ;;  %v20114_v49 = vld [vmem:[%s27990_s5 + $0x184] ss:$48 sps:$4 sm:$0xff]   ;;  %v20117_v50 = vld [vmem:[%s27990_s5 + $0x18c] ss:$48 sps:$4 sm:$0xff]  }
 0x4f4   :  { %8907 = vmatprep.subr.bf16.mxu0 %v20021_v45  ;;  %9768 = vmatprep.subr.bf16.mxu1 %v20024_v52  ;;  %v20112_v45 = vld [vmem:[%s27990_s5 + $0x180] ss:$48 sps:$4 sm:$0xff]   ;;  %v20115_v52 = vld [vmem:[%s27990_s5 + $0x188] ss:$48 sps:$4 sm:$0xff]  }
 0x4f7   :  { %8908 = vmatpush1.bf16.msra.mxu0 %v20019_v53  ;;  %9769 = vmatpush1.bf16.msra.mxu1 %v20022_v48  ;;  %v20120_v53 = vld [vmem:[%s27990_s5 + $0x1e4] ss:$48 sps:$4 sm:$0xff]   ;;  %v20123_v48 = vld [vmem:[%s27990_s5 + $0x1ec] ss:$48 sps:$4 sm:$0xff]  }
 0x4f8   :  { %8909 = vmatprep.subr.bf16.mxu0 %v20027_v55  ;;  %9770 = vmatprep.subr.bf16.mxu1 %v20030_v56  ;;  %v20118_v55 = vld [vmem:[%s27990_s5 + $0x1e0] ss:$48 sps:$4 sm:$0xff]   ;;  %v20121_v56 = vld [vmem:[%s27990_s5 + $0x1e8] ss:$48 sps:$4 sm:$0xff]  }
 0x4fb   :  { %8910 = vmatpush1.bf16.msra.mxu0 %v20025_v51  ;;  %9771 = vmatpush1.bf16.msra.mxu1 %v20028_v58  ;;  %v20126_v51 = vld [vmem:[%s27990_s5 + $0x244] ss:$48 sps:$4 sm:$0xff]   ;;  %v20129_v58 = vld [vmem:[%s27990_s5 + $0x24c] ss:$48 sps:$4 sm:$0xff]  }
 0x4fc   :  { %8911 = vmatprep.subr.bf16.mxu0 %v20033_v59  ;;  %9772 = vmatprep.subr.bf16.mxu1 %v20036_v54  ;;  %v20124_v59 = vld [vmem:[%s27990_s5 + $0x240] ss:$48 sps:$4 sm:$0xff]   ;;  %v20127_v54 = vld [vmem:[%s27990_s5 + $0x248] ss:$48 sps:$4 sm:$0xff]  }
 0x4ff   :  { %8912 = vmatpush1.bf16.msra.mxu0 %v20031_v61  ;;  %9773 = vmatpush1.bf16.msra.mxu1 %v20034_v62  ;;  %v20132_v61 = vld [vmem:[%s27990_s5 + $0x2a4] ss:$48 sps:$4 sm:$0xff]   ;;  %v20135_v62 = vld [vmem:[%s27990_s5 + $0x2ac] ss:$48 sps:$4 sm:$0xff]  }
 0x500   :  { %8922 = vmatprep.subr.bf16.mxu0 %v20041_v63  ;;  %9783 = vmatprep.subr.bf16.mxu1 %v20044_v0  ;;  %v20130_v63 = vld [vmem:[%s27990_s5 + $0x2a0] ss:$48 sps:$4 sm:$0xff]   ;;  %v20133_v0 = vld [vmem:[%s27990_s5 + $0x2a8] ss:$48 sps:$4 sm:$0xff]  }
 0x502   :  { %8914 = vmatmul.mubr.bf16.vlgmr.msra.gmra.mrb[0].mxu0 %v15745_v2  ;;  %9775 = vmatmul.mubr.bf16.vlgmr.msra.gmra.mrb[0].mxu1 %v15745_v2  ;;  %v20136_v2 = vld [vmem:[%s27990_s5 + $0x300] ss:$48 sps:$4 sm:$0xff]  }
 0x503   :  { %8923 = vmatpush1.bf16.msra.mxu0 %v20039_v57  ;;  %9784 = vmatpush1.bf16.msra.mxu1 %v20042_v1  ;;  %v20138_v57 = vld [vmem:[%s27990_s5 + $0x304] ss:$48 sps:$4 sm:$0xff]   ;;  %v20141_v1 = vld [vmem:[%s27990_s5 + $0x30c] ss:$48 sps:$4 sm:$0xff]  }
 0x504   :  { %8924 = vmatprep.subr.bf16.mxu0 %v20047_v3  ;;  %9785 = vmatprep.subr.bf16.mxu1 %v20050_v4  ;;  %v20139_v3 = vld [vmem:[%s27990_s5 + $0x308] ss:$48 sps:$4 sm:$0xff]   ;;  %v20144_v4 = vld [vmem:[%s27990_s5 + $0x364] ss:$48 sps:$4 sm:$0xff]  }
 0x505   :  { %8954 = vmatprep.mubr.bf16.mxu0 %v21280_v32  ;;  %9815 = vmatprep.mubr.bf16.mxu1 %v21280_v32  ;;  %v20060_v32 = vld [vmem:[%s27988_s1 + $0x2868] ss:$16 sps:$4 sm:$0xff]  }
 0x507   :  { %8925 = vmatpush1.bf16.msra.mxu0 %v20045_v5  ;;  %9786 = vmatpush1.bf16.msra.mxu1 %v20048_v60  ;;  %v20147_v5 = vld [vmem:[%s27990_s5 + $0x36c] ss:$48 sps:$4 sm:$0xff]   ;;  %v20142_v60 = vld [vmem:[%s27990_s5 + $0x360] ss:$48 sps:$4 sm:$0xff]  }
 0x508   :  { %8926 = vmatprep.subr.bf16.mxu0 %v20053_v6  ;;  %9787 = vmatprep.subr.bf16.mxu1 %v20056_v7  ;;  %v20145_v6 = vld [vmem:[%s27990_s5 + $0x368] ss:$48 sps:$4 sm:$0xff]   ;;  %v20150_v7 = vld [vmem:[%s27990_s5 + $0x3c4] ss:$48 sps:$4 sm:$0xff]  }
 0x50b   :  { %8927 = vmatpush1.bf16.msra.mxu0 %v20051_v8  ;;  %9788 = vmatpush1.bf16.msra.mxu1 %v20054_v9  ;;  %v20153_v8 = vld [vmem:[%s27990_s5 + $0x3cc] ss:$48 sps:$4 sm:$0xff]   ;;  %v20148_v9 = vld [vmem:[%s27990_s5 + $0x3c0] ss:$48 sps:$4 sm:$0xff]  }
 0x50c   :  { %8928 = vmatprep.subr.bf16.mxu0 %v20059_v10  ;;  %9789 = vmatprep.subr.bf16.mxu1 %v20062_v12  ;;  %v20151_v10 = vld [vmem:[%s27990_s5 + $0x3c8] ss:$48 sps:$4 sm:$0xff]   ;;  %v20156_v12 = vld [vmem:[%s27990_s5 + $0x424] ss:$48 sps:$4 sm:$0xff]  }
 0x50f   :  { %8929 = vmatpush1.bf16.msra.mxu0 %v20057_v13  ;;  %9790 = vmatpush1.bf16.msra.mxu1 %v20060_v32  ;;  %v20159_v13 = vld [vmem:[%s27990_s5 + $0x42c] ss:$48 sps:$4 sm:$0xff]   ;;  %v20154_v32 = vld [vmem:[%s27990_s5 + $0x420] ss:$48 sps:$4 sm:$0xff]  }
 0x510   :  { %8930 = vmatprep.subr.bf16.mxu0 %v20065_v15  ;;  %9791 = vmatprep.subr.bf16.mxu1 %v20068_v11  ;;  %v20157_v15 = vld [vmem:[%s27990_s5 + $0x428] ss:$48 sps:$4 sm:$0xff]   ;;  %v20162_v11 = vld [vmem:[%s27990_s5 + $0x484] ss:$48 sps:$4 sm:$0xff]  }
 0x513   :  { %8931 = vmatpush1.bf16.msra.mxu0 %v20063_v17  ;;  %9792 = vmatpush1.bf16.msra.mxu1 %v20066_v14  ;;  %v20165_v17 = vld [vmem:[%s27990_s5 + $0x48c] ss:$48 sps:$4 sm:$0xff]   ;;  %v20160_v14 = vld [vmem:[%s27990_s5 + $0x480] ss:$48 sps:$4 sm:$0xff]  }
 0x514   :  { %8932 = vmatprep.subr.bf16.mxu0 %v20071_v19  ;;  %9793 = vmatprep.subr.bf16.mxu1 %v20074_v20  ;;  %v20163_v19 = vld [vmem:[%s27990_s5 + $0x488] ss:$48 sps:$4 sm:$0xff]   ;;  %v20168_v20 = vld [vmem:[%s27990_s5 + $0x4e4] ss:$48 sps:$4 sm:$0xff]  }
 0x517   :  { %8933 = vmatpush1.bf16.msra.mxu0 %v20069_v16  ;;  %9794 = vmatpush1.bf16.msra.mxu1 %v20072_v22  ;;  %v20171_v16 = vld [vmem:[%s27990_s5 + $0x4ec] ss:$48 sps:$4 sm:$0xff]   ;;  %v20166_v22 = vld [vmem:[%s27990_s5 + $0x4e0] ss:$48 sps:$4 sm:$0xff]  }
 0x518   :  { %8934 = vmatprep.subr.bf16.mxu0 %v20077_v23  ;;  %9795 = vmatprep.subr.bf16.mxu1 %v20080_v18  ;;  %v20169_v23 = vld [vmem:[%s27990_s5 + $0x4e8] ss:$48 sps:$4 sm:$0xff]   ;;  %v20174_v18 = vld [vmem:[%s27990_s5 + $0x544] ss:$48 sps:$4 sm:$0xff]  }
 0x51b   :  { %8935 = vmatpush1.bf16.msra.mxu0 %v20075_v25  ;;  %9796 = vmatpush1.bf16.msra.mxu1 %v20078_v26  ;;  %v20177_v25 = vld [vmem:[%s27990_s5 + $0x54c] ss:$48 sps:$4 sm:$0xff]   ;;  %v20172_v26 = vld [vmem:[%s27990_s5 + $0x540] ss:$48 sps:$4 sm:$0xff]  }
 0x51c   :  { %8936 = vmatprep.subr.bf16.mxu0 %v20083_v21  ;;  %9797 = vmatprep.subr.bf16.mxu1 %v20086_v28  ;;  %v20175_v21 = vld [vmem:[%s27990_s5 + $0x548] ss:$48 sps:$4 sm:$0xff]   ;;  %v20180_v28 = vld [vmem:[%s27990_s5 + $0x5a4] ss:$48 sps:$4 sm:$0xff]  }
 0x51f   :  { %8937 = vmatpush1.bf16.msra.mxu0 %v20081_v29  ;;  %9798 = vmatpush1.bf16.msra.mxu1 %v20084_v24  ;;  %v20183_v29 = vld [vmem:[%s27990_s5 + $0x5ac] ss:$48 sps:$4 sm:$0xff]   ;;  %v20178_v24 = vld [vmem:[%s27990_s5 + $0x5a0] ss:$48 sps:$4 sm:$0xff]  }
 0x520   :  { %12214 = vmatprep.subr.bf16.mxu0 %v20090_v31  ;;  %12296 = vmatprep.subr.bf16.mxu1 %v20093_v27  ;;  %v20181_v31 = vld [vmem:[%s27990_s5 + $0x5a8] ss:$48 sps:$4 sm:$0xff]   ;;  %v20186_v27 = vld [vmem:[%s27990_s5 + $0x604] ss:$48 sps:$4 sm:$0xff]  }
 0x522   :  { %8955 = vmatmul.mubr.bf16.vlgmr.msra.gmra.mrb[0].mxu0 %v20087_v34  ;;  %9816 = vmatmul.mubr.bf16.vlgmr.msra.gmra.mrb[0].mxu1 %v20087_v34  ;;  %v20189_v34 = vld [vmem:[%s27990_s5 + $0x60c] ss:$48 sps:$4 sm:$0xff]  }
 0x523   :  { %12215 = vmatpush1.bf16.msra.mxu0 %v20088_v35  ;;  %12297 = vmatpush1.bf16.msra.mxu1 %v20091_v30  ;;  %v1378_v35 = vlaneseq }
 0x524   :  { %12216 = vmatprep.subr.bf16.mxu0 %v20096_v37  ;;  %12298 = vmatprep.subr.bf16.mxu1 %v20099_v38  ;;  %v25668_v38 = vld [vmem:[%s27991_s2] sm:$0xf] }
 0x525   :  { %v25660_v30 = vshrl.u32 %v1378_v35, 7  ;;  %v20246_v35 = vld [vmem:[%s27990_s5 + $0x9c4] ss:$48 sps:$4 sm:$0xff]  }
 0x527   :  { %12217 = vmatpush1.bf16.msra.mxu0 %v20094_v39  ;;  %12299 = vmatpush1.bf16.msra.mxu1 %v20097_v40  ;;  %v25663_v37 = vsub.s32 0, %v25660_v30  ;;  %v25671_v39 = vsub.s32 1, %v25660_v30  ;;  %v25674_v40 = vsub.s32 3, %v25660_v30 }
 0x528   :  { %12218 = vmatprep.subr.bf16.mxu0 %v20102_v41  ;;  %12300 = vmatprep.subr.bf16.mxu1 %v20105_v36 }
 0x529   :  { %v1381_v41 = vrot.slane %v25668_v38, %v25663_v37  ;;  %v1385_v36 = vrot.slane %v25668_v38, %v25671_v39 }
 0x52b   :  { %12219 = vmatpush1.bf16.msra.mxu0 %v20100_v43  ;;  %12301 = vmatpush1.bf16.msra.mxu1 %v20103_v44  ;;  %v1393_v43 = vrot.slane %v25668_v38, %v25674_v40 }
 0x52c   :  { %12220 = vmatprep.subr.bf16.mxu0 %v20108_v33  ;;  %12302 = vmatprep.subr.bf16.mxu1 %v20111_v46 }
 0x52f   :  { %12221 = vmatpush1.bf16.msra.mxu0 %v20106_v47  ;;  %12303 = vmatpush1.bf16.msra.mxu1 %v20109_v42 }
 0x530   :  { %12222 = vmatprep.subr.bf16.mxu0 %v20114_v49  ;;  %12304 = vmatprep.subr.bf16.mxu1 %v20117_v50 }
 0x533   :  { %12223 = vmatpush1.bf16.msra.mxu0 %v20112_v45  ;;  %12305 = vmatpush1.bf16.msra.mxu1 %v20115_v52 }
 0x534   :  { %12224 = vmatprep.subr.bf16.mxu0 %v20120_v53  ;;  %12306 = vmatprep.subr.bf16.mxu1 %v20123_v48 }
 0x537   :  { %12225 = vmatpush1.bf16.msra.mxu0 %v20118_v55  ;;  %12307 = vmatpush1.bf16.msra.mxu1 %v20121_v56 }
 0x538   :  { %12226 = vmatprep.subr.bf16.mxu0 %v20126_v51  ;;  %12308 = vmatprep.subr.bf16.mxu1 %v20129_v58 }
 0x53b   :  { %12227 = vmatpush1.bf16.msra.mxu0 %v20124_v59  ;;  %12309 = vmatpush1.bf16.msra.mxu1 %v20127_v54  ;;  %v20184_v59 = vld [vmem:[%s27990_s5 + $0x600] ss:$48 sps:$4 sm:$0xff]   ;;  %v20187_v54 = vld [vmem:[%s27990_s5 + $0x608] ss:$48 sps:$4 sm:$0xff]  }
 0x53c   :  { %12228 = vmatprep.subr.bf16.mxu0 %v20132_v61  ;;  %12310 = vmatprep.subr.bf16.mxu1 %v20135_v62  ;;  %v20192_v62 = vld [vmem:[%s27990_s5 + $0x664] ss:$48 sps:$4 sm:$0xff]  }
 0x53f   :  { %12229 = vmatpush1.bf16.msra.mxu0 %v20130_v63  ;;  %12311 = vmatpush1.bf16.msra.mxu1 %v20133_v0  ;;  %v20195_v63 = vld [vmem:[%s27990_s5 + $0x66c] ss:$48 sps:$4 sm:$0xff]  }
 0x540   :  { %12230 = vmatprep.subr.bf16.mxu0 %v20138_v57  ;;  %12312 = vmatprep.subr.bf16.mxu1 %v20141_v1  ;;  %v20190_v57 = vld [vmem:[%s27990_s5 + $0x660] ss:$48 sps:$4 sm:$0xff]   ;;  %v20193_v1 = vld [vmem:[%s27990_s5 + $0x668] ss:$48 sps:$4 sm:$0xff]  }
 0x543   :  { %12231 = vmatpush1.bf16.msra.mxu0 %v20136_v2  ;;  %12313 = vmatpush1.bf16.msra.mxu1 %v20139_v3  ;;  %v20198_v2 = vld [vmem:[%s27990_s5 + $0x6c4] ss:$48 sps:$4 sm:$0xff]   ;;  %v20201_v3 = vld [vmem:[%s27990_s5 + $0x6cc] ss:$48 sps:$4 sm:$0xff]  }
 0x544   :  { %12232 = vmatprep.subr.bf16.mxu0 %v20144_v4  ;;  %12314 = vmatprep.subr.bf16.mxu1 %v20147_v5  ;;  %v20196_v4 = vld [vmem:[%s27990_s5 + $0x6c0] ss:$48 sps:$4 sm:$0xff]   ;;  %v20199_v5 = vld [vmem:[%s27990_s5 + $0x6c8] ss:$48 sps:$4 sm:$0xff]  }
 0x547   :  { %12233 = vmatpush1.bf16.msra.mxu0 %v20142_v60  ;;  %12315 = vmatpush1.bf16.msra.mxu1 %v20145_v6  ;;  %v20204_v60 = vld [vmem:[%s27990_s5 + $0x724] ss:$48 sps:$4 sm:$0xff]   ;;  %v20207_v6 = vld [vmem:[%s27990_s5 + $0x72c] ss:$48 sps:$4 sm:$0xff]  }
 0x548   :  { %12234 = vmatprep.subr.bf16.mxu0 %v20150_v7  ;;  %12316 = vmatprep.subr.bf16.mxu1 %v20153_v8  ;;  %v20202_v7 = vld [vmem:[%s27990_s5 + $0x720] ss:$48 sps:$4 sm:$0xff]   ;;  %v20205_v8 = vld [vmem:[%s27990_s5 + $0x728] ss:$48 sps:$4 sm:$0xff]  }
 0x54b   :  { %12235 = vmatpush1.bf16.msra.mxu0 %v20148_v9  ;;  %12317 = vmatpush1.bf16.msra.mxu1 %v20151_v10  ;;  %v20210_v9 = vld [vmem:[%s27990_s5 + $0x784] ss:$48 sps:$4 sm:$0xff]   ;;  %v20213_v10 = vld [vmem:[%s27990_s5 + $0x78c] ss:$48 sps:$4 sm:$0xff]  }
 0x54c   :  { %12236 = vmatprep.subr.bf16.mxu0 %v20156_v12  ;;  %12318 = vmatprep.subr.bf16.mxu1 %v20159_v13  ;;  %v20208_v12 = vld [vmem:[%s27990_s5 + $0x780] ss:$48 sps:$4 sm:$0xff]   ;;  %v20211_v13 = vld [vmem:[%s27990_s5 + $0x788] ss:$48 sps:$4 sm:$0xff]  }
 0x54f   :  { %12237 = vmatpush1.bf16.msra.mxu0 %v20154_v32  ;;  %12319 = vmatpush1.bf16.msra.mxu1 %v20157_v15  ;;  %v20216_v32 = vld [vmem:[%s27990_s5 + $0x7e4] ss:$48 sps:$4 sm:$0xff]   ;;  %v20219_v15 = vld [vmem:[%s27990_s5 + $0x7ec] ss:$48 sps:$4 sm:$0xff]  }
 0x550   :  { %12238 = vmatprep.subr.bf16.mxu0 %v20162_v11  ;;  %12320 = vmatprep.subr.bf16.mxu1 %v20165_v17  ;;  %v20214_v11 = vld [vmem:[%s27990_s5 + $0x7e0] ss:$48 sps:$4 sm:$0xff]   ;;  %v20217_v17 = vld [vmem:[%s27990_s5 + $0x7e8] ss:$48 sps:$4 sm:$0xff]  }
 0x553   :  { %12239 = vmatpush1.bf16.msra.mxu0 %v20160_v14  ;;  %12321 = vmatpush1.bf16.msra.mxu1 %v20163_v19  ;;  %v20222_v14 = vld [vmem:[%s27990_s5 + $0x844] ss:$48 sps:$4 sm:$0xff]   ;;  %v20225_v19 = vld [vmem:[%s27990_s5 + $0x84c] ss:$48 sps:$4 sm:$0xff]  }
 0x554   :  { %12240 = vmatprep.subr.bf16.mxu0 %v20168_v20  ;;  %12322 = vmatprep.subr.bf16.mxu1 %v20171_v16  ;;  %v20220_v20 = vld [vmem:[%s27990_s5 + $0x840] ss:$48 sps:$4 sm:$0xff]   ;;  %v20223_v16 = vld [vmem:[%s27990_s5 + $0x848] ss:$48 sps:$4 sm:$0xff]  }
 0x557   :  { %12241 = vmatpush1.bf16.msra.mxu0 %v20166_v22  ;;  %12323 = vmatpush1.bf16.msra.mxu1 %v20169_v23  ;;  %v20228_v22 = vld [vmem:[%s27990_s5 + $0x8a4] ss:$48 sps:$4 sm:$0xff]   ;;  %v20231_v23 = vld [vmem:[%s27990_s5 + $0x8ac] ss:$48 sps:$4 sm:$0xff]  }
 0x558   :  { %12242 = vmatprep.subr.bf16.mxu0 %v20174_v18  ;;  %12324 = vmatprep.subr.bf16.mxu1 %v20177_v25  ;;  %v20226_v18 = vld [vmem:[%s27990_s5 + $0x8a0] ss:$48 sps:$4 sm:$0xff]   ;;  %v20229_v25 = vld [vmem:[%s27990_s5 + $0x8a8] ss:$48 sps:$4 sm:$0xff]  }
 0x55b   :  { %12243 = vmatpush1.bf16.msra.mxu0 %v20172_v26  ;;  %12325 = vmatpush1.bf16.msra.mxu1 %v20175_v21  ;;  %v20234_v26 = vld [vmem:[%s27990_s5 + $0x904] ss:$48 sps:$4 sm:$0xff]   ;;  %v20237_v21 = vld [vmem:[%s27990_s5 + $0x90c] ss:$48 sps:$4 sm:$0xff]  }
 0x55c   :  { %12244 = vmatprep.subr.bf16.mxu0 %v20180_v28  ;;  %12326 = vmatprep.subr.bf16.mxu1 %v20183_v29  ;;  %v20232_v28 = vld [vmem:[%s27990_s5 + $0x900] ss:$48 sps:$4 sm:$0xff]   ;;  %v20235_v29 = vld [vmem:[%s27990_s5 + $0x908] ss:$48 sps:$4 sm:$0xff]  }
 0x55f   :  { %12245 = vmatpush1.bf16.msra.mxu0 %v20178_v24  ;;  %12327 = vmatpush1.bf16.msra.mxu1 %v20181_v31  ;;  %v20240_v24 = vld [vmem:[%s27990_s5 + $0x964] ss:$48 sps:$4 sm:$0xff]   ;;  %v20243_v31 = vld [vmem:[%s27990_s5 + $0x96c] ss:$48 sps:$4 sm:$0xff]  }
 0x560   :  { %12255 = vmatprep.subr.bf16.mxu0 %v20186_v27  ;;  %12337 = vmatprep.subr.bf16.mxu1 %v20189_v34  ;;  %v20238_v27 = vld [vmem:[%s27990_s5 + $0x960] ss:$48 sps:$4 sm:$0xff]   ;;  %v20241_v34 = vld [vmem:[%s27990_s5 + $0x968] ss:$48 sps:$4 sm:$0xff]  }
 0x5f5   :  { %v8956_v44 = vpop.f32.mrb[0].mxu0  ;;  %v25682_v33 = vpop.f32.mrb[0].mxu1 }
 0x5f6   :  { %v17837_v46 = vadd.f32 %v8956_v44, %v1381_v41  ;;  %v8958_v47 = vpop.f32.mrb[1].mxu0  ;;  %v9819_v42 = vpop.f32.mrb[1].mxu1  ;;  %v20249_v41 = vld [vmem:[%s27990_s5 + $0x9cc] ss:$48 sps:$4 sm:$0xff]   ;;  %v20252_v44 = vld [vmem:[%s27990_s5 + $0xa24] ss:$48 sps:$4 sm:$0xff]  }
 0x5f7   :  { %v17838_v49 = vadd.f32 %v8958_v47, %v1385_v36  ;;  %v17840_v50 = vadd.f32 %v9819_v42, %v1393_v43  ;;  %v8960_v45 = vpop.f32.mrb[2].mxu0  ;;  %v9821_v52 = vpop.f32.mrb[2].mxu1  ;;  %v20244_v36 = vld [vmem:[%s27990_s5 + $0x9c0] ss:$48 sps:$4 sm:$0xff]   ;;  %v20247_v43 = vld [vmem:[%s27990_s5 + $0x9c8] ss:$48 sps:$4 sm:$0xff]  }
 0x5f8   :  { %v9824_v53 = vmax.f32 %v17837_v46, 0.0  ;;  %v8961_v48 = vpop.f32.mrb[3].mxu0  ;;  %v9822_v55 = vpop.f32.mrb[3].mxu1  ;;  %v20255_v46 = vld [vmem:[%s27990_s5 + $0xa2c] ss:$48 sps:$4 sm:$0xff]  }
 0x5f9   :  { %v9825_v56 = vmax.f32 %v17838_v49, 0.0  ;;  %v9827_v51 = vmax.f32 %v17840_v50, 0.0  ;;  %v20250_v47 = vld [vmem:[%s27990_s5 + $0xa20] ss:$48 sps:$4 sm:$0xff]   ;;  %v20253_v42 = vld [vmem:[%s27990_s5 + $0xa28] ss:$48 sps:$4 sm:$0xff]  }
 0x5fa   :  { %v25692_v61 = vpack.c.bf16 %v9824_v53, %v9824_v53  ;;  %v20258_v49 = vld [vmem:[%s27990_s5 + $0xa84] ss:$48 sps:$4 sm:$0xff]   ;;  %v20261_v50 = vld [vmem:[%s27990_s5 + $0xa8c] ss:$48 sps:$4 sm:$0xff]   ;;  %v20256_v45 = vld [vmem:[%s27990_s5 + $0xa80] ss:$48 sps:$4 sm:$0xff]  }
 0x5fb   :  { %v25684_v58 = vpack.c.bf16 %v9825_v56, %v9825_v56  ;;  %v25702_v0 = vpack.c.bf16 %v9827_v51, %v9827_v51  ;;  %v20259_v52 = vld [vmem:[%s27990_s5 + $0xa88] ss:$48 sps:$4 sm:$0xff]   ;;  %v25847_v53 = vsub.s32 2, %v25660_v30  ;;  %v20264_v48 = vld [vmem:[%s27990_s5 + $0xae4] ss:$48 sps:$4 sm:$0xff]  }
 0x5fc   :  { %v20267_v55 = vld [vmem:[%s27990_s5 + $0xaec] ss:$48 sps:$4 sm:$0xff]   ;;  %v20262_v56 = vld [vmem:[%s27990_s5 + $0xae0] ss:$48 sps:$4 sm:$0xff]   ;;  %v20265_v51 = vld [vmem:[%s27990_s5 + $0xae8] ss:$48 sps:$4 sm:$0xff]  }
 0x5fd   :  { %12246 = vmatprep.mubr.bf16.mxu0 %v25684_v58  ;;  %12328 = vmatprep.mubr.bf16.mxu1 %v25684_v58 }
 0x5fe   :  { %12247 = vmatmul.mubr.bf16.vlgmr.msra.gmra.mrb[4].mxu0 %v25692_v61  ;;  %12329 = vmatmul.mubr.bf16.vlgmr.msra.gmra.mrb[4].mxu1 %v25692_v61 }
 0x5ff   :  { %12256 = vmatpush1.bf16.msra.mxu0 %v20184_v59  ;;  %12338 = vmatpush1.bf16.msra.mxu1 %v20187_v54  ;;  %v1389_v59 = vrot.slane %v25668_v38, %v25847_v53  ;;  %v20270_v54 = vld [vmem:[%s27990_s5 + $0xb44] ss:$48 sps:$4 sm:$0xff]   ;;  %v20271_v38 = vld [vmem:[%s27990_s5 + $0xb48] ss:$48 sps:$4 sm:$0xff]  }
 0x600   :  { %12287 = vmatprep.mubr.bf16.mxu0 %v25702_v0  ;;  %12369 = vmatprep.mubr.bf16.mxu1 %v25702_v0 }
 0x601   :  { %12257 = vmatprep.subr.bf16.mxu0 %v20192_v62  ;;  %12339 = vmatprep.subr.bf16.mxu1 %v20195_v63  ;;  %v20273_v62 = vld [vmem:[%s27990_s5 + $0xb4c] ss:$48 sps:$4 sm:$0xff]   ;;  %v20268_v63 = vld [vmem:[%s27990_s5 + $0xb40] ss:$48 sps:$4 sm:$0xff]  }
 0x603   :  { %12258 = vmatpush1.bf16.msra.mxu0 %v20190_v57  ;;  %12340 = vmatpush1.bf16.msra.mxu1 %v20193_v1  ;;  %v17839_v57 = vadd.f32 %v25682_v33, %v1389_v59  ;;  %v20276_v1 = vld [vmem:[%s27990_s5 + $0xba4] ss:$48 sps:$4 sm:$0xff]   ;;  %v20277_v33 = vld [vmem:[%s27990_s5 + $0xba8] ss:$48 sps:$4 sm:$0xff]  }
 0x604   :  { %12259 = vmatprep.subr.bf16.mxu0 %v20198_v2  ;;  %12341 = vmatprep.subr.bf16.mxu1 %v20201_v3  ;;  %v20279_v2 = vld [vmem:[%s27990_s5 + $0xbac] ss:$48 sps:$4 sm:$0xff]   ;;  %v20274_v3 = vld [vmem:[%s27990_s5 + $0xba0] ss:$48 sps:$4 sm:$0xff]   ;;  %v20348_v59 = vld [vmem:[%s27990_s5 + $0x434] ss:$48 sps:$4 sm:$0xff]  }
 0x607   :  { %12260 = vmatpush1.bf16.msra.mxu0 %v20196_v4  ;;  %12342 = vmatpush1.bf16.msra.mxu1 %v20199_v5  ;;  %v9826_v4 = vmax.f32 %v17839_v57, 0.0  ;;  %v20282_v5 = vld [vmem:[%s27990_s5 + $0x14] ss:$48 sps:$4 sm:$0xff]   ;;  %v20357_v57 = vld [vmem:[%s27990_s5 + $0x49c] ss:$48 sps:$4 sm:$0xff]  }
 0x608   :  { %12261 = vmatprep.subr.bf16.mxu0 %v20204_v60  ;;  %12343 = vmatprep.subr.bf16.mxu1 %v20207_v6  ;;  %v20285_v60 = vld [vmem:[%s27990_s5 + $0x1c] ss:$48 sps:$4 sm:$0xff]   ;;  %v20280_v6 = vld [vmem:[%s27990_s5 + $0x10] ss:$48 sps:$4 sm:$0xff]  }
 0x60b   :  { %12262 = vmatpush1.bf16.msra.mxu0 %v20202_v7  ;;  %12344 = vmatpush1.bf16.msra.mxu1 %v20205_v8  ;;  %v25897_v7 = vpack.c.bf16 %v9826_v4, %v9826_v4  ;;  %v20283_v8 = vld [vmem:[%s27990_s5 + $0x18] ss:$48 sps:$4 sm:$0xff]   ;;  %v20358_v4 = vld [vmem:[%s27990_s5 + $0x4f0] ss:$48 sps:$4 sm:$0xff]  }
 0x60c   :  { %12263 = vmatprep.subr.bf16.mxu0 %v20210_v9  ;;  %12345 = vmatprep.subr.bf16.mxu1 %v20213_v10  ;;  %v20288_v9 = vld [vmem:[%s27990_s5 + $0x74] ss:$48 sps:$4 sm:$0xff]   ;;  %v20291_v10 = vld [vmem:[%s27990_s5 + $0x7c] ss:$48 sps:$4 sm:$0xff]  }
 0x60f   :  { %12264 = vmatpush1.bf16.msra.mxu0 %v20208_v12  ;;  %12346 = vmatpush1.bf16.msra.mxu1 %v20211_v13  ;;  %v20286_v12 = vld [vmem:[%s27990_s5 + $0x70] ss:$48 sps:$4 sm:$0xff]   ;;  %v20289_v13 = vld [vmem:[%s27990_s5 + $0x78] ss:$48 sps:$4 sm:$0xff]  }
 0x610   :  { %12265 = vmatprep.subr.bf16.mxu0 %v20216_v32  ;;  %12347 = vmatprep.subr.bf16.mxu1 %v20219_v15  ;;  %v20294_v32 = vld [vmem:[%s27990_s5 + $0xd4] ss:$48 sps:$4 sm:$0xff]   ;;  %v20297_v15 = vld [vmem:[%s27990_s5 + $0xdc] ss:$48 sps:$4 sm:$0xff]  }
 0x613   :  { %12266 = vmatpush1.bf16.msra.mxu0 %v20214_v11  ;;  %12348 = vmatpush1.bf16.msra.mxu1 %v20217_v17  ;;  %v20292_v11 = vld [vmem:[%s27990_s5 + $0xd0] ss:$48 sps:$4 sm:$0xff]   ;;  %v20295_v17 = vld [vmem:[%s27990_s5 + $0xd8] ss:$48 sps:$4 sm:$0xff]  }
 0x614   :  { %12267 = vmatprep.subr.bf16.mxu0 %v20222_v14  ;;  %12349 = vmatprep.subr.bf16.mxu1 %v20225_v19  ;;  %v20300_v14 = vld [vmem:[%s27990_s5 + $0x134] ss:$48 sps:$4 sm:$0xff]   ;;  %v20303_v19 = vld [vmem:[%s27990_s5 + $0x13c] ss:$48 sps:$4 sm:$0xff]  }
 0x617   :  { %12268 = vmatpush1.bf16.msra.mxu0 %v20220_v20  ;;  %12350 = vmatpush1.bf16.msra.mxu1 %v20223_v16  ;;  %v20298_v20 = vld [vmem:[%s27990_s5 + $0x130] ss:$48 sps:$4 sm:$0xff]   ;;  %v20301_v16 = vld [vmem:[%s27990_s5 + $0x138] ss:$48 sps:$4 sm:$0xff]  }
 0x618   :  { %12269 = vmatprep.subr.bf16.mxu0 %v20228_v22  ;;  %12351 = vmatprep.subr.bf16.mxu1 %v20231_v23  ;;  %v20306_v22 = vld [vmem:[%s27990_s5 + $0x194] ss:$48 sps:$4 sm:$0xff]   ;;  %v20309_v23 = vld [vmem:[%s27990_s5 + $0x19c] ss:$48 sps:$4 sm:$0xff]  }
 0x61b   :  { %12270 = vmatpush1.bf16.msra.mxu0 %v20226_v18  ;;  %12352 = vmatpush1.bf16.msra.mxu1 %v20229_v25  ;;  %v20304_v18 = vld [vmem:[%s27990_s5 + $0x190] ss:$48 sps:$4 sm:$0xff]   ;;  %v20307_v25 = vld [vmem:[%s27990_s5 + $0x198] ss:$48 sps:$4 sm:$0xff]  }
 0x61c   :  { %12271 = vmatprep.subr.bf16.mxu0 %v20234_v26  ;;  %12353 = vmatprep.subr.bf16.mxu1 %v20237_v21  ;;  %v20312_v26 = vld [vmem:[%s27990_s5 + $0x1f4] ss:$48 sps:$4 sm:$0xff]   ;;  %v20315_v21 = vld [vmem:[%s27990_s5 + $0x1fc] ss:$48 sps:$4 sm:$0xff]  }
 0x61f   :  { %12272 = vmatpush1.bf16.msra.mxu0 %v20232_v28  ;;  %12354 = vmatpush1.bf16.msra.mxu1 %v20235_v29  ;;  %v20310_v28 = vld [vmem:[%s27990_s5 + $0x1f0] ss:$48 sps:$4 sm:$0xff]   ;;  %v20313_v29 = vld [vmem:[%s27990_s5 + $0x1f8] ss:$48 sps:$4 sm:$0xff]  }
 0x620   :  { %12273 = vmatprep.subr.bf16.mxu0 %v20240_v24  ;;  %12355 = vmatprep.subr.bf16.mxu1 %v20243_v31  ;;  %v20318_v24 = vld [vmem:[%s27990_s5 + $0x254] ss:$48 sps:$4 sm:$0xff]   ;;  %v20321_v31 = vld [vmem:[%s27990_s5 + $0x25c] ss:$48 sps:$4 sm:$0xff]  }
 0x623   :  { %12274 = vmatpush1.bf16.msra.mxu0 %v20238_v27  ;;  %12356 = vmatpush1.bf16.msra.mxu1 %v20241_v34  ;;  %v20316_v27 = vld [vmem:[%s27990_s5 + $0x250] ss:$48 sps:$4 sm:$0xff]   ;;  %v20319_v34 = vld [vmem:[%s27990_s5 + $0x258] ss:$48 sps:$4 sm:$0xff]  }
 0x624   :  { %12275 = vmatprep.subr.bf16.mxu0 %v20246_v35  ;;  %12357 = vmatprep.subr.bf16.mxu1 %v20249_v41  ;;  %v20324_v35 = vld [vmem:[%s27990_s5 + $0x2b4] ss:$48 sps:$4 sm:$0xff]   ;;  %v20327_v41 = vld [vmem:[%s27990_s5 + $0x2bc] ss:$48 sps:$4 sm:$0xff]  }
 0x627   :  { %12276 = vmatpush1.bf16.msra.mxu0 %v20244_v36  ;;  %12358 = vmatpush1.bf16.msra.mxu1 %v20247_v43  ;;  %v20322_v36 = vld [vmem:[%s27990_s5 + $0x2b0] ss:$48 sps:$4 sm:$0xff]   ;;  %v20325_v43 = vld [vmem:[%s27990_s5 + $0x2b8] ss:$48 sps:$4 sm:$0xff]  }
 0x628   :  { %12277 = vmatprep.subr.bf16.mxu0 %v20252_v44  ;;  %12359 = vmatprep.subr.bf16.mxu1 %v20255_v46  ;;  %v20330_v44 = vld [vmem:[%s27990_s5 + $0x314] ss:$48 sps:$4 sm:$0xff]   ;;  %v20333_v46 = vld [vmem:[%s27990_s5 + $0x31c] ss:$48 sps:$4 sm:$0xff]  }
 0x62b   :  { %12278 = vmatpush1.bf16.msra.mxu0 %v20250_v47  ;;  %12360 = vmatpush1.bf16.msra.mxu1 %v20253_v42  ;;  %v20328_v47 = vld [vmem:[%s27990_s5 + $0x310] ss:$48 sps:$4 sm:$0xff]   ;;  %v20331_v42 = vld [vmem:[%s27990_s5 + $0x318] ss:$48 sps:$4 sm:$0xff]  }
 0x62c   :  { %12279 = vmatprep.subr.bf16.mxu0 %v20258_v49  ;;  %12361 = vmatprep.subr.bf16.mxu1 %v20261_v50  ;;  %v20336_v49 = vld [vmem:[%s27990_s5 + $0x374] ss:$48 sps:$4 sm:$0xff]   ;;  %v20339_v50 = vld [vmem:[%s27990_s5 + $0x37c] ss:$48 sps:$4 sm:$0xff]  }
 0x62f   :  { %12280 = vmatpush1.bf16.msra.mxu0 %v20256_v45  ;;  %12362 = vmatpush1.bf16.msra.mxu1 %v20259_v52  ;;  %v20334_v45 = vld [vmem:[%s27990_s5 + $0x370] ss:$48 sps:$4 sm:$0xff]   ;;  %v20337_v52 = vld [vmem:[%s27990_s5 + $0x378] ss:$48 sps:$4 sm:$0xff]  }
 0x630   :  { %12281 = vmatprep.subr.bf16.mxu0 %v20264_v48  ;;  %12363 = vmatprep.subr.bf16.mxu1 %v20267_v55  ;;  %v20342_v48 = vld [vmem:[%s27990_s5 + $0x3d4] ss:$48 sps:$4 sm:$0xff]   ;;  %v20345_v55 = vld [vmem:[%s27990_s5 + $0x3dc] ss:$48 sps:$4 sm:$0xff]  }
 0x633   :  { %12282 = vmatpush1.bf16.msra.mxu0 %v20262_v56  ;;  %12364 = vmatpush1.bf16.msra.mxu1 %v20265_v51  ;;  %v20340_v56 = vld [vmem:[%s27990_s5 + $0x3d0] ss:$48 sps:$4 sm:$0xff]   ;;  %v20343_v51 = vld [vmem:[%s27990_s5 + $0x3d8] ss:$48 sps:$4 sm:$0xff]  }
 0x634   :  { %12283 = vmatprep.subr.bf16.mxu0 %v20270_v54  ;;  %12365 = vmatprep.subr.bf16.mxu1 %v20273_v62  ;;  %v20351_v54 = vld [vmem:[%s27990_s5 + $0x43c] ss:$48 sps:$4 sm:$0xff]   ;;  %v20346_v62 = vld [vmem:[%s27990_s5 + $0x430] ss:$48 sps:$4 sm:$0xff]  }
 0x637   :  { %12284 = vmatpush1.bf16.msra.mxu0 %v20268_v63  ;;  %12366 = vmatpush1.bf16.msra.mxu1 %v20271_v38  ;;  %v20349_v63 = vld [vmem:[%s27990_s5 + $0x438] ss:$48 sps:$4 sm:$0xff]   ;;  %v20354_v38 = vld [vmem:[%s27990_s5 + $0x494] ss:$48 sps:$4 sm:$0xff]  }
 0x638   :  { %12285 = vmatprep.subr.bf16.mxu0 %v20276_v1  ;;  %12367 = vmatprep.subr.bf16.mxu1 %v20279_v2  ;;  %v20352_v1 = vld [vmem:[%s27990_s5 + $0x490] ss:$48 sps:$4 sm:$0xff]   ;;  %v20355_v2 = vld [vmem:[%s27990_s5 + $0x498] ss:$48 sps:$4 sm:$0xff]  }
 0x63b   :  { %12286 = vmatpush1.bf16.msra.mxu0 %v20274_v3  ;;  %12368 = vmatpush1.bf16.msra.mxu1 %v20277_v33  ;;  %v20360_v3 = vld [vmem:[%s27990_s5 + $0x4f4] ss:$48 sps:$4 sm:$0xff]   ;;  %v20363_v33 = vld [vmem:[%s27990_s5 + $0x4fc] ss:$48 sps:$4 sm:$0xff]  }
 0x63c   :  { %12378 = vmatprep.subr.bf16.mxu0 %v20282_v5  ;;  %12460 = vmatprep.subr.bf16.mxu1 %v20285_v60  ;;  %v20361_v5 = vld [vmem:[%s27990_s5 + $0x4f8] ss:$48 sps:$4 sm:$0xff]   ;;  %v20366_v60 = vld [vmem:[%s27990_s5 + $0x554] ss:$48 sps:$4 sm:$0xff]  }
 0x63e   :  { %12288 = vmatmul.mubr.bf16.vlgmr.msra.gmra.mrb[4].mxu0 %v25897_v7  ;;  %12370 = vmatmul.mubr.bf16.vlgmr.msra.gmra.mrb[4].mxu1 %v25897_v7 }
 0x63f   :  { %12379 = vmatpush1.bf16.msra.mxu0 %v20280_v6  ;;  %12410 = vmatprep.mubr.bf16.mxu0 %v25684_v58  ;;  %v20369_v6 = vld [vmem:[%s27990_s5 + $0x55c] ss:$48 sps:$4 sm:$0xff]  }
 0x640   :  { %12461 = vmatpush1.bf16.msra.mxu1 %v20283_v8  ;;  %12492 = vmatprep.mubr.bf16.mxu1 %v25684_v58  ;;  %v20364_v8 = vld [vmem:[%s27990_s5 + $0x550] ss:$48 sps:$4 sm:$0xff]  }
 0x641   :  { %12380 = vmatprep.subr.bf16.mxu0 %v20288_v9  ;;  %12462 = vmatprep.subr.bf16.mxu1 %v20291_v10  ;;  %v20367_v9 = vld [vmem:[%s27990_s5 + $0x558] ss:$48 sps:$4 sm:$0xff]   ;;  %v20372_v10 = vld [vmem:[%s27990_s5 + $0x5b4] ss:$48 sps:$4 sm:$0xff]  }
 0x643   :  { %12381 = vmatpush1.bf16.msra.mxu0 %v20286_v12  ;;  %v20375_v12 = vld [vmem:[%s27990_s5 + $0x5bc] ss:$48 sps:$4 sm:$0xff]  }
 0x644   :  { %12463 = vmatpush1.bf16.msra.mxu1 %v20289_v13  ;;  %12382 = vmatprep.subr.bf16.mxu0 %v20294_v32  ;;  %v20370_v13 = vld [vmem:[%s27990_s5 + $0x5b0] ss:$48 sps:$4 sm:$0xff]   ;;  %v20373_v32 = vld [vmem:[%s27990_s5 + $0x5b8] ss:$48 sps:$4 sm:$0xff]  }
 0x645   :  { %12464 = vmatprep.subr.bf16.mxu1 %v20297_v15  ;;  %v20378_v15 = vld [vmem:[%s27990_s5 + $0x614] ss:$48 sps:$4 sm:$0xff]  }
 0x647   :  { %12383 = vmatpush1.bf16.msra.mxu0 %v20292_v11  ;;  %v20381_v11 = vld [vmem:[%s27990_s5 + $0x61c] ss:$48 sps:$4 sm:$0xff]  }
 0x648   :  { %12465 = vmatpush1.bf16.msra.mxu1 %v20295_v17  ;;  %12384 = vmatprep.subr.bf16.mxu0 %v20300_v14  ;;  %v9832_v17 = vld [vmem:[%s27992_s4] sm:$0xff] }
 0x649   :  { %12466 = vmatprep.subr.bf16.mxu1 %v20303_v19  ;;  %9835 = vperm.xlu0 %18078, %v9832_v17   ;;  %v20376_v14 = vld [vmem:[%s27990_s5 + $0x610] ss:$48 sps:$4 sm:$0xff]   ;;  %v20379_v19 = vld [vmem:[%s27990_s5 + $0x618] ss:$48 sps:$4 sm:$0xff]   ;;  %v20462_v17 = vld [vmem:[%s27990_s5 + $0xb54] ss:$48 sps:$4 sm:$0xff]  }
 0x64b   :  { %12385 = vmatpush1.bf16.msra.mxu0 %v20298_v20  ;;  %v20384_v20 = vld [vmem:[%s27990_s5 + $0x674] ss:$48 sps:$4 sm:$0xff]  }
 0x64c   :  { %12467 = vmatpush1.bf16.msra.mxu1 %v20301_v16  ;;  %12386 = vmatprep.subr.bf16.mxu0 %v20306_v22  ;;  %v20387_v16 = vld [vmem:[%s27990_s5 + $0x67c] ss:$48 sps:$4 sm:$0xff]   ;;  %v20382_v22 = vld [vmem:[%s27990_s5 + $0x670] ss:$48 sps:$4 sm:$0xff]  }
 0x64d   :  { %12468 = vmatprep.subr.bf16.mxu1 %v20309_v23  ;;  %v20385_v23 = vld [vmem:[%s27990_s5 + $0x678] ss:$48 sps:$4 sm:$0xff]  }
 0x64f   :  { %12387 = vmatpush1.bf16.msra.mxu0 %v20304_v18  ;;  %v20390_v18 = vld [vmem:[%s27990_s5 + $0x6d4] ss:$48 sps:$4 sm:$0xff]  }
 0x650   :  { %12469 = vmatpush1.bf16.msra.mxu1 %v20307_v25  ;;  %12388 = vmatprep.subr.bf16.mxu0 %v20312_v26  ;;  %v20393_v25 = vld [vmem:[%s27990_s5 + $0x6dc] ss:$48 sps:$4 sm:$0xff]   ;;  %v20388_v26 = vld [vmem:[%s27990_s5 + $0x6d0] ss:$48 sps:$4 sm:$0xff]  }
 0x651   :  { %12470 = vmatprep.subr.bf16.mxu1 %v20315_v21  ;;  %v20391_v21 = vld [vmem:[%s27990_s5 + $0x6d8] ss:$48 sps:$4 sm:$0xff]  }
 0x653   :  { %12389 = vmatpush1.bf16.msra.mxu0 %v20310_v28  ;;  %v20396_v28 = vld [vmem:[%s27990_s5 + $0x734] ss:$48 sps:$4 sm:$0xff]  }
 0x654   :  { %12471 = vmatpush1.bf16.msra.mxu1 %v20313_v29  ;;  %12390 = vmatprep.subr.bf16.mxu0 %v20318_v24  ;;  %v20399_v29 = vld [vmem:[%s27990_s5 + $0x73c] ss:$48 sps:$4 sm:$0xff]   ;;  %v20394_v24 = vld [vmem:[%s27990_s5 + $0x730] ss:$48 sps:$4 sm:$0xff]  }
 0x655   :  { %12472 = vmatprep.subr.bf16.mxu1 %v20321_v31  ;;  %v20397_v31 = vld [vmem:[%s27990_s5 + $0x738] ss:$48 sps:$4 sm:$0xff]  }
 0x657   :  { %12391 = vmatpush1.bf16.msra.mxu0 %v20316_v27  ;;  %v20402_v27 = vld [vmem:[%s27990_s5 + $0x794] ss:$48 sps:$4 sm:$0xff]  }
 0x658   :  { %12473 = vmatpush1.bf16.msra.mxu1 %v20319_v34  ;;  %12392 = vmatprep.subr.bf16.mxu0 %v20324_v35  ;;  %v20405_v34 = vld [vmem:[%s27990_s5 + $0x79c] ss:$48 sps:$4 sm:$0xff]   ;;  %v20400_v35 = vld [vmem:[%s27990_s5 + $0x790] ss:$48 sps:$4 sm:$0xff]  }
 0x659   :  { %12474 = vmatprep.subr.bf16.mxu1 %v20327_v41  ;;  %v20403_v41 = vld [vmem:[%s27990_s5 + $0x798] ss:$48 sps:$4 sm:$0xff]  }
 0x65b   :  { %12393 = vmatpush1.bf16.msra.mxu0 %v20322_v36  ;;  %v20408_v36 = vld [vmem:[%s27990_s5 + $0x7f4] ss:$48 sps:$4 sm:$0xff]  }
 0x65c   :  { %12475 = vmatpush1.bf16.msra.mxu1 %v20325_v43  ;;  %12394 = vmatprep.subr.bf16.mxu0 %v20330_v44  ;;  %v20411_v43 = vld [vmem:[%s27990_s5 + $0x7fc] ss:$48 sps:$4 sm:$0xff]   ;;  %v20406_v44 = vld [vmem:[%s27990_s5 + $0x7f0] ss:$48 sps:$4 sm:$0xff]  }
 0x65d   :  { %12476 = vmatprep.subr.bf16.mxu1 %v20333_v46  ;;  %v20409_v46 = vld [vmem:[%s27990_s5 + $0x7f8] ss:$48 sps:$4 sm:$0xff]  }
 0x65f   :  { %12395 = vmatpush1.bf16.msra.mxu0 %v20328_v47  ;;  %v20414_v47 = vld [vmem:[%s27990_s5 + $0x854] ss:$48 sps:$4 sm:$0xff]  }
 0x660   :  { %12477 = vmatpush1.bf16.msra.mxu1 %v20331_v42  ;;  %12396 = vmatprep.subr.bf16.mxu0 %v20336_v49  ;;  %v20417_v42 = vld [vmem:[%s27990_s5 + $0x85c] ss:$48 sps:$4 sm:$0xff]   ;;  %v20412_v49 = vld [vmem:[%s27990_s5 + $0x850] ss:$48 sps:$4 sm:$0xff]  }
 0x661   :  { %12478 = vmatprep.subr.bf16.mxu1 %v20339_v50  ;;  %v20415_v50 = vld [vmem:[%s27990_s5 + $0x858] ss:$48 sps:$4 sm:$0xff]  }
 0x663   :  { %12397 = vmatpush1.bf16.msra.mxu0 %v20334_v45  ;;  %v20420_v45 = vld [vmem:[%s27990_s5 + $0x8b4] ss:$48 sps:$4 sm:$0xff]  }
 0x664   :  { %12479 = vmatpush1.bf16.msra.mxu1 %v20337_v52  ;;  %12398 = vmatprep.subr.bf16.mxu0 %v20342_v48  ;;  %v20423_v52 = vld [vmem:[%s27990_s5 + $0x8bc] ss:$48 sps:$4 sm:$0xff]   ;;  %v20418_v48 = vld [vmem:[%s27990_s5 + $0x8b0] ss:$48 sps:$4 sm:$0xff]  }
 0x665   :  { %12480 = vmatprep.subr.bf16.mxu1 %v20345_v55  ;;  %v20421_v55 = vld [vmem:[%s27990_s5 + $0x8b8] ss:$48 sps:$4 sm:$0xff]  }
 0x667   :  { %12399 = vmatpush1.bf16.msra.mxu0 %v20340_v56  ;;  %v20426_v56 = vld [vmem:[%s27990_s5 + $0x914] ss:$48 sps:$4 sm:$0xff]  }
 0x668   :  { %12481 = vmatpush1.bf16.msra.mxu1 %v20343_v51  ;;  %12400 = vmatprep.subr.bf16.mxu0 %v20348_v59  ;;  %v20429_v51 = vld [vmem:[%s27990_s5 + $0x91c] ss:$48 sps:$4 sm:$0xff]   ;;  %v20424_v59 = vld [vmem:[%s27990_s5 + $0x910] ss:$48 sps:$4 sm:$0xff]  }
 0x669   :  { %12482 = vmatprep.subr.bf16.mxu1 %v20351_v54  ;;  %v20427_v54 = vld [vmem:[%s27990_s5 + $0x918] ss:$48 sps:$4 sm:$0xff]  }
 0x66b   :  { %12401 = vmatpush1.bf16.msra.mxu0 %v20346_v62  ;;  %v20432_v62 = vld [vmem:[%s27990_s5 + $0x974] ss:$48 sps:$4 sm:$0xff]  }
 0x66c   :  { %12483 = vmatpush1.bf16.msra.mxu1 %v20349_v63  ;;  %12402 = vmatprep.subr.bf16.mxu0 %v20354_v38  ;;  %v20435_v63 = vld [vmem:[%s27990_s5 + $0x97c] ss:$48 sps:$4 sm:$0xff]   ;;  %v20430_v38 = vld [vmem:[%s27990_s5 + $0x970] ss:$48 sps:$4 sm:$0xff]  }
 0x66d   :  { %12484 = vmatprep.subr.bf16.mxu1 %v20357_v57  ;;  %v20433_v57 = vld [vmem:[%s27990_s5 + $0x978] ss:$48 sps:$4 sm:$0xff]  }
 0x66f   :  { %12403 = vmatpush1.bf16.msra.mxu0 %v20352_v1  ;;  %v20438_v1 = vld [vmem:[%s27990_s5 + $0x9d4] ss:$48 sps:$4 sm:$0xff]  }
 0x670   :  { %12485 = vmatpush1.bf16.msra.mxu1 %v20355_v2  ;;  %12404 = vmatprep.subr.bf16.mxu0 %v20360_v3  ;;  %v20441_v2 = vld [vmem:[%s27990_s5 + $0x9dc] ss:$48 sps:$4 sm:$0xff]   ;;  %v20436_v3 = vld [vmem:[%s27990_s5 + $0x9d0] ss:$48 sps:$4 sm:$0xff]  }
 0x671   :  { %12486 = vmatprep.subr.bf16.mxu1 %v20363_v33  ;;  %v20439_v33 = vld [vmem:[%s27990_s5 + $0x9d8] ss:$48 sps:$4 sm:$0xff]  }
 0x673   :  { %12405 = vmatpush1.bf16.msra.mxu0 %v20358_v4  ;;  %v20444_v4 = vld [vmem:[%s27990_s5 + $0xa34] ss:$48 sps:$4 sm:$0xff]  }
 0x674   :  { %12487 = vmatpush1.bf16.msra.mxu1 %v20361_v5  ;;  %12406 = vmatprep.subr.bf16.mxu0 %v20366_v60  ;;  %v20447_v5 = vld [vmem:[%s27990_s5 + $0xa3c] ss:$48 sps:$4 sm:$0xff]   ;;  %v20442_v60 = vld [vmem:[%s27990_s5 + $0xa30] ss:$48 sps:$4 sm:$0xff]  }
 0x675   :  { %12488 = vmatprep.subr.bf16.mxu1 %v20369_v6  ;;  %v20445_v6 = vld [vmem:[%s27990_s5 + $0xa38] ss:$48 sps:$4 sm:$0xff]  }
 0x677   :  { %12407 = vmatpush1.bf16.msra.mxu0 %v20364_v8  ;;  %v20450_v8 = vld [vmem:[%s27990_s5 + $0xa94] ss:$48 sps:$4 sm:$0xff]  }
 0x678   :  { %12489 = vmatpush1.bf16.msra.mxu1 %v20367_v9  ;;  %12408 = vmatprep.subr.bf16.mxu0 %v20372_v10  ;;  %v20453_v9 = vld [vmem:[%s27990_s5 + $0xa9c] ss:$48 sps:$4 sm:$0xff]   ;;  %v20448_v10 = vld [vmem:[%s27990_s5 + $0xa90] ss:$48 sps:$4 sm:$0xff]  }
 0x679   :  { %12490 = vmatprep.subr.bf16.mxu1 %v20375_v12  ;;  %v20451_v12 = vld [vmem:[%s27990_s5 + $0xa98] ss:$48 sps:$4 sm:$0xff]  }
 0x67b   :  { %12409 = vmatpush1.bf16.msra.mxu0 %v20370_v13  ;;  %v20456_v13 = vld [vmem:[%s27990_s5 + $0xaf4] ss:$48 sps:$4 sm:$0xff]  }
 0x67c   :  { %12491 = vmatpush1.bf16.msra.mxu1 %v20373_v32  ;;  %12419 = vmatprep.subr.bf16.mxu0 %v20378_v15  ;;  %v20459_v32 = vld [vmem:[%s27990_s5 + $0xafc] ss:$48 sps:$4 sm:$0xff]   ;;  %v20454_v15 = vld [vmem:[%s27990_s5 + $0xaf0] ss:$48 sps:$4 sm:$0xff]  }
 0x67d   :  { %12501 = vmatprep.subr.bf16.mxu1 %v20381_v11  ;;  %v20457_v11 = vld [vmem:[%s27990_s5 + $0xaf8] ss:$48 sps:$4 sm:$0xff]  }
 0x67e   :  { %12411 = vmatmul.mubr.bf16.vlgmr.msra.gmra.mrb[8].mxu0 %v25692_v61 }
 0x67f   :  { %12493 = vmatmul.mubr.bf16.vlgmr.msra.gmra.mrb[8].mxu1 %v25692_v61  ;;  %12420 = vmatpush1.bf16.msra.mxu0 %v20376_v14  ;;  %v20465_v14 = vld [vmem:[%s27990_s5 + $0xb5c] ss:$48 sps:$4 sm:$0xff]  }
 0x680   :  { %12451 = vmatprep.mubr.bf16.mxu0 %v25702_v0  ;;  %12502 = vmatpush1.bf16.msra.mxu1 %v20379_v19  ;;  %v20460_v19 = vld [vmem:[%s27990_s5 + $0xb50] ss:$48 sps:$4 sm:$0xff]  }
 0x681   :  { %12533 = vmatprep.mubr.bf16.mxu1 %v25702_v0  ;;  %12421 = vmatprep.subr.bf16.mxu0 %v20384_v20  ;;  %v20463_v20 = vld [vmem:[%s27990_s5 + $0xb58] ss:$48 sps:$4 sm:$0xff]  }
 0x682   :  { %12503 = vmatprep.subr.bf16.mxu1 %v20387_v16  ;;  %v20468_v16 = vld [vmem:[%s27990_s5 + $0xbb4] ss:$48 sps:$4 sm:$0xff]  }
 0x683   :  { %12422 = vmatpush1.bf16.msra.mxu0 %v20382_v22  ;;  %v20471_v22 = vld [vmem:[%s27990_s5 + $0xbbc] ss:$48 sps:$4 sm:$0xff]  }
 0x684   :  { %12504 = vmatpush1.bf16.msra.mxu1 %v20385_v23  ;;  %12423 = vmatprep.subr.bf16.mxu0 %v20390_v18  ;;  %v20466_v23 = vld [vmem:[%s27990_s5 + $0xbb0] ss:$48 sps:$4 sm:$0xff]   ;;  %v20469_v18 = vld [vmem:[%s27990_s5 + $0xbb8] ss:$48 sps:$4 sm:$0xff]  }
 0x685   :  { %12505 = vmatprep.subr.bf16.mxu1 %v20393_v25  ;;  %v20474_v25 = vld [vmem:[%s27990_s5 + $0x24] ss:$48 sps:$4 sm:$0xff]  }
 0x687   :  { %12424 = vmatpush1.bf16.msra.mxu0 %v20388_v26  ;;  %v20477_v26 = vld [vmem:[%s27990_s5 + $0x624] ss:$48 sps:$4 sm:$0xff]  }
 0x688   :  { %12506 = vmatpush1.bf16.msra.mxu1 %v20391_v21  ;;  %12425 = vmatprep.subr.bf16.mxu0 %v20396_v28  ;;  %v20472_v21 = vld [vmem:[%s27990_s5 + $0x20] ss:$48 sps:$4 sm:$0xff]  }
 0x689   :  { %12507 = vmatprep.subr.bf16.mxu1 %v20399_v29  ;;  %v20475_v28 = vld [vmem:[%s27990_s5 + $0x620] ss:$48 sps:$4 sm:$0xff]   ;;  %v20480_v29 = vld [vmem:[%s27990_s5 + $0x84] ss:$48 sps:$4 sm:$0xff]  }
 0x68b   :  { %12426 = vmatpush1.bf16.msra.mxu0 %v20394_v24  ;;  %v20483_v24 = vld [vmem:[%s27990_s5 + $0x684] ss:$48 sps:$4 sm:$0xff]  }
 0x68c   :  { %12508 = vmatpush1.bf16.msra.mxu1 %v20397_v31  ;;  %12427 = vmatprep.subr.bf16.mxu0 %v20402_v27  ;;  %v20478_v31 = vld [vmem:[%s27990_s5 + $0x80] ss:$48 sps:$4 sm:$0xff]  }
 0x68d   :  { %12509 = vmatprep.subr.bf16.mxu1 %v20405_v34  ;;  %v20481_v27 = vld [vmem:[%s27990_s5 + $0x680] ss:$48 sps:$4 sm:$0xff]   ;;  %v20486_v34 = vld [vmem:[%s27990_s5 + $0xe4] ss:$48 sps:$4 sm:$0xff]  }
 0x68f   :  { %12428 = vmatpush1.bf16.msra.mxu0 %v20400_v35  ;;  %v20489_v35 = vld [vmem:[%s27990_s5 + $0x6e4] ss:$48 sps:$4 sm:$0xff]  }
 0x690   :  { %12510 = vmatpush1.bf16.msra.mxu1 %v20403_v41  ;;  %12429 = vmatprep.subr.bf16.mxu0 %v20408_v36  ;;  %v20484_v41 = vld [vmem:[%s27990_s5 + $0xe0] ss:$48 sps:$4 sm:$0xff]  }
 0x691   :  { %12511 = vmatprep.subr.bf16.mxu1 %v20411_v43  ;;  %v20487_v36 = vld [vmem:[%s27990_s5 + $0x6e0] ss:$48 sps:$4 sm:$0xff]   ;;  %v20492_v43 = vld [vmem:[%s27990_s5 + $0x144] ss:$48 sps:$4 sm:$0xff]  }
 0x693   :  { %12430 = vmatpush1.bf16.msra.mxu0 %v20406_v44  ;;  %v20490_v44 = vld [vmem:[%s27990_s5 + $0x140] ss:$48 sps:$4 sm:$0xff]  }
 0x694   :  { %12512 = vmatpush1.bf16.msra.mxu1 %v20409_v46  ;;  %12431 = vmatprep.subr.bf16.mxu0 %v20414_v47  ;;  %v20495_v46 = vld [vmem:[%s27990_s5 + $0x744] ss:$48 sps:$4 sm:$0xff]   ;;  %v20493_v47 = vld [vmem:[%s27990_s5 + $0x740] ss:$48 sps:$4 sm:$0xff]  }
 0x695   :  { %12513 = vmatprep.subr.bf16.mxu1 %v20417_v42  ;;  %v20498_v42 = vld [vmem:[%s27990_s5 + $0x1a4] ss:$48 sps:$4 sm:$0xff]  }
 0x697   :  { %12432 = vmatpush1.bf16.msra.mxu0 %v20412_v49  ;;  %v20496_v49 = vld [vmem:[%s27990_s5 + $0x1a0] ss:$48 sps:$4 sm:$0xff]  }
 0x698   :  { %12514 = vmatpush1.bf16.msra.mxu1 %v20415_v50  ;;  %12433 = vmatprep.subr.bf16.mxu0 %v20420_v45  ;;  %v20501_v50 = vld [vmem:[%s27990_s5 + $0x7a4] ss:$48 sps:$4 sm:$0xff]   ;;  %v20499_v45 = vld [vmem:[%s27990_s5 + $0x7a0] ss:$48 sps:$4 sm:$0xff]  }
 0x699   :  { %12515 = vmatprep.subr.bf16.mxu1 %v20423_v52  ;;  %v20504_v52 = vld [vmem:[%s27990_s5 + $0x204] ss:$48 sps:$4 sm:$0xff]  }
 0x69b   :  { %12434 = vmatpush1.bf16.msra.mxu0 %v20418_v48  ;;  %v20502_v48 = vld [vmem:[%s27990_s5 + $0x200] ss:$48 sps:$4 sm:$0xff]  }
 0x69c   :  { %12516 = vmatpush1.bf16.msra.mxu1 %v20421_v55  ;;  %12435 = vmatprep.subr.bf16.mxu0 %v20426_v56  ;;  %v20507_v55 = vld [vmem:[%s27990_s5 + $0x804] ss:$48 sps:$4 sm:$0xff]   ;;  %v20505_v56 = vld [vmem:[%s27990_s5 + $0x800] ss:$48 sps:$4 sm:$0xff]  }
 0x69d   :  { %12517 = vmatprep.subr.bf16.mxu1 %v20429_v51  ;;  %v20510_v51 = vld [vmem:[%s27990_s5 + $0x264] ss:$48 sps:$4 sm:$0xff]  }
 0x69f   :  { %12436 = vmatpush1.bf16.msra.mxu0 %v20424_v59  ;;  %v20508_v59 = vld [vmem:[%s27990_s5 + $0x260] ss:$48 sps:$4 sm:$0xff]  }
 0x6a0   :  { %12518 = vmatpush1.bf16.msra.mxu1 %v20427_v54  ;;  %12437 = vmatprep.subr.bf16.mxu0 %v20432_v62  ;;  %v20513_v54 = vld [vmem:[%s27990_s5 + $0x864] ss:$48 sps:$4 sm:$0xff]   ;;  %v20511_v62 = vld [vmem:[%s27990_s5 + $0x860] ss:$48 sps:$4 sm:$0xff]  }
 0x6a1   :  { %12519 = vmatprep.subr.bf16.mxu1 %v20435_v63  ;;  %v20516_v63 = vld [vmem:[%s27990_s5 + $0x2c4] ss:$48 sps:$4 sm:$0xff]  }
 0x6a3   :  { %12438 = vmatpush1.bf16.msra.mxu0 %v20430_v38  ;;  %v20514_v38 = vld [vmem:[%s27990_s5 + $0x2c0] ss:$48 sps:$4 sm:$0xff]  }
 0x6a4   :  { %12520 = vmatpush1.bf16.msra.mxu1 %v20433_v57  ;;  %12439 = vmatprep.subr.bf16.mxu0 %v20438_v1  ;;  %v20519_v57 = vld [vmem:[%s27990_s5 + $0x8c4] ss:$48 sps:$4 sm:$0xff]   ;;  %v20517_v1 = vld [vmem:[%s27990_s5 + $0x8c0] ss:$48 sps:$4 sm:$0xff]  }
 0x6a5   :  { %12521 = vmatprep.subr.bf16.mxu1 %v20441_v2  ;;  %v20522_v2 = vld [vmem:[%s27990_s5 + $0x324] ss:$48 sps:$4 sm:$0xff]  }
 0x6a7   :  { %12440 = vmatpush1.bf16.msra.mxu0 %v20436_v3  ;;  %v20520_v3 = vld [vmem:[%s27990_s5 + $0x320] ss:$48 sps:$4 sm:$0xff]  }
 0x6a8   :  { %12522 = vmatpush1.bf16.msra.mxu1 %v20439_v33  ;;  %12441 = vmatprep.subr.bf16.mxu0 %v20444_v4  ;;  %v20525_v33 = vld [vmem:[%s27990_s5 + $0x924] ss:$48 sps:$4 sm:$0xff]   ;;  %v20523_v4 = vld [vmem:[%s27990_s5 + $0x920] ss:$48 sps:$4 sm:$0xff]  }
 0x6a9   :  { %12523 = vmatprep.subr.bf16.mxu1 %v20447_v5  ;;  %v20528_v5 = vld [vmem:[%s27990_s5 + $0x384] ss:$48 sps:$4 sm:$0xff]  }
 0x6ab   :  { %12442 = vmatpush1.bf16.msra.mxu0 %v20442_v60  ;;  %v20526_v60 = vld [vmem:[%s27990_s5 + $0x380] ss:$48 sps:$4 sm:$0xff]  }
 0x6ac   :  { %12524 = vmatpush1.bf16.msra.mxu1 %v20445_v6  ;;  %12443 = vmatprep.subr.bf16.mxu0 %v20450_v8  ;;  %v20531_v6 = vld [vmem:[%s27990_s5 + $0x984] ss:$48 sps:$4 sm:$0xff]   ;;  %v20529_v8 = vld [vmem:[%s27990_s5 + $0x980] ss:$48 sps:$4 sm:$0xff]  }
 0x6ad   :  { %12525 = vmatprep.subr.bf16.mxu1 %v20453_v9  ;;  %v20534_v9 = vld [vmem:[%s27990_s5 + $0x3e4] ss:$48 sps:$4 sm:$0xff]  }
 0x6af   :  { %12444 = vmatpush1.bf16.msra.mxu0 %v20448_v10  ;;  %v20532_v10 = vld [vmem:[%s27990_s5 + $0x3e0] ss:$48 sps:$4 sm:$0xff]  }
 0x6b0   :  { %12526 = vmatpush1.bf16.msra.mxu1 %v20451_v12  ;;  %12445 = vmatprep.subr.bf16.mxu0 %v20456_v13  ;;  %v20537_v12 = vld [vmem:[%s27990_s5 + $0x9e4] ss:$48 sps:$4 sm:$0xff]   ;;  %v20535_v13 = vld [vmem:[%s27990_s5 + $0x9e0] ss:$48 sps:$4 sm:$0xff]  }
 0x6b1   :  { %12527 = vmatprep.subr.bf16.mxu1 %v20459_v32  ;;  %v20540_v32 = vld [vmem:[%s27990_s5 + $0x444] ss:$48 sps:$4 sm:$0xff]  }
 0x6b3   :  { %12446 = vmatpush1.bf16.msra.mxu0 %v20454_v15  ;;  %v20538_v15 = vld [vmem:[%s27990_s5 + $0x440] ss:$48 sps:$4 sm:$0xff]  }
 0x6b4   :  { %12528 = vmatpush1.bf16.msra.mxu1 %v20457_v11  ;;  %12447 = vmatprep.subr.bf16.mxu0 %v20462_v17  ;;  %v20543_v11 = vld [vmem:[%s27990_s5 + $0xa44] ss:$48 sps:$4 sm:$0xff]   ;;  %v20541_v17 = vld [vmem:[%s27990_s5 + $0xa40] ss:$48 sps:$4 sm:$0xff]  }
 0x6b5   :  { %12529 = vmatprep.subr.bf16.mxu1 %v20465_v14  ;;  %v20546_v14 = vld [vmem:[%s27990_s5 + $0x4a4] ss:$48 sps:$4 sm:$0xff]  }
 0x6b7   :  { %12448 = vmatpush1.bf16.msra.mxu0 %v20460_v19  ;;  %v20544_v19 = vld [vmem:[%s27990_s5 + $0x4a0] ss:$48 sps:$4 sm:$0xff]  }
 0x6b8   :  { %12530 = vmatpush1.bf16.msra.mxu1 %v20463_v20  ;;  %12449 = vmatprep.subr.bf16.mxu0 %v20468_v16  ;;  %v20549_v20 = vld [vmem:[%s27990_s5 + $0xaa4] ss:$48 sps:$4 sm:$0xff]   ;;  %v20547_v16 = vld [vmem:[%s27990_s5 + $0xaa0] ss:$48 sps:$4 sm:$0xff]  }
 0x6b9   :  { %12531 = vmatprep.subr.bf16.mxu1 %v20471_v22  ;;  %v20552_v22 = vld [vmem:[%s27990_s5 + $0x504] ss:$48 sps:$4 sm:$0xff]  }
 0x6bb   :  { %12450 = vmatpush1.bf16.msra.mxu0 %v20466_v23  ;;  %v20550_v23 = vld [vmem:[%s27990_s5 + $0x500] ss:$48 sps:$4 sm:$0xff]  }
 0x6bc   :  { %12532 = vmatpush1.bf16.msra.mxu1 %v20469_v18  ;;  %12542 = vmatprep.subr.bf16.mxu0 %v20474_v25  ;;  %v20555_v18 = vld [vmem:[%s27990_s5 + $0xb04] ss:$48 sps:$4 sm:$0xff]   ;;  %v20553_v25 = vld [vmem:[%s27990_s5 + $0xb00] ss:$48 sps:$4 sm:$0xff]  }
 0x6bd   :  { %12583 = vmatprep.subr.bf16.mxu1 %v20477_v26  ;;  %v20558_v26 = vld [vmem:[%s27990_s5 + $0x564] ss:$48 sps:$4 sm:$0xff]  }
 0x6be   :  { %12452 = vmatmul.mubr.bf16.vlgmr.msra.gmra.mrb[8].mxu0 %v25897_v7 }
 0x6bf   :  { %12534 = vmatmul.mubr.bf16.vlgmr.msra.gmra.mrb[8].mxu1 %v25897_v7  ;;  %12543 = vmatpush1.bf16.msra.mxu0 %v20472_v21  ;;  %v20556_v21 = vld [vmem:[%s27990_s5 + $0x560] ss:$48 sps:$4 sm:$0xff]  }
 0x6c0   :  { %12574 = vmatprep.mubr.bf16.mxu0 %v25684_v58  ;;  %12584 = vmatpush1.bf16.msra.mxu1 %v20475_v28  ;;  %v20561_v28 = vld [vmem:[%s27990_s5 + $0xb64] ss:$48 sps:$4 sm:$0xff]  }
 0x6c1   :  { %12615 = vmatprep.mubr.bf16.mxu1 %v25702_v0  ;;  %12544 = vmatprep.subr.bf16.mxu0 %v20480_v29  ;;  %v20559_v29 = vld [vmem:[%s27990_s5 + $0xb60] ss:$48 sps:$4 sm:$0xff]  }
 0x6c2   :  { %12585 = vmatprep.subr.bf16.mxu1 %v20483_v24  ;;  %v20564_v24 = vld [vmem:[%s27990_s5 + $0x5c4] ss:$48 sps:$4 sm:$0xff]  }
 0x6c3   :  { %12545 = vmatpush1.bf16.msra.mxu0 %v20478_v31  ;;  %v20562_v31 = vld [vmem:[%s27990_s5 + $0x5c0] ss:$48 sps:$4 sm:$0xff]  }
 0x6c4   :  { %12586 = vmatpush1.bf16.msra.mxu1 %v20481_v27  ;;  %12546 = vmatprep.subr.bf16.mxu0 %v20486_v34  ;;  %v20567_v27 = vld [vmem:[%s27990_s5 + $0xbc4] ss:$48 sps:$4 sm:$0xff]   ;;  %v20565_v34 = vld [vmem:[%s27990_s5 + $0xbc0] ss:$48 sps:$4 sm:$0xff]  }
 0x6c5   :  { %12587 = vmatprep.subr.bf16.mxu1 %v20489_v35  ;;  %v20570_v35 = vld [vmem:[%s27990_s5 + $0x2c] ss:$48 sps:$4 sm:$0xff]  }
 0x6c7   :  { %12547 = vmatpush1.bf16.msra.mxu0 %v20484_v41  ;;  %v20573_v41 = vld [vmem:[%s27990_s5 + $0x62c] ss:$48 sps:$4 sm:$0xff]  }
 0x6c8   :  { %12588 = vmatpush1.bf16.msra.mxu1 %v20487_v36  ;;  %12548 = vmatprep.subr.bf16.mxu0 %v20492_v43  ;;  %v20568_v36 = vld [vmem:[%s27990_s5 + $0x28] ss:$48 sps:$4 sm:$0xff]  }
 0x6c9   :  { %12589 = vmatprep.subr.bf16.mxu1 %v20495_v46  ;;  %v20571_v43 = vld [vmem:[%s27990_s5 + $0x628] ss:$48 sps:$4 sm:$0xff]  }
 0x6ca   :  { %v20574_v46 = vld [vmem:[%s27990_s5 + $0x88] ss:$48 sps:$4 sm:$0xff]  }
 0x6cb   :  { %12549 = vmatpush1.bf16.msra.mxu0 %v20490_v44  ;;  %v20576_v44 = vld [vmem:[%s27990_s5 + $0x8c] ss:$48 sps:$4 sm:$0xff]  }
 0x6cc   :  { %12590 = vmatpush1.bf16.msra.mxu1 %v20493_v47  ;;  %12550 = vmatprep.subr.bf16.mxu0 %v20498_v42  ;;  %v20577_v47 = vld [vmem:[%s27990_s5 + $0x688] ss:$48 sps:$4 sm:$0xff]   ;;  %v20579_v42 = vld [vmem:[%s27990_s5 + $0x68c] ss:$48 sps:$4 sm:$0xff]  }
 0x6cd   :  { %12591 = vmatprep.subr.bf16.mxu1 %v20501_v50  ;;  %v20585_v50 = vld [vmem:[%s27990_s5 + $0x6ec] ss:$48 sps:$4 sm:$0xff]  }
 0x6cf   :  { %12551 = vmatpush1.bf16.msra.mxu0 %v20496_v49  ;;  %v20582_v49 = vld [vmem:[%s27990_s5 + $0xec] ss:$48 sps:$4 sm:$0xff]  }
 0x6d0   :  { %12592 = vmatpush1.bf16.msra.mxu1 %v20499_v45  ;;  %12552 = vmatprep.subr.bf16.mxu0 %v20504_v52  ;;  %v20580_v45 = vld [vmem:[%s27990_s5 + $0xe8] ss:$48 sps:$4 sm:$0xff]  }
 0x6d1   :  { %12593 = vmatprep.subr.bf16.mxu1 %v20507_v55  ;;  %v20586_v52 = vld [vmem:[%s27990_s5 + $0x148] ss:$48 sps:$4 sm:$0xff]  }
 0x6d2   :  { %v20589_v55 = vld [vmem:[%s27990_s5 + $0x748] ss:$48 sps:$4 sm:$0xff]  }
 0x6d3   :  { %12553 = vmatpush1.bf16.msra.mxu0 %v20502_v48  ;;  %v20591_v48 = vld [vmem:[%s27990_s5 + $0x74c] ss:$48 sps:$4 sm:$0xff]  }
 0x6d4   :  { %12594 = vmatpush1.bf16.msra.mxu1 %v20505_v56  ;;  %12554 = vmatprep.subr.bf16.mxu0 %v20510_v51  ;;  %v20594_v56 = vld [vmem:[%s27990_s5 + $0x1ac] ss:$48 sps:$4 sm:$0xff]   ;;  %v20592_v51 = vld [vmem:[%s27990_s5 + $0x1a8] ss:$48 sps:$4 sm:$0xff]  }
 0x6d5   :  { %12595 = vmatprep.subr.bf16.mxu1 %v20513_v54  ;;  %v20595_v54 = vld [vmem:[%s27990_s5 + $0x7a8] ss:$48 sps:$4 sm:$0xff]  }
 0x6d7   :  { %12555 = vmatpush1.bf16.msra.mxu0 %v20508_v59  ;;  %v20597_v59 = vld [vmem:[%s27990_s5 + $0x7ac] ss:$48 sps:$4 sm:$0xff]  }
 0x6d8   :  { %12596 = vmatpush1.bf16.msra.mxu1 %v20511_v62  ;;  %12556 = vmatprep.subr.bf16.mxu0 %v20516_v63  ;;  %v20600_v62 = vld [vmem:[%s27990_s5 + $0x20c] ss:$48 sps:$4 sm:$0xff]   ;;  %v20598_v63 = vld [vmem:[%s27990_s5 + $0x208] ss:$48 sps:$4 sm:$0xff]  }
 0x6d9   :  { %12597 = vmatprep.subr.bf16.mxu1 %v20519_v57  ;;  %v20601_v57 = vld [vmem:[%s27990_s5 + $0x808] ss:$48 sps:$4 sm:$0xff]  }
 0x6db   :  { %12557 = vmatpush1.bf16.msra.mxu0 %v20514_v38  ;;  %v20603_v38 = vld [vmem:[%s27990_s5 + $0x80c] ss:$48 sps:$4 sm:$0xff]  }
 0x6dc   :  { %12598 = vmatpush1.bf16.msra.mxu1 %v20517_v1  ;;  %12558 = vmatprep.subr.bf16.mxu0 %v20522_v2  ;;  %v20606_v1 = vld [vmem:[%s27990_s5 + $0x26c] ss:$48 sps:$4 sm:$0xff]   ;;  %v20604_v2 = vld [vmem:[%s27990_s5 + $0x268] ss:$48 sps:$4 sm:$0xff]  }
 0x6dd   :  { %12599 = vmatprep.subr.bf16.mxu1 %v20525_v33  ;;  %v20607_v33 = vld [vmem:[%s27990_s5 + $0x868] ss:$48 sps:$4 sm:$0xff]  }
 0x6df   :  { %12559 = vmatpush1.bf16.msra.mxu0 %v20520_v3  ;;  %v20609_v3 = vld [vmem:[%s27990_s5 + $0x86c] ss:$48 sps:$4 sm:$0xff]  }
 0x6e0   :  { %12600 = vmatpush1.bf16.msra.mxu1 %v20523_v4  ;;  %12560 = vmatprep.subr.bf16.mxu0 %v20528_v5  ;;  %v20612_v4 = vld [vmem:[%s27990_s5 + $0x2cc] ss:$48 sps:$4 sm:$0xff]   ;;  %v20610_v5 = vld [vmem:[%s27990_s5 + $0x2c8] ss:$48 sps:$4 sm:$0xff]  }
 0x6e1   :  { %12601 = vmatprep.subr.bf16.mxu1 %v20531_v6  ;;  %v20613_v6 = vld [vmem:[%s27990_s5 + $0x8c8] ss:$48 sps:$4 sm:$0xff]  }
 0x6e3   :  { %12561 = vmatpush1.bf16.msra.mxu0 %v20526_v60  ;;  %v20615_v60 = vld [vmem:[%s27990_s5 + $0x8cc] ss:$48 sps:$4 sm:$0xff]  }
 0x6e4   :  { %12602 = vmatpush1.bf16.msra.mxu1 %v20529_v8  ;;  %12562 = vmatprep.subr.bf16.mxu0 %v20534_v9  ;;  %v20618_v8 = vld [vmem:[%s27990_s5 + $0x32c] ss:$48 sps:$4 sm:$0xff]   ;;  %v20616_v9 = vld [vmem:[%s27990_s5 + $0x328] ss:$48 sps:$4 sm:$0xff]  }
 0x6e5   :  { %12603 = vmatprep.subr.bf16.mxu1 %v20537_v12  ;;  %v20619_v12 = vld [vmem:[%s27990_s5 + $0x928] ss:$48 sps:$4 sm:$0xff]  }
 0x6e7   :  { %12563 = vmatpush1.bf16.msra.mxu0 %v20532_v10  ;;  %v20621_v10 = vld [vmem:[%s27990_s5 + $0x92c] ss:$48 sps:$4 sm:$0xff]  }
 0x6e8   :  { %12604 = vmatpush1.bf16.msra.mxu1 %v20535_v13  ;;  %12564 = vmatprep.subr.bf16.mxu0 %v20540_v32  ;;  %v20624_v13 = vld [vmem:[%s27990_s5 + $0x38c] ss:$48 sps:$4 sm:$0xff]   ;;  %v20622_v32 = vld [vmem:[%s27990_s5 + $0x388] ss:$48 sps:$4 sm:$0xff]  }
 0x6e9   :  { %12605 = vmatprep.subr.bf16.mxu1 %v20543_v11  ;;  %v20625_v11 = vld [vmem:[%s27990_s5 + $0x988] ss:$48 sps:$4 sm:$0xff]  }
 0x6eb   :  { %12565 = vmatpush1.bf16.msra.mxu0 %v20538_v15  ;;  %v20627_v15 = vld [vmem:[%s27990_s5 + $0x98c] ss:$48 sps:$4 sm:$0xff]  }
 0x6ec   :  { %12606 = vmatpush1.bf16.msra.mxu1 %v20541_v17  ;;  %12566 = vmatprep.subr.bf16.mxu0 %v20546_v14  ;;  %v20630_v17 = vld [vmem:[%s27990_s5 + $0x3ec] ss:$48 sps:$4 sm:$0xff]   ;;  %v20628_v14 = vld [vmem:[%s27990_s5 + $0x3e8] ss:$48 sps:$4 sm:$0xff]  }
 0x6ed   :  { %12607 = vmatprep.subr.bf16.mxu1 %v20549_v20  ;;  %v20631_v20 = vld [vmem:[%s27990_s5 + $0x9e8] ss:$48 sps:$4 sm:$0xff]  }
 0x6ef   :  { %12567 = vmatpush1.bf16.msra.mxu0 %v20544_v19  ;;  %v20633_v19 = vld [vmem:[%s27990_s5 + $0x9ec] ss:$48 sps:$4 sm:$0xff]  }
 0x6f0   :  { %12608 = vmatpush1.bf16.msra.mxu1 %v20547_v16  ;;  %12568 = vmatprep.subr.bf16.mxu0 %v20552_v22  ;;  %v20636_v16 = vld [vmem:[%s27990_s5 + $0x44c] ss:$48 sps:$4 sm:$0xff]   ;;  %v20634_v22 = vld [vmem:[%s27990_s5 + $0x448] ss:$48 sps:$4 sm:$0xff]  }
 0x6f1   :  { %12609 = vmatprep.subr.bf16.mxu1 %v20555_v18  ;;  %v20637_v18 = vld [vmem:[%s27990_s5 + $0xa48] ss:$48 sps:$4 sm:$0xff]  }
 0x6f3   :  { %12569 = vmatpush1.bf16.msra.mxu0 %v20550_v23  ;;  %v20639_v23 = vld [vmem:[%s27990_s5 + $0xa4c] ss:$48 sps:$4 sm:$0xff]  }
 0x6f4   :  { %12610 = vmatpush1.bf16.msra.mxu1 %v20553_v25  ;;  %12570 = vmatprep.subr.bf16.mxu0 %v20558_v26  ;;  %v20642_v25 = vld [vmem:[%s27990_s5 + $0x4ac] ss:$48 sps:$4 sm:$0xff]   ;;  %v20640_v26 = vld [vmem:[%s27990_s5 + $0x4a8] ss:$48 sps:$4 sm:$0xff]  }
 0x6f5   :  { %12611 = vmatprep.subr.bf16.mxu1 %v20561_v28  ;;  %v20643_v28 = vld [vmem:[%s27990_s5 + $0xaa8] ss:$48 sps:$4 sm:$0xff]  }
 0x6f7   :  { %12571 = vmatpush1.bf16.msra.mxu0 %v20556_v21  ;;  %v20645_v21 = vld [vmem:[%s27990_s5 + $0xaac] ss:$48 sps:$4 sm:$0xff]  }
 0x6f8   :  { %12612 = vmatpush1.bf16.msra.mxu1 %v20559_v29  ;;  %12572 = vmatprep.subr.bf16.mxu0 %v20564_v24  ;;  %v20648_v29 = vld [vmem:[%s27990_s5 + $0x50c] ss:$48 sps:$4 sm:$0xff]   ;;  %v20646_v24 = vld [vmem:[%s27990_s5 + $0x508] ss:$48 sps:$4 sm:$0xff]  }
 0x6f9   :  { %12613 = vmatprep.subr.bf16.mxu1 %v20567_v27  ;;  %v20649_v27 = vld [vmem:[%s27990_s5 + $0xb08] ss:$48 sps:$4 sm:$0xff]  }
 0x6fb   :  { %12573 = vmatpush1.bf16.msra.mxu0 %v20562_v31  ;;  %v20651_v31 = vld [vmem:[%s27990_s5 + $0xb0c] ss:$48 sps:$4 sm:$0xff]  }
 0x6fc   :  { %12614 = vmatpush1.bf16.msra.mxu1 %v20565_v34  ;;  %12624 = vmatprep.subr.bf16.mxu0 %v20570_v35  ;;  %v20654_v34 = vld [vmem:[%s27990_s5 + $0x56c] ss:$48 sps:$4 sm:$0xff]   ;;  %v20652_v35 = vld [vmem:[%s27990_s5 + $0x568] ss:$48 sps:$4 sm:$0xff]  }
 0x6fd   :  { %12665 = vmatprep.subr.bf16.mxu1 %v20573_v41  ;;  %v20657_v41 = vld [vmem:[%s27990_s5 + $0xb6c] ss:$48 sps:$4 sm:$0xff]  }
 0x6fe   :  { %12575 = vmatmul.mubr.bf16.vlgmr.msra.gmra.mrb[12].mxu0 %v25692_v61 }
 0x6ff   :  { %12616 = vmatmul.mubr.bf16.vlgmr.msra.gmra.mrb[12].mxu1 %v25897_v7  ;;  %12625 = vmatpush1.bf16.msra.mxu0 %v20568_v36  ;;  %v20655_v36 = vld [vmem:[%s27990_s5 + $0xb68] ss:$48 sps:$4 sm:$0xff]  }
 0x700   :  { %12656 = vmatprep.mubr.bf16.mxu0 %v25684_v58  ;;  %12666 = vmatpush1.bf16.msra.mxu1 %v20571_v43  ;;  %v20583_v58 = vld [vmem:[%s27990_s5 + $0x6e8] ss:$48 sps:$4 sm:$0xff]   ;;  %v20660_v43 = vld [vmem:[%s27990_s5 + $0x5cc] ss:$48 sps:$4 sm:$0xff]  }
 0x701   :  { %12697 = vmatprep.mubr.bf16.mxu1 %v25702_v0  ;;  %12626 = vmatprep.subr.bf16.mxu0 %v20576_v44  ;;  %v20588_v0 = vld [vmem:[%s27990_s5 + $0x14c] ss:$48 sps:$4 sm:$0xff]  }
 0x702   :  { %12667 = vmatprep.subr.bf16.mxu1 %v20579_v42  ;;  %v20663_v44 = vld [vmem:[%s27990_s5 + $0xbcc] ss:$48 sps:$4 sm:$0xff]   ;;  %v26677_v42 = vpop.permute.xlu0 %9835 }
 0x703   :  { %12627 = vmatpush1.bf16.msra.mxu0 %v20574_v46  ;;  %v20658_v46 = vld [vmem:[%s27990_s5 + $0x5c8] ss:$48 sps:$4 sm:$0xff]  }
 0x704   :  { %12668 = vmatpush1.bf16.msra.mxu1 %v20577_v47  ;;  %12628 = vmatprep.subr.bf16.mxu0 %v20582_v49  ;;  %v9829_v47 = vld [vmem:[%s27994_s3 + $0x8] sm:$0xff] }
 0x705   :  { %12669 = vmatprep.subr.bf16.mxu1 %v20585_v50  ;;  %v20661_v49 = vld [vmem:[%s27990_s5 + $0xbc8] ss:$48 sps:$4 sm:$0xff]   ;;  %v20666_v50 = vld [vmem:[%s27993_s6 + $0x4] ss:$48 sps:$4 sm:$0xff]  }
 0x707   :  { %12629 = vmatpush1.bf16.msra.mxu0 %v20580_v45  ;;  %v20664_v45 = vld [vmem:[%s27993_s6] ss:$48 sps:$4 sm:$0xff]  }
 0x708   :  { %12670 = vmatpush1.bf16.msra.mxu1 %v20583_v58  ;;  %12630 = vmatprep.subr.bf16.mxu0 %v20588_v0  ;;  %v20669_v58 = vld [vmem:[%s27993_s6 + $0xc] ss:$48 sps:$4 sm:$0xff]   ;;  %v26692_v0 = vmul.f32 %v26677_v42, %v9829_v47 }
 0x709   :  { %12671 = vmatprep.subr.bf16.mxu1 %v20591_v48  ;;  %v20672_v48 = vld [vmem:[%s27993_s6 + $0x64] ss:$48 sps:$4 sm:$0xff]   ;;  %v20747_v47 = vld [vmem:[%s27993_s6 + $0x4ec] ss:$48 sps:$4 sm:$0xff]  }
 0x70b   :  { %12631 = vmatpush1.bf16.msra.mxu0 %v20586_v52  ;;  %v20667_v52 = vld [vmem:[%s27993_s6 + $0x8] ss:$48 sps:$4 sm:$0xff]  }
 0x70c   :  { %12672 = vmatpush1.bf16.msra.mxu1 %v20589_v55  ;;  %12632 = vmatprep.subr.bf16.mxu0 %v20594_v56  ;;  %v20675_v55 = vld [vmem:[%s27993_s6 + $0x6c] ss:$48 sps:$4 sm:$0xff]   ;;  %v26705_v56 = vpack.c.bf16 %v26692_v0, %v26692_v0 }
 0x70d   :  { %12673 = vmatprep.subr.bf16.mxu1 %v20597_v59  ;;  %v20673_v59 = vld [vmem:[%s27993_s6 + $0x68] ss:$48 sps:$4 sm:$0xff]  }
 0x70f   :  { %12633 = vmatpush1.bf16.msra.mxu0 %v20592_v51  ;;  %v20670_v51 = vld [vmem:[%s27993_s6 + $0x60] ss:$48 sps:$4 sm:$0xff]  }
 0x710   :  { %12674 = vmatpush1.bf16.msra.mxu1 %v20595_v54  ;;  %12634 = vmatprep.subr.bf16.mxu0 %v20600_v62  ;;  %v20678_v54 = vld [vmem:[%s27993_s6 + $0xc4] ss:$48 sps:$4 sm:$0xff]   ;;  %v20679_v62 = vld [vmem:[%s27993_s6 + $0xc8] ss:$48 sps:$4 sm:$0xff]  }
 0x711   :  { %12675 = vmatprep.subr.bf16.mxu1 %v20603_v38  ;;  %v20682_v38 = vld [vmem:[%s27993_s6 + $0x120] ss:$48 sps:$4 sm:$0xff]  }
 0x713   :  { %12635 = vmatpush1.bf16.msra.mxu0 %v20598_v63  ;;  %v20684_v63 = vld [vmem:[%s27993_s6 + $0x124] ss:$48 sps:$4 sm:$0xff]  }
 0x714   :  { %12676 = vmatpush1.bf16.msra.mxu1 %v20601_v57  ;;  %12636 = vmatprep.subr.bf16.mxu0 %v20606_v1  ;;  %v20687_v57 = vld [vmem:[%s27993_s6 + $0x12c] ss:$48 sps:$4 sm:$0xff]   ;;  %v20685_v1 = vld [vmem:[%s27993_s6 + $0x128] ss:$48 sps:$4 sm:$0xff]  }
 0x715   :  { %12677 = vmatprep.subr.bf16.mxu1 %v20609_v3  ;;  %v20688_v3 = vld [vmem:[%s27993_s6 + $0x180] ss:$48 sps:$4 sm:$0xff]  }
 0x717   :  { %12637 = vmatpush1.bf16.msra.mxu0 %v20604_v2  ;;  %v20690_v2 = vld [vmem:[%s27993_s6 + $0x184] ss:$48 sps:$4 sm:$0xff]  }
 0x718   :  { %12678 = vmatpush1.bf16.msra.mxu1 %v20607_v33  ;;  %12638 = vmatprep.subr.bf16.mxu0 %v20612_v4  ;;  %v20693_v33 = vld [vmem:[%s27993_s6 + $0x18c] ss:$48 sps:$4 sm:$0xff]   ;;  %v20691_v4 = vld [vmem:[%s27993_s6 + $0x188] ss:$48 sps:$4 sm:$0xff]  }
 0x719   :  { %12679 = vmatprep.subr.bf16.mxu1 %v20615_v60  ;;  %v20694_v60 = vld [vmem:[%s27993_s6 + $0x1e0] ss:$48 sps:$4 sm:$0xff]  }
 0x71b   :  { %12639 = vmatpush1.bf16.msra.mxu0 %v20610_v5  ;;  %v20696_v5 = vld [vmem:[%s27993_s6 + $0x1e4] ss:$48 sps:$4 sm:$0xff]  }
 0x71c   :  { %12680 = vmatpush1.bf16.msra.mxu1 %v20613_v6  ;;  %12640 = vmatprep.subr.bf16.mxu0 %v20618_v8  ;;  %v20699_v6 = vld [vmem:[%s27993_s6 + $0x1ec] ss:$48 sps:$4 sm:$0xff]   ;;  %v20697_v8 = vld [vmem:[%s27993_s6 + $0x1e8] ss:$48 sps:$4 sm:$0xff]  }
 0x71d   :  { %12681 = vmatprep.subr.bf16.mxu1 %v20621_v10  ;;  %v20705_v10 = vld [vmem:[%s27993_s6 + $0x24c] ss:$48 sps:$4 sm:$0xff]  }
 0x71f   :  { %12641 = vmatpush1.bf16.msra.mxu0 %v20616_v9  ;;  %v20702_v9 = vld [vmem:[%s27993_s6 + $0x244] ss:$48 sps:$4 sm:$0xff]  }
 0x720   :  { %12682 = vmatpush1.bf16.msra.mxu1 %v20619_v12  ;;  %12642 = vmatprep.subr.bf16.mxu0 %v20624_v13  ;;  %v20700_v12 = vld [vmem:[%s27993_s6 + $0x240] ss:$48 sps:$4 sm:$0xff]   ;;  %v20703_v13 = vld [vmem:[%s27993_s6 + $0x248] ss:$48 sps:$4 sm:$0xff]  }
 0x721   :  { %12683 = vmatprep.subr.bf16.mxu1 %v20627_v15  ;;  %v20711_v15 = vld [vmem:[%s27993_s6 + $0x2ac] ss:$48 sps:$4 sm:$0xff]  }
 0x723   :  { %12643 = vmatpush1.bf16.msra.mxu0 %v20622_v32  ;;  %v20708_v32 = vld [vmem:[%s27993_s6 + $0x2a4] ss:$48 sps:$4 sm:$0xff]  }
 0x724   :  { %12684 = vmatpush1.bf16.msra.mxu1 %v20625_v11  ;;  %12644 = vmatprep.subr.bf16.mxu0 %v20630_v17  ;;  %v20706_v11 = vld [vmem:[%s27993_s6 + $0x2a0] ss:$48 sps:$4 sm:$0xff]   ;;  %v20709_v17 = vld [vmem:[%s27993_s6 + $0x2a8] ss:$48 sps:$4 sm:$0xff]  }
 0x725   :  { %12685 = vmatprep.subr.bf16.mxu1 %v20633_v19  ;;  %v20712_v19 = vld [vmem:[%s27993_s6 + $0x300] ss:$48 sps:$4 sm:$0xff]  }
 0x727   :  { %12645 = vmatpush1.bf16.msra.mxu0 %v20628_v14  ;;  %v20714_v14 = vld [vmem:[%s27993_s6 + $0x304] ss:$48 sps:$4 sm:$0xff]  }
 0x728   :  { %12686 = vmatpush1.bf16.msra.mxu1 %v20631_v20  ;;  %12646 = vmatprep.subr.bf16.mxu0 %v20636_v16  ;;  %v20717_v20 = vld [vmem:[%s27993_s6 + $0x30c] ss:$48 sps:$4 sm:$0xff]   ;;  %v20715_v16 = vld [vmem:[%s27993_s6 + $0x308] ss:$48 sps:$4 sm:$0xff]  }
 0x729   :  { %12687 = vmatprep.subr.bf16.mxu1 %v20639_v23  ;;  %v20718_v23 = vld [vmem:[%s27993_s6 + $0x360] ss:$48 sps:$4 sm:$0xff]  }
 0x72b   :  { %12647 = vmatpush1.bf16.msra.mxu0 %v20634_v22  ;;  %v20720_v22 = vld [vmem:[%s27993_s6 + $0x364] ss:$48 sps:$4 sm:$0xff]  }
 0x72c   :  { %12688 = vmatpush1.bf16.msra.mxu1 %v20637_v18  ;;  %12648 = vmatprep.subr.bf16.mxu0 %v20642_v25  ;;  %v20723_v18 = vld [vmem:[%s27993_s6 + $0x36c] ss:$48 sps:$4 sm:$0xff]   ;;  %v20721_v25 = vld [vmem:[%s27993_s6 + $0x368] ss:$48 sps:$4 sm:$0xff]  }
 0x72d   :  { %12689 = vmatprep.subr.bf16.mxu1 %v20645_v21  ;;  %v20724_v21 = vld [vmem:[%s27993_s6 + $0x3c0] ss:$48 sps:$4 sm:$0xff]  }
 0x72f   :  { %12649 = vmatpush1.bf16.msra.mxu0 %v20640_v26  ;;  %v20726_v26 = vld [vmem:[%s27993_s6 + $0x3c4] ss:$48 sps:$4 sm:$0xff]  }
 0x730   :  { %12690 = vmatpush1.bf16.msra.mxu1 %v20643_v28  ;;  %12650 = vmatprep.subr.bf16.mxu0 %v20648_v29  ;;  %v20729_v28 = vld [vmem:[%s27993_s6 + $0x3cc] ss:$48 sps:$4 sm:$0xff]   ;;  %v20727_v29 = vld [vmem:[%s27993_s6 + $0x3c8] ss:$48 sps:$4 sm:$0xff]  }
 0x731   :  { %12691 = vmatprep.subr.bf16.mxu1 %v20651_v31  ;;  %v20730_v31 = vld [vmem:[%s27993_s6 + $0x420] ss:$48 sps:$4 sm:$0xff]  }
 0x733   :  { %12651 = vmatpush1.bf16.msra.mxu0 %v20646_v24  ;;  %v20732_v24 = vld [vmem:[%s27993_s6 + $0x424] ss:$48 sps:$4 sm:$0xff]  }
 0x734   :  { %12692 = vmatpush1.bf16.msra.mxu1 %v20649_v27  ;;  %12652 = vmatprep.subr.bf16.mxu0 %v20654_v34  ;;  %v20735_v27 = vld [vmem:[%s27993_s6 + $0x42c] ss:$48 sps:$4 sm:$0xff]   ;;  %v20733_v34 = vld [vmem:[%s27993_s6 + $0x428] ss:$48 sps:$4 sm:$0xff]  }
 0x735   :  { %12693 = vmatprep.subr.bf16.mxu1 %v20657_v41  ;;  %v20736_v41 = vld [vmem:[%s27993_s6 + $0x480] ss:$48 sps:$4 sm:$0xff]  }
 0x737   :  { %12653 = vmatpush1.bf16.msra.mxu0 %v20652_v35  ;;  %v20738_v35 = vld [vmem:[%s27993_s6 + $0x484] ss:$48 sps:$4 sm:$0xff]  }
 0x738   :  { %12694 = vmatpush1.bf16.msra.mxu1 %v20655_v36  ;;  %12654 = vmatprep.subr.bf16.mxu0 %v20660_v43  ;;  %v20741_v36 = vld [vmem:[%s27993_s6 + $0x48c] ss:$48 sps:$4 sm:$0xff]   ;;  %v20739_v43 = vld [vmem:[%s27993_s6 + $0x488] ss:$48 sps:$4 sm:$0xff]  }
 0x739   :  { %12695 = vmatprep.subr.bf16.mxu1 %v20663_v44  ;;  %v20744_v44 = vld [vmem:[%s27993_s6 + $0x4e4] ss:$48 sps:$4 sm:$0xff]  }
 0x73b   :  { %12655 = vmatpush1.bf16.msra.mxu0 %v20658_v46  ;;  %v20742_v46 = vld [vmem:[%s27993_s6 + $0x4e0] ss:$48 sps:$4 sm:$0xff]  }
 0x73c   :  { %12696 = vmatpush1.bf16.msra.mxu1 %v20661_v49  ;;  %15078 = vmatprep.subr.bf16.mxu0 %v20666_v50  ;;  %v20745_v49 = vld [vmem:[%s27993_s6 + $0x4e8] ss:$48 sps:$4 sm:$0xff]   ;;  %v20750_v50 = vld [vmem:[%s27993_s6 + $0x544] ss:$48 sps:$4 sm:$0xff]  }
 0x73d   :  { %15160 = vmatprep.subr.bf16.mxu1 %v20669_v58  ;;  %v20748_v58 = vld [vmem:[%s27993_s6 + $0x540] ss:$48 sps:$4 sm:$0xff]  }
 0x73e   :  { %12657 = vmatmul.mubr.bf16.vlgmr.msra.gmra.mrb[16].mxu0 %v25692_v61  ;;  %v20681_v61 = vld [vmem:[%s27993_s6 + $0xcc] ss:$48 sps:$4 sm:$0xff]  }
 0x73f   :  { %12698 = vmatmul.mubr.bf16.vlgmr.msra.gmra.mrb[16].mxu1 %v25897_v7  ;;  %15079 = vmatpush1.bf16.msra.mxu0 %v20664_v45  ;;  %v20676_v7 = vld [vmem:[%s27993_s6 + $0xc0] ss:$48 sps:$4 sm:$0xff]   ;;  %v20753_v45 = vld [vmem:[%s27993_s6 + $0x54c] ss:$48 sps:$4 sm:$0xff]  }
 0x740   :  { %15161 = vmatpush1.bf16.msra.mxu1 %v20667_v52  ;;  %15080 = vmatprep.subr.bf16.mxu0 %v20672_v48  ;;  %v9828_v52 = vld [vmem:[%s27994_s3] sm:$0xff]  ;;  %v20751_v48 = vld [vmem:[%s27993_s6 + $0x548] ss:$48 sps:$4 sm:$0xff]  }
 0x741   :  { %15162 = vmatprep.subr.bf16.mxu1 %v20675_v55  ;;  %15110 = vmatprep.mubr.bf16.mxu0 %v26705_v56  ;;  %v9831_v55 = vld [vmem:[%s27994_s3 + $0x18] sm:$0xff] }
 0x742   :  { %15192 = vmatprep.mubr.bf16.mxu1 %v26705_v56 }
 0x743   :  { %15081 = vmatpush1.bf16.msra.mxu0 %v20670_v51  ;;  %v20756_v51 = vld [vmem:[%s27993_s6 + $0x5a4] ss:$48 sps:$4 sm:$0xff]  }
 0x744   :  { %15163 = vmatpush1.bf16.msra.mxu1 %v20673_v59  ;;  %15082 = vmatprep.subr.bf16.mxu0 %v20678_v54  ;;  %v20754_v59 = vld [vmem:[%s27993_s6 + $0x5a0] ss:$48 sps:$4 sm:$0xff]   ;;  %v20759_v54 = vld [vmem:[%s27993_s6 + $0x5ac] ss:$48 sps:$4 sm:$0xff]  }
 0x745   :  { %15164 = vmatprep.subr.bf16.mxu1 %v20681_v61  ;;  %v26889_v61 = vmul.f32 %v26677_v42, %v9828_v52  ;;  %v20831_v52 = vld [vmem:[%s27993_s6 + $0xa2c] ss:$48 sps:$4 sm:$0xff]  }
 0x747   :  { %15083 = vmatpush1.bf16.msra.mxu0 %v20676_v7  ;;  %v26892_v7 = vmul.f32 %v26677_v42, %v9831_v55  ;;  %v20829_v55 = vld [vmem:[%s27993_s6 + $0xa28] ss:$48 sps:$4 sm:$0xff]  }
 0x748   :  { %15165 = vmatpush1.bf16.msra.mxu1 %v20679_v62  ;;  %15084 = vmatprep.subr.bf16.mxu0 %v20684_v63  ;;  %v20757_v62 = vld [vmem:[%s27993_s6 + $0x5a8] ss:$48 sps:$4 sm:$0xff]   ;;  %v20762_v63 = vld [vmem:[%s27993_s6 + $0x604] ss:$48 sps:$4 sm:$0xff]  }
 0x749   :  { %15166 = vmatprep.subr.bf16.mxu1 %v20687_v57  ;;  %v20765_v57 = vld [vmem:[%s27993_s6 + $0x60c] ss:$48 sps:$4 sm:$0xff]  }
 0x74b   :  { %15085 = vmatpush1.bf16.msra.mxu0 %v20682_v38  ;;  %v20760_v38 = vld [vmem:[%s27993_s6 + $0x600] ss:$48 sps:$4 sm:$0xff]  }
 0x74c   :  { %15167 = vmatpush1.bf16.msra.mxu1 %v20685_v1  ;;  %15086 = vmatprep.subr.bf16.mxu0 %v20690_v2  ;;  %v26908_v1 = vpack.c.bf16 %v26889_v61, %v26889_v61  ;;  %v20763_v2 = vld [vmem:[%s27993_s6 + $0x608] ss:$48 sps:$4 sm:$0xff]  }
 0x74d   :  { %15168 = vmatprep.subr.bf16.mxu1 %v20693_v33  ;;  %v26918_v33 = vpack.c.bf16 %v26892_v7, %v26892_v7 }
 0x74f   :  { %15087 = vmatpush1.bf16.msra.mxu0 %v20688_v3  ;;  %v20768_v3 = vld [vmem:[%s27993_s6 + $0x664] ss:$48 sps:$4 sm:$0xff]  }
 0x750   :  { %15169 = vmatpush1.bf16.msra.mxu1 %v20691_v4  ;;  %15088 = vmatprep.subr.bf16.mxu0 %v20696_v5  ;;  %v20766_v4 = vld [vmem:[%s27993_s6 + $0x660] ss:$48 sps:$4 sm:$0xff]   ;;  %v20769_v5 = vld [vmem:[%s27993_s6 + $0x668] ss:$48 sps:$4 sm:$0xff]  }
 0x751   :  { %15170 = vmatprep.subr.bf16.mxu1 %v20699_v6  ;;  %v20774_v6 = vld [vmem:[%s27993_s6 + $0x6c4] ss:$48 sps:$4 sm:$0xff]  }
 0x753   :  { %15089 = vmatpush1.bf16.msra.mxu0 %v20694_v60  ;;  %v20771_v60 = vld [vmem:[%s27993_s6 + $0x66c] ss:$48 sps:$4 sm:$0xff]  }
 0x754   :  { %15171 = vmatpush1.bf16.msra.mxu1 %v20697_v8  ;;  %15090 = vmatprep.subr.bf16.mxu0 %v20702_v9  ;;  %v20777_v8 = vld [vmem:[%s27993_s6 + $0x6cc] ss:$48 sps:$4 sm:$0xff]   ;;  %v20772_v9 = vld [vmem:[%s27993_s6 + $0x6c0] ss:$48 sps:$4 sm:$0xff]  }
 0x755   :  { %15172 = vmatprep.subr.bf16.mxu1 %v20705_v10  ;;  %v20775_v10 = vld [vmem:[%s27993_s6 + $0x6c8] ss:$48 sps:$4 sm:$0xff]  }
 0x757   :  { %15091 = vmatpush1.bf16.msra.mxu0 %v20700_v12  ;;  %v20780_v12 = vld [vmem:[%s27993_s6 + $0x724] ss:$48 sps:$4 sm:$0xff]  }
 0x758   :  { %15173 = vmatpush1.bf16.msra.mxu1 %v20703_v13  ;;  %15092 = vmatprep.subr.bf16.mxu0 %v20708_v32  ;;  %v20783_v13 = vld [vmem:[%s27993_s6 + $0x72c] ss:$48 sps:$4 sm:$0xff]   ;;  %v20778_v32 = vld [vmem:[%s27993_s6 + $0x720] ss:$48 sps:$4 sm:$0xff]  }
 0x759   :  { %15174 = vmatprep.subr.bf16.mxu1 %v20711_v15  ;;  %v20781_v15 = vld [vmem:[%s27993_s6 + $0x728] ss:$48 sps:$4 sm:$0xff]  }
 0x75b   :  { %15093 = vmatpush1.bf16.msra.mxu0 %v20706_v11  ;;  %v20786_v11 = vld [vmem:[%s27993_s6 + $0x784] ss:$48 sps:$4 sm:$0xff]  }
 0x75c   :  { %15175 = vmatpush1.bf16.msra.mxu1 %v20709_v17  ;;  %15094 = vmatprep.subr.bf16.mxu0 %v20714_v14  ;;  %v20789_v17 = vld [vmem:[%s27993_s6 + $0x78c] ss:$48 sps:$4 sm:$0xff]   ;;  %v20784_v14 = vld [vmem:[%s27993_s6 + $0x780] ss:$48 sps:$4 sm:$0xff]  }
 0x75d   :  { %15176 = vmatprep.subr.bf16.mxu1 %v20717_v20  ;;  %v20792_v20 = vld [vmem:[%s27993_s6 + $0x7e4] ss:$48 sps:$4 sm:$0xff]  }
 0x75f   :  { %15095 = vmatpush1.bf16.msra.mxu0 %v20712_v19  ;;  %v20787_v19 = vld [vmem:[%s27993_s6 + $0x788] ss:$48 sps:$4 sm:$0xff]  }
 0x760   :  { %15177 = vmatpush1.bf16.msra.mxu1 %v20715_v16  ;;  %15096 = vmatprep.subr.bf16.mxu0 %v20720_v22  ;;  %v20795_v16 = vld [vmem:[%s27993_s6 + $0x7ec] ss:$48 sps:$4 sm:$0xff]   ;;  %v20790_v22 = vld [vmem:[%s27993_s6 + $0x7e0] ss:$48 sps:$4 sm:$0xff]  }
 0x761   :  { %15178 = vmatprep.subr.bf16.mxu1 %v20723_v18  ;;  %v20798_v18 = vld [vmem:[%s27993_s6 + $0x844] ss:$48 sps:$4 sm:$0xff]  }
 0x763   :  { %15097 = vmatpush1.bf16.msra.mxu0 %v20718_v23  ;;  %v20793_v23 = vld [vmem:[%s27993_s6 + $0x7e8] ss:$48 sps:$4 sm:$0xff]  }
 0x764   :  { %15179 = vmatpush1.bf16.msra.mxu1 %v20721_v25  ;;  %15098 = vmatprep.subr.bf16.mxu0 %v20726_v26  ;;  %v20801_v25 = vld [vmem:[%s27993_s6 + $0x84c] ss:$48 sps:$4 sm:$0xff]   ;;  %v20796_v26 = vld [vmem:[%s27993_s6 + $0x840] ss:$48 sps:$4 sm:$0xff]  }
 0x765   :  { %15180 = vmatprep.subr.bf16.mxu1 %v20729_v28  ;;  %v20804_v28 = vld [vmem:[%s27993_s6 + $0x8a4] ss:$48 sps:$4 sm:$0xff]  }
 0x767   :  { %15099 = vmatpush1.bf16.msra.mxu0 %v20724_v21  ;;  %v20799_v21 = vld [vmem:[%s27993_s6 + $0x848] ss:$48 sps:$4 sm:$0xff]  }
 0x768   :  { %15181 = vmatpush1.bf16.msra.mxu1 %v20727_v29  ;;  %15100 = vmatprep.subr.bf16.mxu0 %v20732_v24  ;;  %v20807_v29 = vld [vmem:[%s27993_s6 + $0x8ac] ss:$48 sps:$4 sm:$0xff]   ;;  %v20802_v24 = vld [vmem:[%s27993_s6 + $0x8a0] ss:$48 sps:$4 sm:$0xff]  }
 0x769   :  { %15182 = vmatprep.subr.bf16.mxu1 %v20735_v27  ;;  %v20810_v27 = vld [vmem:[%s27993_s6 + $0x904] ss:$48 sps:$4 sm:$0xff]  }
 0x76b   :  { %15101 = vmatpush1.bf16.msra.mxu0 %v20730_v31  ;;  %v20805_v31 = vld [vmem:[%s27993_s6 + $0x8a8] ss:$48 sps:$4 sm:$0xff]  }
 0x76c   :  { %15183 = vmatpush1.bf16.msra.mxu1 %v20733_v34  ;;  %15102 = vmatprep.subr.bf16.mxu0 %v20738_v35  ;;  %v20813_v34 = vld [vmem:[%s27993_s6 + $0x90c] ss:$48 sps:$4 sm:$0xff]   ;;  %v20808_v35 = vld [vmem:[%s27993_s6 + $0x900] ss:$48 sps:$4 sm:$0xff]  }
 0x76d   :  { %15184 = vmatprep.subr.bf16.mxu1 %v20741_v36  ;;  %v20816_v36 = vld [vmem:[%s27993_s6 + $0x964] ss:$48 sps:$4 sm:$0xff]  }
 0x76f   :  { %15103 = vmatpush1.bf16.msra.mxu0 %v20736_v41  ;;  %v20811_v41 = vld [vmem:[%s27993_s6 + $0x908] ss:$48 sps:$4 sm:$0xff]  }
 0x770   :  { %15185 = vmatpush1.bf16.msra.mxu1 %v20739_v43  ;;  %15104 = vmatprep.subr.bf16.mxu0 %v20744_v44  ;;  %v20819_v43 = vld [vmem:[%s27993_s6 + $0x96c] ss:$48 sps:$4 sm:$0xff]   ;;  %v20814_v44 = vld [vmem:[%s27993_s6 + $0x960] ss:$48 sps:$4 sm:$0xff]  }
 0x771   :  { %15186 = vmatprep.subr.bf16.mxu1 %v20747_v47  ;;  %v20822_v47 = vld [vmem:[%s27993_s6 + $0x9c4] ss:$48 sps:$4 sm:$0xff]  }
 0x773   :  { %15105 = vmatpush1.bf16.msra.mxu0 %v20742_v46  ;;  %v20817_v46 = vld [vmem:[%s27993_s6 + $0x968] ss:$48 sps:$4 sm:$0xff]  }
 0x774   :  { %15187 = vmatpush1.bf16.msra.mxu1 %v20745_v49  ;;  %15106 = vmatprep.subr.bf16.mxu0 %v20750_v50  ;;  %v20825_v49 = vld [vmem:[%s27993_s6 + $0x9cc] ss:$48 sps:$4 sm:$0xff]   ;;  %v20820_v50 = vld [vmem:[%s27993_s6 + $0x9c0] ss:$48 sps:$4 sm:$0xff]  }
 0x775   :  { %15188 = vmatprep.subr.bf16.mxu1 %v20753_v45  ;;  %v20823_v45 = vld [vmem:[%s27993_s6 + $0x9c8] ss:$48 sps:$4 sm:$0xff]  }
 0x777   :  { %15107 = vmatpush1.bf16.msra.mxu0 %v20748_v58  ;;  %v20828_v58 = vld [vmem:[%s27993_s6 + $0xa24] ss:$48 sps:$4 sm:$0xff]  }
 0x778   :  { %15189 = vmatpush1.bf16.msra.mxu1 %v20751_v48  ;;  %15108 = vmatprep.subr.bf16.mxu0 %v20756_v51  ;;  %v20826_v48 = vld [vmem:[%s27993_s6 + $0xa20] ss:$48 sps:$4 sm:$0xff]   ;;  %v20834_v51 = vld [vmem:[%s27993_s6 + $0xa84] ss:$48 sps:$4 sm:$0xff]  }
 0x779   :  { %15190 = vmatprep.subr.bf16.mxu1 %v20759_v54  ;;  %v20832_v54 = vld [vmem:[%s27993_s6 + $0xa80] ss:$48 sps:$4 sm:$0xff]  }
 0x77b   :  { %15109 = vmatpush1.bf16.msra.mxu0 %v20754_v59  ;;  %v20837_v59 = vld [vmem:[%s27993_s6 + $0xa8c] ss:$48 sps:$4 sm:$0xff]  }
 0x77c   :  { %15191 = vmatpush1.bf16.msra.mxu1 %v20757_v62  ;;  %15119 = vmatprep.subr.bf16.mxu0 %v20762_v63  ;;  %v20835_v62 = vld [vmem:[%s27993_s6 + $0xa88] ss:$48 sps:$4 sm:$0xff]   ;;  %v20840_v63 = vld [vmem:[%s27993_s6 + $0xae4] ss:$48 sps:$4 sm:$0xff]  }
 0x77d   :  { %15201 = vmatprep.subr.bf16.mxu1 %v20765_v57  ;;  %v20838_v57 = vld [vmem:[%s27993_s6 + $0xae0] ss:$48 sps:$4 sm:$0xff]  }
 0x77e   :  { %15111 = vmatmul.mubr.bf16.vlgmr.msra.gmra.mrb[4].mxu0 %v26908_v1 }
 0x77f   :  { %15193 = vmatmul.mubr.bf16.vlgmr.msra.gmra.mrb[4].mxu1 %v26908_v1  ;;  %15120 = vmatpush1.bf16.msra.mxu0 %v20760_v38  ;;  %v20843_v38 = vld [vmem:[%s27993_s6 + $0xaec] ss:$48 sps:$4 sm:$0xff]  }
 0x780   :  { %15151 = vmatprep.mubr.bf16.mxu0 %v26918_v33  ;;  %15202 = vmatpush1.bf16.msra.mxu1 %v20763_v2  ;;  %v20841_v2 = vld [vmem:[%s27993_s6 + $0xae8] ss:$48 sps:$4 sm:$0xff]  }
 0x781   :  { %15233 = vmatprep.mubr.bf16.mxu1 %v26918_v33  ;;  %15121 = vmatprep.subr.bf16.mxu0 %v20768_v3  ;;  %v20846_v3 = vld [vmem:[%s27993_s6 + $0xb44] ss:$48 sps:$4 sm:$0xff]  }
 0x782   :  { %15203 = vmatprep.subr.bf16.mxu1 %v20771_v60  ;;  %v20847_v60 = vld [vmem:[%s27993_s6 + $0xb48] ss:$48 sps:$4 sm:$0xff]  }
 0x783   :  { %15122 = vmatpush1.bf16.msra.mxu0 %v20766_v4  ;;  %v20849_v4 = vld [vmem:[%s27993_s6 + $0xb4c] ss:$48 sps:$4 sm:$0xff]  }
 0x784   :  { %15204 = vmatpush1.bf16.msra.mxu1 %v20769_v5  ;;  %15123 = vmatprep.subr.bf16.mxu0 %v20774_v6  ;;  %v20844_v5 = vld [vmem:[%s27993_s6 + $0xb40] ss:$48 sps:$4 sm:$0xff]   ;;  %v20852_v6 = vld [vmem:[%s27993_s6 + $0xba4] ss:$48 sps:$4 sm:$0xff]  }
 0x785   :  { %15205 = vmatprep.subr.bf16.mxu1 %v20777_v8  ;;  %v9830_v8 = vld [vmem:[%s27994_s3 + $0x10] sm:$0xff] }
 0x787   :  { %15124 = vmatpush1.bf16.msra.mxu0 %v20772_v9  ;;  %v20855_v9 = vld [vmem:[%s27993_s6 + $0xbac] ss:$48 sps:$4 sm:$0xff]  }
 0x788   :  { %15206 = vmatpush1.bf16.msra.mxu1 %v20775_v10  ;;  %15125 = vmatprep.subr.bf16.mxu0 %v20780_v12  ;;  %v20850_v10 = vld [vmem:[%s27993_s6 + $0xba0] ss:$48 sps:$4 sm:$0xff]   ;;  %v27102_v12 = vmul.f32 %v26677_v42, %v9830_v8  ;;  %v20906_v8 = vld [vmem:[%s27993_s6 + $0x314] ss:$48 sps:$4 sm:$0xff]  }
 0x789   :  { %15207 = vmatprep.subr.bf16.mxu1 %v20783_v13  ;;  %v20853_v13 = vld [vmem:[%s27993_s6 + $0xba8] ss:$48 sps:$4 sm:$0xff]   ;;  %v20856_v42 = vld [vmem:[%s27993_s6 + $0x10] ss:$48 sps:$4 sm:$0xff]  }
 0x78b   :  { %15126 = vmatpush1.bf16.msra.mxu0 %v20778_v32  ;;  %v20858_v32 = vld [vmem:[%s27993_s6 + $0x14] ss:$48 sps:$4 sm:$0xff]  }
 0x78c   :  { %15208 = vmatpush1.bf16.msra.mxu1 %v20781_v15  ;;  %15127 = vmatprep.subr.bf16.mxu0 %v20786_v11  ;;  %v20861_v15 = vld [vmem:[%s27993_s6 + $0x1c] ss:$48 sps:$4 sm:$0xff]   ;;  %v27118_v11 = vpack.c.bf16 %v27102_v12, %v27102_v12 }
 0x78d   :  { %15209 = vmatprep.subr.bf16.mxu1 %v20789_v17  ;;  %v20859_v17 = vld [vmem:[%s27993_s6 + $0x18] ss:$48 sps:$4 sm:$0xff]  }
 0x78f   :  { %15128 = vmatpush1.bf16.msra.mxu0 %v20784_v14  ;;  %v20864_v14 = vld [vmem:[%s27993_s6 + $0x74] ss:$48 sps:$4 sm:$0xff]  }
 0x790   :  { %15210 = vmatpush1.bf16.msra.mxu1 %v20787_v19  ;;  %15129 = vmatprep.subr.bf16.mxu0 %v20792_v20  ;;  %v20867_v19 = vld [vmem:[%s27993_s6 + $0x7c] ss:$48 sps:$4 sm:$0xff]   ;;  %v20862_v20 = vld [vmem:[%s27993_s6 + $0x70] ss:$48 sps:$4 sm:$0xff]  }
 0x791   :  { %15211 = vmatprep.subr.bf16.mxu1 %v20795_v16  ;;  %v20865_v16 = vld [vmem:[%s27993_s6 + $0x78] ss:$48 sps:$4 sm:$0xff]  }
 0x793   :  { %15130 = vmatpush1.bf16.msra.mxu0 %v20790_v22  ;;  %v20870_v22 = vld [vmem:[%s27993_s6 + $0xd4] ss:$48 sps:$4 sm:$0xff]  }
 0x794   :  { %15212 = vmatpush1.bf16.msra.mxu1 %v20793_v23  ;;  %15131 = vmatprep.subr.bf16.mxu0 %v20798_v18  ;;  %v20873_v23 = vld [vmem:[%s27993_s6 + $0xdc] ss:$48 sps:$4 sm:$0xff]   ;;  %v20868_v18 = vld [vmem:[%s27993_s6 + $0xd0] ss:$48 sps:$4 sm:$0xff]  }
 0x795   :  { %15213 = vmatprep.subr.bf16.mxu1 %v20801_v25  ;;  %v20871_v25 = vld [vmem:[%s27993_s6 + $0xd8] ss:$48 sps:$4 sm:$0xff]  }
 0x797   :  { %15132 = vmatpush1.bf16.msra.mxu0 %v20796_v26  ;;  %v20876_v26 = vld [vmem:[%s27993_s6 + $0x134] ss:$48 sps:$4 sm:$0xff]  }
 0x798   :  { %15214 = vmatpush1.bf16.msra.mxu1 %v20799_v21  ;;  %15133 = vmatprep.subr.bf16.mxu0 %v20804_v28  ;;  %v20879_v21 = vld [vmem:[%s27993_s6 + $0x13c] ss:$48 sps:$4 sm:$0xff]   ;;  %v20874_v28 = vld [vmem:[%s27993_s6 + $0x130] ss:$48 sps:$4 sm:$0xff]  }
 0x799   :  { %15215 = vmatprep.subr.bf16.mxu1 %v20807_v29  ;;  %v20877_v29 = vld [vmem:[%s27993_s6 + $0x138] ss:$48 sps:$4 sm:$0xff]  }
 0x79b   :  { %15134 = vmatpush1.bf16.msra.mxu0 %v20802_v24  ;;  %v20882_v24 = vld [vmem:[%s27993_s6 + $0x194] ss:$48 sps:$4 sm:$0xff]  }
 0x79c   :  { %15216 = vmatpush1.bf16.msra.mxu1 %v20805_v31  ;;  %15135 = vmatprep.subr.bf16.mxu0 %v20810_v27  ;;  %v20885_v31 = vld [vmem:[%s27993_s6 + $0x19c] ss:$48 sps:$4 sm:$0xff]   ;;  %v20880_v27 = vld [vmem:[%s27993_s6 + $0x190] ss:$48 sps:$4 sm:$0xff]  }
 0x79d   :  { %15217 = vmatprep.subr.bf16.mxu1 %v20813_v34  ;;  %v27175_v34 = vld [vmem:[%s27995_s7 + $0x8] sm:$0xf] }
 0x79f   :  { %15136 = vmatpush1.bf16.msra.mxu0 %v20808_v35  ;;  %v20883_v35 = vld [vmem:[%s27993_s6 + $0x198] ss:$48 sps:$4 sm:$0xff]  }
 0x7a0   :  { %15218 = vmatpush1.bf16.msra.mxu1 %v20811_v41  ;;  %15137 = vmatprep.subr.bf16.mxu0 %v20816_v36  ;;  %v20888_v41 = vld [vmem:[%s27993_s6 + $0x1f4] ss:$48 sps:$4 sm:$0xff]   ;;  %v20891_v36 = vld [vmem:[%s27993_s6 + $0x1fc] ss:$48 sps:$4 sm:$0xff]  }
 0x7a1   :  { %15219 = vmatprep.subr.bf16.mxu1 %v20819_v43  ;;  %v10269_v43 = vrot.slane %v27175_v34, %v25663_v37 }
 0x7a3   :  { %15138 = vmatpush1.bf16.msra.mxu0 %v20814_v44  ;;  %v10273_v44 = vrot.slane %v27175_v34, %v25671_v39 }
 0x7a4   :  { %15220 = vmatpush1.bf16.msra.mxu1 %v20817_v46  ;;  %15139 = vmatprep.subr.bf16.mxu0 %v20822_v47  ;;  %v20886_v46 = vld [vmem:[%s27993_s6 + $0x1f0] ss:$48 sps:$4 sm:$0xff]   ;;  %v20889_v47 = vld [vmem:[%s27993_s6 + $0x1f8] ss:$48 sps:$4 sm:$0xff]  }
 0x7a5   :  { %15221 = vmatprep.subr.bf16.mxu1 %v20825_v49  ;;  %v20894_v49 = vld [vmem:[%s27993_s6 + $0x254] ss:$48 sps:$4 sm:$0xff]  }
 0x7a7   :  { %15140 = vmatpush1.bf16.msra.mxu0 %v20820_v50 }
 0x7a8   :  { %15222 = vmatpush1.bf16.msra.mxu1 %v20823_v45  ;;  %15141 = vmatprep.subr.bf16.mxu0 %v20828_v58  ;;  %v20897_v45 = vld [vmem:[%s27993_s6 + $0x25c] ss:$48 sps:$4 sm:$0xff]  }
 0x7a9   :  { %15223 = vmatprep.subr.bf16.mxu1 %v20831_v52 }
 0x7ab   :  { %15142 = vmatpush1.bf16.msra.mxu0 %v20826_v48 }
 0x7ac   :  { %15224 = vmatpush1.bf16.msra.mxu1 %v20829_v55  ;;  %15143 = vmatprep.subr.bf16.mxu0 %v20834_v51 }
 0x7ad   :  { %15225 = vmatprep.subr.bf16.mxu1 %v20837_v59 }
 0x7af   :  { %15144 = vmatpush1.bf16.msra.mxu0 %v20832_v54  ;;  %v20892_v54 = vld [vmem:[%s27993_s6 + $0x250] ss:$48 sps:$4 sm:$0xff]  }
 0x7b0   :  { %15226 = vmatpush1.bf16.msra.mxu1 %v20835_v62  ;;  %15145 = vmatprep.subr.bf16.mxu0 %v20840_v63 }
 0x7b1   :  { %15227 = vmatprep.subr.bf16.mxu1 %v20843_v38 }
 0x7b3   :  { %15146 = vmatpush1.bf16.msra.mxu0 %v20838_v57  ;;  %v20895_v57 = vld [vmem:[%s27993_s6 + $0x258] ss:$48 sps:$4 sm:$0xff]  }
 0x7b4   :  { %15228 = vmatpush1.bf16.msra.mxu1 %v20841_v2  ;;  %15147 = vmatprep.subr.bf16.mxu0 %v20846_v3  ;;  %v20900_v2 = vld [vmem:[%s27993_s6 + $0x2b4] ss:$48 sps:$4 sm:$0xff]  }
 0x7b5   :  { %15229 = vmatprep.subr.bf16.mxu1 %v20849_v4 }
 0x7b7   :  { %15148 = vmatpush1.bf16.msra.mxu0 %v20844_v5  ;;  %v20903_v5 = vld [vmem:[%s27993_s6 + $0x2bc] ss:$48 sps:$4 sm:$0xff]  }
 0x7b8   :  { %15230 = vmatpush1.bf16.msra.mxu1 %v20847_v60  ;;  %15149 = vmatprep.subr.bf16.mxu0 %v20852_v6  ;;  %v20898_v60 = vld [vmem:[%s27993_s6 + $0x2b0] ss:$48 sps:$4 sm:$0xff]   ;;  %v20901_v6 = vld [vmem:[%s27993_s6 + $0x2b8] ss:$48 sps:$4 sm:$0xff]  }
 0x7b9   :  { %15231 = vmatprep.subr.bf16.mxu1 %v20855_v9  ;;  %v20909_v9 = vld [vmem:[%s27993_s6 + $0x31c] ss:$48 sps:$4 sm:$0xff]  }
 0x7bb   :  { %15150 = vmatpush1.bf16.msra.mxu0 %v20850_v10  ;;  %v20904_v10 = vld [vmem:[%s27993_s6 + $0x310] ss:$48 sps:$4 sm:$0xff]  }
 0x7bc   :  { %15232 = vmatpush1.bf16.msra.mxu1 %v20853_v13  ;;  %15242 = vmatprep.subr.bf16.mxu0 %v20858_v32  ;;  %v20907_v13 = vld [vmem:[%s27993_s6 + $0x318] ss:$48 sps:$4 sm:$0xff]   ;;  %v20912_v32 = vld [vmem:[%s27993_s6 + $0x374] ss:$48 sps:$4 sm:$0xff]  }
 0x7bd   :  { %15324 = vmatprep.subr.bf16.mxu1 %v20861_v15  ;;  %v20915_v15 = vld [vmem:[%s27993_s6 + $0x37c] ss:$48 sps:$4 sm:$0xff]  }
 0x7be   :  { %15152 = vmatmul.mubr.bf16.vlgmr.msra.gmra.mrb[4].mxu0 %v27118_v11 }
 0x7bf   :  { %15234 = vmatmul.mubr.bf16.vlgmr.msra.gmra.mrb[4].mxu1 %v27118_v11  ;;  %15243 = vmatpush1.bf16.msra.mxu0 %v20856_v42  ;;  %v20910_v42 = vld [vmem:[%s27993_s6 + $0x370] ss:$48 sps:$4 sm:$0xff]  }
 0x7c0   :  { %15274 = vmatprep.mubr.bf16.mxu0 %v26705_v56  ;;  %15325 = vmatpush1.bf16.msra.mxu1 %v20859_v17  ;;  %v20913_v17 = vld [vmem:[%s27993_s6 + $0x378] ss:$48 sps:$4 sm:$0xff]  }
 0x7c1   :  { %15356 = vmatprep.mubr.bf16.mxu1 %v26705_v56  ;;  %15244 = vmatprep.subr.bf16.mxu0 %v20864_v14  ;;  %v20918_v14 = vld [vmem:[%s27993_s6 + $0x3d4] ss:$48 sps:$4 sm:$0xff]  }
 0x7c2   :  { %15326 = vmatprep.subr.bf16.mxu1 %v20867_v19  ;;  %v20921_v19 = vld [vmem:[%s27993_s6 + $0x3dc] ss:$48 sps:$4 sm:$0xff]  }
 0x7c3   :  { %15245 = vmatpush1.bf16.msra.mxu0 %v20862_v20  ;;  %v20916_v20 = vld [vmem:[%s27993_s6 + $0x3d0] ss:$48 sps:$4 sm:$0xff]  }
 0x7c4   :  { %15327 = vmatpush1.bf16.msra.mxu1 %v20865_v16  ;;  %15246 = vmatprep.subr.bf16.mxu0 %v20870_v22  ;;  %v20919_v16 = vld [vmem:[%s27993_s6 + $0x3d8] ss:$48 sps:$4 sm:$0xff]   ;;  %v20924_v22 = vld [vmem:[%s27993_s6 + $0x434] ss:$48 sps:$4 sm:$0xff]  }
 0x7c5   :  { %15328 = vmatprep.subr.bf16.mxu1 %v20873_v23  ;;  %v20927_v23 = vld [vmem:[%s27993_s6 + $0x43c] ss:$48 sps:$4 sm:$0xff]  }
 0x7c7   :  { %15247 = vmatpush1.bf16.msra.mxu0 %v20868_v18  ;;  %v20922_v18 = vld [vmem:[%s27993_s6 + $0x430] ss:$48 sps:$4 sm:$0xff]  }
 0x7c8   :  { %15329 = vmatpush1.bf16.msra.mxu1 %v20871_v25  ;;  %15248 = vmatprep.subr.bf16.mxu0 %v20876_v26  ;;  %v20925_v25 = vld [vmem:[%s27993_s6 + $0x438] ss:$48 sps:$4 sm:$0xff]   ;;  %v20930_v26 = vld [vmem:[%s27993_s6 + $0x494] ss:$48 sps:$4 sm:$0xff]  }
 0x7c9   :  { %15330 = vmatprep.subr.bf16.mxu1 %v20879_v21  ;;  %v20933_v21 = vld [vmem:[%s27993_s6 + $0x49c] ss:$48 sps:$4 sm:$0xff]  }
 0x7cb   :  { %15249 = vmatpush1.bf16.msra.mxu0 %v20874_v28  ;;  %v20928_v28 = vld [vmem:[%s27993_s6 + $0x490] ss:$48 sps:$4 sm:$0xff]  }
 0x7cc   :  { %15331 = vmatpush1.bf16.msra.mxu1 %v20877_v29  ;;  %15250 = vmatprep.subr.bf16.mxu0 %v20882_v24  ;;  %v20931_v29 = vld [vmem:[%s27993_s6 + $0x498] ss:$48 sps:$4 sm:$0xff]   ;;  %v20936_v24 = vld [vmem:[%s27993_s6 + $0x4f4] ss:$48 sps:$4 sm:$0xff]  }
 0x7cd   :  { %15332 = vmatprep.subr.bf16.mxu1 %v20885_v31  ;;  %v20939_v31 = vld [vmem:[%s27993_s6 + $0x4fc] ss:$48 sps:$4 sm:$0xff]  }
 0x7cf   :  { %15251 = vmatpush1.bf16.msra.mxu0 %v20880_v27  ;;  %v20934_v27 = vld [vmem:[%s27993_s6 + $0x4f0] ss:$48 sps:$4 sm:$0xff]  }
 0x7d0   :  { %15333 = vmatpush1.bf16.msra.mxu1 %v20883_v35  ;;  %15252 = vmatprep.subr.bf16.mxu0 %v20888_v41  ;;  %v20937_v35 = vld [vmem:[%s27993_s6 + $0x4f8] ss:$48 sps:$4 sm:$0xff]   ;;  %v20942_v41 = vld [vmem:[%s27993_s6 + $0x554] ss:$48 sps:$4 sm:$0xff]  }
 0x7d1   :  { %v12576_v50 = vpop.f32.mrb[12].mxu0  ;;  %15334 = vmatprep.subr.bf16.mxu1 %v20891_v36  ;;  %v20945_v36 = vld [vmem:[%s27993_s6 + $0x55c] ss:$48 sps:$4 sm:$0xff]  }
 0x7d2   :  { %v12577_v58 = vadd.f32 %v12576_v50, %v10269_v43  ;;  %v12617_v52 = vpop.f32.mrb[12].mxu1  ;;  %v12578_v48 = vpop.f32.mrb[13].mxu0  ;;  %v20940_v43 = vld [vmem:[%s27993_s6 + $0x550] ss:$48 sps:$4 sm:$0xff]   ;;  %v20949_v50 = vld [vmem:[%s27993_s6 + $0x5b8] ss:$48 sps:$4 sm:$0xff]  }
 0x7d3   :  { %v12579_v55 = vadd.f32 %v12578_v48, %v10273_v44  ;;  %v12619_v51 = vpop.f32.mrb[13].mxu1  ;;  %v12580_v59 = vpop.f32.mrb[14].mxu0  ;;  %15253 = vmatpush1.bf16.msra.mxu0 %v20886_v46  ;;  %v20943_v44 = vld [vmem:[%s27993_s6 + $0x558] ss:$48 sps:$4 sm:$0xff]   ;;  %v20948_v46 = vld [vmem:[%s27993_s6 + $0x5b4] ss:$48 sps:$4 sm:$0xff]  }
 0x7d4   :  { %v27205_v62 = vadd.f32 %v12617_v52, %v12577_v58  ;;  %v12621_v63 = vpop.f32.mrb[14].mxu1  ;;  %15335 = vmatpush1.bf16.msra.mxu1 %v20889_v47  ;;  %v12581_v38 = vpop.f32.mrb[15].mxu0  ;;  %15254 = vmatprep.subr.bf16.mxu0 %v20894_v49  ;;  %v20951_v47 = vld [vmem:[%s27993_s6 + $0x5bc] ss:$48 sps:$4 sm:$0xff]   ;;  %v20946_v49 = vld [vmem:[%s27993_s6 + $0x5b0] ss:$48 sps:$4 sm:$0xff]  }
 0x7d5   :  { %v27213_v3 = vadd.f32 %v12619_v51, %v12579_v55  ;;  %v12622_v4 = vpop.f32.mrb[15].mxu1  ;;  %15336 = vmatprep.subr.bf16.mxu1 %v20897_v45  ;;  %v20954_v45 = vld [vmem:[%s27993_s6 + $0x614] ss:$48 sps:$4 sm:$0xff]   ;;  %v20957_v58 = vld [vmem:[%s27993_s6 + $0x61c] ss:$48 sps:$4 sm:$0xff]  }
 0x7d6   :  { %v20952_v52 = vld [vmem:[%s27993_s6 + $0x610] ss:$48 sps:$4 sm:$0xff]   ;;  %v20955_v48 = vld [vmem:[%s27993_s6 + $0x618] ss:$48 sps:$4 sm:$0xff]   ;;  %v20960_v55 = vld [vmem:[%s27993_s6 + $0x674] ss:$48 sps:$4 sm:$0xff]  }
 0x7d7   :  { %15255 = vmatpush1.bf16.msra.mxu0 %v20892_v54  ;;  %v20963_v51 = vld [vmem:[%s27993_s6 + $0x67c] ss:$48 sps:$4 sm:$0xff]   ;;  %v20958_v59 = vld [vmem:[%s27993_s6 + $0x670] ss:$48 sps:$4 sm:$0xff]   ;;  %v20961_v54 = vld [vmem:[%s27993_s6 + $0x678] ss:$48 sps:$4 sm:$0xff]  }
 0x7d8   :  { %15337 = vmatpush1.bf16.msra.mxu1 %v20895_v57  ;;  %15256 = vmatprep.subr.bf16.mxu0 %v20900_v2  ;;  %v20966_v63 = vld [vmem:[%s27993_s6 + $0x6d4] ss:$48 sps:$4 sm:$0xff]   ;;  %v20969_v38 = vld [vmem:[%s27993_s6 + $0x6dc] ss:$48 sps:$4 sm:$0xff]   ;;  %v20964_v57 = vld [vmem:[%s27993_s6 + $0x6d0] ss:$48 sps:$4 sm:$0xff]  }
 0x7d9   :  { %15338 = vmatprep.subr.bf16.mxu1 %v20903_v5  ;;  %v20967_v2 = vld [vmem:[%s27993_s6 + $0x6d8] ss:$48 sps:$4 sm:$0xff]   ;;  %v20972_v4 = vld [vmem:[%s27993_s6 + $0x734] ss:$48 sps:$4 sm:$0xff]   ;;  %v20975_v5 = vld [vmem:[%s27993_s6 + $0x73c] ss:$48 sps:$4 sm:$0xff]  }
 0x7db   :  { %15257 = vmatpush1.bf16.msra.mxu0 %v20898_v60  ;;  %v20970_v60 = vld [vmem:[%s27993_s6 + $0x730] ss:$48 sps:$4 sm:$0xff]  }
 0x7dc   :  { %15339 = vmatpush1.bf16.msra.mxu1 %v20901_v6  ;;  %15258 = vmatprep.subr.bf16.mxu0 %v20906_v8  ;;  %v20973_v6 = vld [vmem:[%s27993_s6 + $0x738] ss:$48 sps:$4 sm:$0xff]   ;;  %v20978_v8 = vld [vmem:[%s27993_s6 + $0x794] ss:$48 sps:$4 sm:$0xff]  }
 0x7dd   :  { %15340 = vmatprep.subr.bf16.mxu1 %v20909_v9  ;;  %v20981_v9 = vld [vmem:[%s27993_s6 + $0x79c] ss:$48 sps:$4 sm:$0xff]  }
 0x7df   :  { %15259 = vmatpush1.bf16.msra.mxu0 %v20904_v10  ;;  %v20976_v10 = vld [vmem:[%s27993_s6 + $0x790] ss:$48 sps:$4 sm:$0xff]  }
 0x7e0   :  { %15341 = vmatpush1.bf16.msra.mxu1 %v20907_v13  ;;  %15260 = vmatprep.subr.bf16.mxu0 %v20912_v32  ;;  %v20979_v13 = vld [vmem:[%s27993_s6 + $0x798] ss:$48 sps:$4 sm:$0xff]   ;;  %v20984_v32 = vld [vmem:[%s27993_s6 + $0x7f4] ss:$48 sps:$4 sm:$0xff]  }
 0x7e1   :  { %15342 = vmatprep.subr.bf16.mxu1 %v20915_v15  ;;  %v20987_v15 = vld [vmem:[%s27993_s6 + $0x7fc] ss:$48 sps:$4 sm:$0xff]  }
 0x7e3   :  { %15261 = vmatpush1.bf16.msra.mxu0 %v20910_v42  ;;  %v10277_v42 = vrot.slane %v27175_v34, %v25847_v53 }
 0x7e4   :  { %15343 = vmatpush1.bf16.msra.mxu1 %v20913_v17  ;;  %15262 = vmatprep.subr.bf16.mxu0 %v20918_v14  ;;  %v10281_v17 = vrot.slane %v27175_v34, %v25674_v40  ;;  %v20982_v14 = vld [vmem:[%s27993_s6 + $0x7f0] ss:$48 sps:$4 sm:$0xff]   ;;  %v20993_v34 = vld [vmem:[%s27993_s6 + $0x85c] ss:$48 sps:$4 sm:$0xff]  }
 0x7e5   :  { %15344 = vmatprep.subr.bf16.mxu1 %v20921_v19  ;;  %v20985_v19 = vld [vmem:[%s27993_s6 + $0x7f8] ss:$48 sps:$4 sm:$0xff]  }
 0x7e7   :  { %15263 = vmatpush1.bf16.msra.mxu0 %v20916_v20  ;;  %v20990_v20 = vld [vmem:[%s27993_s6 + $0x854] ss:$48 sps:$4 sm:$0xff]  }
 0x7e8   :  { %15345 = vmatpush1.bf16.msra.mxu1 %v20919_v16  ;;  %15264 = vmatprep.subr.bf16.mxu0 %v20924_v22 }
 0x7e9   :  { %15346 = vmatprep.subr.bf16.mxu1 %v20927_v23 }
 0x7eb   :  { %15265 = vmatpush1.bf16.msra.mxu0 %v20922_v18 }
 0x7ec   :  { %15347 = vmatpush1.bf16.msra.mxu1 %v20925_v25  ;;  %15266 = vmatprep.subr.bf16.mxu0 %v20930_v26 }
 0x7ed   :  { %15348 = vmatprep.subr.bf16.mxu1 %v20933_v21 }
 0x7ef   :  { %15267 = vmatpush1.bf16.msra.mxu0 %v20928_v28  ;;  %v20988_v28 = vld [vmem:[%s27993_s6 + $0x850] ss:$48 sps:$4 sm:$0xff]  }
 0x7f0   :  { %15349 = vmatpush1.bf16.msra.mxu1 %v20931_v29  ;;  %15268 = vmatprep.subr.bf16.mxu0 %v20936_v24 }
 0x7f1   :  { %15350 = vmatprep.subr.bf16.mxu1 %v20939_v31 }
 0x7f3   :  { %15269 = vmatpush1.bf16.msra.mxu0 %v20934_v27  ;;  %v20991_v27 = vld [vmem:[%s27993_s6 + $0x858] ss:$48 sps:$4 sm:$0xff]  }
 0x7f4   :  { %15351 = vmatpush1.bf16.msra.mxu1 %v20937_v35  ;;  %15270 = vmatprep.subr.bf16.mxu0 %v20942_v41  ;;  %v20996_v35 = vld [vmem:[%s27993_s6 + $0x8b4] ss:$48 sps:$4 sm:$0xff]  }
 0x7f5   :  { %15352 = vmatprep.subr.bf16.mxu1 %v20945_v36 }
 0x7f7   :  { %15271 = vmatpush1.bf16.msra.mxu0 %v20940_v43  ;;  %v20999_v43 = vld [vmem:[%s27993_s6 + $0x8bc] ss:$48 sps:$4 sm:$0xff]  }
 0x7f8   :  { %15353 = vmatpush1.bf16.msra.mxu1 %v20943_v44  ;;  %15272 = vmatprep.subr.bf16.mxu0 %v20948_v46  ;;  %v20994_v44 = vld [vmem:[%s27993_s6 + $0x8b0] ss:$48 sps:$4 sm:$0xff]   ;;  %v20997_v46 = vld [vmem:[%s27993_s6 + $0x8b8] ss:$48 sps:$4 sm:$0xff]  }
 0x7f9   :  { %15354 = vmatprep.subr.bf16.mxu1 %v20951_v47  ;;  %v21002_v47 = vld [vmem:[%s27993_s6 + $0x914] ss:$48 sps:$4 sm:$0xff]  }
 0x7fb   :  { %15273 = vmatpush1.bf16.msra.mxu0 %v20946_v49  ;;  %v21005_v49 = vld [vmem:[%s27993_s6 + $0x91c] ss:$48 sps:$4 sm:$0xff]  }
 0x7fc   :  { %15355 = vmatpush1.bf16.msra.mxu1 %v20949_v50  ;;  %15283 = vmatprep.subr.bf16.mxu0 %v20954_v45  ;;  %v21000_v50 = vld [vmem:[%s27993_s6 + $0x910] ss:$48 sps:$4 sm:$0xff]   ;;  %v21003_v45 = vld [vmem:[%s27993_s6 + $0x918] ss:$48 sps:$4 sm:$0xff]  }
 0x7fd   :  { %15365 = vmatprep.subr.bf16.mxu1 %v20957_v58  ;;  %v21008_v58 = vld [vmem:[%s27993_s6 + $0x974] ss:$48 sps:$4 sm:$0xff]  }
 0x7fe   :  { %15275 = vmatmul.mubr.bf16.vlgmr.msra.gmra.mrb[8].mxu0 %v26908_v1 }
 0x7ff   :  { %15357 = vmatmul.mubr.bf16.vlgmr.msra.gmra.mrb[8].mxu1 %v26908_v1  ;;  %15284 = vmatpush1.bf16.msra.mxu0 %v20952_v52  ;;  %v21011_v52 = vld [vmem:[%s27993_s6 + $0x97c] ss:$48 sps:$4 sm:$0xff]  }
 0x800   :  { %15315 = vmatprep.mubr.bf16.mxu0 %v26918_v33  ;;  %15366 = vmatpush1.bf16.msra.mxu1 %v20955_v48  ;;  %v21006_v48 = vld [vmem:[%s27993_s6 + $0x970] ss:$48 sps:$4 sm:$0xff]  }
 0x801   :  { %15397 = vmatprep.mubr.bf16.mxu1 %v26918_v33  ;;  %15285 = vmatprep.subr.bf16.mxu0 %v20960_v55  ;;  %v21009_v55 = vld [vmem:[%s27993_s6 + $0x978] ss:$48 sps:$4 sm:$0xff]  }
 0x802   :  { %15367 = vmatprep.subr.bf16.mxu1 %v20963_v51  ;;  %v21014_v51 = vld [vmem:[%s27993_s6 + $0x9d4] ss:$48 sps:$4 sm:$0xff]  }
 0x803   :  { %15286 = vmatpush1.bf16.msra.mxu0 %v20958_v59  ;;  %v21017_v59 = vld [vmem:[%s27993_s6 + $0x9dc] ss:$48 sps:$4 sm:$0xff]  }
 0x804   :  { %15368 = vmatpush1.bf16.msra.mxu1 %v20961_v54  ;;  %15287 = vmatprep.subr.bf16.mxu0 %v20966_v63  ;;  %v21012_v54 = vld [vmem:[%s27993_s6 + $0x9d0] ss:$48 sps:$4 sm:$0xff]   ;;  %v21015_v63 = vld [vmem:[%s27993_s6 + $0x9d8] ss:$48 sps:$4 sm:$0xff]  }
 0x805   :  { %15369 = vmatprep.subr.bf16.mxu1 %v20969_v38  ;;  %v21020_v38 = vld [vmem:[%s27993_s6 + $0xa34] ss:$48 sps:$4 sm:$0xff]  }
 0x807   :  { %15288 = vmatpush1.bf16.msra.mxu0 %v20964_v57  ;;  %v21023_v57 = vld [vmem:[%s27993_s6 + $0xa3c] ss:$48 sps:$4 sm:$0xff]  }
 0x808   :  { %15370 = vmatpush1.bf16.msra.mxu1 %v20967_v2  ;;  %15289 = vmatprep.subr.bf16.mxu0 %v20972_v4  ;;  %v21018_v2 = vld [vmem:[%s27993_s6 + $0xa30] ss:$48 sps:$4 sm:$0xff]   ;;  %v21021_v4 = vld [vmem:[%s27993_s6 + $0xa38] ss:$48 sps:$4 sm:$0xff]  }
 0x809   :  { %15371 = vmatprep.subr.bf16.mxu1 %v20975_v5  ;;  %v21026_v5 = vld [vmem:[%s27993_s6 + $0xa94] ss:$48 sps:$4 sm:$0xff]  }
 0x80b   :  { %15290 = vmatpush1.bf16.msra.mxu0 %v20970_v60  ;;  %v21029_v60 = vld [vmem:[%s27993_s6 + $0xa9c] ss:$48 sps:$4 sm:$0xff]  }
 0x80c   :  { %15372 = vmatpush1.bf16.msra.mxu1 %v20973_v6  ;;  %15291 = vmatprep.subr.bf16.mxu0 %v20978_v8  ;;  %v21024_v6 = vld [vmem:[%s27993_s6 + $0xa90] ss:$48 sps:$4 sm:$0xff]   ;;  %v21027_v8 = vld [vmem:[%s27993_s6 + $0xa98] ss:$48 sps:$4 sm:$0xff]  }
 0x80d   :  { %15373 = vmatprep.subr.bf16.mxu1 %v20981_v9  ;;  %v21032_v9 = vld [vmem:[%s27993_s6 + $0xaf4] ss:$48 sps:$4 sm:$0xff]  }
 0x80f   :  { %15292 = vmatpush1.bf16.msra.mxu0 %v20976_v10  ;;  %v21035_v10 = vld [vmem:[%s27993_s6 + $0xafc] ss:$48 sps:$4 sm:$0xff]  }
 0x810   :  { %15374 = vmatpush1.bf16.msra.mxu1 %v20979_v13  ;;  %15293 = vmatprep.subr.bf16.mxu0 %v20984_v32  ;;  %v21030_v13 = vld [vmem:[%s27993_s6 + $0xaf0] ss:$48 sps:$4 sm:$0xff]   ;;  %v21033_v32 = vld [vmem:[%s27993_s6 + $0xaf8] ss:$48 sps:$4 sm:$0xff]  }
 0x811   :  { %v12658_v16 = vpop.f32.mrb[16].mxu0  ;;  %15375 = vmatprep.subr.bf16.mxu1 %v20987_v15  ;;  %v21038_v15 = vld [vmem:[%s27993_s6 + $0xb54] ss:$48 sps:$4 sm:$0xff]  }
 0x812   :  { %v12659_v22 = vadd.f32 %v12658_v16, %v10277_v42  ;;  %v12699_v23 = vpop.f32.mrb[16].mxu1  ;;  %v12660_v18 = vpop.f32.mrb[17].mxu0  ;;  %v21041_v42 = vld [vmem:[%s27993_s6 + $0xb5c] ss:$48 sps:$4 sm:$0xff]   ;;  %v21042_v16 = vld [vmem:[%s27993_s6 + $0xbb0] ss:$48 sps:$4 sm:$0xff]  }
 0x813   :  { %v12661_v25 = vadd.f32 %v12660_v18, %v10281_v17  ;;  %v12701_v26 = vpop.f32.mrb[17].mxu1  ;;  %v12662_v21 = vpop.f32.mrb[18].mxu0  ;;  %15294 = vmatpush1.bf16.msra.mxu0 %v20982_v14  ;;  %v21036_v17 = vld [vmem:[%s27993_s6 + $0xb50] ss:$48 sps:$4 sm:$0xff]   ;;  %v21039_v14 = vld [vmem:[%s27993_s6 + $0xb58] ss:$48 sps:$4 sm:$0xff]  }
 0x814   :  { %v27409_v29 = vadd.f32 %v12699_v23, %v12659_v22  ;;  %v12703_v24 = vpop.f32.mrb[18].mxu1  ;;  %15376 = vmatpush1.bf16.msra.mxu1 %v20985_v19  ;;  %v12663_v31 = vpop.f32.mrb[19].mxu0  ;;  %15295 = vmatprep.subr.bf16.mxu0 %v20990_v20  ;;  %v21044_v19 = vld [vmem:[%s27993_s6 + $0xbb4] ss:$48 sps:$4 sm:$0xff]   ;;  %v21047_v20 = vld [vmem:[%s27993_s6 + $0xbbc] ss:$48 sps:$4 sm:$0xff]  }
 0x815   :  { %v27417_v41 = vadd.f32 %v12701_v26, %v12661_v25  ;;  %v12704_v36 = vpop.f32.mrb[19].mxu1  ;;  %15377 = vmatprep.subr.bf16.mxu1 %v20993_v34  ;;  %v21045_v34 = vld [vmem:[%s27993_s6 + $0xbb8] ss:$48 sps:$4 sm:$0xff]   ;;  %v21050_v22 = vld [vmem:[%s27993_s6 + $0x24] ss:$48 sps:$4 sm:$0xff]  }
 0x816   :  { %v21053_v23 = vld [vmem:[%s27993_s6 + $0x2c] ss:$48 sps:$4 sm:$0xff]   ;;  %v21048_v18 = vld [vmem:[%s27993_s6 + $0x20] ss:$48 sps:$4 sm:$0xff]   ;;  %v21051_v25 = vld [vmem:[%s27993_s6 + $0x28] ss:$48 sps:$4 sm:$0xff]  }
 0x817   :  { %15296 = vmatpush1.bf16.msra.mxu0 %v20988_v28  ;;  %v21056_v26 = vld [vmem:[%s27993_s6 + $0x84] ss:$48 sps:$4 sm:$0xff]   ;;  %v21059_v21 = vld [vmem:[%s27993_s6 + $0x8c] ss:$48 sps:$4 sm:$0xff]   ;;  %v21054_v28 = vld [vmem:[%s27993_s6 + $0x80] ss:$48 sps:$4 sm:$0xff]  }
 0x818   :  { %15378 = vmatpush1.bf16.msra.mxu1 %v20991_v27  ;;  %15297 = vmatprep.subr.bf16.mxu0 %v20996_v35  ;;  %v21057_v24 = vld [vmem:[%s27993_s6 + $0x88] ss:$48 sps:$4 sm:$0xff]   ;;  %v21062_v31 = vld [vmem:[%s27993_s6 + $0xe4] ss:$48 sps:$4 sm:$0xff]   ;;  %v21065_v27 = vld [vmem:[%s27993_s6 + $0xec] ss:$48 sps:$4 sm:$0xff]  }
 0x819   :  { %15379 = vmatprep.subr.bf16.mxu1 %v20999_v43  ;;  %v21060_v35 = vld [vmem:[%s27993_s6 + $0xe0] ss:$48 sps:$4 sm:$0xff]   ;;  %v21063_v36 = vld [vmem:[%s27993_s6 + $0xe8] ss:$48 sps:$4 sm:$0xff]   ;;  %v21071_v43 = vld [vmem:[%s27993_s6 + $0x14c] ss:$48 sps:$4 sm:$0xff]  }
 0x81b   :  { %15298 = vmatpush1.bf16.msra.mxu0 %v20994_v44  ;;  %v21066_v44 = vld [vmem:[%s27993_s6 + $0x140] ss:$48 sps:$4 sm:$0xff]  }
 0x81c   :  { %15380 = vmatpush1.bf16.msra.mxu1 %v20997_v46  ;;  %15299 = vmatprep.subr.bf16.mxu0 %v21002_v47  ;;  %v21069_v46 = vld [vmem:[%s27993_s6 + $0x148] ss:$48 sps:$4 sm:$0xff]   ;;  %v21074_v47 = vld [vmem:[%s27993_s6 + $0x1a4] ss:$48 sps:$4 sm:$0xff]  }
 0x81d   :  { %15381 = vmatprep.subr.bf16.mxu1 %v21005_v49  ;;  %v21077_v49 = vld [vmem:[%s27993_s6 + $0x1ac] ss:$48 sps:$4 sm:$0xff]  }
 0x81f   :  { %15300 = vmatpush1.bf16.msra.mxu0 %v21000_v50  ;;  %v21072_v50 = vld [vmem:[%s27993_s6 + $0x1a0] ss:$48 sps:$4 sm:$0xff]  }
 0x820   :  { %15382 = vmatpush1.bf16.msra.mxu1 %v21003_v45  ;;  %15301 = vmatprep.subr.bf16.mxu0 %v21008_v58  ;;  %v21075_v45 = vld [vmem:[%s27993_s6 + $0x1a8] ss:$48 sps:$4 sm:$0xff]   ;;  %v21080_v58 = vld [vmem:[%s27993_s6 + $0x204] ss:$48 sps:$4 sm:$0xff]  }
 0x821   :  { %15383 = vmatprep.subr.bf16.mxu1 %v21011_v52  ;;  %v21083_v52 = vld [vmem:[%s27993_s6 + $0x20c] ss:$48 sps:$4 sm:$0xff]  }
 0x823   :  { %15302 = vmatpush1.bf16.msra.mxu0 %v21006_v48  ;;  %v21078_v48 = vld [vmem:[%s27993_s6 + $0x200] ss:$48 sps:$4 sm:$0xff]  }
 0x824   :  { %15384 = vmatpush1.bf16.msra.mxu1 %v21009_v55  ;;  %15303 = vmatprep.subr.bf16.mxu0 %v21014_v51  ;;  %v21081_v55 = vld [vmem:[%s27993_s6 + $0x208] ss:$48 sps:$4 sm:$0xff]   ;;  %v21086_v51 = vld [vmem:[%s27993_s6 + $0x264] ss:$48 sps:$4 sm:$0xff]  }
 0x825   :  { %15385 = vmatprep.subr.bf16.mxu1 %v21017_v59  ;;  %v21089_v59 = vld [vmem:[%s27993_s6 + $0x26c] ss:$48 sps:$4 sm:$0xff]  }
 0x827   :  { %15304 = vmatpush1.bf16.msra.mxu0 %v21012_v54  ;;  %v21084_v54 = vld [vmem:[%s27993_s6 + $0x260] ss:$48 sps:$4 sm:$0xff]  }
 0x828   :  { %15386 = vmatpush1.bf16.msra.mxu1 %v21015_v63  ;;  %15305 = vmatprep.subr.bf16.mxu0 %v21020_v38  ;;  %v21087_v63 = vld [vmem:[%s27993_s6 + $0x268] ss:$48 sps:$4 sm:$0xff]   ;;  %v21092_v38 = vld [vmem:[%s27993_s6 + $0x2c4] ss:$48 sps:$4 sm:$0xff]  }
 0x829   :  { %15387 = vmatprep.subr.bf16.mxu1 %v21023_v57  ;;  %v21095_v57 = vld [vmem:[%s27993_s6 + $0x2cc] ss:$48 sps:$4 sm:$0xff]  }
 0x82b   :  { %15306 = vmatpush1.bf16.msra.mxu0 %v21018_v2  ;;  %v21090_v2 = vld [vmem:[%s27993_s6 + $0x2c0] ss:$48 sps:$4 sm:$0xff]  }
 0x82c   :  { %15388 = vmatpush1.bf16.msra.mxu1 %v21021_v4  ;;  %15307 = vmatprep.subr.bf16.mxu0 %v21026_v5  ;;  %v21093_v4 = vld [vmem:[%s27993_s6 + $0x2c8] ss:$48 sps:$4 sm:$0xff]   ;;  %v21098_v5 = vld [vmem:[%s27993_s6 + $0x324] ss:$48 sps:$4 sm:$0xff]  }
 0x82d   :  { %15389 = vmatprep.subr.bf16.mxu1 %v21029_v60  ;;  %v21101_v60 = vld [vmem:[%s27993_s6 + $0x32c] ss:$48 sps:$4 sm:$0xff]  }
 0x82f   :  { %15308 = vmatpush1.bf16.msra.mxu0 %v21024_v6  ;;  %v21096_v6 = vld [vmem:[%s27993_s6 + $0x320] ss:$48 sps:$4 sm:$0xff]  }
 0x830   :  { %15390 = vmatpush1.bf16.msra.mxu1 %v21027_v8  ;;  %15309 = vmatprep.subr.bf16.mxu0 %v21032_v9  ;;  %v21099_v8 = vld [vmem:[%s27993_s6 + $0x328] ss:$48 sps:$4 sm:$0xff]   ;;  %v21104_v9 = vld [vmem:[%s27993_s6 + $0x384] ss:$48 sps:$4 sm:$0xff]  }
 0x831   :  { %15391 = vmatprep.subr.bf16.mxu1 %v21035_v10  ;;  %v21107_v10 = vld [vmem:[%s27993_s6 + $0x38c] ss:$48 sps:$4 sm:$0xff]  }
 0x833   :  { %15310 = vmatpush1.bf16.msra.mxu0 %v21030_v13  ;;  %v21102_v13 = vld [vmem:[%s27993_s6 + $0x380] ss:$48 sps:$4 sm:$0xff]  }
 0x834   :  { %15392 = vmatpush1.bf16.msra.mxu1 %v21033_v32  ;;  %15311 = vmatprep.subr.bf16.mxu0 %v21038_v15  ;;  %v21105_v32 = vld [vmem:[%s27993_s6 + $0x388] ss:$48 sps:$4 sm:$0xff]   ;;  %v21110_v15 = vld [vmem:[%s27993_s6 + $0x3e4] ss:$48 sps:$4 sm:$0xff]  }
 0x835   :  { %15393 = vmatprep.subr.bf16.mxu1 %v21041_v42  ;;  %v21113_v42 = vld [vmem:[%s27993_s6 + $0x3ec] ss:$48 sps:$4 sm:$0xff]  }
 0x837   :  { %15312 = vmatpush1.bf16.msra.mxu0 %v21036_v17  ;;  %v21108_v17 = vld [vmem:[%s27993_s6 + $0x3e0] ss:$48 sps:$4 sm:$0xff]  }
 0x838   :  { %15394 = vmatpush1.bf16.msra.mxu1 %v21039_v14  ;;  %15313 = vmatprep.subr.bf16.mxu0 %v21044_v19  ;;  %v21111_v14 = vld [vmem:[%s27993_s6 + $0x3e8] ss:$48 sps:$4 sm:$0xff]   ;;  %v21116_v19 = vld [vmem:[%s27993_s6 + $0x444] ss:$48 sps:$4 sm:$0xff]  }
 0x839   :  { %15395 = vmatprep.subr.bf16.mxu1 %v21047_v20  ;;  %v21119_v20 = vld [vmem:[%s27993_s6 + $0x44c] ss:$48 sps:$4 sm:$0xff]  }
 0x83b   :  { %15314 = vmatpush1.bf16.msra.mxu0 %v21042_v16  ;;  %v21114_v16 = vld [vmem:[%s27993_s6 + $0x440] ss:$48 sps:$4 sm:$0xff]  }
 0x83c   :  { %15396 = vmatpush1.bf16.msra.mxu1 %v21045_v34  ;;  %15406 = vmatprep.subr.bf16.mxu0 %v21050_v22  ;;  %v21117_v34 = vld [vmem:[%s27993_s6 + $0x448] ss:$48 sps:$4 sm:$0xff]   ;;  %v21122_v22 = vld [vmem:[%s27993_s6 + $0x4a4] ss:$48 sps:$4 sm:$0xff]  }
 0x83d   :  { %15488 = vmatprep.subr.bf16.mxu1 %v21053_v23  ;;  %v21125_v23 = vld [vmem:[%s27993_s6 + $0x4ac] ss:$48 sps:$4 sm:$0xff]  }
 0x83e   :  { %15316 = vmatmul.mubr.bf16.vlgmr.msra.gmra.mrb[8].mxu0 %v27118_v11 }
 0x83f   :  { %15398 = vmatmul.mubr.bf16.vlgmr.msra.gmra.mrb[8].mxu1 %v27118_v11  ;;  %15407 = vmatpush1.bf16.msra.mxu0 %v21048_v18  ;;  %v21120_v18 = vld [vmem:[%s27993_s6 + $0x4a0] ss:$48 sps:$4 sm:$0xff]  }
 0x840   :  { %15438 = vmatprep.mubr.bf16.mxu0 %v26705_v56  ;;  %15489 = vmatpush1.bf16.msra.mxu1 %v21051_v25  ;;  %v21123_v25 = vld [vmem:[%s27993_s6 + $0x4a8] ss:$48 sps:$4 sm:$0xff]  }
 0x841   :  { %15520 = vmatprep.mubr.bf16.mxu1 %v26705_v56  ;;  %15408 = vmatprep.subr.bf16.mxu0 %v21056_v26  ;;  %v21068_v56 = vld [vmem:[%s27993_s6 + $0x144] ss:$48 sps:$4 sm:$0xff]  }
 0x842   :  { %15490 = vmatprep.subr.bf16.mxu1 %v21059_v21  ;;  %v21128_v26 = vld [vmem:[%s27993_s6 + $0x504] ss:$48 sps:$4 sm:$0xff]   ;;  %v21131_v21 = vld [vmem:[%s27993_s6 + $0x50c] ss:$48 sps:$4 sm:$0xff]  }
 0x843   :  { %15409 = vmatpush1.bf16.msra.mxu0 %v21054_v28  ;;  %v21126_v28 = vld [vmem:[%s27993_s6 + $0x500] ss:$48 sps:$4 sm:$0xff]  }
 0x844   :  { %15491 = vmatpush1.bf16.msra.mxu1 %v21057_v24  ;;  %15410 = vmatprep.subr.bf16.mxu0 %v21062_v31  ;;  %v21129_v24 = vld [vmem:[%s27993_s6 + $0x508] ss:$48 sps:$4 sm:$0xff]   ;;  %v21134_v31 = vld [vmem:[%s27993_s6 + $0x564] ss:$48 sps:$4 sm:$0xff]  }
 0x845   :  { %15492 = vmatprep.subr.bf16.mxu1 %v21065_v27  ;;  %v21137_v27 = vld [vmem:[%s27993_s6 + $0x56c] ss:$48 sps:$4 sm:$0xff]  }
 0x847   :  { %15411 = vmatpush1.bf16.msra.mxu0 %v21060_v35  ;;  %v21132_v35 = vld [vmem:[%s27993_s6 + $0x560] ss:$48 sps:$4 sm:$0xff]  }
 0x848   :  { %15493 = vmatpush1.bf16.msra.mxu1 %v21063_v36  ;;  %15412 = vmatprep.subr.bf16.mxu0 %v21068_v56  ;;  %v21135_v36 = vld [vmem:[%s27993_s6 + $0x568] ss:$48 sps:$4 sm:$0xff]   ;;  %v21140_v56 = vld [vmem:[%s27993_s6 + $0x5c4] ss:$48 sps:$4 sm:$0xff]  }
 0x849   :  { %15494 = vmatprep.subr.bf16.mxu1 %v21071_v43  ;;  %v21143_v43 = vld [vmem:[%s27993_s6 + $0x5cc] ss:$48 sps:$4 sm:$0xff]  }
 0x84b   :  { %15413 = vmatpush1.bf16.msra.mxu0 %v21066_v44  ;;  %v21138_v44 = vld [vmem:[%s27993_s6 + $0x5c0] ss:$48 sps:$4 sm:$0xff]  }
 0x84c   :  { %15495 = vmatpush1.bf16.msra.mxu1 %v21069_v46  ;;  %15414 = vmatprep.subr.bf16.mxu0 %v21074_v47  ;;  %v21141_v46 = vld [vmem:[%s27993_s6 + $0x5c8] ss:$48 sps:$4 sm:$0xff]   ;;  %v21146_v47 = vld [vmem:[%s27993_s6 + $0x624] ss:$48 sps:$4 sm:$0xff]  }
 0x84d   :  { %15496 = vmatprep.subr.bf16.mxu1 %v21077_v49  ;;  %v21149_v49 = vld [vmem:[%s27993_s6 + $0x62c] ss:$48 sps:$4 sm:$0xff]  }
 0x84f   :  { %15415 = vmatpush1.bf16.msra.mxu0 %v21072_v50  ;;  %v21144_v50 = vld [vmem:[%s27993_s6 + $0x620] ss:$48 sps:$4 sm:$0xff]  }
 0x850   :  { %15497 = vmatpush1.bf16.msra.mxu1 %v21075_v45  ;;  %15416 = vmatprep.subr.bf16.mxu0 %v21080_v58  ;;  %v21147_v45 = vld [vmem:[%s27993_s6 + $0x628] ss:$48 sps:$4 sm:$0xff]   ;;  %v21152_v58 = vld [vmem:[%s27993_s6 + $0x684] ss:$48 sps:$4 sm:$0xff]  }
 0x851   :  { %15498 = vmatprep.subr.bf16.mxu1 %v21083_v52  ;;  %v21155_v52 = vld [vmem:[%s27993_s6 + $0x68c] ss:$48 sps:$4 sm:$0xff]  }
 0x853   :  { %15417 = vmatpush1.bf16.msra.mxu0 %v21078_v48  ;;  %v21150_v48 = vld [vmem:[%s27993_s6 + $0x680] ss:$48 sps:$4 sm:$0xff]  }
 0x854   :  { %15499 = vmatpush1.bf16.msra.mxu1 %v21081_v55  ;;  %15418 = vmatprep.subr.bf16.mxu0 %v21086_v51  ;;  %v21153_v55 = vld [vmem:[%s27993_s6 + $0x688] ss:$48 sps:$4 sm:$0xff]   ;;  %v21158_v51 = vld [vmem:[%s27993_s6 + $0x6e4] ss:$48 sps:$4 sm:$0xff]  }
 0x855   :  { %15500 = vmatprep.subr.bf16.mxu1 %v21089_v59  ;;  %v21156_v59 = vld [vmem:[%s27993_s6 + $0x6e0] ss:$48 sps:$4 sm:$0xff]  }
 0x857   :  { %15419 = vmatpush1.bf16.msra.mxu0 %v21084_v54  ;;  %v21159_v54 = vld [vmem:[%s27993_s6 + $0x6e8] ss:$48 sps:$4 sm:$0xff]  }
 0x858   :  { %15501 = vmatpush1.bf16.msra.mxu1 %v21087_v63  ;;  %15420 = vmatprep.subr.bf16.mxu0 %v21092_v38  ;;  %v21167_v63 = vld [vmem:[%s27993_s6 + $0x74c] ss:$48 sps:$4 sm:$0xff]   ;;  %v21162_v38 = vld [vmem:[%s27993_s6 + $0x740] ss:$48 sps:$4 sm:$0xff]  }
 0x859   :  { %15502 = vmatprep.subr.bf16.mxu1 %v21095_v57  ;;  %v21165_v57 = vld [vmem:[%s27993_s6 + $0x748] ss:$48 sps:$4 sm:$0xff]  }
 0x85b   :  { %15421 = vmatpush1.bf16.msra.mxu0 %v21090_v2  ;;  %v21170_v2 = vld [vmem:[%s27993_s6 + $0x7a4] ss:$48 sps:$4 sm:$0xff]  }
 0x85c   :  { %15503 = vmatpush1.bf16.msra.mxu1 %v21093_v4  ;;  %15422 = vmatprep.subr.bf16.mxu0 %v21098_v5  ;;  %v21173_v4 = vld [vmem:[%s27993_s6 + $0x7ac] ss:$48 sps:$4 sm:$0xff]   ;;  %v21168_v5 = vld [vmem:[%s27993_s6 + $0x7a0] ss:$48 sps:$4 sm:$0xff]  }
 0x85d   :  { %15504 = vmatprep.subr.bf16.mxu1 %v21101_v60  ;;  %v21171_v60 = vld [vmem:[%s27993_s6 + $0x7a8] ss:$48 sps:$4 sm:$0xff]  }
 0x85f   :  { %15423 = vmatpush1.bf16.msra.mxu0 %v21096_v6  ;;  %v21176_v6 = vld [vmem:[%s27993_s6 + $0x804] ss:$48 sps:$4 sm:$0xff]  }
 0x860   :  { %15505 = vmatpush1.bf16.msra.mxu1 %v21099_v8  ;;  %15424 = vmatprep.subr.bf16.mxu0 %v21104_v9  ;;  %v21179_v8 = vld [vmem:[%s27993_s6 + $0x80c] ss:$48 sps:$4 sm:$0xff]   ;;  %v21174_v9 = vld [vmem:[%s27993_s6 + $0x800] ss:$48 sps:$4 sm:$0xff]  }
 0x861   :  { %15506 = vmatprep.subr.bf16.mxu1 %v21107_v10  ;;  %v21177_v10 = vld [vmem:[%s27993_s6 + $0x808] ss:$48 sps:$4 sm:$0xff]  }
 0x863   :  { %15425 = vmatpush1.bf16.msra.mxu0 %v21102_v13  ;;  %v21182_v13 = vld [vmem:[%s27993_s6 + $0x864] ss:$48 sps:$4 sm:$0xff]  }
 0x864   :  { %15507 = vmatpush1.bf16.msra.mxu1 %v21105_v32  ;;  %15426 = vmatprep.subr.bf16.mxu0 %v21110_v15  ;;  %v21185_v15 = vld [vmem:[%s27993_s6 + $0x86c] ss:$48 sps:$4 sm:$0xff]  }
 0x865   :  { %15508 = vmatprep.subr.bf16.mxu1 %v21113_v42 }
 0x867   :  { %15427 = vmatpush1.bf16.msra.mxu0 %v21108_v17 }
 0x868   :  { %15509 = vmatpush1.bf16.msra.mxu1 %v21111_v14  ;;  %15428 = vmatprep.subr.bf16.mxu0 %v21116_v19 }
 0x869   :  { %15510 = vmatprep.subr.bf16.mxu1 %v21119_v20  ;;  %v21180_v20 = vld [vmem:[%s27993_s6 + $0x860] ss:$48 sps:$4 sm:$0xff]  }
 0x86b   :  { %15429 = vmatpush1.bf16.msra.mxu0 %v21114_v16 }
 0x86c   :  { %15511 = vmatpush1.bf16.msra.mxu1 %v21117_v34  ;;  %15430 = vmatprep.subr.bf16.mxu0 %v21122_v22  ;;  %v21183_v22 = vld [vmem:[%s27993_s6 + $0x868] ss:$48 sps:$4 sm:$0xff]  }
 0x86d   :  { %15512 = vmatprep.subr.bf16.mxu1 %v21125_v23  ;;  %v21188_v23 = vld [vmem:[%s27993_s6 + $0x8c4] ss:$48 sps:$4 sm:$0xff]  }
 0x86f   :  { %15431 = vmatpush1.bf16.msra.mxu0 %v21120_v18 }
 0x870   :  { %15513 = vmatpush1.bf16.msra.mxu1 %v21123_v25  ;;  %15432 = vmatprep.subr.bf16.mxu0 %v21128_v26  ;;  %v21191_v25 = vld [vmem:[%s27993_s6 + $0x8cc] ss:$48 sps:$4 sm:$0xff]   ;;  %v21186_v26 = vld [vmem:[%s27993_s6 + $0x8c0] ss:$48 sps:$4 sm:$0xff]  }
 0x871   :  { %15514 = vmatprep.subr.bf16.mxu1 %v21131_v21  ;;  %v21189_v21 = vld [vmem:[%s27993_s6 + $0x8c8] ss:$48 sps:$4 sm:$0xff]  }
 0x873   :  { %15433 = vmatpush1.bf16.msra.mxu0 %v21126_v28  ;;  %v21194_v28 = vld [vmem:[%s27993_s6 + $0x924] ss:$48 sps:$4 sm:$0xff]  }
 0x874   :  { %15515 = vmatpush1.bf16.msra.mxu1 %v21129_v24  ;;  %15434 = vmatprep.subr.bf16.mxu0 %v21134_v31  ;;  %v21197_v24 = vld [vmem:[%s27993_s6 + $0x92c] ss:$48 sps:$4 sm:$0xff]   ;;  %v21192_v31 = vld [vmem:[%s27993_s6 + $0x920] ss:$48 sps:$4 sm:$0xff]  }
 0x875   :  { %15516 = vmatprep.subr.bf16.mxu1 %v21137_v27  ;;  %v21195_v27 = vld [vmem:[%s27993_s6 + $0x928] ss:$48 sps:$4 sm:$0xff]  }
 0x877   :  { %15435 = vmatpush1.bf16.msra.mxu0 %v21132_v35  ;;  %v21200_v35 = vld [vmem:[%s27993_s6 + $0x984] ss:$48 sps:$4 sm:$0xff]  }
 0x878   :  { %15517 = vmatpush1.bf16.msra.mxu1 %v21135_v36  ;;  %15436 = vmatprep.subr.bf16.mxu0 %v21140_v56  ;;  %v21203_v36 = vld [vmem:[%s27993_s6 + $0x98c] ss:$48 sps:$4 sm:$0xff]   ;;  %v21198_v56 = vld [vmem:[%s27993_s6 + $0x980] ss:$48 sps:$4 sm:$0xff]  }
 0x879   :  { %15518 = vmatprep.subr.bf16.mxu1 %v21143_v43  ;;  %v21201_v43 = vld [vmem:[%s27993_s6 + $0x988] ss:$48 sps:$4 sm:$0xff]  }
 0x87b   :  { %15437 = vmatpush1.bf16.msra.mxu0 %v21138_v44  ;;  %v21206_v44 = vld [vmem:[%s27993_s6 + $0x9e4] ss:$48 sps:$4 sm:$0xff]  }
 0x87c   :  { %15519 = vmatpush1.bf16.msra.mxu1 %v21141_v46  ;;  %15447 = vmatprep.subr.bf16.mxu0 %v21146_v47  ;;  %v21209_v46 = vld [vmem:[%s27993_s6 + $0x9ec] ss:$48 sps:$4 sm:$0xff]   ;;  %v21204_v47 = vld [vmem:[%s27993_s6 + $0x9e0] ss:$48 sps:$4 sm:$0xff]  }
 0x87d   :  { %15529 = vmatprep.subr.bf16.mxu1 %v21149_v49  ;;  %v21207_v49 = vld [vmem:[%s27993_s6 + $0x9e8] ss:$48 sps:$4 sm:$0xff]  }
 0x87e   :  { %15439 = vmatmul.mubr.bf16.vlgmr.msra.gmra.mrb[20].mxu0 %v26908_v1 }
 0x87f   :  { %15521 = vmatmul.mubr.bf16.vlgmr.msra.gmra.mrb[20].mxu1 %v26908_v1  ;;  %15448 = vmatpush1.bf16.msra.mxu0 %v21144_v50  ;;  %v21161_v1 = vld [vmem:[%s27993_s6 + $0x6ec] ss:$48 sps:$4 sm:$0xff]   ;;  %v21212_v50 = vld [vmem:[%s27993_s6 + $0xa44] ss:$48 sps:$4 sm:$0xff]  }
 0x880   :  { %15479 = vmatprep.mubr.bf16.mxu0 %v26918_v33  ;;  %15530 = vmatpush1.bf16.msra.mxu1 %v21147_v45  ;;  %v21215_v45 = vld [vmem:[%s27993_s6 + $0xa4c] ss:$48 sps:$4 sm:$0xff]  }
 0x881   :  { %15561 = vmatprep.mubr.bf16.mxu1 %v26918_v33  ;;  %15449 = vmatprep.subr.bf16.mxu0 %v21152_v58  ;;  %v21164_v33 = vld [vmem:[%s27993_s6 + $0x744] ss:$48 sps:$4 sm:$0xff]   ;;  %v21210_v58 = vld [vmem:[%s27993_s6 + $0xa40] ss:$48 sps:$4 sm:$0xff]  }
 0x882   :  { %15531 = vmatprep.subr.bf16.mxu1 %v21155_v52  ;;  %v21213_v52 = vld [vmem:[%s27993_s6 + $0xa48] ss:$48 sps:$4 sm:$0xff]  }
 0x883   :  { %15450 = vmatpush1.bf16.msra.mxu0 %v21150_v48  ;;  %v21218_v48 = vld [vmem:[%s27993_s6 + $0xaa4] ss:$48 sps:$4 sm:$0xff]  }
 0x884   :  { %15532 = vmatpush1.bf16.msra.mxu1 %v21153_v55  ;;  %15451 = vmatprep.subr.bf16.mxu0 %v21158_v51  ;;  %v21221_v55 = vld [vmem:[%s27993_s6 + $0xaac] ss:$48 sps:$4 sm:$0xff]   ;;  %v21216_v51 = vld [vmem:[%s27993_s6 + $0xaa0] ss:$48 sps:$4 sm:$0xff]  }
 0x885   :  { %15533 = vmatprep.subr.bf16.mxu1 %v21161_v1  ;;  %v21219_v1 = vld [vmem:[%s27993_s6 + $0xaa8] ss:$48 sps:$4 sm:$0xff]  }
 0x887   :  { %15452 = vmatpush1.bf16.msra.mxu0 %v21156_v59  ;;  %v21224_v59 = vld [vmem:[%s27993_s6 + $0xb04] ss:$48 sps:$4 sm:$0xff]  }
 0x888   :  { %15534 = vmatpush1.bf16.msra.mxu1 %v21159_v54  ;;  %15453 = vmatprep.subr.bf16.mxu0 %v21164_v33  ;;  %v21227_v54 = vld [vmem:[%s27993_s6 + $0xb0c] ss:$48 sps:$4 sm:$0xff]   ;;  %v21222_v33 = vld [vmem:[%s27993_s6 + $0xb00] ss:$48 sps:$4 sm:$0xff]  }
 0x889   :  { %15535 = vmatprep.subr.bf16.mxu1 %v21167_v63  ;;  %v21225_v63 = vld [vmem:[%s27993_s6 + $0xb08] ss:$48 sps:$4 sm:$0xff]  }
 0x88b   :  { %15454 = vmatpush1.bf16.msra.mxu0 %v21162_v38  ;;  %v21230_v38 = vld [vmem:[%s27993_s6 + $0xb64] ss:$48 sps:$4 sm:$0xff]  }
 0x88c   :  { %15536 = vmatpush1.bf16.msra.mxu1 %v21165_v57  ;;  %15455 = vmatprep.subr.bf16.mxu0 %v21170_v2  ;;  %v21233_v57 = vld [vmem:[%s27993_s6 + $0xb6c] ss:$48 sps:$4 sm:$0xff]   ;;  %v21228_v2 = vld [vmem:[%s27993_s6 + $0xb60] ss:$48 sps:$4 sm:$0xff]  }
 0x88d   :  { %15537 = vmatprep.subr.bf16.mxu1 %v21173_v4  ;;  %v21231_v4 = vld [vmem:[%s27993_s6 + $0xb68] ss:$48 sps:$4 sm:$0xff]  }
 0x88f   :  { %15456 = vmatpush1.bf16.msra.mxu0 %v21168_v5  ;;  %v21236_v5 = vld [vmem:[%s27993_s6 + $0xbc4] ss:$48 sps:$4 sm:$0xff]  }
 0x890   :  { %15538 = vmatpush1.bf16.msra.mxu1 %v21171_v60  ;;  %15457 = vmatprep.subr.bf16.mxu0 %v21176_v6  ;;  %v21239_v60 = vld [vmem:[%s27993_s6 + $0xbcc] ss:$48 sps:$4 sm:$0xff]   ;;  %v21234_v6 = vld [vmem:[%s27993_s6 + $0xbc0] ss:$48 sps:$4 sm:$0xff]  }
 0x891   :  { %v27799_v32 = vpop.f32.mrb[4].mxu0  ;;  %15539 = vmatprep.subr.bf16.mxu1 %v21179_v8  ;;  %v21237_v8 = vld [vmem:[%s27993_s6 + $0xbc8] ss:$48 sps:$4 sm:$0xff]  }
 0x892   :  { %v27804_v42 = vpop.f32.mrb[4].mxu1  ;;  %v27806_v17 = vpop.f32.mrb[5].mxu0 }
 0x893   :  { %v27808_v14 = vpop.f32.mrb[5].mxu1  ;;  %v15157_v19 = vpop.f32.mrb[6].mxu0  ;;  %15458 = vmatpush1.bf16.msra.mxu0 %v21174_v9 }
 0x894   :  { %v15239_v16 = vpop.f32.mrb[6].mxu1  ;;  %15540 = vmatpush1.bf16.msra.mxu1 %v21177_v10  ;;  %v15158_v34 = vpop.f32.mrb[7].mxu0  ;;  %15459 = vmatprep.subr.bf16.mxu0 %v21182_v13 }
 0x895   :  { %v15240_v18 = vpop.f32.mrb[7].mxu1  ;;  %15541 = vmatprep.subr.bf16.mxu1 %v21185_v15 }
 0x897   :  { %15460 = vmatpush1.bf16.msra.mxu0 %v21180_v20 }
 0x898   :  { %15542 = vmatpush1.bf16.msra.mxu1 %v21183_v22  ;;  %15461 = vmatprep.subr.bf16.mxu0 %v21188_v23  ;;  %v18_v22 = vstv %s27996_s10  ;;  %v10230_v23 = vld [vmem:[%s27995_s7] sm:$0xff] }
 0x899   :  { %15543 = vmatprep.subr.bf16.mxu1 %v21191_v25  ;;  %19 = vst [vmem:[#allocation2] sm:$0x1] %v18_v22  ;;  %v10237_v18 = vrot.slane %v10230_v23, %v25663_v37 }
 0x89b   :  { %15462 = vmatpush1.bf16.msra.mxu0 %v21186_v26  ;;  %v10245_v26 = vrot.slane %v10230_v23, %v25847_v53 }
 0x89c   :  { %15544 = vmatpush1.bf16.msra.mxu1 %v21189_v21  ;;  %15463 = vmatprep.subr.bf16.mxu0 %v21194_v28  ;;  %v10241_v28 = vrot.slane %v10230_v23, %v25671_v39 }
 0x89d   :  { %15545 = vmatprep.subr.bf16.mxu1 %v21197_v24 }
 0x89f   :  { %15464 = vmatpush1.bf16.msra.mxu0 %v21192_v31  ;;  %v10249_v31 = vrot.slane %v10230_v23, %v25674_v40 }
 0x8a0   :  { %15546 = vmatpush1.bf16.msra.mxu1 %v21195_v27  ;;  %15465 = vmatprep.subr.bf16.mxu0 %v21200_v35 }
 0x8a1   :  { %15547 = vmatprep.subr.bf16.mxu1 %v21203_v36 }
 0x8a3   :  { %15466 = vmatpush1.bf16.msra.mxu0 %v21198_v56 }
 0x8a4   :  { %15548 = vmatpush1.bf16.msra.mxu1 %v21201_v43  ;;  %15467 = vmatprep.subr.bf16.mxu0 %v21206_v44 }
 0x8a5   :  { %15549 = vmatprep.subr.bf16.mxu1 %v21209_v46  ;;  %v10252_v46 = vsub.s32 4, %v25660_v30 }
 0x8a7   :  { %15468 = vmatpush1.bf16.msra.mxu0 %v21204_v47 }
 0x8a8   :  { %15550 = vmatpush1.bf16.msra.mxu1 %v21207_v49  ;;  %15469 = vmatprep.subr.bf16.mxu0 %v21212_v50  ;;  %v10260_v49 = vsub.s32 6, %v25660_v30 }
 0x8a9   :  { %15551 = vmatprep.subr.bf16.mxu1 %v21215_v45  ;;  %v10256_v45 = vsub.s32 5, %v25660_v30 }
 0x8ab   :  { %15470 = vmatpush1.bf16.msra.mxu0 %v21210_v58 }
 0x8ac   :  { %15552 = vmatpush1.bf16.msra.mxu1 %v21213_v52  ;;  %15471 = vmatprep.subr.bf16.mxu0 %v21218_v48  ;;  %v10264_v52 = vsub.s32 7, %v25660_v30 }
 0x8ad   :  { %15553 = vmatprep.subr.bf16.mxu1 %v21221_v55  ;;  %v10253_v55 = vrot.slane %v10230_v23, %v10252_v46 }
 0x8af   :  { %15472 = vmatpush1.bf16.msra.mxu0 %v21216_v51 }
 0x8b0   :  { %15554 = vmatpush1.bf16.msra.mxu1 %v21219_v1  ;;  %15473 = vmatprep.subr.bf16.mxu0 %v21224_v59  ;;  %v10261_v59 = vrot.slane %v10230_v23, %v10260_v49 }
 0x8b1   :  { %15555 = vmatprep.subr.bf16.mxu1 %v21227_v54 }
 0x8b3   :  { %15474 = vmatpush1.bf16.msra.mxu0 %v21222_v33  ;;  %v10257_v33 = vrot.slane %v10230_v23, %v10256_v45 }
 0x8b4   :  { %15556 = vmatpush1.bf16.msra.mxu1 %v21225_v63  ;;  %15475 = vmatprep.subr.bf16.mxu0 %v21230_v38  ;;  %v10265_v38 = vrot.slane %v10230_v23, %v10264_v52 }
 0x8b5   :  { %15557 = vmatprep.subr.bf16.mxu1 %v21233_v57 }
 0x8b7   :  { %15476 = vmatpush1.bf16.msra.mxu0 %v21228_v2 }
 0x8b8   :  { %15558 = vmatpush1.bf16.msra.mxu1 %v21231_v4  ;;  %15477 = vmatprep.subr.bf16.mxu0 %v21236_v5 }
 0x8b9   :  { %15559 = vmatprep.subr.bf16.mxu1 %v21239_v60 }
 0x8bb   :  { %15478 = vmatpush1.bf16.msra.mxu0 %v21234_v6 }
 0x8bc   :  { %15560 = vmatpush1.bf16.msra.mxu1 %v21237_v8 }
 0x8be   :  { %15480 = vmatmul.mubr.bf16.vlgmr.msra.gmra.mrb[20].mxu0 %v27118_v11 }
 0x8bf   :  { %15562 = vmatmul.mubr.bf16.vlgmr.msra.gmra.mrb[20].mxu1 %v27118_v11  ;;  %v13094_v11 = vld [vmem:[%s27997_s8] sm:$0xff] }
 0x8c0   :  { %v13101_v25 = vrot.slane %v13094_v11, %v25663_v37  ;;  %v13109_v21 = vrot.slane %v13094_v11, %v25847_v53  ;;  %v13105_v24 = vrot.slane %v13094_v11, %v25671_v39  ;;  %v13113_v27 = vrot.slane %v13094_v11, %v25674_v40 }
 0x8c1   :  { %v13117_v51 = vrot.slane %v13094_v11, %v10252_v46  ;;  %v13121_v63 = vrot.slane %v13094_v11, %v10256_v45  ;;  %v13129_v57 = vrot.slane %v13094_v11, %v10264_v52 }
 0x8c2   :  { %v17841_v35 = vadd.f32 %v13101_v25, %v10237_v18  ;;  %v17845_v36 = vadd.f32 %v13109_v21, %v10245_v26  ;;  %v17843_v56 = vadd.f32 %v13105_v24, %v10241_v28  ;;  %v17847_v43 = vadd.f32 %v13113_v27, %v10249_v31 }
 0x8c3   :  { %v17855_v30 = vadd.f32 %v13129_v57, %v10265_v38 }
 0x8c4   :  { %v17842_v44 = vadd.f32 %v17841_v35, %v27799_v32  ;;  %v17846_v47 = vadd.f32 %v17845_v36, %v27804_v42  ;;  %v17844_v50 = vadd.f32 %v17843_v56, %v27806_v17  ;;  %v17848_v58 = vadd.f32 %v17847_v43, %v27808_v14 }
 0x8c5   :  { %v13125_v32 = vrot.slane %v13094_v11, %v10260_v49  ;;  %v17849_v17 = vadd.f32 %v13117_v51, %v10253_v55  ;;  %v17851_v14 = vadd.f32 %v13121_v63, %v10257_v33 }
 0x8c6   :  { %v17828_v48 = vmul.f32 -1.442695, %v17842_v44  ;;  %v17830_v1 = vmul.f32 -1.442695, %v17846_v47  ;;  %v17829_v54 = vmul.f32 -1.442695, %v17844_v50 }
 0x8c7   :  { %v17831_v42 = vmul.f32 -1.442695, %v17848_v58  ;;  %v17853_v2 = vadd.f32 %v13125_v32, %v10261_v59 }
 0x8c8   :  { %21240 = vpow2.f32 %v17828_v48 }
 0x8c9   :  { %21242 = vpow2.f32 %v17830_v1 }
 0x8ca   :  { %21244 = vpow2.f32 %v17829_v54 }
 0x8cb   :  { %21246 = vpow2.f32 %v17831_v42 }
 0x911   :  { %v15317_v9 = vpop.f32.mrb[8].mxu0 }
 0x912   :  { %v15399_v10 = vpop.f32.mrb[8].mxu1  ;;  %v15319_v13 = vpop.f32.mrb[9].mxu0  ;;  %v17850_v4 = vadd.f32 %v17849_v17, %v15317_v9  ;;  %v13095_v9 = vld [vmem:[%s27997_s8 + $0x8] sm:$0xf] }
 0x913   :  { %v15401_v15 = vpop.f32.mrb[9].mxu1  ;;  %v15321_v19 = vpop.f32.mrb[10].mxu0  ;;  %v17854_v5 = vadd.f32 %v17853_v2, %v15399_v10  ;;  %v17852_v60 = vadd.f32 %v17851_v14, %v15319_v13  ;;  %v13141_v24 = vrot.slane %v13095_v9, %v25847_v53  ;;  %v13137_v31 = vrot.slane %v13095_v9, %v25671_v39 }
 0x914   :  { %v15403_v20 = vpop.f32.mrb[10].mxu1  ;;  %v15322_v16 = vpop.f32.mrb[11].mxu0  ;;  %v17856_v6 = vadd.f32 %v17855_v30, %v15401_v15  ;;  %v17832_v8 = vmul.f32 -1.442695, %v17850_v4  ;;  %v13133_v15 = vrot.slane %v13095_v9, %v25663_v37  ;;  %v13145_v36 = vrot.slane %v13095_v9, %v25674_v40 }
 0x915   :  { %v15404_v34 = vpop.f32.mrb[11].mxu1  ;;  %v17834_v19 = vmul.f32 -1.442695, %v17854_v5  ;;  %v21241_v20 = vpop.eup %21240  ;;  %v17833_v16 = vmul.f32 -1.442695, %v17852_v60 }
 0x916   :  { %v21243_v34 = vpop.eup %21242  ;;  %v17835_v22 = vmul.f32 -1.442695, %v17856_v6  ;;  %21248 = vpow2.f32 %v17832_v8  ;;  %v15586_v18 = vadd.f32 1.0, %v21241_v20  ;;  %v15658_v8 = vld [vmem:[%s27998_s9] sm:$0xf] }
 0x917   :  { %v21245_v23 = vpop.eup %21244  ;;  %21250 = vpow2.f32 %v17834_v19  ;;  %v15588_v25 = vadd.f32 1.0, %v21243_v34 }
 0x918   :  { %v21247_v11 = vpop.eup %21246  ;;  %21252 = vpow2.f32 %v17833_v16  ;;  %v15587_v26 = vadd.f32 1.0, %v21245_v23 }
 0x919   :  { %21254 = vpow2.f32 %v17835_v22  ;;  %v15589_v21 = vadd.f32 1.0, %v21247_v11 }
 0x91a   :  { %21256 = vrcp.f32 %v15586_v18 }
 0x91b   :  { %21258 = vrcp.f32 %v15588_v25 }
 0x91c   :  { %21260 = vrcp.f32 %v15587_v26 }
 0x91d   :  { %21262 = vrcp.f32 %v15589_v21 }
 0x920   :  { %v21249_v10 = vpop.eup %21248 }
 0x921   :  { %v21251_v13 = vpop.eup %21250  ;;  %v15614_v35 = vadd.f32 1.0, %v21249_v10 }
 0x922   :  { %v21253_v28 = vpop.eup %21252  ;;  %v15616_v56 = vadd.f32 1.0, %v21251_v13  ;;  %v15667_v13 = vrot.slane %v15658_v8, %v25671_v39  ;;  %v15675_v39 = vrot.slane %v15658_v8, %v25674_v40 }
 0x923   :  { %v21255_v27 = vpop.eup %21254  ;;  %v15615_v46 = vadd.f32 1.0, %v21253_v28  ;;  %21264 = vrcp.f32 %v15614_v35 }
 0x924   :  { %v21257_v44 = vpop.eup %21256  ;;  %v15617_v58 = vadd.f32 1.0, %v21255_v27  ;;  %21266 = vrcp.f32 %v15616_v56  ;;  %v17836_v56 = vld [vmem:[#allocation2] ss:$0 sm:$0xff] }
 0x925   :  { %v21259_v45 = vpop.eup %21258  ;;  %21268 = vrcp.f32 %v15615_v46 }
 0x926   :  { %v21261_v1 = vpop.eup %21260  ;;  %21270 = vrcp.f32 %v15617_v58 }
 0x927   :  { %v21263_v63 = vpop.eup %21262 }
 0x92d   :  { %v21265_v5 = vpop.eup %21264 }
 0x92e   :  { %v21267_v60 = vpop.eup %21266  ;;  %v15638_v19 = vsub.f32 1.0, %v21265_v5  ;;  %v15646_v22 = vmul.f32 %v21265_v5, %v26889_v61  ;;  %v15671_v61 = vrot.slane %v15658_v8, %v25847_v53 }
 0x92f   :  { %v21269_v6 = vpop.eup %21268  ;;  %v15640_v16 = vsub.f32 1.0, %v21267_v60  ;;  %v15648_v25 = vmul.f32 %v21267_v60, %v27102_v12 }
 0x930   :  { %v15639_v34 = vsub.f32 1.0, %v21269_v6  ;;  %v15647_v9 = vmul.f32 %v21269_v6, %v26692_v0 }
 0x991   :  { %v15481_v43 = vpop.f32.mrb[20].mxu0 }
 0x992   :  { %v17857_v47 = vadd.f32 %v15481_v43, %v13133_v15  ;;  %v15563_v49 = vpop.f32.mrb[20].mxu1  ;;  %v15483_v50 = vpop.f32.mrb[21].mxu0 }
 0x993   :  { %v17859_v52 = vadd.f32 %v15563_v49, %v13141_v24  ;;  %v17858_v48 = vadd.f32 %v15483_v50, %v13137_v31  ;;  %v15565_v55 = vpop.f32.mrb[21].mxu1  ;;  %v15485_v51 = vpop.f32.mrb[22].mxu0 }
 0x994   :  { %v15626_v59 = vmul.f32 %v21257_v44, %v17857_v47  ;;  %v17860_v32 = vadd.f32 %v15565_v55, %v13145_v36  ;;  %v15567_v54 = vpop.f32.mrb[22].mxu1  ;;  %v15486_v33 = vpop.f32.mrb[23].mxu0 }
 0x995   :  { %v15628_v42 = vmul.f32 %v21259_v45, %v17859_v52  ;;  %v15627_v38 = vmul.f32 %v21261_v1, %v17858_v48  ;;  %v15568_v57 = vpop.f32.mrb[23].mxu1 }
 0x996   :  { %v15630_v17 = vadd.f32 %v15626_v59, %v27205_v62  ;;  %v15629_v2 = vmul.f32 %v21263_v63, %v17860_v32  ;;  %v21271_v62 = vpop.eup %21270 }
 0x997   :  { %v15632_v14 = vadd.f32 %v15628_v42, %v27409_v29  ;;  %v15631_v30 = vadd.f32 %v15627_v38, %v27213_v3  ;;  %v15641_v11 = vsub.f32 1.0, %v21271_v62  ;;  %v15649_v28 = vmul.f32 %v21271_v62, %v26892_v7 }
 0x998   :  { %21272 = vtanh.f32 %v15630_v17  ;;  %v15633_v4 = vadd.f32 %v15629_v2, %v27417_v41  ;;  %v15663_v41 = vrot.slane %v15658_v8, %v25663_v37 }
 0x999   :  { %21274 = vtanh.f32 %v15632_v14 }
 0x99a   :  { %21276 = vtanh.f32 %v15631_v30 }
 0x99b   :  { %21278 = vtanh.f32 %v15633_v4 }
 0x9a2   :  { %v21273_v20 = vpop.eup %21272 }
 0x9a3   :  { %v21275_v29 = vpop.eup %21274  ;;  %v15642_v3 = vmul.f32 %v21273_v20, %v15638_v19 }
 0x9a4   :  { %v21277_v23 = vpop.eup %21276  ;;  %v15644_v18 = vmul.f32 %v21275_v29, %v15640_v16 }
 0x9a5   :  { %v21279_v26 = vpop.eup %21278  ;;  %v15643_v21 = vmul.f32 %v21277_v23, %v15639_v34  ;;  %v15650_v10 = vadd.f32 %v15646_v22, %v15642_v3 }
 0x9a6   :  { %v15645_v15 = vmul.f32 %v21279_v26, %v15641_v11  ;;  %v15652_v24 = vadd.f32 %v15648_v25, %v15644_v18 }
 0x9a7   :  { %v15651_v31 = vadd.f32 %v15647_v9, %v15643_v21  ;;  %v15680_v37 = vmul.f32 %v15663_v41, %v15650_v10  ;;  %15654 = vst [vmem:[%s27999_s12] sm:$0xff] %v15650_v10 }
 0x9a8   :  { %v15653_v12 = vadd.f32 %v15649_v28, %v15645_v15  ;;  %15656 = vst [vmem:[%s27999_s12 + $0x10] sm:$0xff] %v15652_v24  ;;  %v15682_v53 = vmul.f32 %v15671_v61, %v15652_v24 }
 0x9a9   :  { %15655 = vst [vmem:[%s27999_s12 + $0x8] sm:$0xff] %v15651_v31  ;;  %v15681_v0 = vmul.f32 %v15667_v13, %v15651_v31 }
 0x9aa   :  { %15657 = vst [vmem:[%s27999_s12 + $0x18] sm:$0xff] %v15653_v12  ;;  %v15683_v27 = vmul.f32 %v15675_v39, %v15653_v12 }
 0x9ab   :  { %v15684_v7 = vadd.f32 %v15681_v0, %v15680_v37 }
 0x9ad   :  { %v15685_v35 = vadd.f32 %v15684_v7, %v15682_v53 }
 0x9af   :  { %v15686_v36 = vadd.f32 %v15685_v35, %v15683_v27 }
 0x9b1   :  { %15687 = vadd.xlane.f32.xlu0 %v15686_v36 }
 0xa3e   :  { %v15688_v43 = vpop.xlane.xlu0 %15687 }
 0xa3f   :  { %v15696_v44 = vadd.f32 %v17836_v56, %v15688_v43 }
 0xa41   :  { %15698 = vst.msk [vmem:[%s28000_s11] sm:$0xff] %vm15697_vm0, %v15696_v44 }

</bundles_post_ra>
